<compile_context>
chip_gen: v5e
topology: v5e:2x2
jax: 0.10.0
libtpu: 0.0.40
codegen_flags: <defaults>
</compile_context>

<pallas_src>
import functools
import math

import jax
import jax.numpy as jnp
from jax.experimental import pallas as pl
from jax.experimental.pallas import tpu as pltpu

MODES1 = 12
MODES2 = 12
WIDTH = 32

_PACK = 4            # pixels packed per row for 32-channel pointwise layers (4*32 = 128 lanes)
_HEAD_PIX = 32       # pixels per output row of the MLP head (32*4 = 128 output lanes)
_HEAD_SUB = 8        # pixels per fc1/fc2 sub-matmul inside the head
_O_TILE = 8          # output-channel tile for the spectral mode mix
_MODE_PAD = 128      # pad spectral mode axis to a multiple of 128 lanes
_MIN_GRID_STEPS = 8  # keep >= 8 grid steps (pipelining depth + v7x's 2 TensorCores)


@functools.lru_cache(maxsize=None)
def _vmem_budget():
    """Generation-specific scoped-VMEM budget (bytes)."""
    phys = 64 * 1024 * 1024
    try:
        phys = int(pltpu.get_tpu_info().vmem_capacity_bytes)
    except Exception:  # pragma: no cover - conservative fallback
        pass
    return max(32 * 1024 * 1024, min(phys * 3 // 4, 112 * 1024 * 1024))


def _cparams(n_axes):
    return pltpu.CompilerParams(
        dimension_semantics=("parallel",) * n_axes,
        vmem_limit_bytes=_vmem_budget())


def _pick_row_tile(n_rows, row_bytes):
    """Largest row tile that (a) fits the VMEM budget double-buffered and
    (b) still leaves >= _MIN_GRID_STEPS grid steps."""
    if n_rows <= 8:
        return n_rows
    cap = (_vmem_budget() // 6) // max(row_bytes, 1)
    cap = max(8, min(cap, 16384))
    tile = min(cap, pl.cdiv(n_rows, _MIN_GRID_STEPS))
    tile = max(8, (tile // 8) * 8)
    return min(tile, n_rows)


# ----------------------------------------------------------------------------
# In-kernel exact GELU (erf-based, matches torch.nn.functional.gelu default).
# Abramowitz & Stegun 7.1.26 rational approximation (|err| <= 1.5e-7); only exp
# is needed (EUP slot).
# ----------------------------------------------------------------------------
_SQRT_HALF = 0.7071067811865476


def _erf(z):
    a = jnp.abs(z)
    t = 1.0 / (1.0 + 0.3275911 * a)
    poly = t * (0.254829592 + t * (-0.284496736 + t * (1.421413741
               + t * (-1.453152027 + t * 1.061405429))))
    e = 1.0 - poly * jnp.exp(-a * a)
    return jnp.where(z < 0.0, -e, e)


def _gelu(x):
    return 0.5 * x * (1.0 + _erf(x * _SQRT_HALF))


# ----------------------------------------------------------------------------
# Pallas kernels
# ----------------------------------------------------------------------------
def _pw_kernel(x_ref, w_ref, b_ref, o_ref):
    y = jnp.dot(x_ref[...], w_ref[...], preferred_element_type=jnp.float32)
    o_ref[...] = y + b_ref[...]


def _pw_gelu_kernel(x_ref, w_ref, b_ref, o_ref):
    y = jnp.dot(x_ref[...], w_ref[...], preferred_element_type=jnp.float32)
    o_ref[...] = _gelu(y + b_ref[...])


def _pw_res_kernel(x_ref, w_ref, b_ref, r_ref, o_ref):
    y = jnp.dot(x_ref[...], w_ref[...], preferred_element_type=jnp.float32)
    o_ref[...] = y + b_ref[...] + r_ref[...]


def _pw_res_gelu_kernel(x_ref, w_ref, b_ref, r_ref, o_ref):
    y = jnp.dot(x_ref[...], w_ref[...], preferred_element_type=jnp.float32)
    o_ref[...] = _gelu(y + b_ref[...] + r_ref[...])


def _fc0_kernel(a_ref, w_ref, b_ref, o_ref, *, s1, s2):
    """fc0 lift with in-kernel grid generation.

    a_ref: (1, T, 4) raw input, 4 pixels per row.  w_ref: (12, 128) packed fc0
    weight (rows: a for pix 0..3, gx for pix 0..3, gy for pix 0..3).  Output
    (1, T, 128) = 4 pixels x 32 channels, lane-dense.
    """
    tg = a_ref.shape[1]
    a4 = a_ref[0]                                               # (T, 4)
    base = pl.program_id(1) * (tg * _PACK)
    row = jax.lax.broadcasted_iota(jnp.int32, (tg, _PACK), 0)
    col = jax.lax.broadcasted_iota(jnp.int32, (tg, _PACK), 1)
    # in-image pixel index; exact in f32 for S*S < 2**24 (any practical FNO size)
    pix = (base + row * _PACK + col).astype(jnp.float32)
    i = jnp.floor((pix + 0.5) * (1.0 / s2))
    j = pix - i * s2
    step_x = (1.0 - 2.0 / s1) / max(s1 - 1, 1)
    step_y = (1.0 - 2.0 / s2) / max(s2 - 1, 1)
    gx = 1.0 / s1 + i * step_x
    gy = 1.0 / s2 + j * step_y
    x12 = jnp.concatenate([a4, gx, gy], axis=1)                 # (T, 12)
    o_ref[0] = jnp.dot(x12, w_ref[...], preferred_element_type=jnp.float32) + b_ref[...]


def _mlp_head_kernel(x_ref, w1_ref, b1_ref, w2_ref, b2_ref, o_ref, *, n_sub):
    """fc1 -> GELU -> fc2 over 32 pixels/row, processed in n_sub groups of 8 pixels.

    x_ref: (T, 1024); w1_ref: (256, 512) block-diag; w2_ref: (512, 32) block-diag;
    output (T, 128) lane-dense (= 32 pixels x 4 channels)."""
    sub_in = w1_ref.shape[0]
    outs = []
    for g in range(n_sub):
        xg = x_ref[:, g * sub_in:(g + 1) * sub_in]
        h = jnp.dot(xg, w1_ref[...], preferred_element_type=jnp.float32) + b1_ref[...]
        h = _gelu(h)
        outs.append(jnp.dot(h, w2_ref[...], preferred_element_type=jnp.float32) + b2_ref[...])
    o_ref[...] = jnp.concatenate(outs, axis=1)


def _cmix_kernel(xr_ref, xi_ref, wr_ref, wi_ref, or_ref, oi_ref):
    """Complex per-mode channel mixing for one (batch, O-tile) block.

    xr/xi: (1, I, M), wr/wi: (I, Ot, M), out: (1, Ot, M).  Unrolled loop over I
    keeps the live set to two (Ot, M) accumulators (a few vregs) -> no spills."""
    n_in = wr_ref.shape[0]
    accr = jnp.zeros(or_ref.shape[1:], jnp.float32)
    acci = jnp.zeros(or_ref.shape[1:], jnp.float32)
    for i in range(n_in):
        xr_i = xr_ref[0, i:i + 1, :]          # (1, M)
        xi_i = xi_ref[0, i:i + 1, :]
        wr_i = wr_ref[i]                      # (Ot, M)
        wi_i = wi_ref[i]
        accr = accr + (xr_i * wr_i - xi_i * wi_i)
        acci = acci + (xr_i * wi_i + xi_i * wr_i)
    or_ref[0] = accr
    oi_ref[0] = acci


# ----------------------------------------------------------------------------
# Wrappers
# ----------------------------------------------------------------------------
def pointwise_linear(x, w, b, residual=None, gelu=False):
    """y = act(x @ w + b (+ residual)) over the channel axis, lane-packed 4 pixels/row."""
    orig_shape = x.shape
    cin = orig_shape[-1]
    cout = w.shape[1]
    R = math.prod(orig_shape[:-1])
    p = _PACK if R % _PACK == 0 else 1
    Rg = R // p

    wp = jnp.kron(jnp.eye(p, dtype=w.dtype), w) if p > 1 else w      # block-diagonal
    bp = jnp.tile(b, p).reshape(1, p * cout)
    x2 = x.reshape(Rg, p * cin)

    row_bytes = (p * cin + p * cout * (2 if residual is not None else 1)) * 4
    tile = _pick_row_tile(Rg, row_bytes)
    grid = (pl.cdiv(Rg, tile),)

    in_specs = [
        pl.BlockSpec((tile, p * cin), lambda i: (i, 0)),
        pl.BlockSpec((p * cin, p * cout), lambda i: (0, 0)),
        pl.BlockSpec((1, p * cout), lambda i: (0, 0)),
    ]
    args = [x2, wp, bp]
    if residual is not None:
        in_specs.append(pl.BlockSpec((tile, p * cout), lambda i: (i, 0)))
        args.append(residual.reshape(Rg, p * cout))
        kernel = _pw_res_gelu_kernel if gelu else _pw_res_kernel
    else:
        kernel = _pw_gelu_kernel if gelu else _pw_kernel

    out = pl.pallas_call(
        kernel,
        out_shape=jax.ShapeDtypeStruct((Rg, p * cout), jnp.float32),
        grid_spec=pltpu.PrefetchScalarGridSpec(
            num_scalar_prefetch=0,
            grid=grid,
            in_specs=in_specs,
            out_specs=pl.BlockSpec((tile, p * cout), lambda i: (i, 0)),
        ),
        compiler_params=_cparams(1),
    )(*args)
    return out.reshape(orig_shape[:-1] + (cout,))


def _grid_coords(B, s1, s2):
    gx = jnp.linspace(1.0 / s1, 1.0 - 1.0 / s1, s1, dtype=jnp.float32)
    gy = jnp.linspace(1.0 / s2, 1.0 - 1.0 / s2, s2, dtype=jnp.float32)
    gx = jnp.broadcast_to(gx.reshape(1, s1, 1, 1), (B, s1, s2, 1))
    gy = jnp.broadcast_to(gy.reshape(1, 1, s2, 1), (B, s1, s2, 1))
    return gx, gy


def _fc0_packed_weight(w, b):
    """Pack the (3, width) fc0 weight for the [a|gx|gy] x 4-pixel input layout."""
    width = w.shape[1]
    wp = jnp.zeros((3 * _PACK, _PACK * width), w.dtype)
    for p in range(_PACK):
        wp = wp.at[p, p * width:(p + 1) * width].set(w[0])
        wp = wp.at[_PACK + p, p * width:(p + 1) * width].set(w[1])
        wp = wp.at[2 * _PACK + p, p * width:(p + 1) * width].set(w[2])
    bp = jnp.tile(b, _PACK).reshape(1, _PACK * width)
    return wp, bp


def fc0_lift(a, w, b, s1, s2):
    """fc0 on (a(x,y), x, y) without materializing the (B,S,S,3) concat in HBM.

    a: (B, S1, S2) float32; returns (B, S1, S2, width)."""
    B = a.shape[0]
    width = w.shape[1]
    npix = s1 * s2
    if npix % _PACK != 0:
        gx, gy = _grid_coords(B, s1, s2)
        x3 = jnp.concatenate([a[..., None], gx, gy], axis=-1)
        return pointwise_linear(x3, w, b)

    G = npix // _PACK
    a4 = a.reshape(B, G, _PACK)
    wp, bp = _fc0_packed_weight(w, b)
    tile = _pick_row_tile(G, (_PACK + _PACK * width) * 4)
    grid = (B, pl.cdiv(G, tile))

    out = pl.pallas_call(
        functools.partial(_fc0_kernel, s1=s1, s2=s2),
        out_shape=jax.ShapeDtypeStruct((B, G, _PACK * width), jnp.float32),
        grid_spec=pltpu.PrefetchScalarGridSpec(
            num_scalar_prefetch=0,
            grid=grid,
            in_specs=[
                pl.BlockSpec((1, tile, _PACK), lambda bb, t: (bb, t, 0)),
                pl.BlockSpec((3 * _PACK, _PACK * width), lambda bb, t: (0, 0)),
                pl.BlockSpec((1, _PACK * width), lambda bb, t: (0, 0)),
            ],
            out_specs=pl.BlockSpec((1, tile, _PACK * width), lambda bb, t: (bb, t, 0)),
        ),
        compiler_params=_cparams(2),
    )(a4, wp, bp)
    return out.reshape(B, s1, s2, width)


def mlp_head(x, w1, b1, w2, b2):
    """Fused fc1 -> GELU -> fc2 with a lane-dense (R/32, 128) output slab."""
    orig_shape = x.shape
    cin = orig_shape[-1]
    hid = w1.shape[1]
    cout = w2.shape[1]
    R = math.prod(orig_shape[:-1])
    if R % _HEAD_PIX != 0 or cout * _HEAD_PIX < 128:
        h = pointwise_linear(x, w1, b1, gelu=True)
        return pointwise_linear(h, w2, b2)

    Rg = R // _HEAD_PIX
    n_sub = _HEAD_PIX // _HEAD_SUB
    w1p = jnp.kron(jnp.eye(_HEAD_SUB, dtype=w1.dtype), w1)   # (8*cin, 8*hid)
    b1p = jnp.tile(b1, _HEAD_SUB).reshape(1, _HEAD_SUB * hid)
    w2p = jnp.kron(jnp.eye(_HEAD_SUB, dtype=w2.dtype), w2)   # (8*hid, 8*cout)
    b2p = jnp.tile(b2, _HEAD_SUB).reshape(1, _HEAD_SUB * cout)

    in_w = _HEAD_PIX * cin
    out_w = _HEAD_PIX * cout
    row_bytes = (in_w + out_w + _HEAD_SUB * hid) * 4
    tile = _pick_row_tile(Rg, row_bytes)
    grid = (pl.cdiv(Rg, tile),)

    out = pl.pallas_call(
        functools.partial(_mlp_head_kernel, n_sub=n_sub),
        out_shape=jax.ShapeDtypeStruct((Rg, out_w), jnp.float32),
        grid_spec=pltpu.PrefetchScalarGridSpec(
            num_scalar_prefetch=0,
            grid=grid,
            in_specs=[
                pl.BlockSpec((tile, in_w), lambda i: (i, 0)),
                pl.BlockSpec(w1p.shape, lambda i: (0, 0)),
                pl.BlockSpec((1, _HEAD_SUB * hid), lambda i: (0, 0)),
                pl.BlockSpec(w2p.shape, lambda i: (0, 0)),
                pl.BlockSpec((1, _HEAD_SUB * cout), lambda i: (0, 0)),
            ],
            out_specs=pl.BlockSpec((tile, out_w), lambda i: (i, 0)),
        ),
        compiler_params=_cparams(1),
    )(x.reshape(Rg, in_w), w1p, b1p, w2p, b2p)
    return out.reshape(orig_shape[:-1] + (cout,))


def spectral_mode_mix(xr, xi, wr, wi):
    """Complex einsum out[b,o,m] = sum_i x[b,i,m] * w[i,o,m].

    xr/xi: float32 (B, I, Mp);  wr/wi: float32 (I, O, Mp);  returns (B, O, Mp) x2."""
    B, I, Mp = xr.shape
    O = wr.shape[1]
    ot = _O_TILE if O % _O_TILE == 0 else O
    n_ot = O // ot

    out_r, out_i = pl.pallas_call(
        _cmix_kernel,
        out_shape=(
            jax.ShapeDtypeStruct((B, O, Mp), jnp.float32),
            jax.ShapeDtypeStruct((B, O, Mp), jnp.float32),
        ),
        grid_spec=pltpu.PrefetchScalarGridSpec(
            num_scalar_prefetch=0,
            # B is the inner axis so the weight O-tile stays resident across it.
            grid=(n_ot, B),
            in_specs=[
                pl.BlockSpec((1, I, Mp), lambda o, b: (b, 0, 0)),
                pl.BlockSpec((1, I, Mp), lambda o, b: (b, 0, 0)),
                pl.BlockSpec((I, ot, Mp), lambda o, b: (0, o, 0)),
                pl.BlockSpec((I, ot, Mp), lambda o, b: (0, o, 0)),
            ],
            out_specs=[
                pl.BlockSpec((1, ot, Mp), lambda o, b: (b, o, 0)),
                pl.BlockSpec((1, ot, Mp), lambda o, b: (b, o, 0)),
            ],
        ),
        compiler_params=_cparams(2),
    )(xr, xi, wr, wi)
    return out_r, out_i


# ----------------------------------------------------------------------------
# SpectralConv2d / FNO2d forward
# ----------------------------------------------------------------------------
def spectral_conv2d_nhwc(x, wr, wi, m1=MODES1, m2=MODES2):
    """x: float32 (B, S1, S2, Cin);  wr/wi: float32 (Cin, Cout, Mp) (M zero-padded)."""
    B, S1, S2, C = x.shape
    O = wr.shape[1]
    M = 2 * m1 * m2
    Mp = wr.shape[2]

    # TODO(synk): rfft2/irfft2 have no Pallas primitive; they stay in XLA glue.
    x_ft = jnp.fft.rfft2(x, axes=(1, 2))  # (B, S1, S2//2+1, C) complex64

    modes = jnp.concatenate(
        [x_ft[:, :m1, :m2, :], x_ft[:, S1 - m1:, :m2, :]], axis=1
    )  # (B, 2*m1, m2, C)
    modes = jnp.transpose(modes, (0, 3, 1, 2)).reshape(B, C, M)  # tiny
    xr = jnp.real(modes).astype(jnp.float32)
    xi = jnp.imag(modes).astype(jnp.float32)
    if Mp != M:
        pad = ((0, 0), (0, 0), (0, Mp - M))
        xr = jnp.pad(xr, pad)
        xi = jnp.pad(xi, pad)

    out_r, out_i = spectral_mode_mix(xr, xi, wr, wi)  # (B, O, Mp)

    out_modes = (out_r[:, :, :M] + 1j * out_i[:, :, :M]).reshape(B, O, 2 * m1, m2)
    out_modes = jnp.transpose(out_modes, (0, 2, 3, 1))  # (B, 2*m1, m2, O), tiny

    # TODO(synk): the zero-fill + two scatters below are XLA glue; a persistent
    # aliased out_ft buffer (input_output_aliases) would cut this HBM traffic.
    out_ft = jnp.zeros((B, S1, S2 // 2 + 1, O), dtype=jnp.complex64)
    out_ft = out_ft.at[:, :m1, :m2, :].set(out_modes[:, :m1])
    out_ft = out_ft.at[:, S1 - m1:, :m2, :].set(out_modes[:, m1:])
    return jnp.fft.irfft2(out_ft, s=(S1, S2), axes=(1, 2))  # (B, S1, S2, O) float32


def fno2d_forward(params, x, m1=MODES1, m2=MODES2):
    """x: (B, S, S, 1) float32  ->  (B, S, S, 4) float32."""
    B, S1, S2, _ = x.shape

    # fc0 on (a, x, y); grid coords generated in-kernel.
    x = fc0_lift(x[..., 0], params["fc0_w"], params["fc0_b"], S1, S2)

    for li in range(4):
        x1 = spectral_conv2d_nhwc(
            x, params[f"conv{li}_wr"], params[f"conv{li}_wi"], m1, m2)
        # w_i is a 1x1 conv == pointwise channel linear; spectral residual and
        # (for layers 0-2) the exact-erf GELU are fused into the kernel epilogue.
        x = pointwise_linear(x, params[f"w{li}_w"], params[f"w{li}_b"],
                             residual=x1, gelu=(li < 3))

    # fc1 -> GELU -> fc2 fused in one pallas_call with a lane-dense output slab.
    return mlp_head(x, params["fc1_w"], params["fc1_b"],
                    params["fc2_w"], params["fc2_b"])


# ----------------------------------------------------------------------------
# Deterministic parameter initialization (shapes from FNO2d.__init__)
# ----------------------------------------------------------------------------
def _linear_init(key, fan_in, fan_out):
    kw, kb = jax.random.split(key)
    bound = 1.0 / math.sqrt(fan_in)
    w = jax.random.uniform(kw, (fan_in, fan_out), jnp.float32, -bound, bound)
    b = jax.random.uniform(kb, (fan_out,), jnp.float32, -bound, bound)
    return w, b


def _spectral_init(key, cin, cout, m1, m2):
    kr, ki = jax.random.split(key)
    scale = 1.0 / (cin * cout)
    wr = scale * jax.random.uniform(kr, (cin, cout, m1, m2), jnp.float32)
    wi = scale * jax.random.uniform(ki, (cin, cout, m1, m2), jnp.float32)
    return wr + 1j * wi  # complex64, mirrors torch.rand(..., dtype=cfloat)


def init_params(key, width=WIDTH, m1=MODES1, m2=MODES2):
    keys = jax.random.split(key, 16)
    p = {}
    p["fc0_w"], p["fc0_b"] = _linear_init(keys[0], 3, width)
    M = 2 * m1 * m2
    Mp = pl.cdiv(M, _MODE_PAD) * _MODE_PAD
    for li in range(4):
        k1, k2 = jax.random.split(keys[1 + li])
        w1 = _spectral_init(k1, width, width, m1, m2)  # (I, O, m1, m2) complex
        w2 = _spectral_init(k2, width, width, m1, m2)
        # Kernel-facing layout: float32 (I, O, Mp) real/imag, mode axis zero-padded
        # to a multiple of 128 lanes (built once at init).
        w = jnp.concatenate([w1, w2], axis=2).reshape(width, width, M)
        w = jnp.pad(w, ((0, 0), (0, 0), (0, Mp - M)))
        p[f"conv{li}_wr"] = jnp.real(w).astype(jnp.float32)
        p[f"conv{li}_wi"] = jnp.imag(w).astype(jnp.float32)
        p[f"w{li}_w"], p[f"w{li}_b"] = _linear_init(keys[5 + li], width, width)
    p["fc1_w"], p["fc1_b"] = _linear_init(keys[9], width, 64)
    p["fc2_w"], p["fc2_b"] = _linear_init(keys[10], 64, 4)
    return p


if __name__ == "__main__":
    key = jax.random.PRNGKey(0)
    kp, kx = jax.random.split(key)
    params = init_params(kp)

    B, S = 2, 32  # S >= 2*modes1 and S//2+1 >= modes2, as required by the module
    x = jax.random.normal(kx, (B, S, S, 1), jnp.float32)

    fwd = jax.jit(functools.partial(fno2d_forward, params))
    out = fwd(x)
    out = jax.block_until_ready(out)

    assert out.shape == (B, S, S, 4), out.shape
    assert out.dtype == jnp.float32
    assert bool(jnp.all(jnp.isfinite(out)))
    print("KERNEL_OK")
</pallas_src>

<mosaic_0001>
module attributes {stable_mosaic.version = 11 : i64} {
  func.func @_fc0_kernel(%arg0: i32, %arg1: i32, %arg2: memref<1x32x4xf32, #tpu.memory_space<vmem>>, %arg3: memref<12x128xf32, #tpu.memory_space<vmem>>, %arg4: memref<1x128xf32, #tpu.memory_space<vmem>>, %arg5: memref<1x32x128xf32, #tpu.memory_space<vmem>>) attributes {dimension_semantics = [#tpu.dimension_semantics<parallel>, #tpu.dimension_semantics<parallel>], iteration_bounds = array<i64: 2, 8>, scalar_prefetch = 0 : i64, scratch_operands = 0 : i64, tpu.core_type = #tpu.core_type<tc>, window_params = [{transform_indices = @transform_0, window_bounds = array<i64: 1, 32, 4>}, {pipeline_mode = #tpu.pipeline_mode<synchronous>, transform_indices = @transform_1, window_bounds = array<i64: 12, 128>}, {pipeline_mode = #tpu.pipeline_mode<synchronous>, transform_indices = @transform_2, window_bounds = array<i64: 1, 128>}, {transform_indices = @transform_3, window_bounds = array<i64: 1, 32, 128>}]} {
    %c0 = arith.constant 0 : index
    %c0_0 = arith.constant 0 : index
    %c0_1 = arith.constant 0 : index
    %0 = vector.load %arg2[%c0, %c0_0, %c0_1] : memref<1x32x4xf32, #tpu.memory_space<vmem>>, vector<1x32x4xf32>
    %1 = vector.shape_cast %0 : vector<1x32x4xf32> to vector<32x4xf32>
    %c128_i32 = arith.constant 128 : i32
    %2 = arith.muli %arg1, %c128_i32 : i32
    %3 = tpu.iota {dimensions = array<i32: 0>} : vector<32x4xi32>
    %4 = tpu.iota {dimensions = array<i32: 1>} : vector<32x4xi32>
    %c4_i32 = arith.constant 4 : i32
    %5 = vector.broadcast %c4_i32 : i32 to vector<32x4xi32>
    %6 = arith.muli %3, %5 : vector<32x4xi32>
    %7 = vector.broadcast %2 : i32 to vector<32x4xi32>
    %8 = arith.addi %7, %6 : vector<32x4xi32>
    %9 = arith.addi %8, %4 : vector<32x4xi32>
    %10 = arith.sitofp %9 : vector<32x4xi32> to vector<32x4xf32>
    %cst = arith.constant 5.000000e-01 : f32
    %11 = vector.broadcast %cst : f32 to vector<32x4xf32>
    %12 = arith.addf %10, %11 : vector<32x4xf32>
    %cst_2 = arith.constant 3.125000e-02 : f32
    %13 = vector.broadcast %cst_2 : f32 to vector<32x4xf32>
    %14 = arith.mulf %12, %13 : vector<32x4xf32>
    %15 = math.floor %14 : vector<32x4xf32>
    %cst_3 = arith.constant 3.200000e+01 : f32
    %16 = vector.broadcast %cst_3 : f32 to vector<32x4xf32>
    %17 = arith.mulf %15, %16 : vector<32x4xf32>
    %18 = arith.subf %10, %17 : vector<32x4xf32>
    %cst_4 = arith.constant 0.0302419346 : f32
    %19 = vector.broadcast %cst_4 : f32 to vector<32x4xf32>
    %20 = arith.mulf %15, %19 : vector<32x4xf32>
    %cst_5 = arith.constant 3.125000e-02 : f32
    %21 = vector.broadcast %cst_5 : f32 to vector<32x4xf32>
    %22 = arith.addf %21, %20 : vector<32x4xf32>
    %cst_6 = arith.constant 0.0302419346 : f32
    %23 = vector.broadcast %cst_6 : f32 to vector<32x4xf32>
    %24 = arith.mulf %18, %23 : vector<32x4xf32>
    %cst_7 = arith.constant 3.125000e-02 : f32
    %25 = vector.broadcast %cst_7 : f32 to vector<32x4xf32>
    %26 = arith.addf %25, %24 : vector<32x4xf32>
    %27 = tpu.concatenate %1, %22, %26 in 1 : vector<32x4xf32>, vector<32x4xf32>, vector<32x4xf32> -> vector<32x12xf32>
    %c0_8 = arith.constant 0 : index
    %c0_9 = arith.constant 0 : index
    %28 = vector.load %arg3[%c0_8, %c0_9] : memref<12x128xf32, #tpu.memory_space<vmem>>, vector<12x128xf32>
    %cst_10 = arith.constant dense<0.000000e+00> : vector<32x128xf32>
    %29 = tpu.matmul %27, %28, %cst_10 {dimension_numbers = #tpu.dot_dimension_numbers<[1], [0], [0], [1], [0, 0, 1, 1], [], []>} : vector<32x12xf32>, vector<12x128xf32>, vector<32x128xf32> -> vector<32x128xf32>
    %c0_11 = arith.constant 0 : index
    %c0_12 = arith.constant 0 : index
    %30 = vector.load %arg4[%c0_11, %c0_12] : memref<1x128xf32, #tpu.memory_space<vmem>>, vector<1x128xf32>
    %31 = vector.broadcast %30 : vector<1x128xf32> to vector<32x128xf32>
    %32 = arith.addf %29, %31 : vector<32x128xf32>
    %c0_13 = arith.constant 0 : index
    %c0_14 = arith.constant 0 : index
    %c0_15 = arith.constant 0 : index
    %33 = vector.load %arg5[%c0_13, %c0_14, %c0_15] : memref<1x32x128xf32, #tpu.memory_space<vmem>>, vector<1x32x128xf32>
    %34 = vector.shape_cast %33 : vector<1x32x128xf32> to vector<32x128xf32>
    %35 = vector.shape_cast %32 : vector<32x128xf32> to vector<1x32x128xf32>
    tpu.vector_store %arg5[%c0_13, %c0_14, %c0_15], %35 {strides = array<i32>} : memref<1x32x128xf32, #tpu.memory_space<vmem>>, vector<1x32x128xf32>,
    return
  }
  func.func @transform_0(%arg0: i32, %arg1: i32) -> (i32, i32, i32) {
    %c0_i32 = arith.constant 0 : i32
    %c0_i32_0 = arith.constant 0 : i32
    return %arg0, %arg1, %c0_i32 : i32, i32, i32
  }
  func.func @transform_1(%arg0: i32, %arg1: i32) -> (i32, i32) {
    %c0_i32 = arith.constant 0 : i32
    %c0_i32_0 = arith.constant 0 : i32
    %c0_i32_1 = arith.constant 0 : i32
    return %c0_i32, %c0_i32_0 : i32, i32
  }
  func.func @transform_2(%arg0: i32, %arg1: i32) -> (i32, i32) {
    %c0_i32 = arith.constant 0 : i32
    %c0_i32_0 = arith.constant 0 : i32
    %c0_i32_1 = arith.constant 0 : i32
    return %c0_i32, %c0_i32_0 : i32, i32
  }
  func.func @transform_3(%arg0: i32, %arg1: i32) -> (i32, i32, i32) {
    %c0_i32 = arith.constant 0 : i32
    %c0_i32_0 = arith.constant 0 : i32
    return %arg0, %arg1, %c0_i32 : i32, i32, i32
  }
}

module attributes {stable_mosaic.version = 11 : i64} {
  func.func @_cmix_kernel(%arg0: i32, %arg1: i32, %arg2: memref<1x32x384xf32, #tpu.memory_space<vmem>>, %arg3: memref<1x32x384xf32, #tpu.memory_space<vmem>>, %arg4: memref<32x8x384xf32, #tpu.memory_space<vmem>>, %arg5: memref<32x8x384xf32, #tpu.memory_space<vmem>>, %arg6: memref<1x8x384xf32, #tpu.memory_space<vmem>>, %arg7: memref<1x8x384xf32, #tpu.memory_space<vmem>>) attributes {dimension_semantics = [#tpu.dimension_semantics<parallel>, #tpu.dimension_semantics<parallel>], iteration_bounds = array<i64: 4, 2>, scalar_prefetch = 0 : i64, scratch_operands = 0 : i64, tpu.core_type = #tpu.core_type<tc>, window_params = [{transform_indices = @transform_0, window_bounds = array<i64: 1, 32, 384>}, {transform_indices = @transform_1, window_bounds = array<i64: 1, 32, 384>}, {transform_indices = @transform_2, window_bounds = array<i64: 32, 8, 384>}, {transform_indices = @transform_3, window_bounds = array<i64: 32, 8, 384>}, {transform_indices = @transform_4, window_bounds = array<i64: 1, 8, 384>}, {transform_indices = @transform_5, window_bounds = array<i64: 1, 8, 384>}]} {
    %cst = arith.constant 0.000000e+00 : f32
    %0 = vector.broadcast %cst : f32 to vector<8x384xf32>
    %cst_0 = arith.constant 0.000000e+00 : f32
    %1 = vector.broadcast %cst_0 : f32 to vector<8x384xf32>
    %c0 = arith.constant 0 : index
    %c0_1 = arith.constant 0 : index
    %c0_2 = arith.constant 0 : index
    %2 = vector.load %arg2[%c0, %c0_1, %c0_2] : memref<1x32x384xf32, #tpu.memory_space<vmem>>, vector<1x1x384xf32>
    %3 = vector.shape_cast %2 : vector<1x1x384xf32> to vector<1x384xf32>
    %c0_3 = arith.constant 0 : index
    %c0_4 = arith.constant 0 : index
    %c0_5 = arith.constant 0 : index
    %4 = vector.load %arg3[%c0_3, %c0_4, %c0_5] : memref<1x32x384xf32, #tpu.memory_space<vmem>>, vector<1x1x384xf32>
    %5 = vector.shape_cast %4 : vector<1x1x384xf32> to vector<1x384xf32>
    %c0_6 = arith.constant 0 : index
    %c0_7 = arith.constant 0 : index
    %c0_8 = arith.constant 0 : index
    %6 = vector.load %arg4[%c0_6, %c0_7, %c0_8] : memref<32x8x384xf32, #tpu.memory_space<vmem>>, vector<1x8x384xf32>
    %7 = vector.shape_cast %6 : vector<1x8x384xf32> to vector<8x384xf32>
    %c0_9 = arith.constant 0 : index
    %c0_10 = arith.constant 0 : index
    %c0_11 = arith.constant 0 : index
    %8 = vector.load %arg5[%c0_9, %c0_10, %c0_11] : memref<32x8x384xf32, #tpu.memory_space<vmem>>, vector<1x8x384xf32>
    %9 = vector.shape_cast %8 : vector<1x8x384xf32> to vector<8x384xf32>
    %10 = vector.broadcast %3 : vector<1x384xf32> to vector<8x384xf32>
    %11 = arith.mulf %10, %7 : vector<8x384xf32>
    %12 = vector.broadcast %5 : vector<1x384xf32> to vector<8x384xf32>
    %13 = arith.mulf %12, %9 : vector<8x384xf32>
    %14 = arith.subf %11, %13 : vector<8x384xf32>
    %15 = arith.addf %0, %14 : vector<8x384xf32>
    %16 = vector.broadcast %3 : vector<1x384xf32> to vector<8x384xf32>
    %17 = arith.mulf %16, %9 : vector<8x384xf32>
    %18 = vector.broadcast %5 : vector<1x384xf32> to vector<8x384xf32>
    %19 = arith.mulf %18, %7 : vector<8x384xf32>
    %20 = arith.addf %17, %19 : vector<8x384xf32>
    %21 = arith.addf %1, %20 : vector<8x384xf32>
    %c0_12 = arith.constant 0 : index
    %c1 = arith.constant 1 : index
    %c0_13 = arith.constant 0 : index
    %22 = vector.load %arg2[%c0_12, %c1, %c0_13] : memref<1x32x384xf32, #tpu.memory_space<vmem>>, vector<1x1x384xf32>
    %23 = vector.shape_cast %22 : vector<1x1x384xf32> to vector<1x384xf32>
    %c0_14 = arith.constant 0 : index
    %c1_15 = arith.constant 1 : index
    %c0_16 = arith.constant 0 : index
    %24 = vector.load %arg3[%c0_14, %c1_15, %c0_16] : memref<1x32x384xf32, #tpu.memory_space<vmem>>, vector<1x1x384xf32>
    %25 = vector.shape_cast %24 : vector<1x1x384xf32> to vector<1x384xf32>
    %c1_17 = arith.constant 1 : index
    %c0_18 = arith.constant 0 : index
    %c0_19 = arith.constant 0 : index
    %26 = vector.load %arg4[%c1_17, %c0_18, %c0_19] : memref<32x8x384xf32, #tpu.memory_space<vmem>>, vector<1x8x384xf32>
    %27 = vector.shape_cast %26 : vector<1x8x384xf32> to vector<8x384xf32>
    %c1_20 = arith.constant 1 : index
    %c0_21 = arith.constant 0 : index
    %c0_22 = arith.constant 0 : index
    %28 = vector.load %arg5[%c1_20, %c0_21, %c0_22] : memref<32x8x384xf32, #tpu.memory_space<vmem>>, vector<1x8x384xf32>
    %29 = vector.shape_cast %28 : vector<1x8x384xf32> to vector<8x384xf32>
    %30 = vector.broadcast %23 : vector<1x384xf32> to vector<8x384xf32>
    %31 = arith.mulf %30, %27 : vector<8x384xf32>
    %32 = vector.broadcast %25 : vector<1x384xf32> to vector<8x384xf32>
    %33 = arith.mulf %32, %29 : vector<8x384xf32>
    %34 = arith.subf %31, %33 : vector<8x384xf32>
    %35 = arith.addf %15, %34 : vector<8x384xf32>
    %36 = vector.broadcast %23 : vector<1x384xf32> to vector<8x384xf32>
    %37 = arith.mulf %36, %29 : vector<8x384xf32>
    %38 = vector.broadcast %25 : vector<1x384xf32> to vector<8x384xf32>
    %39 = arith.mulf %38, %27 : vector<8x384xf32>
    %40 = arith.addf %37, %39 : vector<8x384xf32>
    %41 = arith.addf %21, %40 : vector<8x384xf32>
    %c0_23 = arith.constant 0 : index
    %c2 = arith.constant 2 : index
    %c0_24 = arith.constant 0 : index
    %42 = vector.load %arg2[%c0_23, %c2, %c0_24] : memref<1x32x384xf32, #tpu.memory_space<vmem>>, vector<1x1x384xf32>
    %43 = vector.shape_cast %42 : vector<1x1x384xf32> to vector<1x384xf32>
    %c0_25 = arith.constant 0 : index
    %c2_26 = arith.constant 2 : index
    %c0_27 = arith.constant 0 : index
    %44 = vector.load %arg3[%c0_25, %c2_26, %c0_27] : memref<1x32x384xf32, #tpu.memory_space<vmem>>, vector<1x1x384xf32>
    %45 = vector.shape_cast %44 : vector<1x1x384xf32> to vector<1x384xf32>
    %c2_28 = arith.constant 2 : index
    %c0_29 = arith.constant 0 : index
    %c0_30 = arith.constant 0 : index
    %46 = vector.load %arg4[%c2_28, %c0_29, %c0_30] : memref<32x8x384xf32, #tpu.memory_space<vmem>>, vector<1x8x384xf32>
    %47 = vector.shape_cast %46 : vector<1x8x384xf32> to vector<8x384xf32>
    %c2_31 = arith.constant 2 : index
    %c0_32 = arith.constant 0 : index
    %c0_33 = arith.constant 0 : index
    %48 = vector.load %arg5[%c2_31, %c0_32, %c0_33] : memref<32x8x384xf32, #tpu.memory_space<vmem>>, vector<1x8x384xf32>
    %49 = vector.shape_cast %48 : vector<1x8x384xf32> to vector<8x384xf32>
    %50 = vector.broadcast %43 : vector<1x384xf32> to vector<8x384xf32>
    %51 = arith.mulf %50, %47 : vector<8x384xf32>
    %52 = vector.broadcast %45 : vector<1x384xf32> to vector<8x384xf32>
    %53 = arith.mulf %52, %49 : vector<8x384xf32>
    %54 = arith.subf %51, %53 : vector<8x384xf32>
    %55 = arith.addf %35, %54 : vector<8x384xf32>
    %56 = vector.broadcast %43 : vector<1x384xf32> to vector<8x384xf32>
    %57 = arith.mulf %56, %49 : vector<8x384xf32>
    %58 = vector.broadcast %45 : vector<1x384xf32> to vector<8x384xf32>
    %59 = arith.mulf %58, %47 : vector<8x384xf32>
    %60 = arith.addf %57, %59 : vector<8x384xf32>
    %61 = arith.addf %41, %60 : vector<8x384xf32>
    %c0_34 = arith.constant 0 : index
    %c3 = arith.constant 3 : index
    %c0_35 = arith.constant 0 : index
    %62 = vector.load %arg2[%c0_34, %c3, %c0_35] : memref<1x32x384xf32, #tpu.memory_space<vmem>>, vector<1x1x384xf32>
    %63 = vector.shape_cast %62 : vector<1x1x384xf32> to vector<1x384xf32>
    %c0_36 = arith.constant 0 : index
    %c3_37 = arith.constant 3 : index
    %c0_38 = arith.constant 0 : index
    %64 = vector.load %arg3[%c0_36, %c3_37, %c0_38] : memref<1x32x384xf32, #tpu.memory_space<vmem>>, vector<1x1x384xf32>
    %65 = vector.shape_cast %64 : vector<1x1x384xf32> to vector<1x384xf32>
    %c3_39 = arith.constant 3 : index
    %c0_40 = arith.constant 0 : index
    %c0_41 = arith.constant 0 : index
    %66 = vector.load %arg4[%c3_39, %c0_40, %c0_41] : memref<32x8x384xf32, #tpu.memory_space<vmem>>, vector<1x8x384xf32>
    %67 = vector.shape_cast %66 : vector<1x8x384xf32> to vector<8x384xf32>
    %c3_42 = arith.constant 3 : index
    %c0_43 = arith.constant 0 : index
    %c0_44 = arith.constant 0 : index
    %68 = vector.load %arg5[%c3_42, %c0_43, %c0_44] : memref<32x8x384xf32, #tpu.memory_space<vmem>>, vector<1x8x384xf32>
    %69 = vector.shape_cast %68 : vector<1x8x384xf32> to vector<8x384xf32>
    %70 = vector.broadcast %63 : vector<1x384xf32> to vector<8x384xf32>
    %71 = arith.mulf %70, %67 : vector<8x384xf32>
    %72 = vector.broadcast %65 : vector<1x384xf32> to vector<8x384xf32>
    %73 = arith.mulf %72, %69 : vector<8x384xf32>
    %74 = arith.subf %71, %73 : vector<8x384xf32>
    %75 = arith.addf %55, %74 : vector<8x384xf32>
    %76 = vector.broadcast %63 : vector<1x384xf32> to vector<8x384xf32>
    %77 = arith.mulf %76, %69 : vector<8x384xf32>
    %78 = vector.broadcast %65 : vector<1x384xf32> to vector<8x384xf32>
    %79 = arith.mulf %78, %67 : vector<8x384xf32>
    %80 = arith.addf %77, %79 : vector<8x384xf32>
    %81 = arith.addf %61, %80 : vector<8x384xf32>
    %c0_45 = arith.constant 0 : index
    %c4 = arith.constant 4 : index
    %c0_46 = arith.constant 0 : index
    %82 = vector.load %arg2[%c0_45, %c4, %c0_46] : memref<1x32x384xf32, #tpu.memory_space<vmem>>, vector<1x1x384xf32>
    %83 = vector.shape_cast %82 : vector<1x1x384xf32> to vector<1x384xf32>
    %c0_47 = arith.constant 0 : index
    %c4_48 = arith.constant 4 : index
    %c0_49 = arith.constant 0 : index
    %84 = vector.load %arg3[%c0_47, %c4_48, %c0_49] : memref<1x32x384xf32, #tpu.memory_space<vmem>>, vector<1x1x384xf32>
    %85 = vector.shape_cast %84 : vector<1x1x384xf32> to vector<1x384xf32>
    %c4_50 = arith.constant 4 : index
    %c0_51 = arith.constant 0 : index
    %c0_52 = arith.constant 0 : index
    %86 = vector.load %arg4[%c4_50, %c0_51, %c0_52] : memref<32x8x384xf32, #tpu.memory_space<vmem>>, vector<1x8x384xf32>
    %87 = vector.shape_cast %86 : vector<1x8x384xf32> to vector<8x384xf32>
    %c4_53 = arith.constant 4 : index
    %c0_54 = arith.constant 0 : index
    %c0_55 = arith.constant 0 : index
    %88 = vector.load %arg5[%c4_53, %c0_54, %c0_55] : memref<32x8x384xf32, #tpu.memory_space<vmem>>, vector<1x8x384xf32>
    %89 = vector.shape_cast %88 : vector<1x8x384xf32> to vector<8x384xf32>
    %90 = vector.broadcast %83 : vector<1x384xf32> to vector<8x384xf32>
    %91 = arith.mulf %90, %87 : vector<8x384xf32>
    %92 = vector.broadcast %85 : vector<1x384xf32> to vector<8x384xf32>
    %93 = arith.mulf %92, %89 : vector<8x384xf32>
    %94 = arith.subf %91, %93 : vector<8x384xf32>
    %95 = arith.addf %75, %94 : vector<8x384xf32>
    %96 = vector.broadcast %83 : vector<1x384xf32> to vector<8x384xf32>
    %97 = arith.mulf %96, %89 : vector<8x384xf32>
    %98 = vector.broadcast %85 : vector<1x384xf32> to vector<8x384xf32>
    %99 = arith.mulf %98, %87 : vector<8x384xf32>
    %100 = arith.addf %97, %99 : vector<8x384xf32>
    %101 = arith.addf %81, %100 : vector<8x384xf32>
    %c0_56 = arith.constant 0 : index
    %c5 = arith.constant 5 : index
    %c0_57 = arith.constant 0 : index
    %102 = vector.load %arg2[%c0_56, %c5, %c0_57] : memref<1x32x384xf32, #tpu.memory_space<vmem>>, vector<1x1x384xf32>
    %103 = vector.shape_cast %102 : vector<1x1x384xf32> to vector<1x384xf32>
    %c0_58 = arith.constant 0 : index
    %c5_59 = arith.constant 5 : index
    %c0_60 = arith.constant 0 : index
    %104 = vector.load %arg3[%c0_58, %c5_59, %c0_60] : memref<1x32x384xf32, #tpu.memory_space<vmem>>, vector<1x1x384xf32>
    %105 = vector.shape_cast %104 : vector<1x1x384xf32> to vector<1x384xf32>
    %c5_61 = arith.constant 5 : index
    %c0_62 = arith.constant 0 : index
    %c0_63 = arith.constant 0 : index
    %106 = vector.load %arg4[%c5_61, %c0_62, %c0_63] : memref<32x8x384xf32, #tpu.memory_space<vmem>>, vector<1x8x384xf32>
    %107 = vector.shape_cast %106 : vector<1x8x384xf32> to vector<8x384xf32>
    %c5_64 = arith.constant 5 : index
    %c0_65 = arith.constant 0 : index
    %c0_66 = arith.constant 0 : index
    %108 = vector.load %arg5[%c5_64, %c0_65, %c0_66] : memref<32x8x384xf32, #tpu.memory_space<vmem>>, vector<1x8x384xf32>
    %109 = vector.shape_cast %108 : vector<1x8x384xf32> to vector<8x384xf32>
    %110 = vector.broadcast %103 : vector<1x384xf32> to vector<8x384xf32>
    %111 = arith.mulf %110, %107 : vector<8x384xf32>
    %112 = vector.broadcast %105 : vector<1x384xf32> to vector<8x384xf32>
    %113 = arith.mulf %112, %109 : vector<8x384xf32>
    %114 = arith.subf %111, %113 : vector<8x384xf32>
    %115 = arith.addf %95, %114 : vector<8x384xf32>
    %116 = vector.broadcast %103 : vector<1x384xf32> to vector<8x384xf32>
    %117 = arith.mulf %116, %109 : vector<8x384xf32>
    %118 = vector.broadcast %105 : vector<1x384xf32> to vector<8x384xf32>
    %119 = arith.mulf %118, %107 : vector<8x384xf32>
    %120 = arith.addf %117, %119 : vector<8x384xf32>
    %121 = arith.addf %101, %120 : vector<8x384xf32>
    %c0_67 = arith.constant 0 : index
    %c6 = arith.constant 6 : index
    %c0_68 = arith.constant 0 : index
    %122 = vector.load %arg2[%c0_67, %c6, %c0_68] : memref<1x32x384xf32, #tpu.memory_space<vmem>>, vector<1x1x384xf32>
    %123 = vector.shape_cast %122 : vector<1x1x384xf32> to vector<1x384xf32>
    %c0_69 = arith.constant 0 : index
    %c6_70 = arith.constant 6 : index
    %c0_71 = arith.constant 0 : index
    %124 = vector.load %arg3[%c0_69, %c6_70, %c0_71] : memref<1x32x384xf32, #tpu.memory_space<vmem>>, vector<1x1x384xf32>
    %125 = vector.shape_cast %124 : vector<1x1x384xf32> to vector<1x384xf32>
    %c6_72 = arith.constant 6 : index
    %c0_73 = arith.constant 0 : index
    %c0_74 = arith.constant 0 : index
    %126 = vector.load %arg4[%c6_72, %c0_73, %c0_74] : memref<32x8x384xf32, #tpu.memory_space<vmem>>, vector<1x8x384xf32>
    %127 = vector.shape_cast %126 : vector<1x8x384xf32> to vector<8x384xf32>
    %c6_75 = arith.constant 6 : index
    %c0_76 = arith.constant 0 : index
    %c0_77 = arith.constant 0 : index
    %128 = vector.load %arg5[%c6_75, %c0_76, %c0_77] : memref<32x8x384xf32, #tpu.memory_space<vmem>>, vector<1x8x384xf32>
    %129 = vector.shape_cast %128 : vector<1x8x384xf32> to vector<8x384xf32>
    %130 = vector.broadcast %123 : vector<1x384xf32> to vector<8x384xf32>
    %131 = arith.mulf %130, %127 : vector<8x384xf32>
    %132 = vector.broadcast %125 : vector<1x384xf32> to vector<8x384xf32>
    %133 = arith.mulf %132, %129 : vector<8x384xf32>
    %134 = arith.subf %131, %133 : vector<8x384xf32>
    %135 = arith.addf %115, %134 : vector<8x384xf32>
    %136 = vector.broadcast %123 : vector<1x384xf32> to vector<8x384xf32>
    %137 = arith.mulf %136, %129 : vector<8x384xf32>
    %138 = vector.broadcast %125 : vector<1x384xf32> to vector<8x384xf32>
    %139 = arith.mulf %138, %127 : vector<8x384xf32>
    %140 = arith.addf %137, %139 : vector<8x384xf32>
    %141 = arith.addf %121, %140 : vector<8x384xf32>
    %c0_78 = arith.constant 0 : index
    %c7 = arith.constant 7 : index
    %c0_79 = arith.constant 0 : index
    %142 = vector.load %arg2[%c0_78, %c7, %c0_79] : memref<1x32x384xf32, #tpu.memory_space<vmem>>, vector<1x1x384xf32>
    %143 = vector.shape_cast %142 : vector<1x1x384xf32> to vector<1x384xf32>
    %c0_80 = arith.constant 0 : index
    %c7_81 = arith.constant 7 : index
    %c0_82 = arith.constant 0 : index
    %144 = vector.load %arg3[%c0_80, %c7_81, %c0_82] : memref<1x32x384xf32, #tpu.memory_space<vmem>>, vector<1x1x384xf32>
    %145 = vector.shape_cast %144 : vector<1x1x384xf32> to vector<1x384xf32>
    %c7_83 = arith.constant 7 : index
    %c0_84 = arith.constant 0 : index
    %c0_85 = arith.constant 0 : index
    %146 = vector.load %arg4[%c7_83, %c0_84, %c0_85] : memref<32x8x384xf32, #tpu.memory_space<vmem>>, vector<1x8x384xf32>
    %147 = vector.shape_cast %146 : vector<1x8x384xf32> to vector<8x384xf32>
    %c7_86 = arith.constant 7 : index
    %c0_87 = arith.constant 0 : index
    %c0_88 = arith.constant 0 : index
    %148 = vector.load %arg5[%c7_86, %c0_87, %c0_88] : memref<32x8x384xf32, #tpu.memory_space<vmem>>, vector<1x8x384xf32>
    %149 = vector.shape_cast %148 : vector<1x8x384xf32> to vector<8x384xf32>
    %150 = vector.broadcast %143 : vector<1x384xf32> to vector<8x384xf32>
    %151 = arith.mulf %150, %147 : vector<8x384xf32>
    %152 = vector.broadcast %145 : vector<1x384xf32> to vector<8x384xf32>
    %153 = arith.mulf %152, %149 : vector<8x384xf32>
    %154 = arith.subf %151, %153 : vector<8x384xf32>
    %155 = arith.addf %135, %154 : vector<8x384xf32>
    %156 = vector.broadcast %143 : vector<1x384xf32> to vector<8x384xf32>
    %157 = arith.mulf %156, %149 : vector<8x384xf32>
    %158 = vector.broadcast %145 : vector<1x384xf32> to vector<8x384xf32>
    %159 = arith.mulf %158, %147 : vector<8x384xf32>
    %160 = arith.addf %157, %159 : vector<8x384xf32>
    %161 = arith.addf %141, %160 : vector<8x384xf32>
    %c0_89 = arith.constant 0 : index
    %c8 = arith.constant 8 : index
    %c0_90 = arith.constant 0 : index
    %162 = vector.load %arg2[%c0_89, %c8, %c0_90] : memref<1x32x384xf32, #tpu.memory_space<vmem>>, vector<1x1x384xf32>
    %163 = vector.shape_cast %162 : vector<1x1x384xf32> to vector<1x384xf32>
    %c0_91 = arith.constant 0 : index
    %c8_92 = arith.constant 8 : index
    %c0_93 = arith.constant 0 : index
    %164 = vector.load %arg3[%c0_91, %c8_92, %c0_93] : memref<1x32x384xf32, #tpu.memory_space<vmem>>, vector<1x1x384xf32>
    %165 = vector.shape_cast %164 : vector<1x1x384xf32> to vector<1x384xf32>
    %c8_94 = arith.constant 8 : index
    %c0_95 = arith.constant 0 : index
    %c0_96 = arith.constant 0 : index
    %166 = vector.load %arg4[%c8_94, %c0_95, %c0_96] : memref<32x8x384xf32, #tpu.memory_space<vmem>>, vector<1x8x384xf32>
    %167 = vector.shape_cast %166 : vector<1x8x384xf32> to vector<8x384xf32>
    %c8_97 = arith.constant 8 : index
    %c0_98 = arith.constant 0 : index
    %c0_99 = arith.constant 0 : index
    %168 = vector.load %arg5[%c8_97, %c0_98, %c0_99] : memref<32x8x384xf32, #tpu.memory_space<vmem>>, vector<1x8x384xf32>
    %169 = vector.shape_cast %168 : vector<1x8x384xf32> to vector<8x384xf32>
    %170 = vector.broadcast %163 : vector<1x384xf32> to vector<8x384xf32>
    %171 = arith.mulf %170, %167 : vector<8x384xf32>
    %172 = vector.broadcast %165 : vector<1x384xf32> to vector<8x384xf32>
    %173 = arith.mulf %172, %169 : vector<8x384xf32>
    %174 = arith.subf %171, %173 : vector<8x384xf32>
    %175 = arith.addf %155, %174 : vector<8x384xf32>
    %176 = vector.broadcast %163 : vector<1x384xf32> to vector<8x384xf32>
    %177 = arith.mulf %176, %169 : vector<8x384xf32>
    %178 = vector.broadcast %165 : vector<1x384xf32> to vector<8x384xf32>
    %179 = arith.mulf %178, %167 : vector<8x384xf32>
    %180 = arith.addf %177, %179 : vector<8x384xf32>
    %181 = arith.addf %161, %180 : vector<8x384xf32>
    %c0_100 = arith.constant 0 : index
    %c9 = arith.constant 9 : index
    %c0_101 = arith.constant 0 : index
    %182 = vector.load %arg2[%c0_100, %c9, %c0_101] : memref<1x32x384xf32, #tpu.memory_space<vmem>>, vector<1x1x384xf32>
    %183 = vector.shape_cast %182 : vector<1x1x384xf32> to vector<1x384xf32>
    %c0_102 = arith.constant 0 : index
    %c9_103 = arith.constant 9 : index
    %c0_104 = arith.constant 0 : index
    %184 = vector.load %arg3[%c0_102, %c9_103, %c0_104] : memref<1x32x384xf32, #tpu.memory_space<vmem>>, vector<1x1x384xf32>
    %185 = vector.shape_cast %184 : vector<1x1x384xf32> to vector<1x384xf32>
    %c9_105 = arith.constant 9 : index
    %c0_106 = arith.constant 0 : index
    %c0_107 = arith.constant 0 : index
    %186 = vector.load %arg4[%c9_105, %c0_106, %c0_107] : memref<32x8x384xf32, #tpu.memory_space<vmem>>, vector<1x8x384xf32>
    %187 = vector.shape_cast %186 : vector<1x8x384xf32> to vector<8x384xf32>
    %c9_108 = arith.constant 9 : index
    %c0_109 = arith.constant 0 : index
    %c0_110 = arith.constant 0 : index
    %188 = vector.load %arg5[%c9_108, %c0_109, %c0_110] : memref<32x8x384xf32, #tpu.memory_space<vmem>>, vector<1x8x384xf32>
    %189 = vector.shape_cast %188 : vector<1x8x384xf32> to vector<8x384xf32>
    %190 = vector.broadcast %183 : vector<1x384xf32> to vector<8x384xf32>
    %191 = arith.mulf %190, %187 : vector<8x384xf32>
    %192 = vector.broadcast %185 : vector<1x384xf32> to vector<8x384xf32>
    %193 = arith.mulf %192, %189 : vector<8x384xf32>
    %194 = arith.subf %191, %193 : vector<8x384xf32>
    %195 = arith.addf %175, %194 : vector<8x384xf32>
    %196 = vector.broadcast %183 : vector<1x384xf32> to vector<8x384xf32>
    %197 = arith.mulf %196, %189 : vector<8x384xf32>
    %198 = vector.broadcast %185 : vector<1x384xf32> to vector<8x384xf32>
    %199 = arith.mulf %198, %187 : vector<8x384xf32>
    %200 = arith.addf %197, %199 : vector<8x384xf32>
    %201 = arith.addf %181, %200 : vector<8x384xf32>
    %c0_111 = arith.constant 0 : index
    %c10 = arith.constant 10 : index
    %c0_112 = arith.constant 0 : index
    %202 = vector.load %arg2[%c0_111, %c10, %c0_112] : memref<1x32x384xf32, #tpu.memory_space<vmem>>, vector<1x1x384xf32>
    %203 = vector.shape_cast %202 : vector<1x1x384xf32> to vector<1x384xf32>
    %c0_113 = arith.constant 0 : index
    %c10_114 = arith.constant 10 : index
    %c0_115 = arith.constant 0 : index
    %204 = vector.load %arg3[%c0_113, %c10_114, %c0_115] : memref<1x32x384xf32, #tpu.memory_space<vmem>>, vector<1x1x384xf32>
    %205 = vector.shape_cast %204 : vector<1x1x384xf32> to vector<1x384xf32>
    %c10_116 = arith.constant 10 : index
    %c0_117 = arith.constant 0 : index
    %c0_118 = arith.constant 0 : index
    %206 = vector.load %arg4[%c10_116, %c0_117, %c0_118] : memref<32x8x384xf32, #tpu.memory_space<vmem>>, vector<1x8x384xf32>
    %207 = vector.shape_cast %206 : vector<1x8x384xf32> to vector<8x384xf32>
    %c10_119 = arith.constant 10 : index
    %c0_120 = arith.constant 0 : index
    %c0_121 = arith.constant 0 : index
    %208 = vector.load %arg5[%c10_119, %c0_120, %c0_121] : memref<32x8x384xf32, #tpu.memory_space<vmem>>, vector<1x8x384xf32>
    %209 = vector.shape_cast %208 : vector<1x8x384xf32> to vector<8x384xf32>
    %210 = vector.broadcast %203 : vector<1x384xf32> to vector<8x384xf32>
    %211 = arith.mulf %210, %207 : vector<8x384xf32>
    %212 = vector.broadcast %205 : vector<1x384xf32> to vector<8x384xf32>
    %213 = arith.mulf %212, %209 : vector<8x384xf32>
    %214 = arith.subf %211, %213 : vector<8x384xf32>
    %215 = arith.addf %195, %214 : vector<8x384xf32>
    %216 = vector.broadcast %203 : vector<1x384xf32> to vector<8x384xf32>
    %217 = arith.mulf %216, %209 : vector<8x384xf32>
    %218 = vector.broadcast %205 : vector<1x384xf32> to vector<8x384xf32>
    %219 = arith.mulf %218, %207 : vector<8x384xf32>
    %220 = arith.addf %217, %219 : vector<8x384xf32>
    %221 = arith.addf %201, %220 : vector<8x384xf32>
    %c0_122 = arith.constant 0 : index
    %c11 = arith.constant 11 : index
    %c0_123 = arith.constant 0 : index
    %222 = vector.load %arg2[%c0_122, %c11, %c0_123] : memref<1x32x384xf32, #tpu.memory_space<vmem>>, vector<1x1x384xf32>
    %223 = vector.shape_cast %222 : vector<1x1x384xf32> to vector<1x384xf32>
    %c0_124 = arith.constant 0 : index
    %c11_125 = arith.constant 11 : index
    %c0_126 = arith.constant 0 : index
    %224 = vector.load %arg3[%c0_124, %c11_125, %c0_126] : memref<1x32x384xf32, #tpu.memory_space<vmem>>, vector<1x1x384xf32>
    %225 = vector.shape_cast %224 : vector<1x1x384xf32> to vector<1x384xf32>
    %c11_127 = arith.constant 11 : index
    %c0_128 = arith.constant 0 : index
    %c0_129 = arith.constant 0 : index
    %226 = vector.load %arg4[%c11_127, %c0_128, %c0_129] : memref<32x8x384xf32, #tpu.memory_space<vmem>>, vector<1x8x384xf32>
    %227 = vector.shape_cast %226 : vector<1x8x384xf32> to vector<8x384xf32>
    %c11_130 = arith.constant 11 : index
    %c0_131 = arith.constant 0 : index
    %c0_132 = arith.constant 0 : index
    %228 = vector.load %arg5[%c11_130, %c0_131, %c0_132] : memref<32x8x384xf32, #tpu.memory_space<vmem>>, vector<1x8x384xf32>
    %229 = vector.shape_cast %228 : vector<1x8x384xf32> to vector<8x384xf32>
    %230 = vector.broadcast %223 : vector<1x384xf32> to vector<8x384xf32>
    %231 = arith.mulf %230, %227 : vector<8x384xf32>
    %232 = vector.broadcast %225 : vector<1x384xf32> to vector<8x384xf32>
    %233 = arith.mulf %232, %229 : vector<8x384xf32>
    %234 = arith.subf %231, %233 : vector<8x384xf32>
    %235 = arith.addf %215, %234 : vector<8x384xf32>
    %236 = vector.broadcast %223 : vector<1x384xf32> to vector<8x384xf32>
    %237 = arith.mulf %236, %229 : vector<8x384xf32>
    %238 = vector.broadcast %225 : vector<1x384xf32> to vector<8x384xf32>
    %239 = arith.mulf %238, %227 : vector<8x384xf32>
    %240 = arith.addf %237, %239 : vector<8x384xf32>
    %241 = arith.addf %221, %240 : vector<8x384xf32>
    %c0_133 = arith.constant 0 : index
    %c12 = arith.constant 12 : index
    %c0_134 = arith.constant 0 : index
    %242 = vector.load %arg2[%c0_133, %c12, %c0_134] : memref<1x32x384xf32, #tpu.memory_space<vmem>>, vector<1x1x384xf32>
    %243 = vector.shape_cast %242 : vector<1x1x384xf32> to vector<1x384xf32>
    %c0_135 = arith.constant 0 : index
    %c12_136 = arith.constant 12 : index
    %c0_137 = arith.constant 0 : index
    %244 = vector.load %arg3[%c0_135, %c12_136, %c0_137] : memref<1x32x384xf32, #tpu.memory_space<vmem>>, vector<1x1x384xf32>
    %245 = vector.shape_cast %244 : vector<1x1x384xf32> to vector<1x384xf32>
    %c12_138 = arith.constant 12 : index
    %c0_139 = arith.constant 0 : index
    %c0_140 = arith.constant 0 : index
    %246 = vector.load %arg4[%c12_138, %c0_139, %c0_140] : memref<32x8x384xf32, #tpu.memory_space<vmem>>, vector<1x8x384xf32>
    %247 = vector.shape_cast %246 : vector<1x8x384xf32> to vector<8x384xf32>
    %c12_141 = arith.constant 12 : index
    %c0_142 = arith.constant 0 : index
    %c0_143 = arith.constant 0 : index
    %248 = vector.load %arg5[%c12_141, %c0_142, %c0_143] : memref<32x8x384xf32, #tpu.memory_space<vmem>>, vector<1x8x384xf32>
    %249 = vector.shape_cast %248 : vector<1x8x384xf32> to vector<8x384xf32>
    %250 = vector.broadcast %243 : vector<1x384xf32> to vector<8x384xf32>
    %251 = arith.mulf %250, %247 : vector<8x384xf32>
    %252 = vector.broadcast %245 : vector<1x384xf32> to vector<8x384xf32>
    %253 = arith.mulf %252, %249 : vector<8x384xf32>
    %254 = arith.subf %251, %253 : vector<8x384xf32>
    %255 = arith.addf %235, %254 : vector<8x384xf32>
    %256 = vector.broadcast %243 : vector<1x384xf32> to vector<8x384xf32>
    %257 = arith.mulf %256, %249 : vector<8x384xf32>
    %258 = vector.broadcast %245 : vector<1x384xf32> to vector<8x384xf32>
    %259 = arith.mulf %258, %247 : vector<8x384xf32>
    %260 = arith.addf %257, %259 : vector<8x384xf32>
    %261 = arith.addf %241, %260 : vector<8x384xf32>
    %c0_144 = arith.constant 0 : index
    %c13 = arith.constant 13 : index
    %c0_145 = arith.constant 0 : index
    %262 = vector.load %arg2[%c0_144, %c13, %c0_145] : memref<1x32x384xf32, #tpu.memory_space<vmem>>, vector<1x1x384xf32>
    %263 = vector.shape_cast %262 : vector<1x1x384xf32> to vector<1x384xf32>
    %c0_146 = arith.constant 0 : index
    %c13_147 = arith.constant 13 : index
    %c0_148 = arith.constant 0 : index
    %264 = vector.load %arg3[%c0_146, %c13_147, %c0_148] : memref<1x32x384xf32, #tpu.memory_space<vmem>>, vector<1x1x384xf32>
    %265 = vector.shape_cast %264 : vector<1x1x384xf32> to vector<1x384xf32>
    %c13_149 = arith.constant 13 : index
    %c0_150 = arith.constant 0 : index
    %c0_151 = arith.constant 0 : index
    %266 = vector.load %arg4[%c13_149, %c0_150, %c0_151] : memref<32x8x384xf32, #tpu.memory_space<vmem>>, vector<1x8x384xf32>
    %267 = vector.shape_cast %266 : vector<1x8x384xf32> to vector<8x384xf32>
    %c13_152 = arith.constant 13 : index
    %c0_153 = arith.constant 0 : index
    %c0_154 = arith.constant 0 : index
    %268 = vector.load %arg5[%c13_152, %c0_153, %c0_154] : memref<32x8x384xf32, #tpu.memory_space<vmem>>, vector<1x8x384xf32>
    %269 = vector.shape_cast %268 : vector<1x8x384xf32> to vector<8x384xf32>
    %270 = vector.broadcast %263 : vector<1x384xf32> to vector<8x384xf32>
    %271 = arith.mulf %270, %267 : vector<8x384xf32>
    %272 = vector.broadcast %265 : vector<1x384xf32> to vector<8x384xf32>
    %273 = arith.mulf %272, %269 : vector<8x384xf32>
    %274 = arith.subf %271, %273 : vector<8x384xf32>
    %275 = arith.addf %255, %274 : vector<8x384xf32>
    %276 = vector.broadcast %263 : vector<1x384xf32> to vector<8x384xf32>
    %277 = arith.mulf %276, %269 : vector<8x384xf32>
    %278 = vector.broadcast %265 : vector<1x384xf32> to vector<8x384xf32>
    %279 = arith.mulf %278, %267 : vector<8x384xf32>
    %280 = arith.addf %277, %279 : vector<8x384xf32>
    %281 = arith.addf %261, %280 : vector<8x384xf32>
    %c0_155 = arith.constant 0 : index
    %c14 = arith.constant 14 : index
    %c0_156 = arith.constant 0 : index
    %282 = vector.load %arg2[%c0_155, %c14, %c0_156] : memref<1x32x384xf32, #tpu.memory_space<vmem>>, vector<1x1x384xf32>
    %283 = vector.shape_cast %282 : vector<1x1x384xf32> to vector<1x384xf32>
    %c0_157 = arith.constant 0 : index
    %c14_158 = arith.constant 14 : index
    %c0_159 = arith.constant 0 : index
    %284 = vector.load %arg3[%c0_157, %c14_158, %c0_159] : memref<1x32x384xf32, #tpu.memory_space<vmem>>, vector<1x1x384xf32>
    %285 = vector.shape_cast %284 : vector<1x1x384xf32> to vector<1x384xf32>
    %c14_160 = arith.constant 14 : index
    %c0_161 = arith.constant 0 : index
    %c0_162 = arith.constant 0 : index
    %286 = vector.load %arg4[%c14_160, %c0_161, %c0_162] : memref<32x8x384xf32, #tpu.memory_space<vmem>>, vector<1x8x384xf32>
    %287 = vector.shape_cast %286 : vector<1x8x384xf32> to vector<8x384xf32>
    %c14_163 = arith.constant 14 : index
    %c0_164 = arith.constant 0 : index
    %c0_165 = arith.constant 0 : index
    %288 = vector.load %arg5[%c14_163, %c0_164, %c0_165] : memref<32x8x384xf32, #tpu.memory_space<vmem>>, vector<1x8x384xf32>
    %289 = vector.shape_cast %288 : vector<1x8x384xf32> to vector<8x384xf32>
    %290 = vector.broadcast %283 : vector<1x384xf32> to vector<8x384xf32>
    %291 = arith.mulf %290, %287 : vector<8x384xf32>
    %292 = vector.broadcast %285 : vector<1x384xf32> to vector<8x384xf32>
    %293 = arith.mulf %292, %289 : vector<8x384xf32>
    %294 = arith.subf %291, %293 : vector<8x384xf32>
    %295 = arith.addf %275, %294 : vector<8x384xf32>
    %296 = vector.broadcast %283 : vector<1x384xf32> to vector<8x384xf32>
    %297 = arith.mulf %296, %289 : vector<8x384xf32>
    %298 = vector.broadcast %285 : vector<1x384xf32> to vector<8x384xf32>
    %299 = arith.mulf %298, %287 : vector<8x384xf32>
    %300 = arith.addf %297, %299 : vector<8x384xf32>
    %301 = arith.addf %281, %300 : vector<8x384xf32>
    %c0_166 = arith.constant 0 : index
    %c15 = arith.constant 15 : index
    %c0_167 = arith.constant 0 : index
    %302 = vector.load %arg2[%c0_166, %c15, %c0_167] : memref<1x32x384xf32, #tpu.memory_space<vmem>>, vector<1x1x384xf32>
    %303 = vector.shape_cast %302 : vector<1x1x384xf32> to vector<1x384xf32>
    %c0_168 = arith.constant 0 : index
    %c15_169 = arith.constant 15 : index
    %c0_170 = arith.constant 0 : index
    %304 = vector.load %arg3[%c0_168, %c15_169, %c0_170] : memref<1x32x384xf32, #tpu.memory_space<vmem>>, vector<1x1x384xf32>
    %305 = vector.shape_cast %304 : vector<1x1x384xf32> to vector<1x384xf32>
    %c15_171 = arith.constant 15 : index
    %c0_172 = arith.constant 0 : index
    %c0_173 = arith.constant 0 : index
    %306 = vector.load %arg4[%c15_171, %c0_172, %c0_173] : memref<32x8x384xf32, #tpu.memory_space<vmem>>, vector<1x8x384xf32>
    %307 = vector.shape_cast %306 : vector<1x8x384xf32> to vector<8x384xf32>
    %c15_174 = arith.constant 15 : index
    %c0_175 = arith.constant 0 : index
    %c0_176 = arith.constant 0 : index
    %308 = vector.load %arg5[%c15_174, %c0_175, %c0_176] : memref<32x8x384xf32, #tpu.memory_space<vmem>>, vector<1x8x384xf32>
    %309 = vector.shape_cast %308 : vector<1x8x384xf32> to vector<8x384xf32>
    %310 = vector.broadcast %303 : vector<1x384xf32> to vector<8x384xf32>
    %311 = arith.mulf %310, %307 : vector<8x384xf32>
    %312 = vector.broadcast %305 : vector<1x384xf32> to vector<8x384xf32>
    %313 = arith.mulf %312, %309 : vector<8x384xf32>
    %314 = arith.subf %311, %313 : vector<8x384xf32>
    %315 = arith.addf %295, %314 : vector<8x384xf32>
    %316 = vector.broadcast %303 : vector<1x384xf32> to vector<8x384xf32>
    %317 = arith.mulf %316, %309 : vector<8x384xf32>
    %318 = vector.broadcast %305 : vector<1x384xf32> to vector<8x384xf32>
    %319 = arith.mulf %318, %307 : vector<8x384xf32>
    %320 = arith.addf %317, %319 : vector<8x384xf32>
    %321 = arith.addf %301, %320 : vector<8x384xf32>
    %c0_177 = arith.constant 0 : index
    %c16 = arith.constant 16 : index
    %c0_178 = arith.constant 0 : index
    %322 = vector.load %arg2[%c0_177, %c16, %c0_178] : memref<1x32x384xf32, #tpu.memory_space<vmem>>, vector<1x1x384xf32>
    %323 = vector.shape_cast %322 : vector<1x1x384xf32> to vector<1x384xf32>
    %c0_179 = arith.constant 0 : index
    %c16_180 = arith.constant 16 : index
    %c0_181 = arith.constant 0 : index
    %324 = vector.load %arg3[%c0_179, %c16_180, %c0_181] : memref<1x32x384xf32, #tpu.memory_space<vmem>>, vector<1x1x384xf32>
    %325 = vector.shape_cast %324 : vector<1x1x384xf32> to vector<1x384xf32>
    %c16_182 = arith.constant 16 : index
    %c0_183 = arith.constant 0 : index
    %c0_184 = arith.constant 0 : index
    %326 = vector.load %arg4[%c16_182, %c0_183, %c0_184] : memref<32x8x384xf32, #tpu.memory_space<vmem>>, vector<1x8x384xf32>
    %327 = vector.shape_cast %326 : vector<1x8x384xf32> to vector<8x384xf32>
    %c16_185 = arith.constant 16 : index
    %c0_186 = arith.constant 0 : index
    %c0_187 = arith.constant 0 : index
    %328 = vector.load %arg5[%c16_185, %c0_186, %c0_187] : memref<32x8x384xf32, #tpu.memory_space<vmem>>, vector<1x8x384xf32>
    %329 = vector.shape_cast %328 : vector<1x8x384xf32> to vector<8x384xf32>
    %330 = vector.broadcast %323 : vector<1x384xf32> to vector<8x384xf32>
    %331 = arith.mulf %330, %327 : vector<8x384xf32>
    %332 = vector.broadcast %325 : vector<1x384xf32> to vector<8x384xf32>
    %333 = arith.mulf %332, %329 : vector<8x384xf32>
    %334 = arith.subf %331, %333 : vector<8x384xf32>
    %335 = arith.addf %315, %334 : vector<8x384xf32>
    %336 = vector.broadcast %323 : vector<1x384xf32> to vector<8x384xf32>
    %337 = arith.mulf %336, %329 : vector<8x384xf32>
    %338 = vector.broadcast %325 : vector<1x384xf32> to vector<8x384xf32>
    %339 = arith.mulf %338, %327 : vector<8x384xf32>
    %340 = arith.addf %337, %339 : vector<8x384xf32>
    %341 = arith.addf %321, %340 : vector<8x384xf32>
    %c0_188 = arith.constant 0 : index
    %c17 = arith.constant 17 : index
    %c0_189 = arith.constant 0 : index
    %342 = vector.load %arg2[%c0_188, %c17, %c0_189] : memref<1x32x384xf32, #tpu.memory_space<vmem>>, vector<1x1x384xf32>
    %343 = vector.shape_cast %342 : vector<1x1x384xf32> to vector<1x384xf32>
    %c0_190 = arith.constant 0 : index
    %c17_191 = arith.constant 17 : index
    %c0_192 = arith.constant 0 : index
    %344 = vector.load %arg3[%c0_190, %c17_191, %c0_192] : memref<1x32x384xf32, #tpu.memory_space<vmem>>, vector<1x1x384xf32>
    %345 = vector.shape_cast %344 : vector<1x1x384xf32> to vector<1x384xf32>
    %c17_193 = arith.constant 17 : index
    %c0_194 = arith.constant 0 : index
    %c0_195 = arith.constant 0 : index
    %346 = vector.load %arg4[%c17_193, %c0_194, %c0_195] : memref<32x8x384xf32, #tpu.memory_space<vmem>>, vector<1x8x384xf32>
    %347 = vector.shape_cast %346 : vector<1x8x384xf32> to vector<8x384xf32>
    %c17_196 = arith.constant 17 : index
    %c0_197 = arith.constant 0 : index
    %c0_198 = arith.constant 0 : index
    %348 = vector.load %arg5[%c17_196, %c0_197, %c0_198] : memref<32x8x384xf32, #tpu.memory_space<vmem>>, vector<1x8x384xf32>
    %349 = vector.shape_cast %348 : vector<1x8x384xf32> to vector<8x384xf32>
    %350 = vector.broadcast %343 : vector<1x384xf32> to vector<8x384xf32>
    %351 = arith.mulf %350, %347 : vector<8x384xf32>
    %352 = vector.broadcast %345 : vector<1x384xf32> to vector<8x384xf32>
    %353 = arith.mulf %352, %349 : vector<8x384xf32>
    %354 = arith.subf %351, %353 : vector<8x384xf32>
    %355 = arith.addf %335, %354 : vector<8x384xf32>
    %356 = vector.broadcast %343 : vector<1x384xf32> to vector<8x384xf32>
    %357 = arith.mulf %356, %349 : vector<8x384xf32>
    %358 = vector.broadcast %345 : vector<1x384xf32> to vector<8x384xf32>
    %359 = arith.mulf %358, %347 : vector<8x384xf32>
    %360 = arith.addf %357, %359 : vector<8x384xf32>
    %361 = arith.addf %341, %360 : vector<8x384xf32>
    %c0_199 = arith.constant 0 : index
    %c18 = arith.constant 18 : index
    %c0_200 = arith.constant 0 : index
    %362 = vector.load %arg2[%c0_199, %c18, %c0_200] : memref<1x32x384xf32, #tpu.memory_space<vmem>>, vector<1x1x384xf32>
    %363 = vector.shape_cast %362 : vector<1x1x384xf32> to vector<1x384xf32>
    %c0_201 = arith.constant 0 : index
    %c18_202 = arith.constant 18 : index
    %c0_203 = arith.constant 0 : index
    %364 = vector.load %arg3[%c0_201, %c18_202, %c0_203] : memref<1x32x384xf32, #tpu.memory_space<vmem>>, vector<1x1x384xf32>
    %365 = vector.shape_cast %364 : vector<1x1x384xf32> to vector<1x384xf32>
    %c18_204 = arith.constant 18 : index
    %c0_205 = arith.constant 0 : index
    %c0_206 = arith.constant 0 : index
    %366 = vector.load %arg4[%c18_204, %c0_205, %c0_206] : memref<32x8x384xf32, #tpu.memory_space<vmem>>, vector<1x8x384xf32>
    %367 = vector.shape_cast %366 : vector<1x8x384xf32> to vector<8x384xf32>
    %c18_207 = arith.constant 18 : index
    %c0_208 = arith.constant 0 : index
    %c0_209 = arith.constant 0 : index
    %368 = vector.load %arg5[%c18_207, %c0_208, %c0_209] : memref<32x8x384xf32, #tpu.memory_space<vmem>>, vector<1x8x384xf32>
    %369 = vector.shape_cast %368 : vector<1x8x384xf32> to vector<8x384xf32>
    %370 = vector.broadcast %363 : vector<1x384xf32> to vector<8x384xf32>
    %371 = arith.mulf %370, %367 : vector<8x384xf32>
    %372 = vector.broadcast %365 : vector<1x384xf32> to vector<8x384xf32>
    %373 = arith.mulf %372, %369 : vector<8x384xf32>
    %374 = arith.subf %371, %373 : vector<8x384xf32>
    %375 = arith.addf %355, %374 : vector<8x384xf32>
    %376 = vector.broadcast %363 : vector<1x384xf32> to vector<8x384xf32>
    %377 = arith.mulf %376, %369 : vector<8x384xf32>
    %378 = vector.broadcast %365 : vector<1x384xf32> to vector<8x384xf32>
    %379 = arith.mulf %378, %367 : vector<8x384xf32>
    %380 = arith.addf %377, %379 : vector<8x384xf32>
    %381 = arith.addf %361, %380 : vector<8x384xf32>
    %c0_210 = arith.constant 0 : index
    %c19 = arith.constant 19 : index
    %c0_211 = arith.constant 0 : index
    %382 = vector.load %arg2[%c0_210, %c19, %c0_211] : memref<1x32x384xf32, #tpu.memory_space<vmem>>, vector<1x1x384xf32>
    %383 = vector.shape_cast %382 : vector<1x1x384xf32> to vector<1x384xf32>
    %c0_212 = arith.constant 0 : index
    %c19_213 = arith.constant 19 : index
    %c0_214 = arith.constant 0 : index
    %384 = vector.load %arg3[%c0_212, %c19_213, %c0_214] : memref<1x32x384xf32, #tpu.memory_space<vmem>>, vector<1x1x384xf32>
    %385 = vector.shape_cast %384 : vector<1x1x384xf32> to vector<1x384xf32>
    %c19_215 = arith.constant 19 : index
    %c0_216 = arith.constant 0 : index
    %c0_217 = arith.constant 0 : index
    %386 = vector.load %arg4[%c19_215, %c0_216, %c0_217] : memref<32x8x384xf32, #tpu.memory_space<vmem>>, vector<1x8x384xf32>
    %387 = vector.shape_cast %386 : vector<1x8x384xf32> to vector<8x384xf32>
    %c19_218 = arith.constant 19 : index
    %c0_219 = arith.constant 0 : index
    %c0_220 = arith.constant 0 : index
    %388 = vector.load %arg5[%c19_218, %c0_219, %c0_220] : memref<32x8x384xf32, #tpu.memory_space<vmem>>, vector<1x8x384xf32>
    %389 = vector.shape_cast %388 : vector<1x8x384xf32> to vector<8x384xf32>
    %390 = vector.broadcast %383 : vector<1x384xf32> to vector<8x384xf32>
    %391 = arith.mulf %390, %387 : vector<8x384xf32>
    %392 = vector.broadcast %385 : vector<1x384xf32> to vector<8x384xf32>
    %393 = arith.mulf %392, %389 : vector<8x384xf32>
    %394 = arith.subf %391, %393 : vector<8x384xf32>
    %395 = arith.addf %375, %394 : vector<8x384xf32>
    %396 = vector.broadcast %383 : vector<1x384xf32> to vector<8x384xf32>
    %397 = arith.mulf %396, %389 : vector<8x384xf32>
    %398 = vector.broadcast %385 : vector<1x384xf32> to vector<8x384xf32>
    %399 = arith.mulf %398, %387 : vector<8x384xf32>
    %400 = arith.addf %397, %399 : vector<8x384xf32>
    %401 = arith.addf %381, %400 : vector<8x384xf32>
    %c0_221 = arith.constant 0 : index
    %c20 = arith.constant 20 : index
    %c0_222 = arith.constant 0 : index
    %402 = vector.load %arg2[%c0_221, %c20, %c0_222] : memref<1x32x384xf32, #tpu.memory_space<vmem>>, vector<1x1x384xf32>
    %403 = vector.shape_cast %402 : vector<1x1x384xf32> to vector<1x384xf32>
    %c0_223 = arith.constant 0 : index
    %c20_224 = arith.constant 20 : index
    %c0_225 = arith.constant 0 : index
    %404 = vector.load %arg3[%c0_223, %c20_224, %c0_225] : memref<1x32x384xf32, #tpu.memory_space<vmem>>, vector<1x1x384xf32>
    %405 = vector.shape_cast %404 : vector<1x1x384xf32> to vector<1x384xf32>
    %c20_226 = arith.constant 20 : index
    %c0_227 = arith.constant 0 : index
    %c0_228 = arith.constant 0 : index
    %406 = vector.load %arg4[%c20_226, %c0_227, %c0_228] : memref<32x8x384xf32, #tpu.memory_space<vmem>>, vector<1x8x384xf32>
    %407 = vector.shape_cast %406 : vector<1x8x384xf32> to vector<8x384xf32>
    %c20_229 = arith.constant 20 : index
    %c0_230 = arith.constant 0 : index
    %c0_231 = arith.constant 0 : index
    %408 = vector.load %arg5[%c20_229, %c0_230, %c0_231] : memref<32x8x384xf32, #tpu.memory_space<vmem>>, vector<1x8x384xf32>
    %409 = vector.shape_cast %408 : vector<1x8x384xf32> to vector<8x384xf32>
    %410 = vector.broadcast %403 : vector<1x384xf32> to vector<8x384xf32>
    %411 = arith.mulf %410, %407 : vector<8x384xf32>
    %412 = vector.broadcast %405 : vector<1x384xf32> to vector<8x384xf32>
    %413 = arith.mulf %412, %409 : vector<8x384xf32>
    %414 = arith.subf %411, %413 : vector<8x384xf32>
    %415 = arith.addf %395, %414 : vector<8x384xf32>
    %416 = vector.broadcast %403 : vector<1x384xf32> to vector<8x384xf32>
    %417 = arith.mulf %416, %409 : vector<8x384xf32>
    %418 = vector.broadcast %405 : vector<1x384xf32> to vector<8x384xf32>
    %419 = arith.mulf %418, %407 : vector<8x384xf32>
    %420 = arith.addf %417, %419 : vector<8x384xf32>
    %421 = arith.addf %401, %420 : vector<8x384xf32>
    %c0_232 = arith.constant 0 : index
    %c21 = arith.constant 21 : index
    %c0_233 = arith.constant 0 : index
    %422 = vector.load %arg2[%c0_232, %c21, %c0_233] : memref<1x32x384xf32, #tpu.memory_space<vmem>>, vector<1x1x384xf32>
    %423 = vector.shape_cast %422 : vector<1x1x384xf32> to vector<1x384xf32>
    %c0_234 = arith.constant 0 : index
    %c21_235 = arith.constant 21 : index
    %c0_236 = arith.constant 0 : index
    %424 = vector.load %arg3[%c0_234, %c21_235, %c0_236] : memref<1x32x384xf32, #tpu.memory_space<vmem>>, vector<1x1x384xf32>
    %425 = vector.shape_cast %424 : vector<1x1x384xf32> to vector<1x384xf32>
    %c21_237 = arith.constant 21 : index
    %c0_238 = arith.constant 0 : index
    %c0_239 = arith.constant 0 : index
    %426 = vector.load %arg4[%c21_237, %c0_238, %c0_239] : memref<32x8x384xf32, #tpu.memory_space<vmem>>, vector<1x8x384xf32>
    %427 = vector.shape_cast %426 : vector<1x8x384xf32> to vector<8x384xf32>
    %c21_240 = arith.constant 21 : index
    %c0_241 = arith.constant 0 : index
    %c0_242 = arith.constant 0 : index
    %428 = vector.load %arg5[%c21_240, %c0_241, %c0_242] : memref<32x8x384xf32, #tpu.memory_space<vmem>>, vector<1x8x384xf32>
    %429 = vector.shape_cast %428 : vector<1x8x384xf32> to vector<8x384xf32>
    %430 = vector.broadcast %423 : vector<1x384xf32> to vector<8x384xf32>
    %431 = arith.mulf %430, %427 : vector<8x384xf32>
    %432 = vector.broadcast %425 : vector<1x384xf32> to vector<8x384xf32>
    %433 = arith.mulf %432, %429 : vector<8x384xf32>
    %434 = arith.subf %431, %433 : vector<8x384xf32>
    %435 = arith.addf %415, %434 : vector<8x384xf32>
    %436 = vector.broadcast %423 : vector<1x384xf32> to vector<8x384xf32>
    %437 = arith.mulf %436, %429 : vector<8x384xf32>
    %438 = vector.broadcast %425 : vector<1x384xf32> to vector<8x384xf32>
    %439 = arith.mulf %438, %427 : vector<8x384xf32>
    %440 = arith.addf %437, %439 : vector<8x384xf32>
    %441 = arith.addf %421, %440 : vector<8x384xf32>
    %c0_243 = arith.constant 0 : index
    %c22 = arith.constant 22 : index
    %c0_244 = arith.constant 0 : index
    %442 = vector.load %arg2[%c0_243, %c22, %c0_244] : memref<1x32x384xf32, #tpu.memory_space<vmem>>, vector<1x1x384xf32>
    %443 = vector.shape_cast %442 : vector<1x1x384xf32> to vector<1x384xf32>
    %c0_245 = arith.constant 0 : index
    %c22_246 = arith.constant 22 : index
    %c0_247 = arith.constant 0 : index
    %444 = vector.load %arg3[%c0_245, %c22_246, %c0_247] : memref<1x32x384xf32, #tpu.memory_space<vmem>>, vector<1x1x384xf32>
    %445 = vector.shape_cast %444 : vector<1x1x384xf32> to vector<1x384xf32>
    %c22_248 = arith.constant 22 : index
    %c0_249 = arith.constant 0 : index
    %c0_250 = arith.constant 0 : index
    %446 = vector.load %arg4[%c22_248, %c0_249, %c0_250] : memref<32x8x384xf32, #tpu.memory_space<vmem>>, vector<1x8x384xf32>
    %447 = vector.shape_cast %446 : vector<1x8x384xf32> to vector<8x384xf32>
    %c22_251 = arith.constant 22 : index
    %c0_252 = arith.constant 0 : index
    %c0_253 = arith.constant 0 : index
    %448 = vector.load %arg5[%c22_251, %c0_252, %c0_253] : memref<32x8x384xf32, #tpu.memory_space<vmem>>, vector<1x8x384xf32>
    %449 = vector.shape_cast %448 : vector<1x8x384xf32> to vector<8x384xf32>
    %450 = vector.broadcast %443 : vector<1x384xf32> to vector<8x384xf32>
    %451 = arith.mulf %450, %447 : vector<8x384xf32>
    %452 = vector.broadcast %445 : vector<1x384xf32> to vector<8x384xf32>
    %453 = arith.mulf %452, %449 : vector<8x384xf32>
    %454 = arith.subf %451, %453 : vector<8x384xf32>
    %455 = arith.addf %435, %454 : vector<8x384xf32>
    %456 = vector.broadcast %443 : vector<1x384xf32> to vector<8x384xf32>
    %457 = arith.mulf %456, %449 : vector<8x384xf32>
    %458 = vector.broadcast %445 : vector<1x384xf32> to vector<8x384xf32>
    %459 = arith.mulf %458, %447 : vector<8x384xf32>
    %460 = arith.addf %457, %459 : vector<8x384xf32>
    %461 = arith.addf %441, %460 : vector<8x384xf32>
    %c0_254 = arith.constant 0 : index
    %c23 = arith.constant 23 : index
    %c0_255 = arith.constant 0 : index
    %462 = vector.load %arg2[%c0_254, %c23, %c0_255] : memref<1x32x384xf32, #tpu.memory_space<vmem>>, vector<1x1x384xf32>
    %463 = vector.shape_cast %462 : vector<1x1x384xf32> to vector<1x384xf32>
    %c0_256 = arith.constant 0 : index
    %c23_257 = arith.constant 23 : index
    %c0_258 = arith.constant 0 : index
    %464 = vector.load %arg3[%c0_256, %c23_257, %c0_258] : memref<1x32x384xf32, #tpu.memory_space<vmem>>, vector<1x1x384xf32>
    %465 = vector.shape_cast %464 : vector<1x1x384xf32> to vector<1x384xf32>
    %c23_259 = arith.constant 23 : index
    %c0_260 = arith.constant 0 : index
    %c0_261 = arith.constant 0 : index
    %466 = vector.load %arg4[%c23_259, %c0_260, %c0_261] : memref<32x8x384xf32, #tpu.memory_space<vmem>>, vector<1x8x384xf32>
    %467 = vector.shape_cast %466 : vector<1x8x384xf32> to vector<8x384xf32>
    %c23_262 = arith.constant 23 : index
    %c0_263 = arith.constant 0 : index
    %c0_264 = arith.constant 0 : index
    %468 = vector.load %arg5[%c23_262, %c0_263, %c0_264] : memref<32x8x384xf32, #tpu.memory_space<vmem>>, vector<1x8x384xf32>
    %469 = vector.shape_cast %468 : vector<1x8x384xf32> to vector<8x384xf32>
    %470 = vector.broadcast %463 : vector<1x384xf32> to vector<8x384xf32>
    %471 = arith.mulf %470, %467 : vector<8x384xf32>
    %472 = vector.broadcast %465 : vector<1x384xf32> to vector<8x384xf32>
    %473 = arith.mulf %472, %469 : vector<8x384xf32>
    %474 = arith.subf %471, %473 : vector<8x384xf32>
    %475 = arith.addf %455, %474 : vector<8x384xf32>
    %476 = vector.broadcast %463 : vector<1x384xf32> to vector<8x384xf32>
    %477 = arith.mulf %476, %469 : vector<8x384xf32>
    %478 = vector.broadcast %465 : vector<1x384xf32> to vector<8x384xf32>
    %479 = arith.mulf %478, %467 : vector<8x384xf32>
    %480 = arith.addf %477, %479 : vector<8x384xf32>
    %481 = arith.addf %461, %480 : vector<8x384xf32>
    %c0_265 = arith.constant 0 : index
    %c24 = arith.constant 24 : index
    %c0_266 = arith.constant 0 : index
    %482 = vector.load %arg2[%c0_265, %c24, %c0_266] : memref<1x32x384xf32, #tpu.memory_space<vmem>>, vector<1x1x384xf32>
    %483 = vector.shape_cast %482 : vector<1x1x384xf32> to vector<1x384xf32>
    %c0_267 = arith.constant 0 : index
    %c24_268 = arith.constant 24 : index
    %c0_269 = arith.constant 0 : index
    %484 = vector.load %arg3[%c0_267, %c24_268, %c0_269] : memref<1x32x384xf32, #tpu.memory_space<vmem>>, vector<1x1x384xf32>
    %485 = vector.shape_cast %484 : vector<1x1x384xf32> to vector<1x384xf32>
    %c24_270 = arith.constant 24 : index
    %c0_271 = arith.constant 0 : index
    %c0_272 = arith.constant 0 : index
    %486 = vector.load %arg4[%c24_270, %c0_271, %c0_272] : memref<32x8x384xf32, #tpu.memory_space<vmem>>, vector<1x8x384xf32>
    %487 = vector.shape_cast %486 : vector<1x8x384xf32> to vector<8x384xf32>
    %c24_273 = arith.constant 24 : index
    %c0_274 = arith.constant 0 : index
    %c0_275 = arith.constant 0 : index
    %488 = vector.load %arg5[%c24_273, %c0_274, %c0_275] : memref<32x8x384xf32, #tpu.memory_space<vmem>>, vector<1x8x384xf32>
    %489 = vector.shape_cast %488 : vector<1x8x384xf32> to vector<8x384xf32>
    %490 = vector.broadcast %483 : vector<1x384xf32> to vector<8x384xf32>
    %491 = arith.mulf %490, %487 : vector<8x384xf32>
    %492 = vector.broadcast %485 : vector<1x384xf32> to vector<8x384xf32>
    %493 = arith.mulf %492, %489 : vector<8x384xf32>
    %494 = arith.subf %491, %493 : vector<8x384xf32>
    %495 = arith.addf %475, %494 : vector<8x384xf32>
    %496 = vector.broadcast %483 : vector<1x384xf32> to vector<8x384xf32>
    %497 = arith.mulf %496, %489 : vector<8x384xf32>
    %498 = vector.broadcast %485 : vector<1x384xf32> to vector<8x384xf32>
    %499 = arith.mulf %498, %487 : vector<8x384xf32>
    %500 = arith.addf %497, %499 : vector<8x384xf32>
    %501 = arith.addf %481, %500 : vector<8x384xf32>
    %c0_276 = arith.constant 0 : index
    %c25 = arith.constant 25 : index
    %c0_277 = arith.constant 0 : index
    %502 = vector.load %arg2[%c0_276, %c25, %c0_277] : memref<1x32x384xf32, #tpu.memory_space<vmem>>, vector<1x1x384xf32>
    %503 = vector.shape_cast %502 : vector<1x1x384xf32> to vector<1x384xf32>
    %c0_278 = arith.constant 0 : index
    %c25_279 = arith.constant 25 : index
    %c0_280 = arith.constant 0 : index
    %504 = vector.load %arg3[%c0_278, %c25_279, %c0_280] : memref<1x32x384xf32, #tpu.memory_space<vmem>>, vector<1x1x384xf32>
    %505 = vector.shape_cast %504 : vector<1x1x384xf32> to vector<1x384xf32>
    %c25_281 = arith.constant 25 : index
    %c0_282 = arith.constant 0 : index
    %c0_283 = arith.constant 0 : index
    %506 = vector.load %arg4[%c25_281, %c0_282, %c0_283] : memref<32x8x384xf32, #tpu.memory_space<vmem>>, vector<1x8x384xf32>
    %507 = vector.shape_cast %506 : vector<1x8x384xf32> to vector<8x384xf32>
    %c25_284 = arith.constant 25 : index
    %c0_285 = arith.constant 0 : index
    %c0_286 = arith.constant 0 : index
    %508 = vector.load %arg5[%c25_284, %c0_285, %c0_286] : memref<32x8x384xf32, #tpu.memory_space<vmem>>, vector<1x8x384xf32>
    %509 = vector.shape_cast %508 : vector<1x8x384xf32> to vector<8x384xf32>
    %510 = vector.broadcast %503 : vector<1x384xf32> to vector<8x384xf32>
    %511 = arith.mulf %510, %507 : vector<8x384xf32>
    %512 = vector.broadcast %505 : vector<1x384xf32> to vector<8x384xf32>
    %513 = arith.mulf %512, %509 : vector<8x384xf32>
    %514 = arith.subf %511, %513 : vector<8x384xf32>
    %515 = arith.addf %495, %514 : vector<8x384xf32>
    %516 = vector.broadcast %503 : vector<1x384xf32> to vector<8x384xf32>
    %517 = arith.mulf %516, %509 : vector<8x384xf32>
    %518 = vector.broadcast %505 : vector<1x384xf32> to vector<8x384xf32>
    %519 = arith.mulf %518, %507 : vector<8x384xf32>
    %520 = arith.addf %517, %519 : vector<8x384xf32>
    %521 = arith.addf %501, %520 : vector<8x384xf32>
    %c0_287 = arith.constant 0 : index
    %c26 = arith.constant 26 : index
    %c0_288 = arith.constant 0 : index
    %522 = vector.load %arg2[%c0_287, %c26, %c0_288] : memref<1x32x384xf32, #tpu.memory_space<vmem>>, vector<1x1x384xf32>
    %523 = vector.shape_cast %522 : vector<1x1x384xf32> to vector<1x384xf32>
    %c0_289 = arith.constant 0 : index
    %c26_290 = arith.constant 26 : index
    %c0_291 = arith.constant 0 : index
    %524 = vector.load %arg3[%c0_289, %c26_290, %c0_291] : memref<1x32x384xf32, #tpu.memory_space<vmem>>, vector<1x1x384xf32>
    %525 = vector.shape_cast %524 : vector<1x1x384xf32> to vector<1x384xf32>
    %c26_292 = arith.constant 26 : index
    %c0_293 = arith.constant 0 : index
    %c0_294 = arith.constant 0 : index
    %526 = vector.load %arg4[%c26_292, %c0_293, %c0_294] : memref<32x8x384xf32, #tpu.memory_space<vmem>>, vector<1x8x384xf32>
    %527 = vector.shape_cast %526 : vector<1x8x384xf32> to vector<8x384xf32>
    %c26_295 = arith.constant 26 : index
    %c0_296 = arith.constant 0 : index
    %c0_297 = arith.constant 0 : index
    %528 = vector.load %arg5[%c26_295, %c0_296, %c0_297] : memref<32x8x384xf32, #tpu.memory_space<vmem>>, vector<1x8x384xf32>
    %529 = vector.shape_cast %528 : vector<1x8x384xf32> to vector<8x384xf32>
    %530 = vector.broadcast %523 : vector<1x384xf32> to vector<8x384xf32>
    %531 = arith.mulf %530, %527 : vector<8x384xf32>
    %532 = vector.broadcast %525 : vector<1x384xf32> to vector<8x384xf32>
    %533 = arith.mulf %532, %529 : vector<8x384xf32>
    %534 = arith.subf %531, %533 : vector<8x384xf32>
    %535 = arith.addf %515, %534 : vector<8x384xf32>
    %536 = vector.broadcast %523 : vector<1x384xf32> to vector<8x384xf32>
    %537 = arith.mulf %536, %529 : vector<8x384xf32>
    %538 = vector.broadcast %525 : vector<1x384xf32> to vector<8x384xf32>
    %539 = arith.mulf %538, %527 : vector<8x384xf32>
    %540 = arith.addf %537, %539 : vector<8x384xf32>
    %541 = arith.addf %521, %540 : vector<8x384xf32>
    %c0_298 = arith.constant 0 : index
    %c27 = arith.constant 27 : index
    %c0_299 = arith.constant 0 : index
    %542 = vector.load %arg2[%c0_298, %c27, %c0_299] : memref<1x32x384xf32, #tpu.memory_space<vmem>>, vector<1x1x384xf32>
    %543 = vector.shape_cast %542 : vector<1x1x384xf32> to vector<1x384xf32>
    %c0_300 = arith.constant 0 : index
    %c27_301 = arith.constant 27 : index
    %c0_302 = arith.constant 0 : index
    %544 = vector.load %arg3[%c0_300, %c27_301, %c0_302] : memref<1x32x384xf32, #tpu.memory_space<vmem>>, vector<1x1x384xf32>
    %545 = vector.shape_cast %544 : vector<1x1x384xf32> to vector<1x384xf32>
    %c27_303 = arith.constant 27 : index
    %c0_304 = arith.constant 0 : index
    %c0_305 = arith.constant 0 : index
    %546 = vector.load %arg4[%c27_303, %c0_304, %c0_305] : memref<32x8x384xf32, #tpu.memory_space<vmem>>, vector<1x8x384xf32>
    %547 = vector.shape_cast %546 : vector<1x8x384xf32> to vector<8x384xf32>
    %c27_306 = arith.constant 27 : index
    %c0_307 = arith.constant 0 : index
    %c0_308 = arith.constant 0 : index
    %548 = vector.load %arg5[%c27_306, %c0_307, %c0_308] : memref<32x8x384xf32, #tpu.memory_space<vmem>>, vector<1x8x384xf32>
    %549 = vector.shape_cast %548 : vector<1x8x384xf32> to vector<8x384xf32>
    %550 = vector.broadcast %543 : vector<1x384xf32> to vector<8x384xf32>
    %551 = arith.mulf %550, %547 : vector<8x384xf32>
    %552 = vector.broadcast %545 : vector<1x384xf32> to vector<8x384xf32>
    %553 = arith.mulf %552, %549 : vector<8x384xf32>
    %554 = arith.subf %551, %553 : vector<8x384xf32>
    %555 = arith.addf %535, %554 : vector<8x384xf32>
    %556 = vector.broadcast %543 : vector<1x384xf32> to vector<8x384xf32>
    %557 = arith.mulf %556, %549 : vector<8x384xf32>
    %558 = vector.broadcast %545 : vector<1x384xf32> to vector<8x384xf32>
    %559 = arith.mulf %558, %547 : vector<8x384xf32>
    %560 = arith.addf %557, %559 : vector<8x384xf32>
    %561 = arith.addf %541, %560 : vector<8x384xf32>
    %c0_309 = arith.constant 0 : index
    %c28 = arith.constant 28 : index
    %c0_310 = arith.constant 0 : index
    %562 = vector.load %arg2[%c0_309, %c28, %c0_310] : memref<1x32x384xf32, #tpu.memory_space<vmem>>, vector<1x1x384xf32>
    %563 = vector.shape_cast %562 : vector<1x1x384xf32> to vector<1x384xf32>
    %c0_311 = arith.constant 0 : index
    %c28_312 = arith.constant 28 : index
    %c0_313 = arith.constant 0 : index
    %564 = vector.load %arg3[%c0_311, %c28_312, %c0_313] : memref<1x32x384xf32, #tpu.memory_space<vmem>>, vector<1x1x384xf32>
    %565 = vector.shape_cast %564 : vector<1x1x384xf32> to vector<1x384xf32>
    %c28_314 = arith.constant 28 : index
    %c0_315 = arith.constant 0 : index
    %c0_316 = arith.constant 0 : index
    %566 = vector.load %arg4[%c28_314, %c0_315, %c0_316] : memref<32x8x384xf32, #tpu.memory_space<vmem>>, vector<1x8x384xf32>
    %567 = vector.shape_cast %566 : vector<1x8x384xf32> to vector<8x384xf32>
    %c28_317 = arith.constant 28 : index
    %c0_318 = arith.constant 0 : index
    %c0_319 = arith.constant 0 : index
    %568 = vector.load %arg5[%c28_317, %c0_318, %c0_319] : memref<32x8x384xf32, #tpu.memory_space<vmem>>, vector<1x8x384xf32>
    %569 = vector.shape_cast %568 : vector<1x8x384xf32> to vector<8x384xf32>
    %570 = vector.broadcast %563 : vector<1x384xf32> to vector<8x384xf32>
    %571 = arith.mulf %570, %567 : vector<8x384xf32>
    %572 = vector.broadcast %565 : vector<1x384xf32> to vector<8x384xf32>
    %573 = arith.mulf %572, %569 : vector<8x384xf32>
    %574 = arith.subf %571, %573 : vector<8x384xf32>
    %575 = arith.addf %555, %574 : vector<8x384xf32>
    %576 = vector.broadcast %563 : vector<1x384xf32> to vector<8x384xf32>
    %577 = arith.mulf %576, %569 : vector<8x384xf32>
    %578 = vector.broadcast %565 : vector<1x384xf32> to vector<8x384xf32>
    %579 = arith.mulf %578, %567 : vector<8x384xf32>
    %580 = arith.addf %577, %579 : vector<8x384xf32>
    %581 = arith.addf %561, %580 : vector<8x384xf32>
    %c0_320 = arith.constant 0 : index
    %c29 = arith.constant 29 : index
    %c0_321 = arith.constant 0 : index
    %582 = vector.load %arg2[%c0_320, %c29, %c0_321] : memref<1x32x384xf32, #tpu.memory_space<vmem>>, vector<1x1x384xf32>
    %583 = vector.shape_cast %582 : vector<1x1x384xf32> to vector<1x384xf32>
    %c0_322 = arith.constant 0 : index
    %c29_323 = arith.constant 29 : index
    %c0_324 = arith.constant 0 : index
    %584 = vector.load %arg3[%c0_322, %c29_323, %c0_324] : memref<1x32x384xf32, #tpu.memory_space<vmem>>, vector<1x1x384xf32>
    %585 = vector.shape_cast %584 : vector<1x1x384xf32> to vector<1x384xf32>
    %c29_325 = arith.constant 29 : index
    %c0_326 = arith.constant 0 : index
    %c0_327 = arith.constant 0 : index
    %586 = vector.load %arg4[%c29_325, %c0_326, %c0_327] : memref<32x8x384xf32, #tpu.memory_space<vmem>>, vector<1x8x384xf32>
    %587 = vector.shape_cast %586 : vector<1x8x384xf32> to vector<8x384xf32>
    %c29_328 = arith.constant 29 : index
    %c0_329 = arith.constant 0 : index
    %c0_330 = arith.constant 0 : index
    %588 = vector.load %arg5[%c29_328, %c0_329, %c0_330] : memref<32x8x384xf32, #tpu.memory_space<vmem>>, vector<1x8x384xf32>
    %589 = vector.shape_cast %588 : vector<1x8x384xf32> to vector<8x384xf32>
    %590 = vector.broadcast %583 : vector<1x384xf32> to vector<8x384xf32>
    %591 = arith.mulf %590, %587 : vector<8x384xf32>
    %592 = vector.broadcast %585 : vector<1x384xf32> to vector<8x384xf32>
    %593 = arith.mulf %592, %589 : vector<8x384xf32>
    %594 = arith.subf %591, %593 : vector<8x384xf32>
    %595 = arith.addf %575, %594 : vector<8x384xf32>
    %596 = vector.broadcast %583 : vector<1x384xf32> to vector<8x384xf32>
    %597 = arith.mulf %596, %589 : vector<8x384xf32>
    %598 = vector.broadcast %585 : vector<1x384xf32> to vector<8x384xf32>
    %599 = arith.mulf %598, %587 : vector<8x384xf32>
    %600 = arith.addf %597, %599 : vector<8x384xf32>
    %601 = arith.addf %581, %600 : vector<8x384xf32>
    %c0_331 = arith.constant 0 : index
    %c30 = arith.constant 30 : index
    %c0_332 = arith.constant 0 : index
    %602 = vector.load %arg2[%c0_331, %c30, %c0_332] : memref<1x32x384xf32, #tpu.memory_space<vmem>>, vector<1x1x384xf32>
    %603 = vector.shape_cast %602 : vector<1x1x384xf32> to vector<1x384xf32>
    %c0_333 = arith.constant 0 : index
    %c30_334 = arith.constant 30 : index
    %c0_335 = arith.constant 0 : index
    %604 = vector.load %arg3[%c0_333, %c30_334, %c0_335] : memref<1x32x384xf32, #tpu.memory_space<vmem>>, vector<1x1x384xf32>
    %605 = vector.shape_cast %604 : vector<1x1x384xf32> to vector<1x384xf32>
    %c30_336 = arith.constant 30 : index
    %c0_337 = arith.constant 0 : index
    %c0_338 = arith.constant 0 : index
    %606 = vector.load %arg4[%c30_336, %c0_337, %c0_338] : memref<32x8x384xf32, #tpu.memory_space<vmem>>, vector<1x8x384xf32>
    %607 = vector.shape_cast %606 : vector<1x8x384xf32> to vector<8x384xf32>
    %c30_339 = arith.constant 30 : index
    %c0_340 = arith.constant 0 : index
    %c0_341 = arith.constant 0 : index
    %608 = vector.load %arg5[%c30_339, %c0_340, %c0_341] : memref<32x8x384xf32, #tpu.memory_space<vmem>>, vector<1x8x384xf32>
    %609 = vector.shape_cast %608 : vector<1x8x384xf32> to vector<8x384xf32>
    %610 = vector.broadcast %603 : vector<1x384xf32> to vector<8x384xf32>
    %611 = arith.mulf %610, %607 : vector<8x384xf32>
    %612 = vector.broadcast %605 : vector<1x384xf32> to vector<8x384xf32>
    %613 = arith.mulf %612, %609 : vector<8x384xf32>
    %614 = arith.subf %611, %613 : vector<8x384xf32>
    %615 = arith.addf %595, %614 : vector<8x384xf32>
    %616 = vector.broadcast %603 : vector<1x384xf32> to vector<8x384xf32>
    %617 = arith.mulf %616, %609 : vector<8x384xf32>
    %618 = vector.broadcast %605 : vector<1x384xf32> to vector<8x384xf32>
    %619 = arith.mulf %618, %607 : vector<8x384xf32>
    %620 = arith.addf %617, %619 : vector<8x384xf32>
    %621 = arith.addf %601, %620 : vector<8x384xf32>
    %c0_342 = arith.constant 0 : index
    %c31 = arith.constant 31 : index
    %c0_343 = arith.constant 0 : index
    %622 = vector.load %arg2[%c0_342, %c31, %c0_343] : memref<1x32x384xf32, #tpu.memory_space<vmem>>, vector<1x1x384xf32>
    %623 = vector.shape_cast %622 : vector<1x1x384xf32> to vector<1x384xf32>
    %c0_344 = arith.constant 0 : index
    %c31_345 = arith.constant 31 : index
    %c0_346 = arith.constant 0 : index
    %624 = vector.load %arg3[%c0_344, %c31_345, %c0_346] : memref<1x32x384xf32, #tpu.memory_space<vmem>>, vector<1x1x384xf32>
    %625 = vector.shape_cast %624 : vector<1x1x384xf32> to vector<1x384xf32>
    %c31_347 = arith.constant 31 : index
    %c0_348 = arith.constant 0 : index
    %c0_349 = arith.constant 0 : index
    %626 = vector.load %arg4[%c31_347, %c0_348, %c0_349] : memref<32x8x384xf32, #tpu.memory_space<vmem>>, vector<1x8x384xf32>
    %627 = vector.shape_cast %626 : vector<1x8x384xf32> to vector<8x384xf32>
    %c31_350 = arith.constant 31 : index
    %c0_351 = arith.constant 0 : index
    %c0_352 = arith.constant 0 : index
    %628 = vector.load %arg5[%c31_350, %c0_351, %c0_352] : memref<32x8x384xf32, #tpu.memory_space<vmem>>, vector<1x8x384xf32>
    %629 = vector.shape_cast %628 : vector<1x8x384xf32> to vector<8x384xf32>
    %630 = vector.broadcast %623 : vector<1x384xf32> to vector<8x384xf32>
    %631 = arith.mulf %630, %627 : vector<8x384xf32>
    %632 = vector.broadcast %625 : vector<1x384xf32> to vector<8x384xf32>
    %633 = arith.mulf %632, %629 : vector<8x384xf32>
    %634 = arith.subf %631, %633 : vector<8x384xf32>
    %635 = arith.addf %615, %634 : vector<8x384xf32>
    %636 = vector.broadcast %623 : vector<1x384xf32> to vector<8x384xf32>
    %637 = arith.mulf %636, %629 : vector<8x384xf32>
    %638 = vector.broadcast %625 : vector<1x384xf32> to vector<8x384xf32>
    %639 = arith.mulf %638, %627 : vector<8x384xf32>
    %640 = arith.addf %637, %639 : vector<8x384xf32>
    %641 = arith.addf %621, %640 : vector<8x384xf32>
    %c0_353 = arith.constant 0 : index
    %c0_354 = arith.constant 0 : index
    %c0_355 = arith.constant 0 : index
    %642 = vector.load %arg6[%c0_353, %c0_354, %c0_355] : memref<1x8x384xf32, #tpu.memory_space<vmem>>, vector<1x8x384xf32>
    %643 = vector.shape_cast %642 : vector<1x8x384xf32> to vector<8x384xf32>
    %644 = vector.shape_cast %635 : vector<8x384xf32> to vector<1x8x384xf32>
    tpu.vector_store %arg6[%c0_353, %c0_354, %c0_355], %644 {strides = array<i32>} : memref<1x8x384xf32, #tpu.memory_space<vmem>>, vector<1x8x384xf32>,
    %c0_356 = arith.constant 0 : index
    %c0_357 = arith.constant 0 : index
    %c0_358 = arith.constant 0 : index
    %645 = vector.load %arg7[%c0_356, %c0_357, %c0_358] : memref<1x8x384xf32, #tpu.memory_space<vmem>>, vector<1x8x384xf32>
    %646 = vector.shape_cast %645 : vector<1x8x384xf32> to vector<8x384xf32>
    %647 = vector.shape_cast %641 : vector<8x384xf32> to vector<1x8x384xf32>
    tpu.vector_store %arg7[%c0_356, %c0_357, %c0_358], %647 {strides = array<i32>} : memref<1x8x384xf32, #tpu.memory_space<vmem>>, vector<1x8x384xf32>,
    return
  }
  func.func @transform_0(%arg0: i32, %arg1: i32) -> (i32, i32, i32) {
    %c0_i32 = arith.constant 0 : i32
    %c0_i32_0 = arith.constant 0 : i32
    %c0_i32_1 = arith.constant 0 : i32
    return %arg1, %c0_i32, %c0_i32_0 : i32, i32, i32
  }
  func.func @transform_1(%arg0: i32, %arg1: i32) -> (i32, i32, i32) {
    %c0_i32 = arith.constant 0 : i32
    %c0_i32_0 = arith.constant 0 : i32
    %c0_i32_1 = arith.constant 0 : i32
    return %arg1, %c0_i32, %c0_i32_0 : i32, i32, i32
  }
  func.func @transform_2(%arg0: i32, %arg1: i32) -> (i32, i32, i32) {
    %c0_i32 = arith.constant 0 : i32
    %c0_i32_0 = arith.constant 0 : i32
    %c0_i32_1 = arith.constant 0 : i32
    return %c0_i32, %arg0, %c0_i32_0 : i32, i32, i32
  }
  func.func @transform_3(%arg0: i32, %arg1: i32) -> (i32, i32, i32) {
    %c0_i32 = arith.constant 0 : i32
    %c0_i32_0 = arith.constant 0 : i32
    %c0_i32_1 = arith.constant 0 : i32
    return %c0_i32, %arg0, %c0_i32_0 : i32, i32, i32
  }
  func.func @transform_4(%arg0: i32, %arg1: i32) -> (i32, i32, i32) {
    %c0_i32 = arith.constant 0 : i32
    %c0_i32_0 = arith.constant 0 : i32
    return %arg1, %arg0, %c0_i32 : i32, i32, i32
  }
  func.func @transform_5(%arg0: i32, %arg1: i32) -> (i32, i32, i32) {
    %c0_i32 = arith.constant 0 : i32
    %c0_i32_0 = arith.constant 0 : i32
    return %arg1, %arg0, %c0_i32 : i32, i32, i32
  }
}

module attributes {stable_mosaic.version = 11 : i64} {
  func.func @_pw_res_gelu_kernel(%arg0: i32, %arg1: memref<64x128xf32, #tpu.memory_space<vmem>>, %arg2: memref<128x128xf32, #tpu.memory_space<vmem>>, %arg3: memref<1x128xf32, #tpu.memory_space<vmem>>, %arg4: memref<64x128xf32, #tpu.memory_space<vmem>>, %arg5: memref<64x128xf32, #tpu.memory_space<vmem>>) attributes {dimension_semantics = [#tpu.dimension_semantics<parallel>], iteration_bounds = array<i64: 8>, scalar_prefetch = 0 : i64, scratch_operands = 0 : i64, tpu.core_type = #tpu.core_type<tc>, window_params = [{transform_indices = @transform_0, window_bounds = array<i64: 64, 128>}, {pipeline_mode = #tpu.pipeline_mode<synchronous>, transform_indices = @transform_1, window_bounds = array<i64: 128, 128>}, {pipeline_mode = #tpu.pipeline_mode<synchronous>, transform_indices = @transform_2, window_bounds = array<i64: 1, 128>}, {transform_indices = @transform_3, window_bounds = array<i64: 64, 128>}, {transform_indices = @transform_4, window_bounds = array<i64: 64, 128>}]} {
    %c0 = arith.constant 0 : index
    %c0_0 = arith.constant 0 : index
    %0 = vector.load %arg1[%c0, %c0_0] : memref<64x128xf32, #tpu.memory_space<vmem>>, vector<64x128xf32>
    %c0_1 = arith.constant 0 : index
    %c0_2 = arith.constant 0 : index
    %1 = vector.load %arg2[%c0_1, %c0_2] : memref<128x128xf32, #tpu.memory_space<vmem>>, vector<128x128xf32>
    %cst = arith.constant dense<0.000000e+00> : vector<64x128xf32>
    %2 = tpu.matmul %0, %1, %cst {dimension_numbers = #tpu.dot_dimension_numbers<[1], [0], [0], [1], [0, 0, 1, 1], [], []>} : vector<64x128xf32>, vector<128x128xf32>, vector<64x128xf32> -> vector<64x128xf32>
    %c0_3 = arith.constant 0 : index
    %c0_4 = arith.constant 0 : index
    %3 = vector.load %arg3[%c0_3, %c0_4] : memref<1x128xf32, #tpu.memory_space<vmem>>, vector<1x128xf32>
    %4 = vector.broadcast %3 : vector<1x128xf32> to vector<64x128xf32>
    %5 = arith.addf %2, %4 : vector<64x128xf32>
    %c0_5 = arith.constant 0 : index
    %c0_6 = arith.constant 0 : index
    %6 = vector.load %arg4[%c0_5, %c0_6] : memref<64x128xf32, #tpu.memory_space<vmem>>, vector<64x128xf32>
    %7 = arith.addf %5, %6 : vector<64x128xf32>
    %cst_7 = arith.constant 5.000000e-01 : f32
    %8 = vector.broadcast %cst_7 : f32 to vector<64x128xf32>
    %9 = arith.mulf %8, %7 : vector<64x128xf32>
    %cst_8 = arith.constant 0.707106769 : f32
    %10 = vector.broadcast %cst_8 : f32 to vector<64x128xf32>
    %11 = arith.mulf %7, %10 : vector<64x128xf32>
    %12 = math.absf %11 : vector<64x128xf32>
    %cst_9 = arith.constant 0.327591091 : f32
    %13 = vector.broadcast %cst_9 : f32 to vector<64x128xf32>
    %14 = arith.mulf %13, %12 : vector<64x128xf32>
    %cst_10 = arith.constant 1.000000e+00 : f32
    %15 = vector.broadcast %cst_10 : f32 to vector<64x128xf32>
    %16 = arith.addf %15, %14 : vector<64x128xf32>
    %cst_11 = arith.constant 1.000000e+00 : f32
    %17 = vector.broadcast %cst_11 : f32 to vector<64x128xf32>
    %18 = arith.divf %17, %16 : vector<64x128xf32>
    %cst_12 = arith.constant 1.06140542 : f32
    %19 = vector.broadcast %cst_12 : f32 to vector<64x128xf32>
    %20 = arith.mulf %18, %19 : vector<64x128xf32>
    %cst_13 = arith.constant -1.45315206 : f32
    %21 = vector.broadcast %cst_13 : f32 to vector<64x128xf32>
    %22 = arith.addf %21, %20 : vector<64x128xf32>
    %23 = arith.mulf %18, %22 : vector<64x128xf32>
    %cst_14 = arith.constant 1.42141378 : f32
    %24 = vector.broadcast %cst_14 : f32 to vector<64x128xf32>
    %25 = arith.addf %24, %23 : vector<64x128xf32>
    %26 = arith.mulf %18, %25 : vector<64x128xf32>
    %cst_15 = arith.constant -0.284496725 : f32
    %27 = vector.broadcast %cst_15 : f32 to vector<64x128xf32>
    %28 = arith.addf %27, %26 : vector<64x128xf32>
    %29 = arith.mulf %18, %28 : vector<64x128xf32>
    %cst_16 = arith.constant 0.254829586 : f32
    %30 = vector.broadcast %cst_16 : f32 to vector<64x128xf32>
    %31 = arith.addf %30, %29 : vector<64x128xf32>
    %32 = arith.mulf %18, %31 : vector<64x128xf32>
    %cst_17 = arith.constant 0.000000e+00 : f32
    %33 = vector.broadcast %cst_17 : f32 to vector<64x128xf32>
    %34 = arith.subf %33, %12 : vector<64x128xf32>
    %35 = arith.mulf %34, %12 : vector<64x128xf32>
    %36 = math.exp %35 : vector<64x128xf32>
    %37 = arith.mulf %32, %36 : vector<64x128xf32>
    %cst_18 = arith.constant 1.000000e+00 : f32
    %38 = vector.broadcast %cst_18 : f32 to vector<64x128xf32>
    %39 = arith.subf %38, %37 : vector<64x128xf32>
    %cst_19 = arith.constant 0.000000e+00 : f32
    %40 = vector.broadcast %cst_19 : f32 to vector<64x128xf32>
    %41 = arith.cmpf olt, %11, %40 : vector<64x128xf32>
    %cst_20 = arith.constant 0.000000e+00 : f32
    %42 = vector.broadcast %cst_20 : f32 to vector<64x128xf32>
    %43 = arith.subf %42, %39 : vector<64x128xf32>
    %44 = arith.select %41, %43, %39 : vector<64x128xi1>, vector<64x128xf32>
    %cst_21 = arith.constant 1.000000e+00 : f32
    %45 = vector.broadcast %cst_21 : f32 to vector<64x128xf32>
    %46 = arith.addf %45, %44 : vector<64x128xf32>
    %47 = arith.mulf %9, %46 : vector<64x128xf32>
    %c0_22 = arith.constant 0 : index
    %c0_23 = arith.constant 0 : index
    %48 = vector.load %arg5[%c0_22, %c0_23] : memref<64x128xf32, #tpu.memory_space<vmem>>, vector<64x128xf32>
    tpu.vector_store %arg5[%c0_22, %c0_23], %47 {strides = array<i32>} : memref<64x128xf32, #tpu.memory_space<vmem>>, vector<64x128xf32>,
    return
  }
  func.func @transform_0(%arg0: i32) -> (i32, i32) {
    %c0_i32 = arith.constant 0 : i32
    %c0_i32_0 = arith.constant 0 : i32
    return %arg0, %c0_i32 : i32, i32
  }
  func.func @transform_1(%arg0: i32) -> (i32, i32) {
    %c0_i32 = arith.constant 0 : i32
    %c0_i32_0 = arith.constant 0 : i32
    %c0_i32_1 = arith.constant 0 : i32
    return %c0_i32, %c0_i32_0 : i32, i32
  }
  func.func @transform_2(%arg0: i32) -> (i32, i32) {
    %c0_i32 = arith.constant 0 : i32
    %c0_i32_0 = arith.constant 0 : i32
    %c0_i32_1 = arith.constant 0 : i32
    return %c0_i32, %c0_i32_0 : i32, i32
  }
  func.func @transform_3(%arg0: i32) -> (i32, i32) {
    %c0_i32 = arith.constant 0 : i32
    %c0_i32_0 = arith.constant 0 : i32
    return %arg0, %c0_i32 : i32, i32
  }
  func.func @transform_4(%arg0: i32) -> (i32, i32) {
    %c0_i32 = arith.constant 0 : i32
    %c0_i32_0 = arith.constant 0 : i32
    return %arg0, %c0_i32 : i32, i32
  }
}

module attributes {stable_mosaic.version = 11 : i64} {
  func.func @_pw_res_kernel(%arg0: i32, %arg1: memref<64x128xf32, #tpu.memory_space<vmem>>, %arg2: memref<128x128xf32, #tpu.memory_space<vmem>>, %arg3: memref<1x128xf32, #tpu.memory_space<vmem>>, %arg4: memref<64x128xf32, #tpu.memory_space<vmem>>, %arg5: memref<64x128xf32, #tpu.memory_space<vmem>>) attributes {dimension_semantics = [#tpu.dimension_semantics<parallel>], iteration_bounds = array<i64: 8>, scalar_prefetch = 0 : i64, scratch_operands = 0 : i64, tpu.core_type = #tpu.core_type<tc>, window_params = [{transform_indices = @transform_0, window_bounds = array<i64: 64, 128>}, {pipeline_mode = #tpu.pipeline_mode<synchronous>, transform_indices = @transform_1, window_bounds = array<i64: 128, 128>}, {pipeline_mode = #tpu.pipeline_mode<synchronous>, transform_indices = @transform_2, window_bounds = array<i64: 1, 128>}, {transform_indices = @transform_3, window_bounds = array<i64: 64, 128>}, {transform_indices = @transform_4, window_bounds = array<i64: 64, 128>}]} {
    %c0 = arith.constant 0 : index
    %c0_0 = arith.constant 0 : index
    %0 = vector.load %arg1[%c0, %c0_0] : memref<64x128xf32, #tpu.memory_space<vmem>>, vector<64x128xf32>
    %c0_1 = arith.constant 0 : index
    %c0_2 = arith.constant 0 : index
    %1 = vector.load %arg2[%c0_1, %c0_2] : memref<128x128xf32, #tpu.memory_space<vmem>>, vector<128x128xf32>
    %cst = arith.constant dense<0.000000e+00> : vector<64x128xf32>
    %2 = tpu.matmul %0, %1, %cst {dimension_numbers = #tpu.dot_dimension_numbers<[1], [0], [0], [1], [0, 0, 1, 1], [], []>} : vector<64x128xf32>, vector<128x128xf32>, vector<64x128xf32> -> vector<64x128xf32>
    %c0_3 = arith.constant 0 : index
    %c0_4 = arith.constant 0 : index
    %3 = vector.load %arg3[%c0_3, %c0_4] : memref<1x128xf32, #tpu.memory_space<vmem>>, vector<1x128xf32>
    %4 = vector.broadcast %3 : vector<1x128xf32> to vector<64x128xf32>
    %5 = arith.addf %2, %4 : vector<64x128xf32>
    %c0_5 = arith.constant 0 : index
    %c0_6 = arith.constant 0 : index
    %6 = vector.load %arg4[%c0_5, %c0_6] : memref<64x128xf32, #tpu.memory_space<vmem>>, vector<64x128xf32>
    %7 = arith.addf %5, %6 : vector<64x128xf32>
    %c0_7 = arith.constant 0 : index
    %c0_8 = arith.constant 0 : index
    %8 = vector.load %arg5[%c0_7, %c0_8] : memref<64x128xf32, #tpu.memory_space<vmem>>, vector<64x128xf32>
    tpu.vector_store %arg5[%c0_7, %c0_8], %7 {strides = array<i32>} : memref<64x128xf32, #tpu.memory_space<vmem>>, vector<64x128xf32>,
    return
  }
  func.func @transform_0(%arg0: i32) -> (i32, i32) {
    %c0_i32 = arith.constant 0 : i32
    %c0_i32_0 = arith.constant 0 : i32
    return %arg0, %c0_i32 : i32, i32
  }
  func.func @transform_1(%arg0: i32) -> (i32, i32) {
    %c0_i32 = arith.constant 0 : i32
    %c0_i32_0 = arith.constant 0 : i32
    %c0_i32_1 = arith.constant 0 : i32
    return %c0_i32, %c0_i32_0 : i32, i32
  }
  func.func @transform_2(%arg0: i32) -> (i32, i32) {
    %c0_i32 = arith.constant 0 : i32
    %c0_i32_0 = arith.constant 0 : i32
    %c0_i32_1 = arith.constant 0 : i32
    return %c0_i32, %c0_i32_0 : i32, i32
  }
  func.func @transform_3(%arg0: i32) -> (i32, i32) {
    %c0_i32 = arith.constant 0 : i32
    %c0_i32_0 = arith.constant 0 : i32
    return %arg0, %c0_i32 : i32, i32
  }
  func.func @transform_4(%arg0: i32) -> (i32, i32) {
    %c0_i32 = arith.constant 0 : i32
    %c0_i32_0 = arith.constant 0 : i32
    return %arg0, %c0_i32 : i32, i32
  }
}

module attributes {stable_mosaic.version = 11 : i64} {
  func.func @_mlp_head_kernel(%arg0: i32, %arg1: memref<8x1024xf32, #tpu.memory_space<vmem>>, %arg2: memref<256x512xf32, #tpu.memory_space<vmem>>, %arg3: memref<1x512xf32, #tpu.memory_space<vmem>>, %arg4: memref<512x32xf32, #tpu.memory_space<vmem>>, %arg5: memref<1x32xf32, #tpu.memory_space<vmem>>, %arg6: memref<8x128xf32, #tpu.memory_space<vmem>>) attributes {dimension_semantics = [#tpu.dimension_semantics<parallel>], iteration_bounds = array<i64: 8>, scalar_prefetch = 0 : i64, scratch_operands = 0 : i64, tpu.core_type = #tpu.core_type<tc>, window_params = [{transform_indices = @transform_0, window_bounds = array<i64: 8, 1024>}, {pipeline_mode = #tpu.pipeline_mode<synchronous>, transform_indices = @transform_1, window_bounds = array<i64: 256, 512>}, {pipeline_mode = #tpu.pipeline_mode<synchronous>, transform_indices = @transform_2, window_bounds = array<i64: 1, 512>}, {pipeline_mode = #tpu.pipeline_mode<synchronous>, transform_indices = @transform_3, window_bounds = array<i64: 512, 32>}, {pipeline_mode = #tpu.pipeline_mode<synchronous>, transform_indices = @transform_4, window_bounds = array<i64: 1, 32>}, {transform_indices = @transform_5, window_bounds = array<i64: 8, 128>}]} {
    %c0 = arith.constant 0 : index
    %c0_0 = arith.constant 0 : index
    %0 = vector.load %arg1[%c0, %c0_0] : memref<8x1024xf32, #tpu.memory_space<vmem>>, vector<8x256xf32>
    %c0_1 = arith.constant 0 : index
    %c0_2 = arith.constant 0 : index
    %1 = vector.load %arg2[%c0_1, %c0_2] : memref<256x512xf32, #tpu.memory_space<vmem>>, vector<256x512xf32>
    %cst = arith.constant dense<0.000000e+00> : vector<8x512xf32>
    %2 = tpu.matmul %0, %1, %cst {dimension_numbers = #tpu.dot_dimension_numbers<[1], [0], [0], [1], [0, 0, 1, 1], [], []>} : vector<8x256xf32>, vector<256x512xf32>, vector<8x512xf32> -> vector<8x512xf32>
    %c0_3 = arith.constant 0 : index
    %c0_4 = arith.constant 0 : index
    %3 = vector.load %arg3[%c0_3, %c0_4] : memref<1x512xf32, #tpu.memory_space<vmem>>, vector<1x512xf32>
    %4 = vector.broadcast %3 : vector<1x512xf32> to vector<8x512xf32>
    %5 = arith.addf %2, %4 : vector<8x512xf32>
    %cst_5 = arith.constant 5.000000e-01 : f32
    %6 = vector.broadcast %cst_5 : f32 to vector<8x512xf32>
    %7 = arith.mulf %6, %5 : vector<8x512xf32>
    %cst_6 = arith.constant 0.707106769 : f32
    %8 = vector.broadcast %cst_6 : f32 to vector<8x512xf32>
    %9 = arith.mulf %5, %8 : vector<8x512xf32>
    %10 = math.absf %9 : vector<8x512xf32>
    %cst_7 = arith.constant 0.327591091 : f32
    %11 = vector.broadcast %cst_7 : f32 to vector<8x512xf32>
    %12 = arith.mulf %11, %10 : vector<8x512xf32>
    %cst_8 = arith.constant 1.000000e+00 : f32
    %13 = vector.broadcast %cst_8 : f32 to vector<8x512xf32>
    %14 = arith.addf %13, %12 : vector<8x512xf32>
    %cst_9 = arith.constant 1.000000e+00 : f32
    %15 = vector.broadcast %cst_9 : f32 to vector<8x512xf32>
    %16 = arith.divf %15, %14 : vector<8x512xf32>
    %cst_10 = arith.constant 1.06140542 : f32
    %17 = vector.broadcast %cst_10 : f32 to vector<8x512xf32>
    %18 = arith.mulf %16, %17 : vector<8x512xf32>
    %cst_11 = arith.constant -1.45315206 : f32
    %19 = vector.broadcast %cst_11 : f32 to vector<8x512xf32>
    %20 = arith.addf %19, %18 : vector<8x512xf32>
    %21 = arith.mulf %16, %20 : vector<8x512xf32>
    %cst_12 = arith.constant 1.42141378 : f32
    %22 = vector.broadcast %cst_12 : f32 to vector<8x512xf32>
    %23 = arith.addf %22, %21 : vector<8x512xf32>
    %24 = arith.mulf %16, %23 : vector<8x512xf32>
    %cst_13 = arith.constant -0.284496725 : f32
    %25 = vector.broadcast %cst_13 : f32 to vector<8x512xf32>
    %26 = arith.addf %25, %24 : vector<8x512xf32>
    %27 = arith.mulf %16, %26 : vector<8x512xf32>
    %cst_14 = arith.constant 0.254829586 : f32
    %28 = vector.broadcast %cst_14 : f32 to vector<8x512xf32>
    %29 = arith.addf %28, %27 : vector<8x512xf32>
    %30 = arith.mulf %16, %29 : vector<8x512xf32>
    %cst_15 = arith.constant 0.000000e+00 : f32
    %31 = vector.broadcast %cst_15 : f32 to vector<8x512xf32>
    %32 = arith.subf %31, %10 : vector<8x512xf32>
    %33 = arith.mulf %32, %10 : vector<8x512xf32>
    %34 = math.exp %33 : vector<8x512xf32>
    %35 = arith.mulf %30, %34 : vector<8x512xf32>
    %cst_16 = arith.constant 1.000000e+00 : f32
    %36 = vector.broadcast %cst_16 : f32 to vector<8x512xf32>
    %37 = arith.subf %36, %35 : vector<8x512xf32>
    %cst_17 = arith.constant 0.000000e+00 : f32
    %38 = vector.broadcast %cst_17 : f32 to vector<8x512xf32>
    %39 = arith.cmpf olt, %9, %38 : vector<8x512xf32>
    %cst_18 = arith.constant 0.000000e+00 : f32
    %40 = vector.broadcast %cst_18 : f32 to vector<8x512xf32>
    %41 = arith.subf %40, %37 : vector<8x512xf32>
    %42 = arith.select %39, %41, %37 : vector<8x512xi1>, vector<8x512xf32>
    %cst_19 = arith.constant 1.000000e+00 : f32
    %43 = vector.broadcast %cst_19 : f32 to vector<8x512xf32>
    %44 = arith.addf %43, %42 : vector<8x512xf32>
    %45 = arith.mulf %7, %44 : vector<8x512xf32>
    %c0_20 = arith.constant 0 : index
    %c0_21 = arith.constant 0 : index
    %46 = vector.load %arg4[%c0_20, %c0_21] : memref<512x32xf32, #tpu.memory_space<vmem>>, vector<512x32xf32>
    %cst_22 = arith.constant dense<0.000000e+00> : vector<8x32xf32>
    %47 = tpu.matmul %45, %46, %cst_22 {dimension_numbers = #tpu.dot_dimension_numbers<[1], [0], [0], [1], [0, 0, 1, 1], [], []>} : vector<8x512xf32>, vector<512x32xf32>, vector<8x32xf32> -> vector<8x32xf32>
    %c0_23 = arith.constant 0 : index
    %c0_24 = arith.constant 0 : index
    %48 = vector.load %arg5[%c0_23, %c0_24] : memref<1x32xf32, #tpu.memory_space<vmem>>, vector<1x32xf32>
    %49 = vector.broadcast %48 : vector<1x32xf32> to vector<8x32xf32>
    %50 = arith.addf %47, %49 : vector<8x32xf32>
    %c0_25 = arith.constant 0 : index
    %c256 = arith.constant 256 : index
    %51 = vector.load %arg1[%c0_25, %c256] : memref<8x1024xf32, #tpu.memory_space<vmem>>, vector<8x256xf32>
    %c0_26 = arith.constant 0 : index
    %c0_27 = arith.constant 0 : index
    %52 = vector.load %arg2[%c0_26, %c0_27] : memref<256x512xf32, #tpu.memory_space<vmem>>, vector<256x512xf32>
    %cst_28 = arith.constant dense<0.000000e+00> : vector<8x512xf32>
    %53 = tpu.matmul %51, %52, %cst_28 {dimension_numbers = #tpu.dot_dimension_numbers<[1], [0], [0], [1], [0, 0, 1, 1], [], []>} : vector<8x256xf32>, vector<256x512xf32>, vector<8x512xf32> -> vector<8x512xf32>
    %c0_29 = arith.constant 0 : index
    %c0_30 = arith.constant 0 : index
    %54 = vector.load %arg3[%c0_29, %c0_30] : memref<1x512xf32, #tpu.memory_space<vmem>>, vector<1x512xf32>
    %55 = vector.broadcast %54 : vector<1x512xf32> to vector<8x512xf32>
    %56 = arith.addf %53, %55 : vector<8x512xf32>
    %cst_31 = arith.constant 5.000000e-01 : f32
    %57 = vector.broadcast %cst_31 : f32 to vector<8x512xf32>
    %58 = arith.mulf %57, %56 : vector<8x512xf32>
    %cst_32 = arith.constant 0.707106769 : f32
    %59 = vector.broadcast %cst_32 : f32 to vector<8x512xf32>
    %60 = arith.mulf %56, %59 : vector<8x512xf32>
    %61 = math.absf %60 : vector<8x512xf32>
    %cst_33 = arith.constant 0.327591091 : f32
    %62 = vector.broadcast %cst_33 : f32 to vector<8x512xf32>
    %63 = arith.mulf %62, %61 : vector<8x512xf32>
    %cst_34 = arith.constant 1.000000e+00 : f32
    %64 = vector.broadcast %cst_34 : f32 to vector<8x512xf32>
    %65 = arith.addf %64, %63 : vector<8x512xf32>
    %cst_35 = arith.constant 1.000000e+00 : f32
    %66 = vector.broadcast %cst_35 : f32 to vector<8x512xf32>
    %67 = arith.divf %66, %65 : vector<8x512xf32>
    %cst_36 = arith.constant 1.06140542 : f32
    %68 = vector.broadcast %cst_36 : f32 to vector<8x512xf32>
    %69 = arith.mulf %67, %68 : vector<8x512xf32>
    %cst_37 = arith.constant -1.45315206 : f32
    %70 = vector.broadcast %cst_37 : f32 to vector<8x512xf32>
    %71 = arith.addf %70, %69 : vector<8x512xf32>
    %72 = arith.mulf %67, %71 : vector<8x512xf32>
    %cst_38 = arith.constant 1.42141378 : f32
    %73 = vector.broadcast %cst_38 : f32 to vector<8x512xf32>
    %74 = arith.addf %73, %72 : vector<8x512xf32>
    %75 = arith.mulf %67, %74 : vector<8x512xf32>
    %cst_39 = arith.constant -0.284496725 : f32
    %76 = vector.broadcast %cst_39 : f32 to vector<8x512xf32>
    %77 = arith.addf %76, %75 : vector<8x512xf32>
    %78 = arith.mulf %67, %77 : vector<8x512xf32>
    %cst_40 = arith.constant 0.254829586 : f32
    %79 = vector.broadcast %cst_40 : f32 to vector<8x512xf32>
    %80 = arith.addf %79, %78 : vector<8x512xf32>
    %81 = arith.mulf %67, %80 : vector<8x512xf32>
    %cst_41 = arith.constant 0.000000e+00 : f32
    %82 = vector.broadcast %cst_41 : f32 to vector<8x512xf32>
    %83 = arith.subf %82, %61 : vector<8x512xf32>
    %84 = arith.mulf %83, %61 : vector<8x512xf32>
    %85 = math.exp %84 : vector<8x512xf32>
    %86 = arith.mulf %81, %85 : vector<8x512xf32>
    %cst_42 = arith.constant 1.000000e+00 : f32
    %87 = vector.broadcast %cst_42 : f32 to vector<8x512xf32>
    %88 = arith.subf %87, %86 : vector<8x512xf32>
    %cst_43 = arith.constant 0.000000e+00 : f32
    %89 = vector.broadcast %cst_43 : f32 to vector<8x512xf32>
    %90 = arith.cmpf olt, %60, %89 : vector<8x512xf32>
    %cst_44 = arith.constant 0.000000e+00 : f32
    %91 = vector.broadcast %cst_44 : f32 to vector<8x512xf32>
    %92 = arith.subf %91, %88 : vector<8x512xf32>
    %93 = arith.select %90, %92, %88 : vector<8x512xi1>, vector<8x512xf32>
    %cst_45 = arith.constant 1.000000e+00 : f32
    %94 = vector.broadcast %cst_45 : f32 to vector<8x512xf32>
    %95 = arith.addf %94, %93 : vector<8x512xf32>
    %96 = arith.mulf %58, %95 : vector<8x512xf32>
    %c0_46 = arith.constant 0 : index
    %c0_47 = arith.constant 0 : index
    %97 = vector.load %arg4[%c0_46, %c0_47] : memref<512x32xf32, #tpu.memory_space<vmem>>, vector<512x32xf32>
    %cst_48 = arith.constant dense<0.000000e+00> : vector<8x32xf32>
    %98 = tpu.matmul %96, %97, %cst_48 {dimension_numbers = #tpu.dot_dimension_numbers<[1], [0], [0], [1], [0, 0, 1, 1], [], []>} : vector<8x512xf32>, vector<512x32xf32>, vector<8x32xf32> -> vector<8x32xf32>
    %c0_49 = arith.constant 0 : index
    %c0_50 = arith.constant 0 : index
    %99 = vector.load %arg5[%c0_49, %c0_50] : memref<1x32xf32, #tpu.memory_space<vmem>>, vector<1x32xf32>
    %100 = vector.broadcast %99 : vector<1x32xf32> to vector<8x32xf32>
    %101 = arith.addf %98, %100 : vector<8x32xf32>
    %c0_51 = arith.constant 0 : index
    %c512 = arith.constant 512 : index
    %102 = vector.load %arg1[%c0_51, %c512] : memref<8x1024xf32, #tpu.memory_space<vmem>>, vector<8x256xf32>
    %c0_52 = arith.constant 0 : index
    %c0_53 = arith.constant 0 : index
    %103 = vector.load %arg2[%c0_52, %c0_53] : memref<256x512xf32, #tpu.memory_space<vmem>>, vector<256x512xf32>
    %cst_54 = arith.constant dense<0.000000e+00> : vector<8x512xf32>
    %104 = tpu.matmul %102, %103, %cst_54 {dimension_numbers = #tpu.dot_dimension_numbers<[1], [0], [0], [1], [0, 0, 1, 1], [], []>} : vector<8x256xf32>, vector<256x512xf32>, vector<8x512xf32> -> vector<8x512xf32>
    %c0_55 = arith.constant 0 : index
    %c0_56 = arith.constant 0 : index
    %105 = vector.load %arg3[%c0_55, %c0_56] : memref<1x512xf32, #tpu.memory_space<vmem>>, vector<1x512xf32>
    %106 = vector.broadcast %105 : vector<1x512xf32> to vector<8x512xf32>
    %107 = arith.addf %104, %106 : vector<8x512xf32>
    %cst_57 = arith.constant 5.000000e-01 : f32
    %108 = vector.broadcast %cst_57 : f32 to vector<8x512xf32>
    %109 = arith.mulf %108, %107 : vector<8x512xf32>
    %cst_58 = arith.constant 0.707106769 : f32
    %110 = vector.broadcast %cst_58 : f32 to vector<8x512xf32>
    %111 = arith.mulf %107, %110 : vector<8x512xf32>
    %112 = math.absf %111 : vector<8x512xf32>
    %cst_59 = arith.constant 0.327591091 : f32
    %113 = vector.broadcast %cst_59 : f32 to vector<8x512xf32>
    %114 = arith.mulf %113, %112 : vector<8x512xf32>
    %cst_60 = arith.constant 1.000000e+00 : f32
    %115 = vector.broadcast %cst_60 : f32 to vector<8x512xf32>
    %116 = arith.addf %115, %114 : vector<8x512xf32>
    %cst_61 = arith.constant 1.000000e+00 : f32
    %117 = vector.broadcast %cst_61 : f32 to vector<8x512xf32>
    %118 = arith.divf %117, %116 : vector<8x512xf32>
    %cst_62 = arith.constant 1.06140542 : f32
    %119 = vector.broadcast %cst_62 : f32 to vector<8x512xf32>
    %120 = arith.mulf %118, %119 : vector<8x512xf32>
    %cst_63 = arith.constant -1.45315206 : f32
    %121 = vector.broadcast %cst_63 : f32 to vector<8x512xf32>
    %122 = arith.addf %121, %120 : vector<8x512xf32>
    %123 = arith.mulf %118, %122 : vector<8x512xf32>
    %cst_64 = arith.constant 1.42141378 : f32
    %124 = vector.broadcast %cst_64 : f32 to vector<8x512xf32>
    %125 = arith.addf %124, %123 : vector<8x512xf32>
    %126 = arith.mulf %118, %125 : vector<8x512xf32>
    %cst_65 = arith.constant -0.284496725 : f32
    %127 = vector.broadcast %cst_65 : f32 to vector<8x512xf32>
    %128 = arith.addf %127, %126 : vector<8x512xf32>
    %129 = arith.mulf %118, %128 : vector<8x512xf32>
    %cst_66 = arith.constant 0.254829586 : f32
    %130 = vector.broadcast %cst_66 : f32 to vector<8x512xf32>
    %131 = arith.addf %130, %129 : vector<8x512xf32>
    %132 = arith.mulf %118, %131 : vector<8x512xf32>
    %cst_67 = arith.constant 0.000000e+00 : f32
    %133 = vector.broadcast %cst_67 : f32 to vector<8x512xf32>
    %134 = arith.subf %133, %112 : vector<8x512xf32>
    %135 = arith.mulf %134, %112 : vector<8x512xf32>
    %136 = math.exp %135 : vector<8x512xf32>
    %137 = arith.mulf %132, %136 : vector<8x512xf32>
    %cst_68 = arith.constant 1.000000e+00 : f32
    %138 = vector.broadcast %cst_68 : f32 to vector<8x512xf32>
    %139 = arith.subf %138, %137 : vector<8x512xf32>
    %cst_69 = arith.constant 0.000000e+00 : f32
    %140 = vector.broadcast %cst_69 : f32 to vector<8x512xf32>
    %141 = arith.cmpf olt, %111, %140 : vector<8x512xf32>
    %cst_70 = arith.constant 0.000000e+00 : f32
    %142 = vector.broadcast %cst_70 : f32 to vector<8x512xf32>
    %143 = arith.subf %142, %139 : vector<8x512xf32>
    %144 = arith.select %141, %143, %139 : vector<8x512xi1>, vector<8x512xf32>
    %cst_71 = arith.constant 1.000000e+00 : f32
    %145 = vector.broadcast %cst_71 : f32 to vector<8x512xf32>
    %146 = arith.addf %145, %144 : vector<8x512xf32>
    %147 = arith.mulf %109, %146 : vector<8x512xf32>
    %c0_72 = arith.constant 0 : index
    %c0_73 = arith.constant 0 : index
    %148 = vector.load %arg4[%c0_72, %c0_73] : memref<512x32xf32, #tpu.memory_space<vmem>>, vector<512x32xf32>
    %cst_74 = arith.constant dense<0.000000e+00> : vector<8x32xf32>
    %149 = tpu.matmul %147, %148, %cst_74 {dimension_numbers = #tpu.dot_dimension_numbers<[1], [0], [0], [1], [0, 0, 1, 1], [], []>} : vector<8x512xf32>, vector<512x32xf32>, vector<8x32xf32> -> vector<8x32xf32>
    %c0_75 = arith.constant 0 : index
    %c0_76 = arith.constant 0 : index
    %150 = vector.load %arg5[%c0_75, %c0_76] : memref<1x32xf32, #tpu.memory_space<vmem>>, vector<1x32xf32>
    %151 = vector.broadcast %150 : vector<1x32xf32> to vector<8x32xf32>
    %152 = arith.addf %149, %151 : vector<8x32xf32>
    %c0_77 = arith.constant 0 : index
    %c768 = arith.constant 768 : index
    %153 = vector.load %arg1[%c0_77, %c768] : memref<8x1024xf32, #tpu.memory_space<vmem>>, vector<8x256xf32>
    %c0_78 = arith.constant 0 : index
    %c0_79 = arith.constant 0 : index
    %154 = vector.load %arg2[%c0_78, %c0_79] : memref<256x512xf32, #tpu.memory_space<vmem>>, vector<256x512xf32>
    %cst_80 = arith.constant dense<0.000000e+00> : vector<8x512xf32>
    %155 = tpu.matmul %153, %154, %cst_80 {dimension_numbers = #tpu.dot_dimension_numbers<[1], [0], [0], [1], [0, 0, 1, 1], [], []>} : vector<8x256xf32>, vector<256x512xf32>, vector<8x512xf32> -> vector<8x512xf32>
    %c0_81 = arith.constant 0 : index
    %c0_82 = arith.constant 0 : index
    %156 = vector.load %arg3[%c0_81, %c0_82] : memref<1x512xf32, #tpu.memory_space<vmem>>, vector<1x512xf32>
    %157 = vector.broadcast %156 : vector<1x512xf32> to vector<8x512xf32>
    %158 = arith.addf %155, %157 : vector<8x512xf32>
    %cst_83 = arith.constant 5.000000e-01 : f32
    %159 = vector.broadcast %cst_83 : f32 to vector<8x512xf32>
    %160 = arith.mulf %159, %158 : vector<8x512xf32>
    %cst_84 = arith.constant 0.707106769 : f32
    %161 = vector.broadcast %cst_84 : f32 to vector<8x512xf32>
    %162 = arith.mulf %158, %161 : vector<8x512xf32>
    %163 = math.absf %162 : vector<8x512xf32>
    %cst_85 = arith.constant 0.327591091 : f32
    %164 = vector.broadcast %cst_85 : f32 to vector<8x512xf32>
    %165 = arith.mulf %164, %163 : vector<8x512xf32>
    %cst_86 = arith.constant 1.000000e+00 : f32
    %166 = vector.broadcast %cst_86 : f32 to vector<8x512xf32>
    %167 = arith.addf %166, %165 : vector<8x512xf32>
    %cst_87 = arith.constant 1.000000e+00 : f32
    %168 = vector.broadcast %cst_87 : f32 to vector<8x512xf32>
    %169 = arith.divf %168, %167 : vector<8x512xf32>
    %cst_88 = arith.constant 1.06140542 : f32
    %170 = vector.broadcast %cst_88 : f32 to vector<8x512xf32>
    %171 = arith.mulf %169, %170 : vector<8x512xf32>
    %cst_89 = arith.constant -1.45315206 : f32
    %172 = vector.broadcast %cst_89 : f32 to vector<8x512xf32>
    %173 = arith.addf %172, %171 : vector<8x512xf32>
    %174 = arith.mulf %169, %173 : vector<8x512xf32>
    %cst_90 = arith.constant 1.42141378 : f32
    %175 = vector.broadcast %cst_90 : f32 to vector<8x512xf32>
    %176 = arith.addf %175, %174 : vector<8x512xf32>
    %177 = arith.mulf %169, %176 : vector<8x512xf32>
    %cst_91 = arith.constant -0.284496725 : f32
    %178 = vector.broadcast %cst_91 : f32 to vector<8x512xf32>
    %179 = arith.addf %178, %177 : vector<8x512xf32>
    %180 = arith.mulf %169, %179 : vector<8x512xf32>
    %cst_92 = arith.constant 0.254829586 : f32
    %181 = vector.broadcast %cst_92 : f32 to vector<8x512xf32>
    %182 = arith.addf %181, %180 : vector<8x512xf32>
    %183 = arith.mulf %169, %182 : vector<8x512xf32>
    %cst_93 = arith.constant 0.000000e+00 : f32
    %184 = vector.broadcast %cst_93 : f32 to vector<8x512xf32>
    %185 = arith.subf %184, %163 : vector<8x512xf32>
    %186 = arith.mulf %185, %163 : vector<8x512xf32>
    %187 = math.exp %186 : vector<8x512xf32>
    %188 = arith.mulf %183, %187 : vector<8x512xf32>
    %cst_94 = arith.constant 1.000000e+00 : f32
    %189 = vector.broadcast %cst_94 : f32 to vector<8x512xf32>
    %190 = arith.subf %189, %188 : vector<8x512xf32>
    %cst_95 = arith.constant 0.000000e+00 : f32
    %191 = vector.broadcast %cst_95 : f32 to vector<8x512xf32>
    %192 = arith.cmpf olt, %162, %191 : vector<8x512xf32>
    %cst_96 = arith.constant 0.000000e+00 : f32
    %193 = vector.broadcast %cst_96 : f32 to vector<8x512xf32>
    %194 = arith.subf %193, %190 : vector<8x512xf32>
    %195 = arith.select %192, %194, %190 : vector<8x512xi1>, vector<8x512xf32>
    %cst_97 = arith.constant 1.000000e+00 : f32
    %196 = vector.broadcast %cst_97 : f32 to vector<8x512xf32>
    %197 = arith.addf %196, %195 : vector<8x512xf32>
    %198 = arith.mulf %160, %197 : vector<8x512xf32>
    %c0_98 = arith.constant 0 : index
    %c0_99 = arith.constant 0 : index
    %199 = vector.load %arg4[%c0_98, %c0_99] : memref<512x32xf32, #tpu.memory_space<vmem>>, vector<512x32xf32>
    %cst_100 = arith.constant dense<0.000000e+00> : vector<8x32xf32>
    %200 = tpu.matmul %198, %199, %cst_100 {dimension_numbers = #tpu.dot_dimension_numbers<[1], [0], [0], [1], [0, 0, 1, 1], [], []>} : vector<8x512xf32>, vector<512x32xf32>, vector<8x32xf32> -> vector<8x32xf32>
    %c0_101 = arith.constant 0 : index
    %c0_102 = arith.constant 0 : index
    %201 = vector.load %arg5[%c0_101, %c0_102] : memref<1x32xf32, #tpu.memory_space<vmem>>, vector<1x32xf32>
    %202 = vector.broadcast %201 : vector<1x32xf32> to vector<8x32xf32>
    %203 = arith.addf %200, %202 : vector<8x32xf32>
    %204 = tpu.concatenate %50, %101, %152, %203 in 1 : vector<8x32xf32>, vector<8x32xf32>, vector<8x32xf32>, vector<8x32xf32> -> vector<8x128xf32>
    %c0_103 = arith.constant 0 : index
    %c0_104 = arith.constant 0 : index
    %205 = vector.load %arg6[%c0_103, %c0_104] : memref<8x128xf32, #tpu.memory_space<vmem>>, vector<8x128xf32>
    tpu.vector_store %arg6[%c0_103, %c0_104], %204 {strides = array<i32>} : memref<8x128xf32, #tpu.memory_space<vmem>>, vector<8x128xf32>,
    return
  }
  func.func @transform_0(%arg0: i32) -> (i32, i32) {
    %c0_i32 = arith.constant 0 : i32
    %c0_i32_0 = arith.constant 0 : i32
    return %arg0, %c0_i32 : i32, i32
  }
  func.func @transform_1(%arg0: i32) -> (i32, i32) {
    %c0_i32 = arith.constant 0 : i32
    %c0_i32_0 = arith.constant 0 : i32
    %c0_i32_1 = arith.constant 0 : i32
    return %c0_i32, %c0_i32_0 : i32, i32
  }
  func.func @transform_2(%arg0: i32) -> (i32, i32) {
    %c0_i32 = arith.constant 0 : i32
    %c0_i32_0 = arith.constant 0 : i32
    %c0_i32_1 = arith.constant 0 : i32
    return %c0_i32, %c0_i32_0 : i32, i32
  }
  func.func @transform_3(%arg0: i32) -> (i32, i32) {
    %c0_i32 = arith.constant 0 : i32
    %c0_i32_0 = arith.constant 0 : i32
    %c0_i32_1 = arith.constant 0 : i32
    return %c0_i32, %c0_i32_0 : i32, i32
  }
  func.func @transform_4(%arg0: i32) -> (i32, i32) {
    %c0_i32 = arith.constant 0 : i32
    %c0_i32_0 = arith.constant 0 : i32
    %c0_i32_1 = arith.constant 0 : i32
    return %c0_i32, %c0_i32_0 : i32, i32
  }
  func.func @transform_5(%arg0: i32) -> (i32, i32) {
    %c0_i32 = arith.constant 0 : i32
    %c0_i32_0 = arith.constant 0 : i32
    return %arg0, %c0_i32 : i32, i32
  }
}

</mosaic_0001>

<bundles_post_ra>
// kernel: squeeze.1
= control target key start
LH: loop header
LB: loop body
LE: loop exit
PB: predicated region body
PF: predicated region fallthrough
CT: control target
= control target key end

     0   :  { %s741_s10 = smov 124   ;;  %s743_s23 = smov 116   ;;  %vm3_vm0 = vcmask 31744   ;;  %s1390_s0 = inlined_call_operand.vmem [shape: f32[2,32,32], index: 0, kind: input, shape index: {}]   ;;  %s1391_s1 = inlined_call_operand.vmem [shape: f32[2,256,4], index: 1, kind: output, shape index: {}]  }
   0x1   :  { %v761_v0 = vld [vmem:[%s1390_s0 + $0x10] sm:$0xff]   ;;  %v766_v1 = vld [vmem:[%s1390_s0] sm:$0xff]   ;;  %v779_v3 = vld [vmem:[%s1390_s0 + $0x18] sm:$0xff]   ;;  %s744_s24 = smov 112   ;;  %s745_s27 = smov 108  }
   0x2   :  { %74 = vrot.lane.b32.xlu1 %v761_v0, %s741_s10  ;;  %56 = vrot.lane.b32.xlu0 %v766_v1, %s741_s10  ;;  %v773_v2 = vld [vmem:[%s1390_s0 + $0x20] sm:$0xff]   ;;  %v784_v4 = vld [vmem:[%s1390_s0 + $0x8] sm:$0xff]   ;;  %s746_s8 = smov 104   ;;  %s747_s5 = smov 100  }
   0x3   :  { %92 = vrot.lane.b32.xlu2 %v773_v2, %s741_s10  ;;  %v791_v5 = vld [vmem:[%s1390_s0 + $0x28] sm:$0xff]   ;;  %v797_v6 = vld [vmem:[%s1390_s0 + $0x38] sm:$0xff]   ;;  %v802_v7 = vld [vmem:[%s1390_s0 + $0x30] sm:$0xff]   ;;  %s742_s0 = smov 120  }
   0x4   :  { %4 = vst.msk [vmem:[%s1391_s1] ss:$8 sm:$0xf] %vm3_vm0, %v766_v1  }
   0x5   :  { %5 = vst.msk [vmem:[%s1391_s1] ss:$8 sm:$0xf0] %vm3_vm0, %v766_v1  }
   0x6   :  { %553 = vst.msk [vmem:[%s1391_s1 + $0x40] ss:$8 sm:$0xf] %vm3_vm0, %v784_v4  }
   0x7   :  { %554 = vst.msk [vmem:[%s1391_s1 + $0x40] ss:$8 sm:$0xf0] %vm3_vm0, %v784_v4  }
   0x8   :  { %556 = vst.msk [vmem:[%s1391_s1 + $0x80] ss:$8 sm:$0xf] %vm3_vm0, %v761_v0  }
   0x9   :  { %557 = vst.msk [vmem:[%s1391_s1 + $0x80] ss:$8 sm:$0xf0] %vm3_vm0, %v761_v0  }
   0xa   :  { %83 = vrot.lane.b32.xlu1 %v779_v3, %s741_s10  ;;  %65 = vrot.lane.b32.xlu0 %v784_v4, %s741_s10  ;;  %559 = vst.msk [vmem:[%s1391_s1 + $0xc0] ss:$8 sm:$0xf] %vm3_vm0, %v779_v3  }
   0xb   :  { %101 = vrot.lane.b32.xlu2 %v791_v5, %s741_s10  ;;  %560 = vst.msk [vmem:[%s1391_s1 + $0xc0] ss:$8 sm:$0xf0] %vm3_vm0, %v779_v3  }
   0xc   :  { %562 = vst.msk [vmem:[%s1391_s1 + $0x100] ss:$8 sm:$0xf] %vm3_vm0, %v773_v2  }
   0xd   :  { %563 = vst.msk [vmem:[%s1391_s1 + $0x100] ss:$8 sm:$0xf0] %vm3_vm0, %v773_v2  }
   0xe   :  { %565 = vst.msk [vmem:[%s1391_s1 + $0x140] ss:$8 sm:$0xf] %vm3_vm0, %v791_v5  }
   0xf   :  { %566 = vst.msk [vmem:[%s1391_s1 + $0x140] ss:$8 sm:$0xf0] %vm3_vm0, %v791_v5  }
  0x10   :  { %568 = vst.msk [vmem:[%s1391_s1 + $0x180] ss:$8 sm:$0xf] %vm3_vm0, %v802_v7  }
  0x11   :  { %569 = vst.msk [vmem:[%s1391_s1 + $0x180] ss:$8 sm:$0xf0] %vm3_vm0, %v802_v7  }
  0x12   :  { %119 = vrot.lane.b32.xlu1 %v797_v6, %s741_s10  ;;  %110 = vrot.lane.b32.xlu0 %v802_v7, %s741_s10  ;;  %571 = vst.msk [vmem:[%s1391_s1 + $0x1c0] ss:$8 sm:$0xf] %vm3_vm0, %v797_v6  }
  0x13   :  { %127 = vrot.lane.b32.xlu2 %v766_v1, %s742_s0  ;;  %572 = vst.msk [vmem:[%s1391_s1 + $0x1c0] ss:$8 sm:$0xf0] %vm3_vm0, %v797_v6  }
  0x1a   :  { %145 = vrot.lane.b32.xlu1 %v761_v0, %s742_s0  ;;  %136 = vrot.lane.b32.xlu0 %v784_v4, %s742_s0 }
  0x1b   :  { %154 = vrot.lane.b32.xlu2 %v779_v3, %s742_s0 }
  0x22   :  { %172 = vrot.lane.b32.xlu1 %v791_v5, %s742_s0  ;;  %163 = vrot.lane.b32.xlu0 %v773_v2, %s742_s0 }
  0x23   :  { %181 = vrot.lane.b32.xlu2 %v802_v7, %s742_s0 }
  0x2a   :  { %198 = vrot.lane.b32.xlu1 %v766_v1, %s743_s23  ;;  %190 = vrot.lane.b32.xlu0 %v797_v6, %s742_s0 }
  0x2b   :  { %207 = vrot.lane.b32.xlu2 %v784_v4, %s743_s23 }
  0x32   :  { %225 = vrot.lane.b32.xlu1 %v779_v3, %s743_s23  ;;  %216 = vrot.lane.b32.xlu0 %v761_v0, %s743_s23 }
  0x33   :  { %234 = vrot.lane.b32.xlu2 %v773_v2, %s743_s23 }
  0x3a   :  { %252 = vrot.lane.b32.xlu1 %v802_v7, %s743_s23  ;;  %243 = vrot.lane.b32.xlu0 %v791_v5, %s743_s23 }
  0x3b   :  { %261 = vrot.lane.b32.xlu2 %v797_v6, %s743_s23 }
  0x42   :  { %278 = vrot.lane.b32.xlu1 %v784_v4, %s744_s24  ;;  %269 = vrot.lane.b32.xlu0 %v766_v1, %s744_s24 }
  0x43   :  { %287 = vrot.lane.b32.xlu2 %v761_v0, %s744_s24 }
  0x4a   :  { %305 = vrot.lane.b32.xlu1 %v773_v2, %s744_s24  ;;  %296 = vrot.lane.b32.xlu0 %v779_v3, %s744_s24 }
  0x4b   :  { %314 = vrot.lane.b32.xlu2 %v791_v5, %s744_s24 }
  0x52   :  { %332 = vrot.lane.b32.xlu1 %v797_v6, %s744_s24  ;;  %323 = vrot.lane.b32.xlu0 %v802_v7, %s744_s24 }
  0x53   :  { %340 = vrot.lane.b32.xlu2 %v766_v1, %s745_s27 }
  0x5a   :  { %358 = vrot.lane.b32.xlu1 %v761_v0, %s745_s27  ;;  %349 = vrot.lane.b32.xlu0 %v784_v4, %s745_s27 }
  0x5b   :  { %367 = vrot.lane.b32.xlu2 %v779_v3, %s745_s27 }
  0x5d   :  { %v93_v8 = vpop.permute.xlu2 %92  }
  0x5e   :  { %585 = vst.msk [vmem:[%s1391_s1 + $0x101] ss:$8 sm:$0xf] %vm3_vm0, %v93_v8  }
  0x5f   :  { %586 = vst.msk [vmem:[%s1391_s1 + $0x101] ss:$8 sm:$0xf0] %vm3_vm0, %v93_v8  }
  0x62   :  { %385 = vrot.lane.b32.xlu1 %v791_v5, %s745_s27  ;;  %376 = vrot.lane.b32.xlu0 %v773_v2, %s745_s27 }
  0x63   :  { %394 = vrot.lane.b32.xlu2 %v802_v7, %s745_s27 }
  0x65   :  { %v102_v9 = vpop.permute.xlu2 %101  }
  0x66   :  { %588 = vst.msk [vmem:[%s1391_s1 + $0x141] ss:$8 sm:$0xf] %vm3_vm0, %v102_v9  }
  0x67   :  { %589 = vst.msk [vmem:[%s1391_s1 + $0x141] ss:$8 sm:$0xf0] %vm3_vm0, %v102_v9  }
  0x6a   :  { %411 = vrot.lane.b32.xlu1 %v766_v1, %s746_s8  ;;  %403 = vrot.lane.b32.xlu0 %v797_v6, %s745_s27 }
  0x6b   :  { %420 = vrot.lane.b32.xlu2 %v784_v4, %s746_s8 }
  0x6d   :  { %v128_v10 = vpop.permute.xlu2 %127  }
  0x6e   :  { %596 = vst.msk [vmem:[%s1391_s1 + $0x2] ss:$8 sm:$0xf] %vm3_vm0, %v128_v10  }
  0x6f   :  { %597 = vst.msk [vmem:[%s1391_s1 + $0x2] ss:$8 sm:$0xf0] %vm3_vm0, %v128_v10  }
  0x72   :  { %438 = vrot.lane.b32.xlu1 %v779_v3, %s746_s8  ;;  %429 = vrot.lane.b32.xlu0 %v761_v0, %s746_s8 }
  0x73   :  { %447 = vrot.lane.b32.xlu2 %v773_v2, %s746_s8 }
  0x74   :  { %v75_v11 = vpop.permute.xlu1 %74   ;;  %v57_v12 = vpop.permute.xlu0 %56  }
  0x75   :  { %579 = vst.msk [vmem:[%s1391_s1 + $0x81] ss:$8 sm:$0xf] %vm3_vm0, %v75_v11   ;;  %v155_v13 = vpop.permute.xlu2 %154  }
  0x76   :  { %580 = vst.msk [vmem:[%s1391_s1 + $0x81] ss:$8 sm:$0xf0] %vm3_vm0, %v75_v11  }
  0x77   :  { %573 = vst.msk [vmem:[%s1391_s1 + $0x1] ss:$8 sm:$0xf] %vm3_vm0, %v57_v12  }
  0x78   :  { %574 = vst.msk [vmem:[%s1391_s1 + $0x1] ss:$8 sm:$0xf0] %vm3_vm0, %v57_v12  }
  0x79   :  { %605 = vst.msk [vmem:[%s1391_s1 + $0xc2] ss:$8 sm:$0xf] %vm3_vm0, %v155_v13  }
  0x7a   :  { %465 = vrot.lane.b32.xlu1 %v802_v7, %s746_s8  ;;  %456 = vrot.lane.b32.xlu0 %v791_v5, %s746_s8  ;;  %606 = vst.msk [vmem:[%s1391_s1 + $0xc2] ss:$8 sm:$0xf0] %vm3_vm0, %v155_v13  }
  0x7b   :  { %474 = vrot.lane.b32.xlu2 %v797_v6, %s746_s8 }
  0x7c   :  { %v84_v14 = vpop.permute.xlu1 %83   ;;  %v66_v15 = vpop.permute.xlu0 %65  }
  0x7d   :  { %582 = vst.msk [vmem:[%s1391_s1 + $0xc1] ss:$8 sm:$0xf] %vm3_vm0, %v84_v14   ;;  %v182_v16 = vpop.permute.xlu2 %181  }
  0x7e   :  { %583 = vst.msk [vmem:[%s1391_s1 + $0xc1] ss:$8 sm:$0xf0] %vm3_vm0, %v84_v14  }
  0x7f   :  { %576 = vst.msk [vmem:[%s1391_s1 + $0x41] ss:$8 sm:$0xf] %vm3_vm0, %v66_v15  }
  0x80   :  { %577 = vst.msk [vmem:[%s1391_s1 + $0x41] ss:$8 sm:$0xf0] %vm3_vm0, %v66_v15  }
  0x81   :  { %614 = vst.msk [vmem:[%s1391_s1 + $0x182] ss:$8 sm:$0xf] %vm3_vm0, %v182_v16  }
  0x82   :  { %491 = vrot.lane.b32.xlu1 %v784_v4, %s747_s5  ;;  %482 = vrot.lane.b32.xlu0 %v766_v1, %s747_s5  ;;  %615 = vst.msk [vmem:[%s1391_s1 + $0x182] ss:$8 sm:$0xf0] %vm3_vm0, %v182_v16  }
  0x83   :  { %500 = vrot.lane.b32.xlu2 %v761_v0, %s747_s5 }
  0x84   :  { %v120_v17 = vpop.permute.xlu1 %119   ;;  %v111_v18 = vpop.permute.xlu0 %110  }
  0x85   :  { %594 = vst.msk [vmem:[%s1391_s1 + $0x1c1] ss:$8 sm:$0xf] %vm3_vm0, %v120_v17   ;;  %v208_v19 = vpop.permute.xlu2 %207  }
  0x86   :  { %595 = vst.msk [vmem:[%s1391_s1 + $0x1c1] ss:$8 sm:$0xf0] %vm3_vm0, %v120_v17  }
  0x87   :  { %591 = vst.msk [vmem:[%s1391_s1 + $0x181] ss:$8 sm:$0xf] %vm3_vm0, %v111_v18  }
  0x88   :  { %592 = vst.msk [vmem:[%s1391_s1 + $0x181] ss:$8 sm:$0xf0] %vm3_vm0, %v111_v18  }
  0x89   :  { %622 = vst.msk [vmem:[%s1391_s1 + $0x43] ss:$8 sm:$0xf] %vm3_vm0, %v208_v19  }
  0x8a   :  { %518 = vrot.lane.b32.xlu1 %v773_v2, %s747_s5  ;;  %509 = vrot.lane.b32.xlu0 %v779_v3, %s747_s5  ;;  %623 = vst.msk [vmem:[%s1391_s1 + $0x43] ss:$8 sm:$0xf0] %vm3_vm0, %v208_v19  }
  0x8b   :  { %527 = vrot.lane.b32.xlu2 %v791_v5, %s747_s5 }
  0x8c   :  { %v146_v20 = vpop.permute.xlu1 %145   ;;  %v137_v21 = vpop.permute.xlu0 %136  }
  0x8d   :  { %602 = vst.msk [vmem:[%s1391_s1 + $0x82] ss:$8 sm:$0xf] %vm3_vm0, %v146_v20   ;;  %v235_v22 = vpop.permute.xlu2 %234  }
  0x8e   :  { %603 = vst.msk [vmem:[%s1391_s1 + $0x82] ss:$8 sm:$0xf0] %vm3_vm0, %v146_v20  }
  0x8f   :  { %599 = vst.msk [vmem:[%s1391_s1 + $0x42] ss:$8 sm:$0xf] %vm3_vm0, %v137_v21  }
  0x90   :  { %600 = vst.msk [vmem:[%s1391_s1 + $0x42] ss:$8 sm:$0xf0] %vm3_vm0, %v137_v21  }
  0x91   :  { %631 = vst.msk [vmem:[%s1391_s1 + $0x103] ss:$8 sm:$0xf] %vm3_vm0, %v235_v22  }
  0x92   :  { %545 = vrot.lane.b32.xlu1 %v797_v6, %s747_s5  ;;  %536 = vrot.lane.b32.xlu0 %v802_v7, %s747_s5  ;;  %632 = vst.msk [vmem:[%s1391_s1 + $0x103] ss:$8 sm:$0xf0] %vm3_vm0, %v235_v22  }
  0x94   :  { %v173_v23 = vpop.permute.xlu1 %172   ;;  %v164_v24 = vpop.permute.xlu0 %163  }
  0x95   :  { %611 = vst.msk [vmem:[%s1391_s1 + $0x142] ss:$8 sm:$0xf] %vm3_vm0, %v173_v23   ;;  %v262_v25 = vpop.permute.xlu2 %261  }
  0x96   :  { %612 = vst.msk [vmem:[%s1391_s1 + $0x142] ss:$8 sm:$0xf0] %vm3_vm0, %v173_v23  }
  0x97   :  { %608 = vst.msk [vmem:[%s1391_s1 + $0x102] ss:$8 sm:$0xf] %vm3_vm0, %v164_v24  }
  0x98   :  { %609 = vst.msk [vmem:[%s1391_s1 + $0x102] ss:$8 sm:$0xf0] %vm3_vm0, %v164_v24  }
  0x99   :  { %640 = vst.msk [vmem:[%s1391_s1 + $0x1c3] ss:$8 sm:$0xf] %vm3_vm0, %v262_v25  }
  0x9a   :  { %641 = vst.msk [vmem:[%s1391_s1 + $0x1c3] ss:$8 sm:$0xf0] %vm3_vm0, %v262_v25  }
  0x9c   :  { %v199_v26 = vpop.permute.xlu1 %198   ;;  %v191_v27 = vpop.permute.xlu0 %190  }
  0x9d   :  { %619 = vst.msk [vmem:[%s1391_s1 + $0x3] ss:$8 sm:$0xf] %vm3_vm0, %v199_v26   ;;  %v288_v28 = vpop.permute.xlu2 %287  }
  0x9e   :  { %620 = vst.msk [vmem:[%s1391_s1 + $0x3] ss:$8 sm:$0xf0] %vm3_vm0, %v199_v26  }
  0x9f   :  { %617 = vst.msk [vmem:[%s1391_s1 + $0x1c2] ss:$8 sm:$0xf] %vm3_vm0, %v191_v27  }
  0xa0   :  { %618 = vst.msk [vmem:[%s1391_s1 + $0x1c2] ss:$8 sm:$0xf0] %vm3_vm0, %v191_v27  }
  0xa1   :  { %648 = vst.msk [vmem:[%s1391_s1 + $0x84] ss:$8 sm:$0xf] %vm3_vm0, %v288_v28  }
  0xa2   :  { %649 = vst.msk [vmem:[%s1391_s1 + $0x84] ss:$8 sm:$0xf0] %vm3_vm0, %v288_v28  }
  0xa4   :  { %v226_v29 = vpop.permute.xlu1 %225   ;;  %v217_v30 = vpop.permute.xlu0 %216  }
  0xa5   :  { %628 = vst.msk [vmem:[%s1391_s1 + $0xc3] ss:$8 sm:$0xf] %vm3_vm0, %v226_v29   ;;  %v315_v31 = vpop.permute.xlu2 %314  }
  0xa6   :  { %629 = vst.msk [vmem:[%s1391_s1 + $0xc3] ss:$8 sm:$0xf0] %vm3_vm0, %v226_v29  }
  0xa7   :  { %625 = vst.msk [vmem:[%s1391_s1 + $0x83] ss:$8 sm:$0xf] %vm3_vm0, %v217_v30  }
  0xa8   :  { %626 = vst.msk [vmem:[%s1391_s1 + $0x83] ss:$8 sm:$0xf0] %vm3_vm0, %v217_v30  }
  0xa9   :  { %657 = vst.msk [vmem:[%s1391_s1 + $0x144] ss:$8 sm:$0xf] %vm3_vm0, %v315_v31  }
  0xaa   :  { %658 = vst.msk [vmem:[%s1391_s1 + $0x144] ss:$8 sm:$0xf0] %vm3_vm0, %v315_v31  }
  0xac   :  { %v253_v32 = vpop.permute.xlu1 %252   ;;  %v244_v33 = vpop.permute.xlu0 %243  }
  0xad   :  { %637 = vst.msk [vmem:[%s1391_s1 + $0x183] ss:$8 sm:$0xf] %vm3_vm0, %v253_v32   ;;  %v341_v34 = vpop.permute.xlu2 %340  }
  0xae   :  { %638 = vst.msk [vmem:[%s1391_s1 + $0x183] ss:$8 sm:$0xf0] %vm3_vm0, %v253_v32  }
  0xaf   :  { %634 = vst.msk [vmem:[%s1391_s1 + $0x143] ss:$8 sm:$0xf] %vm3_vm0, %v244_v33  }
  0xb0   :  { %635 = vst.msk [vmem:[%s1391_s1 + $0x143] ss:$8 sm:$0xf0] %vm3_vm0, %v244_v33  }
  0xb1   :  { %665 = vst.msk [vmem:[%s1391_s1 + $0x5] ss:$8 sm:$0xf] %vm3_vm0, %v341_v34  }
  0xb2   :  { %666 = vst.msk [vmem:[%s1391_s1 + $0x5] ss:$8 sm:$0xf0] %vm3_vm0, %v341_v34  }
  0xb4   :  { %v279_v35 = vpop.permute.xlu1 %278   ;;  %v270_v36 = vpop.permute.xlu0 %269  }
  0xb5   :  { %645 = vst.msk [vmem:[%s1391_s1 + $0x44] ss:$8 sm:$0xf] %vm3_vm0, %v279_v35   ;;  %v368_v37 = vpop.permute.xlu2 %367  }
  0xb6   :  { %646 = vst.msk [vmem:[%s1391_s1 + $0x44] ss:$8 sm:$0xf0] %vm3_vm0, %v279_v35  }
  0xb7   :  { %642 = vst.msk [vmem:[%s1391_s1 + $0x4] ss:$8 sm:$0xf] %vm3_vm0, %v270_v36  }
  0xb8   :  { %643 = vst.msk [vmem:[%s1391_s1 + $0x4] ss:$8 sm:$0xf0] %vm3_vm0, %v270_v36  }
  0xb9   :  { %674 = vst.msk [vmem:[%s1391_s1 + $0xc5] ss:$8 sm:$0xf] %vm3_vm0, %v368_v37  }
  0xba   :  { %675 = vst.msk [vmem:[%s1391_s1 + $0xc5] ss:$8 sm:$0xf0] %vm3_vm0, %v368_v37  }
  0xbc   :  { %v306_v38 = vpop.permute.xlu1 %305   ;;  %v297_v39 = vpop.permute.xlu0 %296  }
  0xbd   :  { %654 = vst.msk [vmem:[%s1391_s1 + $0x104] ss:$8 sm:$0xf] %vm3_vm0, %v306_v38   ;;  %v395_v40 = vpop.permute.xlu2 %394  }
  0xbe   :  { %655 = vst.msk [vmem:[%s1391_s1 + $0x104] ss:$8 sm:$0xf0] %vm3_vm0, %v306_v38  }
  0xbf   :  { %651 = vst.msk [vmem:[%s1391_s1 + $0xc4] ss:$8 sm:$0xf] %vm3_vm0, %v297_v39  }
  0xc0   :  { %652 = vst.msk [vmem:[%s1391_s1 + $0xc4] ss:$8 sm:$0xf0] %vm3_vm0, %v297_v39  }
  0xc1   :  { %683 = vst.msk [vmem:[%s1391_s1 + $0x185] ss:$8 sm:$0xf] %vm3_vm0, %v395_v40  }
  0xc2   :  { %684 = vst.msk [vmem:[%s1391_s1 + $0x185] ss:$8 sm:$0xf0] %vm3_vm0, %v395_v40  }
  0xc4   :  { %v333_v41 = vpop.permute.xlu1 %332   ;;  %v324_v42 = vpop.permute.xlu0 %323  }
  0xc5   :  { %663 = vst.msk [vmem:[%s1391_s1 + $0x1c4] ss:$8 sm:$0xf] %vm3_vm0, %v333_v41   ;;  %v421_v43 = vpop.permute.xlu2 %420  }
  0xc6   :  { %664 = vst.msk [vmem:[%s1391_s1 + $0x1c4] ss:$8 sm:$0xf0] %vm3_vm0, %v333_v41  }
  0xc7   :  { %660 = vst.msk [vmem:[%s1391_s1 + $0x184] ss:$8 sm:$0xf] %vm3_vm0, %v324_v42  }
  0xc8   :  { %661 = vst.msk [vmem:[%s1391_s1 + $0x184] ss:$8 sm:$0xf0] %vm3_vm0, %v324_v42  }
  0xc9   :  { %691 = vst.msk [vmem:[%s1391_s1 + $0x46] ss:$8 sm:$0xf] %vm3_vm0, %v421_v43  }
  0xca   :  { %692 = vst.msk [vmem:[%s1391_s1 + $0x46] ss:$8 sm:$0xf0] %vm3_vm0, %v421_v43  }
  0xcc   :  { %v359_v44 = vpop.permute.xlu1 %358   ;;  %v350_v45 = vpop.permute.xlu0 %349  }
  0xcd   :  { %671 = vst.msk [vmem:[%s1391_s1 + $0x85] ss:$8 sm:$0xf] %vm3_vm0, %v359_v44   ;;  %v448_v46 = vpop.permute.xlu2 %447  }
  0xce   :  { %672 = vst.msk [vmem:[%s1391_s1 + $0x85] ss:$8 sm:$0xf0] %vm3_vm0, %v359_v44  }
  0xcf   :  { %668 = vst.msk [vmem:[%s1391_s1 + $0x45] ss:$8 sm:$0xf] %vm3_vm0, %v350_v45  }
  0xd0   :  { %669 = vst.msk [vmem:[%s1391_s1 + $0x45] ss:$8 sm:$0xf0] %vm3_vm0, %v350_v45  }
  0xd1   :  { %700 = vst.msk [vmem:[%s1391_s1 + $0x106] ss:$8 sm:$0xf] %vm3_vm0, %v448_v46  }
  0xd2   :  { %701 = vst.msk [vmem:[%s1391_s1 + $0x106] ss:$8 sm:$0xf0] %vm3_vm0, %v448_v46  }
  0xd4   :  { %v386_v47 = vpop.permute.xlu1 %385   ;;  %v377_v48 = vpop.permute.xlu0 %376  }
  0xd5   :  { %680 = vst.msk [vmem:[%s1391_s1 + $0x145] ss:$8 sm:$0xf] %vm3_vm0, %v386_v47   ;;  %v475_v49 = vpop.permute.xlu2 %474  }
  0xd6   :  { %681 = vst.msk [vmem:[%s1391_s1 + $0x145] ss:$8 sm:$0xf0] %vm3_vm0, %v386_v47  }
  0xd7   :  { %677 = vst.msk [vmem:[%s1391_s1 + $0x105] ss:$8 sm:$0xf] %vm3_vm0, %v377_v48  }
  0xd8   :  { %678 = vst.msk [vmem:[%s1391_s1 + $0x105] ss:$8 sm:$0xf0] %vm3_vm0, %v377_v48  }
  0xd9   :  { %709 = vst.msk [vmem:[%s1391_s1 + $0x1c6] ss:$8 sm:$0xf] %vm3_vm0, %v475_v49  }
  0xda   :  { %710 = vst.msk [vmem:[%s1391_s1 + $0x1c6] ss:$8 sm:$0xf0] %vm3_vm0, %v475_v49  }
  0xdc   :  { %v412_v50 = vpop.permute.xlu1 %411   ;;  %v404_v51 = vpop.permute.xlu0 %403  }
  0xdd   :  { %688 = vst.msk [vmem:[%s1391_s1 + $0x6] ss:$8 sm:$0xf] %vm3_vm0, %v412_v50   ;;  %v501_v52 = vpop.permute.xlu2 %500  }
  0xde   :  { %689 = vst.msk [vmem:[%s1391_s1 + $0x6] ss:$8 sm:$0xf0] %vm3_vm0, %v412_v50  }
  0xdf   :  { %686 = vst.msk [vmem:[%s1391_s1 + $0x1c5] ss:$8 sm:$0xf] %vm3_vm0, %v404_v51  }
  0xe0   :  { %687 = vst.msk [vmem:[%s1391_s1 + $0x1c5] ss:$8 sm:$0xf0] %vm3_vm0, %v404_v51  }
  0xe1   :  { %717 = vst.msk [vmem:[%s1391_s1 + $0x87] ss:$8 sm:$0xf] %vm3_vm0, %v501_v52  }
  0xe2   :  { %718 = vst.msk [vmem:[%s1391_s1 + $0x87] ss:$8 sm:$0xf0] %vm3_vm0, %v501_v52  }
  0xe4   :  { %v439_v53 = vpop.permute.xlu1 %438   ;;  %v430_v54 = vpop.permute.xlu0 %429  }
  0xe5   :  { %697 = vst.msk [vmem:[%s1391_s1 + $0xc6] ss:$8 sm:$0xf] %vm3_vm0, %v439_v53   ;;  %v528_v55 = vpop.permute.xlu2 %527  }
  0xe6   :  { %698 = vst.msk [vmem:[%s1391_s1 + $0xc6] ss:$8 sm:$0xf0] %vm3_vm0, %v439_v53  }
  0xe7   :  { %694 = vst.msk [vmem:[%s1391_s1 + $0x86] ss:$8 sm:$0xf] %vm3_vm0, %v430_v54  }
  0xe8   :  { %695 = vst.msk [vmem:[%s1391_s1 + $0x86] ss:$8 sm:$0xf0] %vm3_vm0, %v430_v54  }
  0xe9   :  { %726 = vst.msk [vmem:[%s1391_s1 + $0x147] ss:$8 sm:$0xf] %vm3_vm0, %v528_v55  }
  0xea   :  { %727 = vst.msk [vmem:[%s1391_s1 + $0x147] ss:$8 sm:$0xf0] %vm3_vm0, %v528_v55  }
  0xec   :  { %v466_v56 = vpop.permute.xlu1 %465   ;;  %v457_v57 = vpop.permute.xlu0 %456  }
  0xed   :  { %706 = vst.msk [vmem:[%s1391_s1 + $0x186] ss:$8 sm:$0xf] %vm3_vm0, %v466_v56  }
  0xee   :  { %707 = vst.msk [vmem:[%s1391_s1 + $0x186] ss:$8 sm:$0xf0] %vm3_vm0, %v466_v56  }
  0xef   :  { %703 = vst.msk [vmem:[%s1391_s1 + $0x146] ss:$8 sm:$0xf] %vm3_vm0, %v457_v57  }
  0xf0   :  { %704 = vst.msk [vmem:[%s1391_s1 + $0x146] ss:$8 sm:$0xf0] %vm3_vm0, %v457_v57  }
  0xf4   :  { %v492_v58 = vpop.permute.xlu1 %491   ;;  %v483_v59 = vpop.permute.xlu0 %482  }
  0xf5   :  { %714 = vst.msk [vmem:[%s1391_s1 + $0x47] ss:$8 sm:$0xf] %vm3_vm0, %v492_v58  }
  0xf6   :  { %715 = vst.msk [vmem:[%s1391_s1 + $0x47] ss:$8 sm:$0xf0] %vm3_vm0, %v492_v58  }
  0xf7   :  { %711 = vst.msk [vmem:[%s1391_s1 + $0x7] ss:$8 sm:$0xf] %vm3_vm0, %v483_v59  }
  0xf8   :  { %712 = vst.msk [vmem:[%s1391_s1 + $0x7] ss:$8 sm:$0xf0] %vm3_vm0, %v483_v59  }
  0xfc   :  { %v519_v60 = vpop.permute.xlu1 %518   ;;  %v510_v61 = vpop.permute.xlu0 %509  }
  0xfd   :  { %723 = vst.msk [vmem:[%s1391_s1 + $0x107] ss:$8 sm:$0xf] %vm3_vm0, %v519_v60  }
  0xfe   :  { %724 = vst.msk [vmem:[%s1391_s1 + $0x107] ss:$8 sm:$0xf0] %vm3_vm0, %v519_v60  }
  0xff   :  { %720 = vst.msk [vmem:[%s1391_s1 + $0xc7] ss:$8 sm:$0xf] %vm3_vm0, %v510_v61  }
 0x100   :  { %721 = vst.msk [vmem:[%s1391_s1 + $0xc7] ss:$8 sm:$0xf0] %vm3_vm0, %v510_v61  }
 0x104   :  { %v546_v62 = vpop.permute.xlu1 %545   ;;  %v537_v63 = vpop.permute.xlu0 %536  }
 0x105   :  { %732 = vst.msk [vmem:[%s1391_s1 + $0x1c7] ss:$8 sm:$0xf] %vm3_vm0, %v546_v62  }
 0x106   :  { %733 = vst.msk [vmem:[%s1391_s1 + $0x1c7] ss:$8 sm:$0xf0] %vm3_vm0, %v546_v62  }
 0x107   :  { %729 = vst.msk [vmem:[%s1391_s1 + $0x187] ss:$8 sm:$0xf] %vm3_vm0, %v537_v63  }
 0x108   :  { %730 = vst.msk [vmem:[%s1391_s1 + $0x187] ss:$8 sm:$0xf0] %vm3_vm0, %v537_v63  }

// kernel: tile.30
= control target key start
LH: loop header
LB: loop body
LE: loop exit
PB: predicated region body
PF: predicated region fallthrough
CT: control target
= control target key end

     0   :  { %2 = vsyncpa [#allocation1], 0  ;;  %s48_s8 = smov [#allocation0]   ;;  %s65_s0 = inlined_call_operand.hbm [shape: f32[32], index: 0, kind: input, shape index: {}]   ;;  %s66_s1 = inlined_call_operand.vmem [shape: f32[4,32], index: 1, kind: output, shape index: {}]  }
   0x1   :  { %s8_s0 = sshll.u32 %s65_s0, 4  ;;  %s10_s9 = sshll.u32 %s48_s8, 4  ;;  %s9_s0 = int_to_ptr.hbm [resolvable:$true] %s8_s0  ;;  %s11_s9 = int_to_ptr.vmem [resolvable:$true] %s10_s9 }
   0x2   :  { %13 = dma.hbm_to_vmem [thread:$0]  %s9_s0, 16, %s11_s9, [#allocation1]  }
   0x3   :  { %46 = dma.done.wait [#allocation1], 16  }
   0x4   :  { %47 = vsyncadd [#allocation1], 4294967280  ;;  %v18_v0 = vld [vmem:[#allocation0] ss:$0 sm:$0xff] }
   0x5   :  { %19 = vst [vmem:[%s66_s1] sm:$0xf] %v18_v0 }
   0x6   :  { %20 = vsyncpa [#allocation1], 1 }

// kernel: tile.31
= control target key start
LH: loop header
LB: loop body
LE: loop exit
PB: predicated region body
PF: predicated region fallthrough
CT: control target
= control target key end

     0   :  { %s37_s8 = smov 32   ;;  %s38_s9 = smov 64   ;;  %vm7_vm0 = vcmask 261120   ;;  %vm13_vm1 = vcmask 1048320   ;;  %vm19_vm2 = vcmask 785920   ;;  %vm25_vm3 = vcmask 523520   ;;  %s55_s0 = inlined_call_operand.vmem [shape: f32[4,32], index: 0, kind: input, shape index: {}]   ;;  %s56_s1 = inlined_call_operand.vmem [shape: f32[1,128], index: 1, kind: output, shape index: {}]  }
   0x1   :  { %v4_v0 = vld [vmem:[%s55_s0] sm:$0xf]  ;;  %s36_s0 = smov 96  }
   0x2   :  { %5 = vst [vmem:[#allocation1] sm:$0xf] %v4_v0 }
   0x9   :  { %v10_v1 = vld [vmem:[#allocation1 + $0x3] sm:$0x1]   ;;  %v22_v2 = vld [vmem:[#allocation1 + $0x1] sm:$0x1]   ;;  %v16_v3 = vld [vmem:[#allocation1 + $0x2] sm:$0x1]  }
   0xa   :  { %11 = vrot.lane.b32.xlu0 %v10_v1, %s36_s0  ;;  %23 = vrot.lane.b32.xlu1 %v22_v2, %s37_s8  ;;  %v6_v4 = vld [vmem:[#allocation1] sm:$0x1]  }
   0xb   :  { %8 = vst.msk [vmem:[#allocation0] sm:$0x1] %vm7_vm0, %v6_v4  }
  0x12   :  { %17 = vrot.lane.b32.xlu0 %v16_v3, %s38_s9 }
  0x7c   :  { %v12_v5 = vpop.permute.xlu0 %11   ;;  %v24_v6 = vpop.permute.xlu1 %23  }
  0x7d   :  { %14 = vst.msk [vmem:[#allocation0] sm:$0x1] %vm13_vm1, %v12_v5  }
  0x84   :  { %v18_v7 = vpop.permute.xlu0 %17  }
  0x85   :  { %20 = vst.msk [vmem:[#allocation0] sm:$0x1] %vm19_vm2, %v18_v7  }
  0x86   :  { %26 = vst.msk [vmem:[#allocation0] sm:$0x1] %vm25_vm3, %v24_v6  }
  0x8d   :  { %v29_v8 = vld [vmem:[#allocation0] sm:$0x1] }
  0x8e   :  { %32 = vst [vmem:[%s56_s1] sm:$0x1] %v29_v8 }

// kernel: fno2d_forward.10
= control target key start
LH: loop header
LB: loop body
LE: loop exit
PB: predicated region body
PF: predicated region fallthrough
CT: control target
= control target key end

     0   :  { %8 = vsyncpa [#allocation3], 0  ;;  %s674_s12 = smov 0   ;;  %s676_s13 = smov 0   ;;  %s777_s0 = inlined_call_operand.vmem [shape: f32[2,256,4], index: 0, kind: input, shape index: {}]   ;;  %s778_s1 = inlined_call_operand.hbm [shape: f32[12,128], index: 1, kind: input, shape index: {}]   ;;  %s779_s2 = inlined_call_operand.vmem [shape: f32[1,128], index: 2, kind: input, shape index: {}]   ;;  %s780_s3 = inlined_call_operand.vmem [shape: f32[2,256,128], index: 3, kind: output, shape index: {}]  }
   0x1   :  { %s678_s14 = smov 0   ;;  %s680_s15 = smov 0  }
   0x2   :  { %s682_s16 = smov 0  }
   0x3 LB: > { %s492_s17 = sadd.s32 4294967295, %s647_s16   ;;  %s23_s18 = sadd.s32 1, %s639_s14  ;;  %s647_s16 = sphi %s682_s16, %s14_s16   ;;  %s643_s15 = sphi %s680_s15, %s786_s15   ;;  %s639_s14 = sphi %s678_s14, %s785_s14   ;;  %s635_s13 = sphi %s676_s13, %s784_s13   ;;  %s631_s12 = sphi %s674_s12, %s783_s12  }
   0x4   : > { %p24_p0 = scmp.ge.s32.totalorder %s23_s18, 8  ;;  %s26_s19 = sadd.s32 1, %s643_s15 }
   0x5   : > { %p494_p1 = scmp.ge.s32.totalorder %s647_s16, 1  ;;  %p129_p2 = scmp.lt.s32.totalorder %s647_s16, 17 }
   0x6   : > { %s788_s18 = smov (%p24_p0, %s23_s18), 0  ;;  %s790_s19 = smov (!%p24_p0, %s26_s19), %s643_s15 }
   0x7   : > { %p707_p3 = pnand %p494_p1, %p129_p2  ;;  %p28_p4 = scmp.ge.s32.totalorder %s790_s19, 2 }
   0x8   : > { %p711_p5 = scmp.eq.s32.totalorder %s492_s17, 0  ;;  %s140_s24 = sshll.u32 %s778_s1, 4  ;;  %s141_s24 = int_to_ptr.hbm [resolvable:$true] %s140_s24 }
   0x9   : > { %p523_p6 = pneg %p707_p3  ;;  %s792_s19 = smov (%p28_p4, %s790_s19), 0 }
   0xa   : > { %s649_s25 = smov [#allocation2]   ;;  %s650_s27 = smov 128  }
   0xb   : > { %s142_s26 = sshll.u32 %s649_s25, 4  ;;  %p524_p7 = pnand %p711_p5, %p523_p6  ;;  %s143_s26 = int_to_ptr.vmem [resolvable:$true] %s142_s26 }
   0xc   : > { %s651_s28 = smov 8   ;;  %174 = sbr.rel (%p707_p3) target bundleno = 306 (0x132), region = 32 }
   0xd   : > { %526 = dma.hbm_to_vmem [thread:$0]  (!%p524_p7), %s141_s24, 256, %s143_s26, [#allocation3], %s650_s27, %s650_s27, %s651_s28  }
  0x11   : > { %v232_v0 = vlaneseq }
  0x12   : > { %626 = dma.done.wait (%p711_p5), [#allocation3], 256  }
  0x13   : > { %628 = vsyncadd (%p711_p5), [#allocation3], 4294967040  ;;  %s505_s29 = sshll.u32 %s631_s12, 7  ;;  %v233_v1 = vshrl.u32 %v232_v0, 7  ;;  %v238_v6 = vand.u32 127, %v232_v0  ;;  %s652_s30 = smov 4  }
  0x14   : > { %v243_v7 = vstv %s505_s29  ;;  %s653_s4 = smov 8   ;;  %v335_v59 = vld [vmem:[#allocation2 + $0x8] sm:$0xf]  ;;  %vm353_vm0 = vcmask 1043456   ;;  %v334_v60 = vld [vmem:[#allocation2] sm:$0xff]  ;;  %s499_s5 = sshll.u32 %s631_s12, 2 }
  0x15   : > { %v235_v2 = vadd.s32 16, %v233_v1  ;;  %v236_v3 = vadd.s32 24, %v233_v1  ;;  %v239_v4 = vmul.u32 4, %v233_v1  ;;  %v234_v5 = vadd.s32 8, %v233_v1  ;;  %514 = vmatpush.msk.msra.mxu2 %vm353_vm0, %v335_v59  ;;  %515 = vmatpush.msk.msra.mxu3 %vm353_vm0, %v335_v59  ;;  %p208_p8 = scmp.lt.s32.totalorder %s635_s13, 1  ;;  %p210_p9 = scmp.lt.s32.totalorder %s499_s5, 31 }
  0x16   : > { %506 = vmatpush.msk.msra.mxu0 %vm353_vm0, %v335_v59  ;;  %513 = vmatpush.msk.msra.mxu1 %vm353_vm0, %v335_v59  ;;  %vm324_vm1 = vcmask 31744   ;;  %vm329_vm2 = vcmask 64512   ;;  %vm340_vm3 = vcmask 97280  }
  0x17   : > { %v241_v8 = vmul.u32 4, %v235_v2  ;;  %v242_v9 = vmul.u32 4, %v236_v3  ;;  %v244_v10 = vadd.s32 %v243_v7, %v239_v4  ;;  %v240_v11 = vmul.u32 4, %v234_v5  ;;  %517 = vmatpush.msra.mxu2 %v334_v60  ;;  %518 = vmatpush.msra.mxu3 %v334_v60  ;;  %s794_s13 = smov (!%p208_p8, %s635_s13), 1  ;;  %s796_s5 = smov (!%p210_p9, %s499_s5), 31 }
  0x18   : > { %372 = vmatpush.msra.mxu0 %v334_v60  ;;  %516 = vmatpush.msra.mxu1 %v334_v60  ;;  %s500_s6 = sshll.u32 %s794_s13, 5 }
  0x19   : > { %v246_v12 = vadd.s32 %v243_v7, %v241_v8  ;;  %v247_v13 = vadd.s32 %v243_v7, %v242_v9  ;;  %v248_v14 = vadd.s32 %v244_v10, %v238_v6  ;;  %v245_v15 = vadd.s32 %v243_v7, %v240_v11  ;;  %s734_s7 = sadd.s32 %s500_s6, %s796_s5 }
  0x1a   : > { %s501_s8 = sshll.u32 %s734_s7, 3 }
  0x1b   : > { %v250_v16 = vadd.s32 %v246_v12, %v238_v6  ;;  %v251_v17 = vadd.s32 %v247_v13, %v238_v6  ;;  %v252_v18 = vcvt.s32.f32 %v248_v14  ;;  %v249_v19 = vadd.s32 %v245_v15, %v238_v6  ;;  %s215_s11 = scalar_lea.vmem %s777_s0, %s501_s8  ;;  %s225_s21 = scalar_lea.vmem %s780_s3, %s501_s8 }
  0x1c   : > { %v229_v61 = vld [vmem:[%s215_s11 + $0x10] sm:$0xff]  ;;  %v230_v3 = vld [vmem:[%s215_s11 + $0x18] sm:$0xff]  ;;  %v227_v7 = vld [vmem:[%s215_s11] sm:$0xff] }
  0x1d   : > { %v254_v20 = vcvt.s32.f32 %v250_v16  ;;  %v255_v21 = vcvt.s32.f32 %v251_v17  ;;  %v256_v22 = vadd.f32 0.5, %v252_v18  ;;  %v253_v23 = vcvt.s32.f32 %v249_v19  ;;  %v228_v10 = vld [vmem:[%s215_s11 + $0x8] sm:$0xff]  ;;  %v574_v17 = vld [vmem:[%s779_s2] ss:$0 sm:$0xff] }
  0x1f   : > { %v258_v24 = vadd.f32 0.5, %v254_v20  ;;  %v259_v25 = vadd.f32 0.5, %v255_v21  ;;  %v260_v26 = vmul.f32 0.03125, %v256_v22  ;;  %v257_v27 = vadd.f32 0.5, %v253_v23 }
  0x21   : > { %v262_v28 = vmul.f32 0.03125, %v258_v24  ;;  %v263_v29 = vmul.f32 0.03125, %v259_v25  ;;  %v264_v30 = vfloor.f32 %v260_v26  ;;  %v261_v31 = vmul.f32 0.03125, %v257_v27 }
  0x23   : > { %v266_v32 = vfloor.f32 %v262_v28  ;;  %v267_v33 = vfloor.f32 %v263_v29  ;;  %v276_v34 = vmul.f32 0.030241935, %v264_v30  ;;  %v265_v38 = vfloor.f32 %v261_v31 }
  0x24   : > { %v268_v46 = vmul.f32 32.0, %v264_v30 }
  0x25   : > { %v278_v35 = vmul.f32 0.030241935, %v266_v32  ;;  %v270_v36 = vmul.f32 32.0, %v266_v32  ;;  %v271_v37 = vmul.f32 32.0, %v267_v33  ;;  %v280_v39 = vadd.f32 0.03125, %v276_v34 }
  0x26   : > { %v277_v42 = vmul.f32 0.030241935, %v265_v38  ;;  %v279_v44 = vmul.f32 0.030241935, %v267_v33  ;;  %v272_v51 = vsub.f32 %v252_v18, %v268_v46  ;;  %v269_v52 = vmul.f32 32.0, %v265_v38 }
  0x27   : > { %v282_v40 = vadd.f32 0.03125, %v278_v35  ;;  %v274_v41 = vsub.f32 %v254_v20, %v270_v36  ;;  %296 = vrot.lane.b32.xlu2 %v280_v39, %s652_s30  ;;  %v275_v45 = vsub.f32 %v255_v21, %v271_v37 }
  0x28   : > { %v281_v48 = vadd.f32 0.03125, %v277_v42  ;;  %v283_v49 = vadd.f32 0.03125, %v279_v44  ;;  %v284_v54 = vmul.f32 0.030241935, %v272_v51  ;;  %v273_v55 = vsub.f32 %v253_v23, %v269_v52 }
  0x29   : > { %300 = vrot.lane.b32.xlu0 %v282_v40, %s652_s30  ;;  %v286_v43 = vmul.f32 0.030241935, %v274_v41  ;;  %v287_v50 = vmul.f32 0.030241935, %v275_v45 }
  0x2a   : > { %v288_v56 = vadd.f32 0.03125, %v284_v54  ;;  %v285_v57 = vmul.f32 0.030241935, %v273_v55 }
  0x2b   : > { %v290_v47 = vadd.f32 0.03125, %v286_v43  ;;  %v291_v53 = vadd.f32 0.03125, %v287_v50 }
  0x2c   : > { %v289_v58 = vadd.f32 0.03125, %v285_v57 }
  0x2d   : > { %316 = vrot.lane.b32.xlu1 %v290_v47, %s653_s4 }
  0x2f   : > { %298 = vrot.lane.b32.xlu2 %v281_v48, %s652_s30 }
  0x31   : > { %302 = vrot.lane.b32.xlu0 %v283_v49, %s652_s30 }
  0x35   : > { %318 = vrot.lane.b32.xlu1 %v291_v53, %s653_s4 }
  0x39   : > { %312 = vrot.lane.b32.xlu0 %v288_v56, %s653_s4 }
  0x3d   : > { %314 = vrot.lane.b32.xlu1 %v289_v58, %s653_s4 }
  0x81   : > { %v297_v2 = vpop.permute.xlu2 %296 }
  0x82   : > { %v325_v11 = vsel %vm324_vm1, %v227_v7, %v297_v2 }
  0x89   : > { %v299_v9 = vpop.permute.xlu2 %298 }
  0x8a   : > { %v326_v14 = vsel %vm324_vm1, %v228_v10, %v299_v9 }
  0x9b   : > { %v301_v62 = vpop.permute.xlu0 %300 }
  0x9c   : > { %v327_v63 = vsel %vm324_vm1, %v229_v61, %v301_v62 }
  0x9f   : > { %v317_v0 = vpop.permute.xlu1 %316 }
  0xa0   : > { %v332_v1 = vsel %vm329_vm2, %v327_v63, %v317_v0 }
  0xa1   : > { %509 = vmatmul.msk.f32.vlgmr.msra.gmra.mxu2 %vm340_vm3, %v332_v1 }
  0xa3   : > { %v303_v4 = vpop.permute.xlu0 %302 }
  0xa4   : > { %v328_v5 = vsel %vm324_vm1, %v230_v3, %v303_v4 }
  0xa7   : > { %v319_v6 = vpop.permute.xlu1 %318 }
  0xa8   : > { %v333_v8 = vsel %vm329_vm2, %v328_v5, %v319_v6 }
  0xa9   : > { %510 = vmatmul.msk.f32.vlgmr.msra.gmra.mxu3 %vm340_vm3, %v333_v8 }
  0xab   : > { %v313_v12 = vpop.permute.xlu0 %312 }
  0xac   : > { %v330_v13 = vsel %vm329_vm2, %v325_v11, %v313_v12 }
  0xad   : > { %507 = vmatmul.msk.f32.vlgmr.msra.gmra.mxu0 %vm340_vm3, %v330_v13 }
  0xaf   : > { %v315_v15 = vpop.permute.xlu1 %314 }
  0xb0   : > { %v331_v16 = vsel %vm329_vm2, %v326_v14, %v315_v15 }
  0xb1   : > { %508 = vmatmul.msk.f32.vlgmr.msra.gmra.mxu1 %vm340_vm3, %v331_v16 }
 0x124   : > { %v380_v18 = vpop.f32.mrf.mxu2 }
 0x125   : > { %v381_v19 = vadd.f32 %v574_v17, %v380_v18 }
 0x127   : > { %388 = vst [vmem:[%s225_s21 + $0x10] sm:$0xff] %v381_v19 }
 0x12a   : > { %v374_v20 = vpop.f32.mrf.mxu0 }
 0x12b   : > { %v375_v21 = vadd.f32 %v574_v17, %v374_v20 }
 0x12c   : > { %v383_v22 = vpop.f32.mrf.mxu3 }
 0x12d   : > { %386 = vst [vmem:[%s225_s21] sm:$0xff] %v375_v21  ;;  %v384_v23 = vadd.f32 %v574_v17, %v383_v22 }
 0x12e   : > { %v377_v24 = vpop.f32.mrf.mxu1 }
 0x12f   : > { %389 = vst [vmem:[%s225_s21 + $0x18] sm:$0xff] %v384_v23  ;;  %v378_v25 = vadd.f32 %v574_v17, %v377_v24 }
 0x131   : > { %387 = vst [vmem:[%s225_s21 + $0x8] sm:$0xff] %v378_v25 }
 0x132 PF: > { %s14_s16 = sadd.s32 1, %s647_s16   ;;  %s783_s12 = smov %s639_s14 }
 0x133   : > { %p11_p10 = scmp.ge.s32.totalorder %s14_s16, 18   ;;  %s784_s13 = smov %s643_s15 }
 0x134   : > { %s785_s14 = smov %s788_s18  ;;  %s786_s15 = smov %s792_s19 }
 0x135   :  { %13 = sbr.rel (!%p11_p10) target bundleno = 3 (0x3), region = 67 }
 0x13a   :  { %420 = vsyncpa [#allocation3], 1 }
 0x13b   :  { %422 = vsyncpa [#allocation3 + $0x1], 1 }

// kernel: fno2d_forward.11
= control target key start
LH: loop header
LB: loop body
LE: loop exit
PB: predicated region body
PF: predicated region fallthrough
CT: control target
= control target key end

     0   :  { %s2950_s18 = smov 0   ;;  %s2952_s19 = smov 0   ;;  %s3742_s0 = inlined_call_operand.vmem [shape: f32[2,32,384], index: 0, kind: input, shape index: {}]   ;;  %s3743_s1 = inlined_call_operand.vmem [shape: f32[2,32,384], index: 1, kind: input, shape index: {}]   ;;  %s3744_s2 = inlined_call_operand.vmem [shape: f32[32,32,384], index: 2, kind: input, shape index: {}]   ;;  %s3745_s3 = inlined_call_operand.vmem [shape: f32[32,32,384], index: 3, kind: input, shape index: {}]   ;;  %s3746_s4 = inlined_call_operand.vmem [shape: f32[2,32,384], index: 4, kind: output, shape index: {0}]   ;;  %s3747_s5 = inlined_call_operand.vmem [shape: f32[2,32,384], index: 5, kind: output, shape index: {1}]  }
   0x1   :  { %s2954_s20 = smov 0   ;;  %s2956_s21 = smov 0  }
   0x2   :  { %s2958_s22 = smov 0   ;;  %s2960_s23 = smov 0  }
   0x3   :  { %s2962_s24 = smov 0  }
   0x4 LB: > { %s25_s25 = sadd.s32 1, %s2910_s22  ;;  %s28_s26 = sadd.s32 1, %s2914_s23  ;;  %s2918_s24 = sphi %s2962_s24, %s16_s24   ;;  %s2914_s23 = sphi %s2960_s23, %s3754_s23   ;;  %s2910_s22 = sphi %s2958_s22, %s3753_s22   ;;  %s2906_s21 = sphi %s2956_s21, %s3752_s21   ;;  %s2902_s20 = sphi %s2954_s20, %s3751_s20   ;;  %s2898_s19 = sphi %s2952_s19, %s3750_s19   ;;  %s2894_s18 = sphi %s2950_s18, %s3749_s18  }
   0x5   : > { %p26_p0 = scmp.ge.s32.totalorder %s25_s25, 2  ;;  %p94_p1 = scmp.ne.s32.totalorder %s2898_s19, %s2894_s18 }
   0x6   : > { %p95_p2 = scmp.eq.s32.totalorder %s2918_s24, 0  ;;  %s87_s29 = sadd.s32 1, %s2898_s19 }
   0x7   : > { %s3756_s25 = smov (%p26_p0, %s25_s25), 0  ;;  %s3758_s26 = smov (!%p26_p0, %s28_s26), %s2914_s23 }
   0x8   : > { %p2993_p3 = por %p95_p2, %p94_p1  ;;  %p30_p4 = scmp.ge.s32.totalorder %s3758_s26, 4 }
   0x9   : > { %p2542_p6 = scmp.ge.s32.totalorder %s2918_s24, 8 }
   0xa   : > { %s3760_s26 = smov (%p30_p4, %s3758_s26), 0 }
   0xb   : > { %s84_s28 = ssub.s32 %s2914_s23, %s3760_s26  ;;  %202 = sbr.rel (%p2542_p6) target bundleno = 218 (0xda), region = 16 }
   0xc   : > { %p85_p5 = scmp.eq.s32.totalorder %s84_s28, 0 }
   0xe   : > { %s3003_s30 = scalar_select %p85_p5, %s2898_s19, %s87_s29  }
  0x10   : > { %221 = sbr.rel (!%p2993_p3) target bundleno = 117 (0x75), region = 28  ;;  %s223_s6 = sand.u32 (%p2993_p3), 1, %s2898_s19  }
  0x11   : > { %s2801_s7 = smul.u32 (%p2993_p3), 24, %s2914_s23 }
  0x12   : > { %s2800_s8 = smul.u32 (%p2993_p3), 768, %s223_s6 }
  0x13   : > { %s3013_s11 = scalar_lea.vmem (%p2993_p3), %s3744_s2, %s2801_s7 }
  0x14   : > { %v241_v0 = vld [vmem:[%s3013_s11] sm:$0xff] (%p2993_p3)  ;;  %v243_v1 = vld [vmem:[%s3013_s11 + $0x8] sm:$0xff] (%p2993_p3)  ;;  %v245_v2 = vld [vmem:[%s3013_s11 + $0x10] sm:$0xff] (%p2993_p3)  ;;  %s3018_s12 = scalar_lea.vmem (%p2993_p3), [#allocation2], %s2800_s8 }
  0x15   : > { %242 = vst [vmem:[%s3018_s12] sm:$0xff] %v241_v0  ;;  %v247_v3 = vld [vmem:[%s3013_s11 + $0x60] sm:$0xff]  ;;  %v249_v4 = vld [vmem:[%s3013_s11 + $0x68] sm:$0xff]  ;;  %v251_v5 = vld [vmem:[%s3013_s11 + $0x70] sm:$0xff] }
  0x16   : > { %244 = vst [vmem:[%s3018_s12 + $0x8] sm:$0xff] %v243_v1  ;;  %v253_v6 = vld [vmem:[%s3013_s11 + $0xc0] sm:$0xff]  ;;  %v255_v7 = vld [vmem:[%s3013_s11 + $0xc8] sm:$0xff]  ;;  %v257_v8 = vld [vmem:[%s3013_s11 + $0xd0] sm:$0xff] }
  0x17   : > { %246 = vst [vmem:[%s3018_s12 + $0x10] sm:$0xff] %v245_v2  ;;  %v259_v9 = vld [vmem:[%s3013_s11 + $0x120] sm:$0xff]  ;;  %v261_v10 = vld [vmem:[%s3013_s11 + $0x128] sm:$0xff]  ;;  %v263_v11 = vld [vmem:[%s3013_s11 + $0x130] sm:$0xff] }
  0x18   : > { %248 = vst [vmem:[%s3018_s12 + $0x18] sm:$0xff] %v247_v3  ;;  %v265_v12 = vld [vmem:[%s3013_s11 + $0x180] sm:$0xff]  ;;  %v267_v13 = vld [vmem:[%s3013_s11 + $0x188] sm:$0xff]  ;;  %v269_v14 = vld [vmem:[%s3013_s11 + $0x190] sm:$0xff] }
  0x19   : > { %250 = vst [vmem:[%s3018_s12 + $0x20] sm:$0xff] %v249_v4  ;;  %v271_v15 = vld [vmem:[%s3013_s11 + $0x1e0] sm:$0xff]  ;;  %v273_v16 = vld [vmem:[%s3013_s11 + $0x1e8] sm:$0xff]  ;;  %v275_v17 = vld [vmem:[%s3013_s11 + $0x1f0] sm:$0xff] }
  0x1a   : > { %252 = vst [vmem:[%s3018_s12 + $0x28] sm:$0xff] %v251_v5  ;;  %v277_v18 = vld [vmem:[%s3013_s11 + $0x240] sm:$0xff]  ;;  %v279_v19 = vld [vmem:[%s3013_s11 + $0x248] sm:$0xff]  ;;  %v281_v20 = vld [vmem:[%s3013_s11 + $0x250] sm:$0xff] }
  0x1b   : > { %254 = vst [vmem:[%s3018_s12 + $0x30] sm:$0xff] %v253_v6  ;;  %v283_v21 = vld [vmem:[%s3013_s11 + $0x2a0] sm:$0xff]  ;;  %v285_v22 = vld [vmem:[%s3013_s11 + $0x2a8] sm:$0xff]  ;;  %v287_v23 = vld [vmem:[%s3013_s11 + $0x2b0] sm:$0xff] }
  0x1c   : > { %256 = vst [vmem:[%s3018_s12 + $0x38] sm:$0xff] %v255_v7  ;;  %v289_v24 = vld [vmem:[%s3013_s11 + $0x300] sm:$0xff]  ;;  %v291_v25 = vld [vmem:[%s3013_s11 + $0x308] sm:$0xff]  ;;  %v293_v26 = vld [vmem:[%s3013_s11 + $0x310] sm:$0xff] }
  0x1d   : > { %258 = vst [vmem:[%s3018_s12 + $0x40] sm:$0xff] %v257_v8  ;;  %v295_v27 = vld [vmem:[%s3013_s11 + $0x360] sm:$0xff]  ;;  %v297_v28 = vld [vmem:[%s3013_s11 + $0x368] sm:$0xff]  ;;  %v299_v29 = vld [vmem:[%s3013_s11 + $0x370] sm:$0xff] }
  0x1e   : > { %260 = vst [vmem:[%s3018_s12 + $0x48] sm:$0xff] %v259_v9  ;;  %v301_v30 = vld [vmem:[%s3013_s11 + $0x3c0] sm:$0xff]  ;;  %v303_v31 = vld [vmem:[%s3013_s11 + $0x3c8] sm:$0xff]  ;;  %v305_v32 = vld [vmem:[%s3013_s11 + $0x3d0] sm:$0xff] }
  0x1f   : > { %262 = vst [vmem:[%s3018_s12 + $0x50] sm:$0xff] %v261_v10  ;;  %v307_v33 = vld [vmem:[%s3013_s11 + $0x420] sm:$0xff]  ;;  %v309_v34 = vld [vmem:[%s3013_s11 + $0x428] sm:$0xff]  ;;  %v311_v35 = vld [vmem:[%s3013_s11 + $0x430] sm:$0xff] }
  0x20   : > { %264 = vst [vmem:[%s3018_s12 + $0x58] sm:$0xff] %v263_v11  ;;  %v313_v36 = vld [vmem:[%s3013_s11 + $0x480] sm:$0xff]  ;;  %v315_v37 = vld [vmem:[%s3013_s11 + $0x488] sm:$0xff]  ;;  %v317_v38 = vld [vmem:[%s3013_s11 + $0x490] sm:$0xff] }
  0x21   : > { %266 = vst [vmem:[%s3018_s12 + $0x60] sm:$0xff] %v265_v12  ;;  %v319_v39 = vld [vmem:[%s3013_s11 + $0x4e0] sm:$0xff]  ;;  %v321_v40 = vld [vmem:[%s3013_s11 + $0x4e8] sm:$0xff]  ;;  %v323_v41 = vld [vmem:[%s3013_s11 + $0x4f0] sm:$0xff] }
  0x22   : > { %268 = vst [vmem:[%s3018_s12 + $0x68] sm:$0xff] %v267_v13  ;;  %v325_v42 = vld [vmem:[%s3013_s11 + $0x540] sm:$0xff]  ;;  %v327_v43 = vld [vmem:[%s3013_s11 + $0x548] sm:$0xff]  ;;  %v329_v44 = vld [vmem:[%s3013_s11 + $0x550] sm:$0xff] }
  0x23   : > { %270 = vst [vmem:[%s3018_s12 + $0x70] sm:$0xff] %v269_v14  ;;  %v331_v45 = vld [vmem:[%s3013_s11 + $0x5a0] sm:$0xff]  ;;  %v333_v46 = vld [vmem:[%s3013_s11 + $0x5a8] sm:$0xff]  ;;  %v335_v47 = vld [vmem:[%s3013_s11 + $0x5b0] sm:$0xff] }
  0x24   : > { %272 = vst [vmem:[%s3018_s12 + $0x78] sm:$0xff] %v271_v15  ;;  %v337_v48 = vld [vmem:[%s3013_s11 + $0x600] sm:$0xff]  ;;  %v339_v49 = vld [vmem:[%s3013_s11 + $0x608] sm:$0xff]  ;;  %v341_v50 = vld [vmem:[%s3013_s11 + $0x610] sm:$0xff] }
  0x25   : > { %274 = vst [vmem:[%s3018_s12 + $0x80] sm:$0xff] %v273_v16  ;;  %v343_v51 = vld [vmem:[%s3013_s11 + $0x660] sm:$0xff]  ;;  %v345_v52 = vld [vmem:[%s3013_s11 + $0x668] sm:$0xff]  ;;  %v347_v53 = vld [vmem:[%s3013_s11 + $0x670] sm:$0xff] }
  0x26   : > { %276 = vst [vmem:[%s3018_s12 + $0x88] sm:$0xff] %v275_v17  ;;  %v349_v54 = vld [vmem:[%s3013_s11 + $0x6c0] sm:$0xff]  ;;  %v351_v55 = vld [vmem:[%s3013_s11 + $0x6c8] sm:$0xff]  ;;  %v353_v56 = vld [vmem:[%s3013_s11 + $0x6d0] sm:$0xff] }
  0x27   : > { %278 = vst [vmem:[%s3018_s12 + $0x90] sm:$0xff] %v277_v18  ;;  %v355_v57 = vld [vmem:[%s3013_s11 + $0x720] sm:$0xff]  ;;  %v357_v58 = vld [vmem:[%s3013_s11 + $0x728] sm:$0xff]  ;;  %v359_v59 = vld [vmem:[%s3013_s11 + $0x730] sm:$0xff] }
  0x28   : > { %280 = vst [vmem:[%s3018_s12 + $0x98] sm:$0xff] %v279_v19  ;;  %v361_v60 = vld [vmem:[%s3013_s11 + $0x780] sm:$0xff]  ;;  %v363_v61 = vld [vmem:[%s3013_s11 + $0x788] sm:$0xff]  ;;  %v365_v62 = vld [vmem:[%s3013_s11 + $0x790] sm:$0xff] }
  0x29   : > { %282 = vst [vmem:[%s3018_s12 + $0xa0] sm:$0xff] %v281_v20  ;;  %v367_v63 = vld [vmem:[%s3013_s11 + $0x7e0] sm:$0xff]  ;;  %v369_v0 = vld [vmem:[%s3013_s11 + $0x7e8] sm:$0xff]  ;;  %v371_v1 = vld [vmem:[%s3013_s11 + $0x7f0] sm:$0xff] }
  0x2a   : > { %284 = vst [vmem:[%s3018_s12 + $0xa8] sm:$0xff] %v283_v21  ;;  %v373_v2 = vld [vmem:[%s3013_s11 + $0x840] sm:$0xff]  ;;  %v375_v3 = vld [vmem:[%s3013_s11 + $0x848] sm:$0xff]  ;;  %v377_v4 = vld [vmem:[%s3013_s11 + $0x850] sm:$0xff] }
  0x2b   : > { %286 = vst [vmem:[%s3018_s12 + $0xb0] sm:$0xff] %v285_v22  ;;  %v379_v5 = vld [vmem:[%s3013_s11 + $0x8a0] sm:$0xff]  ;;  %v381_v6 = vld [vmem:[%s3013_s11 + $0x8a8] sm:$0xff]  ;;  %v383_v7 = vld [vmem:[%s3013_s11 + $0x8b0] sm:$0xff] }
  0x2c   : > { %288 = vst [vmem:[%s3018_s12 + $0xb8] sm:$0xff] %v287_v23  ;;  %v385_v8 = vld [vmem:[%s3013_s11 + $0x900] sm:$0xff]  ;;  %v387_v9 = vld [vmem:[%s3013_s11 + $0x908] sm:$0xff]  ;;  %v389_v10 = vld [vmem:[%s3013_s11 + $0x910] sm:$0xff] }
  0x2d   : > { %290 = vst [vmem:[%s3018_s12 + $0xc0] sm:$0xff] %v289_v24  ;;  %v391_v11 = vld [vmem:[%s3013_s11 + $0x960] sm:$0xff]  ;;  %v393_v12 = vld [vmem:[%s3013_s11 + $0x968] sm:$0xff]  ;;  %v395_v13 = vld [vmem:[%s3013_s11 + $0x970] sm:$0xff] }
  0x2e   : > { %292 = vst [vmem:[%s3018_s12 + $0xc8] sm:$0xff] %v291_v25  ;;  %v397_v14 = vld [vmem:[%s3013_s11 + $0x9c0] sm:$0xff]  ;;  %v399_v15 = vld [vmem:[%s3013_s11 + $0x9c8] sm:$0xff]  ;;  %v401_v16 = vld [vmem:[%s3013_s11 + $0x9d0] sm:$0xff] }
  0x2f   : > { %294 = vst [vmem:[%s3018_s12 + $0xd0] sm:$0xff] %v293_v26  ;;  %v403_v17 = vld [vmem:[%s3013_s11 + $0xa20] sm:$0xff]  ;;  %v405_v18 = vld [vmem:[%s3013_s11 + $0xa28] sm:$0xff]  ;;  %v407_v19 = vld [vmem:[%s3013_s11 + $0xa30] sm:$0xff] }
  0x30   : > { %296 = vst [vmem:[%s3018_s12 + $0xd8] sm:$0xff] %v295_v27  ;;  %v409_v20 = vld [vmem:[%s3013_s11 + $0xa80] sm:$0xff]  ;;  %v411_v21 = vld [vmem:[%s3013_s11 + $0xa88] sm:$0xff]  ;;  %v413_v22 = vld [vmem:[%s3013_s11 + $0xa90] sm:$0xff] }
  0x31   : > { %298 = vst [vmem:[%s3018_s12 + $0xe0] sm:$0xff] %v297_v28  ;;  %v415_v23 = vld [vmem:[%s3013_s11 + $0xae0] sm:$0xff]  ;;  %v417_v24 = vld [vmem:[%s3013_s11 + $0xae8] sm:$0xff]  ;;  %v419_v25 = vld [vmem:[%s3013_s11 + $0xaf0] sm:$0xff] }
  0x32   : > { %300 = vst [vmem:[%s3018_s12 + $0xe8] sm:$0xff] %v299_v29  ;;  %v421_v26 = vld [vmem:[%s3013_s11 + $0xb40] sm:$0xff]  ;;  %v423_v27 = vld [vmem:[%s3013_s11 + $0xb48] sm:$0xff]  ;;  %v425_v28 = vld [vmem:[%s3013_s11 + $0xb50] sm:$0xff] }
  0x33   : > { %302 = vst [vmem:[%s3018_s12 + $0xf0] sm:$0xff] %v301_v30  ;;  %v427_v29 = vld [vmem:[%s3013_s11 + $0xba0] sm:$0xff]  ;;  %v429_v30 = vld [vmem:[%s3013_s11 + $0xba8] sm:$0xff] }
  0x34   : > { %304 = vst [vmem:[%s3018_s12 + $0xf8] sm:$0xff] %v303_v31  ;;  %v431_v31 = vld [vmem:[%s3013_s11 + $0xbb0] sm:$0xff] }
  0x35   : > { %306 = vst [vmem:[%s3018_s12 + $0x100] sm:$0xff] %v305_v32 }
  0x36   : > { %308 = vst [vmem:[%s3018_s12 + $0x108] sm:$0xff] %v307_v33 }
  0x37   : > { %310 = vst [vmem:[%s3018_s12 + $0x110] sm:$0xff] %v309_v34 }
  0x38   : > { %312 = vst [vmem:[%s3018_s12 + $0x118] sm:$0xff] %v311_v35 }
  0x39   : > { %314 = vst [vmem:[%s3018_s12 + $0x120] sm:$0xff] %v313_v36 }
  0x3a   : > { %316 = vst [vmem:[%s3018_s12 + $0x128] sm:$0xff] %v315_v37 }
  0x3b   : > { %318 = vst [vmem:[%s3018_s12 + $0x130] sm:$0xff] %v317_v38 }
  0x3c   : > { %320 = vst [vmem:[%s3018_s12 + $0x138] sm:$0xff] %v319_v39 }
  0x3d   : > { %322 = vst [vmem:[%s3018_s12 + $0x140] sm:$0xff] %v321_v40 }
  0x3e   : > { %324 = vst [vmem:[%s3018_s12 + $0x148] sm:$0xff] %v323_v41 }
  0x3f   : > { %326 = vst [vmem:[%s3018_s12 + $0x150] sm:$0xff] %v325_v42 }
  0x40   : > { %328 = vst [vmem:[%s3018_s12 + $0x158] sm:$0xff] %v327_v43 }
  0x41   : > { %330 = vst [vmem:[%s3018_s12 + $0x160] sm:$0xff] %v329_v44 }
  0x42   : > { %332 = vst [vmem:[%s3018_s12 + $0x168] sm:$0xff] %v331_v45 }
  0x43   : > { %334 = vst [vmem:[%s3018_s12 + $0x170] sm:$0xff] %v333_v46 }
  0x44   : > { %336 = vst [vmem:[%s3018_s12 + $0x178] sm:$0xff] %v335_v47 }
  0x45   : > { %338 = vst [vmem:[%s3018_s12 + $0x180] sm:$0xff] %v337_v48 }
  0x46   : > { %340 = vst [vmem:[%s3018_s12 + $0x188] sm:$0xff] %v339_v49 }
  0x47   : > { %342 = vst [vmem:[%s3018_s12 + $0x190] sm:$0xff] %v341_v50 }
  0x48   : > { %344 = vst [vmem:[%s3018_s12 + $0x198] sm:$0xff] %v343_v51 }
  0x49   : > { %346 = vst [vmem:[%s3018_s12 + $0x1a0] sm:$0xff] %v345_v52 }
  0x4a   : > { %348 = vst [vmem:[%s3018_s12 + $0x1a8] sm:$0xff] %v347_v53 }
  0x4b   : > { %350 = vst [vmem:[%s3018_s12 + $0x1b0] sm:$0xff] %v349_v54 }
  0x4c   : > { %352 = vst [vmem:[%s3018_s12 + $0x1b8] sm:$0xff] %v351_v55 }
  0x4d   : > { %354 = vst [vmem:[%s3018_s12 + $0x1c0] sm:$0xff] %v353_v56 }
  0x4e   : > { %356 = vst [vmem:[%s3018_s12 + $0x1c8] sm:$0xff] %v355_v57 }
  0x4f   : > { %358 = vst [vmem:[%s3018_s12 + $0x1d0] sm:$0xff] %v357_v58 }
  0x50   : > { %360 = vst [vmem:[%s3018_s12 + $0x1d8] sm:$0xff] %v359_v59 }
  0x51   : > { %362 = vst [vmem:[%s3018_s12 + $0x1e0] sm:$0xff] %v361_v60 }
  0x52   : > { %364 = vst [vmem:[%s3018_s12 + $0x1e8] sm:$0xff] %v363_v61 }
  0x53   : > { %366 = vst [vmem:[%s3018_s12 + $0x1f0] sm:$0xff] %v365_v62 }
  0x54   : > { %368 = vst [vmem:[%s3018_s12 + $0x1f8] sm:$0xff] %v367_v63 }
  0x55   : > { %370 = vst [vmem:[%s3018_s12 + $0x200] sm:$0xff] %v369_v0 }
  0x56   : > { %372 = vst [vmem:[%s3018_s12 + $0x208] sm:$0xff] %v371_v1 }
  0x57   : > { %374 = vst [vmem:[%s3018_s12 + $0x210] sm:$0xff] %v373_v2 }
  0x58   : > { %376 = vst [vmem:[%s3018_s12 + $0x218] sm:$0xff] %v375_v3 }
  0x59   : > { %378 = vst [vmem:[%s3018_s12 + $0x220] sm:$0xff] %v377_v4 }
  0x5a   : > { %380 = vst [vmem:[%s3018_s12 + $0x228] sm:$0xff] %v379_v5 }
  0x5b   : > { %382 = vst [vmem:[%s3018_s12 + $0x230] sm:$0xff] %v381_v6 }
  0x5c   : > { %384 = vst [vmem:[%s3018_s12 + $0x238] sm:$0xff] %v383_v7 }
  0x5d   : > { %386 = vst [vmem:[%s3018_s12 + $0x240] sm:$0xff] %v385_v8 }
  0x5e   : > { %388 = vst [vmem:[%s3018_s12 + $0x248] sm:$0xff] %v387_v9 }
  0x5f   : > { %390 = vst [vmem:[%s3018_s12 + $0x250] sm:$0xff] %v389_v10 }
  0x60   : > { %392 = vst [vmem:[%s3018_s12 + $0x258] sm:$0xff] %v391_v11 }
  0x61   : > { %394 = vst [vmem:[%s3018_s12 + $0x260] sm:$0xff] %v393_v12 }
  0x62   : > { %396 = vst [vmem:[%s3018_s12 + $0x268] sm:$0xff] %v395_v13 }
  0x63   : > { %398 = vst [vmem:[%s3018_s12 + $0x270] sm:$0xff] %v397_v14 }
  0x64   : > { %400 = vst [vmem:[%s3018_s12 + $0x278] sm:$0xff] %v399_v15 }
  0x65   : > { %402 = vst [vmem:[%s3018_s12 + $0x280] sm:$0xff] %v401_v16 }
  0x66   : > { %404 = vst [vmem:[%s3018_s12 + $0x288] sm:$0xff] %v403_v17 }
  0x67   : > { %406 = vst [vmem:[%s3018_s12 + $0x290] sm:$0xff] %v405_v18 }
  0x68   : > { %408 = vst [vmem:[%s3018_s12 + $0x298] sm:$0xff] %v407_v19 }
  0x69   : > { %410 = vst [vmem:[%s3018_s12 + $0x2a0] sm:$0xff] %v409_v20 }
  0x6a   : > { %412 = vst [vmem:[%s3018_s12 + $0x2a8] sm:$0xff] %v411_v21 }
  0x6b   : > { %414 = vst [vmem:[%s3018_s12 + $0x2b0] sm:$0xff] %v413_v22 }
  0x6c   : > { %416 = vst [vmem:[%s3018_s12 + $0x2b8] sm:$0xff] %v415_v23 }
  0x6d   : > { %418 = vst [vmem:[%s3018_s12 + $0x2c0] sm:$0xff] %v417_v24 }
  0x6e   : > { %420 = vst [vmem:[%s3018_s12 + $0x2c8] sm:$0xff] %v419_v25 }
  0x6f   : > { %422 = vst [vmem:[%s3018_s12 + $0x2d0] sm:$0xff] %v421_v26 }
  0x70   : > { %424 = vst [vmem:[%s3018_s12 + $0x2d8] sm:$0xff] %v423_v27 }
  0x71   : > { %426 = vst [vmem:[%s3018_s12 + $0x2e0] sm:$0xff] %v425_v28 }
  0x72   : > { %428 = vst [vmem:[%s3018_s12 + $0x2e8] sm:$0xff] %v427_v29 }
  0x73   : > { %430 = vst [vmem:[%s3018_s12 + $0x2f0] sm:$0xff] %v429_v30 }
  0x74   : > { %432 = vst [vmem:[%s3018_s12 + $0x2f8] sm:$0xff] %v431_v31 }
  0x75 PF: > { %438 = sbr.rel (!%p2993_p3) target bundleno = 218 (0xda), region = 51  ;;  %s440_s13 = sand.u32 (%p2993_p3), 1, %s2898_s19  }
  0x76   : > { %s2803_s14 = smul.u32 (%p2993_p3), 24, %s2914_s23 }
  0x77   : > { %s2802_s15 = smul.u32 (%p2993_p3), 768, %s440_s13 }
  0x78   : > { %s3216_s28 = scalar_lea.vmem (%p2993_p3), %s3745_s3, %s2803_s14 }
  0x79   : > { %v458_v32 = vld [vmem:[%s3216_s28] sm:$0xff] (%p2993_p3)  ;;  %v460_v33 = vld [vmem:[%s3216_s28 + $0x8] sm:$0xff] (%p2993_p3)  ;;  %v462_v34 = vld [vmem:[%s3216_s28 + $0x10] sm:$0xff] (%p2993_p3)  ;;  %s3221_s27 = scalar_lea.vmem (%p2993_p3), [#allocation3], %s2802_s15 }
  0x7a   : > { %459 = vst [vmem:[%s3221_s27] sm:$0xff] %v458_v32  ;;  %v464_v35 = vld [vmem:[%s3216_s28 + $0x60] sm:$0xff]  ;;  %v466_v36 = vld [vmem:[%s3216_s28 + $0x68] sm:$0xff]  ;;  %v468_v37 = vld [vmem:[%s3216_s28 + $0x70] sm:$0xff] }
  0x7b   : > { %461 = vst [vmem:[%s3221_s27 + $0x8] sm:$0xff] %v460_v33  ;;  %v470_v38 = vld [vmem:[%s3216_s28 + $0xc0] sm:$0xff]  ;;  %v472_v39 = vld [vmem:[%s3216_s28 + $0xc8] sm:$0xff]  ;;  %v474_v40 = vld [vmem:[%s3216_s28 + $0xd0] sm:$0xff] }
  0x7c   : > { %463 = vst [vmem:[%s3221_s27 + $0x10] sm:$0xff] %v462_v34  ;;  %v476_v41 = vld [vmem:[%s3216_s28 + $0x120] sm:$0xff]  ;;  %v478_v42 = vld [vmem:[%s3216_s28 + $0x128] sm:$0xff]  ;;  %v480_v43 = vld [vmem:[%s3216_s28 + $0x130] sm:$0xff] }
  0x7d   : > { %465 = vst [vmem:[%s3221_s27 + $0x18] sm:$0xff] %v464_v35  ;;  %v482_v44 = vld [vmem:[%s3216_s28 + $0x180] sm:$0xff]  ;;  %v484_v45 = vld [vmem:[%s3216_s28 + $0x188] sm:$0xff]  ;;  %v486_v46 = vld [vmem:[%s3216_s28 + $0x190] sm:$0xff] }
  0x7e   : > { %467 = vst [vmem:[%s3221_s27 + $0x20] sm:$0xff] %v466_v36  ;;  %v488_v47 = vld [vmem:[%s3216_s28 + $0x1e0] sm:$0xff]  ;;  %v490_v48 = vld [vmem:[%s3216_s28 + $0x1e8] sm:$0xff]  ;;  %v492_v49 = vld [vmem:[%s3216_s28 + $0x1f0] sm:$0xff] }
  0x7f   : > { %469 = vst [vmem:[%s3221_s27 + $0x28] sm:$0xff] %v468_v37  ;;  %v494_v50 = vld [vmem:[%s3216_s28 + $0x240] sm:$0xff]  ;;  %v496_v51 = vld [vmem:[%s3216_s28 + $0x248] sm:$0xff]  ;;  %v498_v52 = vld [vmem:[%s3216_s28 + $0x250] sm:$0xff] }
  0x80   : > { %471 = vst [vmem:[%s3221_s27 + $0x30] sm:$0xff] %v470_v38  ;;  %v500_v53 = vld [vmem:[%s3216_s28 + $0x2a0] sm:$0xff]  ;;  %v502_v54 = vld [vmem:[%s3216_s28 + $0x2a8] sm:$0xff]  ;;  %v504_v55 = vld [vmem:[%s3216_s28 + $0x2b0] sm:$0xff] }
  0x81   : > { %473 = vst [vmem:[%s3221_s27 + $0x38] sm:$0xff] %v472_v39  ;;  %v506_v56 = vld [vmem:[%s3216_s28 + $0x300] sm:$0xff]  ;;  %v508_v57 = vld [vmem:[%s3216_s28 + $0x308] sm:$0xff]  ;;  %v510_v58 = vld [vmem:[%s3216_s28 + $0x310] sm:$0xff] }
  0x82   : > { %475 = vst [vmem:[%s3221_s27 + $0x40] sm:$0xff] %v474_v40  ;;  %v512_v59 = vld [vmem:[%s3216_s28 + $0x360] sm:$0xff]  ;;  %v514_v60 = vld [vmem:[%s3216_s28 + $0x368] sm:$0xff]  ;;  %v516_v61 = vld [vmem:[%s3216_s28 + $0x370] sm:$0xff] }
  0x83   : > { %477 = vst [vmem:[%s3221_s27 + $0x48] sm:$0xff] %v476_v41  ;;  %v518_v62 = vld [vmem:[%s3216_s28 + $0x3c0] sm:$0xff]  ;;  %v520_v63 = vld [vmem:[%s3216_s28 + $0x3c8] sm:$0xff]  ;;  %v522_v0 = vld [vmem:[%s3216_s28 + $0x3d0] sm:$0xff] }
  0x84   : > { %479 = vst [vmem:[%s3221_s27 + $0x50] sm:$0xff] %v478_v42  ;;  %v524_v1 = vld [vmem:[%s3216_s28 + $0x420] sm:$0xff]  ;;  %v526_v2 = vld [vmem:[%s3216_s28 + $0x428] sm:$0xff]  ;;  %v528_v3 = vld [vmem:[%s3216_s28 + $0x430] sm:$0xff] }
  0x85   : > { %481 = vst [vmem:[%s3221_s27 + $0x58] sm:$0xff] %v480_v43  ;;  %v530_v4 = vld [vmem:[%s3216_s28 + $0x480] sm:$0xff]  ;;  %v532_v5 = vld [vmem:[%s3216_s28 + $0x488] sm:$0xff]  ;;  %v534_v6 = vld [vmem:[%s3216_s28 + $0x490] sm:$0xff] }
  0x86   : > { %483 = vst [vmem:[%s3221_s27 + $0x60] sm:$0xff] %v482_v44  ;;  %v536_v7 = vld [vmem:[%s3216_s28 + $0x4e0] sm:$0xff]  ;;  %v538_v8 = vld [vmem:[%s3216_s28 + $0x4e8] sm:$0xff]  ;;  %v540_v9 = vld [vmem:[%s3216_s28 + $0x4f0] sm:$0xff] }
  0x87   : > { %485 = vst [vmem:[%s3221_s27 + $0x68] sm:$0xff] %v484_v45  ;;  %v542_v10 = vld [vmem:[%s3216_s28 + $0x540] sm:$0xff]  ;;  %v544_v11 = vld [vmem:[%s3216_s28 + $0x548] sm:$0xff]  ;;  %v546_v12 = vld [vmem:[%s3216_s28 + $0x550] sm:$0xff] }
  0x88   : > { %487 = vst [vmem:[%s3221_s27 + $0x70] sm:$0xff] %v486_v46  ;;  %v548_v13 = vld [vmem:[%s3216_s28 + $0x5a0] sm:$0xff]  ;;  %v550_v14 = vld [vmem:[%s3216_s28 + $0x5a8] sm:$0xff]  ;;  %v552_v15 = vld [vmem:[%s3216_s28 + $0x5b0] sm:$0xff] }
  0x89   : > { %489 = vst [vmem:[%s3221_s27 + $0x78] sm:$0xff] %v488_v47  ;;  %v554_v16 = vld [vmem:[%s3216_s28 + $0x600] sm:$0xff]  ;;  %v556_v17 = vld [vmem:[%s3216_s28 + $0x608] sm:$0xff]  ;;  %v558_v18 = vld [vmem:[%s3216_s28 + $0x610] sm:$0xff] }
  0x8a   : > { %491 = vst [vmem:[%s3221_s27 + $0x80] sm:$0xff] %v490_v48  ;;  %v560_v19 = vld [vmem:[%s3216_s28 + $0x660] sm:$0xff]  ;;  %v562_v20 = vld [vmem:[%s3216_s28 + $0x668] sm:$0xff]  ;;  %v564_v21 = vld [vmem:[%s3216_s28 + $0x670] sm:$0xff] }
  0x8b   : > { %493 = vst [vmem:[%s3221_s27 + $0x88] sm:$0xff] %v492_v49  ;;  %v566_v22 = vld [vmem:[%s3216_s28 + $0x6c0] sm:$0xff]  ;;  %v568_v23 = vld [vmem:[%s3216_s28 + $0x6c8] sm:$0xff]  ;;  %v570_v24 = vld [vmem:[%s3216_s28 + $0x6d0] sm:$0xff] }
  0x8c   : > { %495 = vst [vmem:[%s3221_s27 + $0x90] sm:$0xff] %v494_v50  ;;  %v572_v25 = vld [vmem:[%s3216_s28 + $0x720] sm:$0xff]  ;;  %v574_v26 = vld [vmem:[%s3216_s28 + $0x728] sm:$0xff]  ;;  %v576_v27 = vld [vmem:[%s3216_s28 + $0x730] sm:$0xff] }
  0x8d   : > { %497 = vst [vmem:[%s3221_s27 + $0x98] sm:$0xff] %v496_v51  ;;  %v578_v28 = vld [vmem:[%s3216_s28 + $0x780] sm:$0xff]  ;;  %v580_v29 = vld [vmem:[%s3216_s28 + $0x788] sm:$0xff]  ;;  %v582_v30 = vld [vmem:[%s3216_s28 + $0x790] sm:$0xff] }
  0x8e   : > { %499 = vst [vmem:[%s3221_s27 + $0xa0] sm:$0xff] %v498_v52  ;;  %v584_v31 = vld [vmem:[%s3216_s28 + $0x7e0] sm:$0xff]  ;;  %v586_v32 = vld [vmem:[%s3216_s28 + $0x7e8] sm:$0xff]  ;;  %v588_v33 = vld [vmem:[%s3216_s28 + $0x7f0] sm:$0xff] }
  0x8f   : > { %501 = vst [vmem:[%s3221_s27 + $0xa8] sm:$0xff] %v500_v53  ;;  %v590_v34 = vld [vmem:[%s3216_s28 + $0x840] sm:$0xff]  ;;  %v592_v35 = vld [vmem:[%s3216_s28 + $0x848] sm:$0xff]  ;;  %v594_v36 = vld [vmem:[%s3216_s28 + $0x850] sm:$0xff] }
  0x90   : > { %503 = vst [vmem:[%s3221_s27 + $0xb0] sm:$0xff] %v502_v54  ;;  %v596_v37 = vld [vmem:[%s3216_s28 + $0x8a0] sm:$0xff]  ;;  %v598_v38 = vld [vmem:[%s3216_s28 + $0x8a8] sm:$0xff]  ;;  %v600_v39 = vld [vmem:[%s3216_s28 + $0x8b0] sm:$0xff] }
  0x91   : > { %505 = vst [vmem:[%s3221_s27 + $0xb8] sm:$0xff] %v504_v55  ;;  %v602_v40 = vld [vmem:[%s3216_s28 + $0x900] sm:$0xff]  ;;  %v604_v41 = vld [vmem:[%s3216_s28 + $0x908] sm:$0xff]  ;;  %v606_v42 = vld [vmem:[%s3216_s28 + $0x910] sm:$0xff] }
  0x92   : > { %507 = vst [vmem:[%s3221_s27 + $0xc0] sm:$0xff] %v506_v56  ;;  %v608_v43 = vld [vmem:[%s3216_s28 + $0x960] sm:$0xff]  ;;  %v610_v44 = vld [vmem:[%s3216_s28 + $0x968] sm:$0xff]  ;;  %v612_v45 = vld [vmem:[%s3216_s28 + $0x970] sm:$0xff] }
  0x93   : > { %509 = vst [vmem:[%s3221_s27 + $0xc8] sm:$0xff] %v508_v57  ;;  %v614_v46 = vld [vmem:[%s3216_s28 + $0x9c0] sm:$0xff]  ;;  %v616_v47 = vld [vmem:[%s3216_s28 + $0x9c8] sm:$0xff]  ;;  %v618_v48 = vld [vmem:[%s3216_s28 + $0x9d0] sm:$0xff] }
  0x94   : > { %511 = vst [vmem:[%s3221_s27 + $0xd0] sm:$0xff] %v510_v58  ;;  %v620_v49 = vld [vmem:[%s3216_s28 + $0xa20] sm:$0xff]  ;;  %v622_v50 = vld [vmem:[%s3216_s28 + $0xa28] sm:$0xff]  ;;  %v624_v51 = vld [vmem:[%s3216_s28 + $0xa30] sm:$0xff] }
  0x95   : > { %513 = vst [vmem:[%s3221_s27 + $0xd8] sm:$0xff] %v512_v59  ;;  %v626_v52 = vld [vmem:[%s3216_s28 + $0xa80] sm:$0xff]  ;;  %v628_v53 = vld [vmem:[%s3216_s28 + $0xa88] sm:$0xff]  ;;  %v630_v54 = vld [vmem:[%s3216_s28 + $0xa90] sm:$0xff] }
  0x96   : > { %515 = vst [vmem:[%s3221_s27 + $0xe0] sm:$0xff] %v514_v60  ;;  %v632_v55 = vld [vmem:[%s3216_s28 + $0xae0] sm:$0xff]  ;;  %v634_v56 = vld [vmem:[%s3216_s28 + $0xae8] sm:$0xff]  ;;  %v636_v57 = vld [vmem:[%s3216_s28 + $0xaf0] sm:$0xff] }
  0x97   : > { %517 = vst [vmem:[%s3221_s27 + $0xe8] sm:$0xff] %v516_v61  ;;  %v638_v58 = vld [vmem:[%s3216_s28 + $0xb40] sm:$0xff]  ;;  %v640_v59 = vld [vmem:[%s3216_s28 + $0xb48] sm:$0xff]  ;;  %v642_v60 = vld [vmem:[%s3216_s28 + $0xb50] sm:$0xff] }
  0x98   : > { %519 = vst [vmem:[%s3221_s27 + $0xf0] sm:$0xff] %v518_v62  ;;  %v644_v61 = vld [vmem:[%s3216_s28 + $0xba0] sm:$0xff]  ;;  %v646_v62 = vld [vmem:[%s3216_s28 + $0xba8] sm:$0xff] }
  0x99   : > { %521 = vst [vmem:[%s3221_s27 + $0xf8] sm:$0xff] %v520_v63  ;;  %v648_v63 = vld [vmem:[%s3216_s28 + $0xbb0] sm:$0xff] }
  0x9a   : > { %523 = vst [vmem:[%s3221_s27 + $0x100] sm:$0xff] %v522_v0 }
  0x9b   : > { %525 = vst [vmem:[%s3221_s27 + $0x108] sm:$0xff] %v524_v1 }
  0x9c   : > { %527 = vst [vmem:[%s3221_s27 + $0x110] sm:$0xff] %v526_v2 }
  0x9d   : > { %529 = vst [vmem:[%s3221_s27 + $0x118] sm:$0xff] %v528_v3 }
  0x9e   : > { %531 = vst [vmem:[%s3221_s27 + $0x120] sm:$0xff] %v530_v4 }
  0x9f   : > { %533 = vst [vmem:[%s3221_s27 + $0x128] sm:$0xff] %v532_v5 }
  0xa0   : > { %535 = vst [vmem:[%s3221_s27 + $0x130] sm:$0xff] %v534_v6 }
  0xa1   : > { %537 = vst [vmem:[%s3221_s27 + $0x138] sm:$0xff] %v536_v7 }
  0xa2   : > { %539 = vst [vmem:[%s3221_s27 + $0x140] sm:$0xff] %v538_v8 }
  0xa3   : > { %541 = vst [vmem:[%s3221_s27 + $0x148] sm:$0xff] %v540_v9 }
  0xa4   : > { %543 = vst [vmem:[%s3221_s27 + $0x150] sm:$0xff] %v542_v10 }
  0xa5   : > { %545 = vst [vmem:[%s3221_s27 + $0x158] sm:$0xff] %v544_v11 }
  0xa6   : > { %547 = vst [vmem:[%s3221_s27 + $0x160] sm:$0xff] %v546_v12 }
  0xa7   : > { %549 = vst [vmem:[%s3221_s27 + $0x168] sm:$0xff] %v548_v13 }
  0xa8   : > { %551 = vst [vmem:[%s3221_s27 + $0x170] sm:$0xff] %v550_v14 }
  0xa9   : > { %553 = vst [vmem:[%s3221_s27 + $0x178] sm:$0xff] %v552_v15 }
  0xaa   : > { %555 = vst [vmem:[%s3221_s27 + $0x180] sm:$0xff] %v554_v16 }
  0xab   : > { %557 = vst [vmem:[%s3221_s27 + $0x188] sm:$0xff] %v556_v17 }
  0xac   : > { %559 = vst [vmem:[%s3221_s27 + $0x190] sm:$0xff] %v558_v18 }
  0xad   : > { %561 = vst [vmem:[%s3221_s27 + $0x198] sm:$0xff] %v560_v19 }
  0xae   : > { %563 = vst [vmem:[%s3221_s27 + $0x1a0] sm:$0xff] %v562_v20 }
  0xaf   : > { %565 = vst [vmem:[%s3221_s27 + $0x1a8] sm:$0xff] %v564_v21 }
  0xb0   : > { %567 = vst [vmem:[%s3221_s27 + $0x1b0] sm:$0xff] %v566_v22 }
  0xb1   : > { %569 = vst [vmem:[%s3221_s27 + $0x1b8] sm:$0xff] %v568_v23 }
  0xb2   : > { %571 = vst [vmem:[%s3221_s27 + $0x1c0] sm:$0xff] %v570_v24 }
  0xb3   : > { %573 = vst [vmem:[%s3221_s27 + $0x1c8] sm:$0xff] %v572_v25 }
  0xb4   : > { %575 = vst [vmem:[%s3221_s27 + $0x1d0] sm:$0xff] %v574_v26 }
  0xb5   : > { %577 = vst [vmem:[%s3221_s27 + $0x1d8] sm:$0xff] %v576_v27 }
  0xb6   : > { %579 = vst [vmem:[%s3221_s27 + $0x1e0] sm:$0xff] %v578_v28 }
  0xb7   : > { %581 = vst [vmem:[%s3221_s27 + $0x1e8] sm:$0xff] %v580_v29 }
  0xb8   : > { %583 = vst [vmem:[%s3221_s27 + $0x1f0] sm:$0xff] %v582_v30 }
  0xb9   : > { %585 = vst [vmem:[%s3221_s27 + $0x1f8] sm:$0xff] %v584_v31 }
  0xba   : > { %587 = vst [vmem:[%s3221_s27 + $0x200] sm:$0xff] %v586_v32 }
  0xbb   : > { %589 = vst [vmem:[%s3221_s27 + $0x208] sm:$0xff] %v588_v33 }
  0xbc   : > { %591 = vst [vmem:[%s3221_s27 + $0x210] sm:$0xff] %v590_v34 }
  0xbd   : > { %593 = vst [vmem:[%s3221_s27 + $0x218] sm:$0xff] %v592_v35 }
  0xbe   : > { %595 = vst [vmem:[%s3221_s27 + $0x220] sm:$0xff] %v594_v36 }
  0xbf   : > { %597 = vst [vmem:[%s3221_s27 + $0x228] sm:$0xff] %v596_v37 }
  0xc0   : > { %599 = vst [vmem:[%s3221_s27 + $0x230] sm:$0xff] %v598_v38 }
  0xc1   : > { %601 = vst [vmem:[%s3221_s27 + $0x238] sm:$0xff] %v600_v39 }
  0xc2   : > { %603 = vst [vmem:[%s3221_s27 + $0x240] sm:$0xff] %v602_v40 }
  0xc3   : > { %605 = vst [vmem:[%s3221_s27 + $0x248] sm:$0xff] %v604_v41 }
  0xc4   : > { %607 = vst [vmem:[%s3221_s27 + $0x250] sm:$0xff] %v606_v42 }
  0xc5   : > { %609 = vst [vmem:[%s3221_s27 + $0x258] sm:$0xff] %v608_v43 }
  0xc6   : > { %611 = vst [vmem:[%s3221_s27 + $0x260] sm:$0xff] %v610_v44 }
  0xc7   : > { %613 = vst [vmem:[%s3221_s27 + $0x268] sm:$0xff] %v612_v45 }
  0xc8   : > { %615 = vst [vmem:[%s3221_s27 + $0x270] sm:$0xff] %v614_v46 }
  0xc9   : > { %617 = vst [vmem:[%s3221_s27 + $0x278] sm:$0xff] %v616_v47 }
  0xca   : > { %619 = vst [vmem:[%s3221_s27 + $0x280] sm:$0xff] %v618_v48 }
  0xcb   : > { %621 = vst [vmem:[%s3221_s27 + $0x288] sm:$0xff] %v620_v49 }
  0xcc   : > { %623 = vst [vmem:[%s3221_s27 + $0x290] sm:$0xff] %v622_v50 }
  0xcd   : > { %625 = vst [vmem:[%s3221_s27 + $0x298] sm:$0xff] %v624_v51 }
  0xce   : > { %627 = vst [vmem:[%s3221_s27 + $0x2a0] sm:$0xff] %v626_v52 }
  0xcf   : > { %629 = vst [vmem:[%s3221_s27 + $0x2a8] sm:$0xff] %v628_v53 }
  0xd0   : > { %631 = vst [vmem:[%s3221_s27 + $0x2b0] sm:$0xff] %v630_v54 }
  0xd1   : > { %633 = vst [vmem:[%s3221_s27 + $0x2b8] sm:$0xff] %v632_v55 }
  0xd2   : > { %635 = vst [vmem:[%s3221_s27 + $0x2c0] sm:$0xff] %v634_v56 }
  0xd3   : > { %637 = vst [vmem:[%s3221_s27 + $0x2c8] sm:$0xff] %v636_v57 }
  0xd4   : > { %639 = vst [vmem:[%s3221_s27 + $0x2d0] sm:$0xff] %v638_v58 }
  0xd5   : > { %641 = vst [vmem:[%s3221_s27 + $0x2d8] sm:$0xff] %v640_v59 }
  0xd6   : > { %643 = vst [vmem:[%s3221_s27 + $0x2e0] sm:$0xff] %v642_v60 }
  0xd7   : > { %645 = vst [vmem:[%s3221_s27 + $0x2e8] sm:$0xff] %v644_v61 }
  0xd8   : > { %647 = vst [vmem:[%s3221_s27 + $0x2f0] sm:$0xff] %v646_v62 }
  0xd9   : > { %649 = vst [vmem:[%s3221_s27 + $0x2f8] sm:$0xff] %v648_v63 }
  0xda PF: > { %p2545_p7 = scmp.ge.s32.totalorder %s2918_s24, 1  ;;  %p654_p8 = scmp.lt.s32.totalorder %s2918_s24, 9 }
  0xdc   : > { %p655_p9 = pnand %p2545_p7, %p654_p8 }
  0xdd   : > { %s661_s29 = sand.u32 (!%p655_p9), 1, %s2894_s18   ;;  %p722_p10 = scmp.lt.s32.totalorder (!%p655_p9), %s2902_s20, 1 }
  0xde   : > { %658 = sbr.rel (%p655_p9) target bundleno = 477 (0x1dd), region = 74  ;;  %p734_p11 = scmp.lt.s32.totalorder (!%p655_p9), %s2906_s21, 3 }
  0xdf   : > { %s2804_s6 = smul.u32 (!%p655_p9), 768, %s661_s29 }
  0xe1   : > { %s3431_s18 = scalar_lea.vmem (!%p655_p9), [#allocation2], %s2804_s6  ;;  %s3436_s14 = scalar_lea.vmem (!%p655_p9), [#allocation3], %s2804_s6 }
  0xe3   : > { %s3762_s20 = smov (!%p722_p10, %s2902_s20), 1  ;;  %v752_v1 = vld [vmem:[%s3431_s18] sm:$0xff]  ;;  %v753_v2 = vld [vmem:[%s3431_s18 + $0x8] sm:$0xff]  ;;  %v754_v7 = vld [vmem:[%s3431_s18 + $0x10] sm:$0xff]  ;;  %s3764_s21 = smov (!%p734_p11, %s2906_s21), 3 }
  0xe4   : > { %s2805_s7 = smul.u32 96, %s3762_s20  ;;  %v755_v4 = vld [vmem:[%s3436_s14] sm:$0xff]  ;;  %v756_v8 = vld [vmem:[%s3436_s14 + $0x8] sm:$0xff]  ;;  %v757_v13 = vld [vmem:[%s3436_s14 + $0x10] sm:$0xff] }
  0xe5   : > { %v2552_v23 = vld [vmem:[%s3431_s18 + $0x18] sm:$0xff]  ;;  %v2553_v27 = vld [vmem:[%s3431_s18 + $0x20] sm:$0xff]  ;;  %v2554_v34 = vld [vmem:[%s3431_s18 + $0x28] sm:$0xff]  ;;  %s2806_s15 = smul.u32 3, %s3764_s21 }
  0xe6   : > { %s3423_s10 = scalar_lea.vmem %s3742_s0, %s2805_s7  ;;  %s3428_s13 = scalar_lea.vmem %s3743_s1, %s2805_s7  ;;  %v2555_v28 = vld [vmem:[%s3436_s14 + $0x18] sm:$0xff]  ;;  %v2556_v29 = vld [vmem:[%s3436_s14 + $0x20] sm:$0xff]  ;;  %v2557_v35 = vld [vmem:[%s3436_s14 + $0x28] sm:$0xff] }
  0xe7   : > { %v750_v0 = vld [vmem:[%s3423_s10] ss:$8 sm:$0x7]  ;;  %v2550_v15 = vld [vmem:[%s3423_s10 + $0x1] ss:$8 sm:$0x7] }
  0xe8   : > { %v751_v3 = vld [vmem:[%s3428_s13] ss:$8 sm:$0x7]  ;;  %v759_v5 = vperm.slane %v750_v0, 0  ;;  %v760_v6 = vperm.slane %v750_v0, 1  ;;  %v761_v9 = vperm.slane %v750_v0, 2 }
  0xe9   : > { %v769_v10 = vperm.slane %v751_v3, 0  ;;  %v770_v11 = vperm.slane %v751_v3, 1  ;;  %v771_v12 = vperm.slane %v751_v3, 2  ;;  %v2551_v22 = vld [vmem:[%s3428_s13 + $0x1] ss:$8 sm:$0x7] }
  0xea   : > { %v765_v14 = vmul.f32 %v759_v5, %v752_v1  ;;  %v3443_v16 = vmul.f32 %v760_v6, %v753_v2  ;;  %v3445_v18 = vmul.f32 %v761_v9, %v754_v7  ;;  %v784_v20 = vmul.f32 %v759_v5, %v755_v4  ;;  %v2558_v45 = vld [vmem:[%s3423_s10 + $0x2] ss:$8 sm:$0x7]  ;;  %v2561_v0 = vld [vmem:[%s3431_s18 + $0x38] sm:$0xff]  ;;  %s2807_s16 = smul.u32 12, %s3762_s20 }
  0xeb   : > { %v775_v17 = vmul.f32 %v769_v10, %v755_v4  ;;  %v3447_v19 = vmul.f32 %v770_v11, %v756_v8  ;;  %v785_v21 = vmul.f32 %v760_v6, %v756_v8  ;;  %v3451_v24 = vmul.f32 %v771_v12, %v757_v13  ;;  %v2560_v56 = vld [vmem:[%s3431_s18 + $0x30] sm:$0xff]  ;;  %v2564_v6 = vld [vmem:[%s3436_s14 + $0x38] sm:$0xff] }
  0xec   : > { %v786_v25 = vmul.f32 %v761_v9, %v757_v13  ;;  %v787_v26 = vmul.f32 %v769_v10, %v752_v1  ;;  %v809_v30 = vperm.slane %v2550_v15, 0  ;;  %v788_v32 = vmul.f32 %v770_v11, %v753_v2  ;;  %v2559_v63 = vld [vmem:[%s3428_s13 + $0x2] ss:$8 sm:$0x7]  ;;  %s3712_s20 = sadd.s32 %s2807_s16, %s2806_s15 }
  0xed   : > { %v778_v31 = vsub.f32 %v765_v14, %v775_v17  ;;  %v789_v33 = vmul.f32 %v771_v12, %v754_v7  ;;  %v810_v36 = vperm.slane %v2550_v15, 1  ;;  %v811_v37 = vperm.slane %v2550_v15, 2  ;;  %v2562_v1 = vld [vmem:[%s3431_s18 + $0x40] sm:$0xff]  ;;  %v2563_v5 = vld [vmem:[%s3436_s14 + $0x30] sm:$0xff]  ;;  %s2548_s17 = sshll.u32 %s3712_s20, 3 }
  0xee   : > { %v815_v38 = vmul.f32 %v2552_v23, %v809_v30  ;;  %v819_v39 = vperm.slane %v2551_v22, 0  ;;  %v820_v40 = vperm.slane %v2551_v22, 1  ;;  %v821_v42 = vperm.slane %v2551_v22, 2  ;;  %v2565_v7 = vld [vmem:[%s3436_s14 + $0x40] sm:$0xff]  ;;  %s740_s27 = scalar_lea.vmem %s3746_s4, %s2548_s17  ;;  %s749_s7 = scalar_lea.vmem %s3747_s5, %s2548_s17 }
  0xef   : > { %v816_v41 = vmul.f32 %v2553_v27, %v810_v36  ;;  %v834_v43 = vmul.f32 %v2555_v28, %v809_v30  ;;  %v835_v44 = vmul.f32 %v2556_v29, %v810_v36  ;;  %v817_v46 = vmul.f32 %v2554_v34, %v811_v37  ;;  %v2566_v17 = vld [vmem:[%s3423_s10 + $0x3] ss:$8 sm:$0x7]  ;;  %v2570_v36 = vld [vmem:[%s3431_s18 + $0x58] sm:$0xff] }
  0xf0   : > { %v825_v47 = vmul.f32 %v2555_v28, %v819_v39  ;;  %v826_v48 = vmul.f32 %v2556_v29, %v820_v40  ;;  %v836_v49 = vmul.f32 %v2557_v35, %v811_v37  ;;  %v827_v50 = vmul.f32 %v2557_v35, %v821_v42  ;;  %v2569_v35 = vld [vmem:[%s3431_s18 + $0x50] sm:$0xff] }
  0xf1   : > { %v837_v51 = vmul.f32 %v2552_v23, %v819_v39  ;;  %v838_v52 = vmul.f32 %v2553_v27, %v820_v40  ;;  %v839_v53 = vmul.f32 %v2554_v34, %v821_v42  ;;  %v779_v54 = vsub.f32 %v3443_v16, %v3447_v19  ;;  %v2568_v34 = vld [vmem:[%s3431_s18 + $0x48] sm:$0xff] }
  0xf2   : > { %v828_v55 = vsub.f32 %v815_v38, %v825_v47  ;;  %v859_v57 = vperm.slane %v2558_v45, 0  ;;  %v860_v58 = vperm.slane %v2558_v45, 1  ;;  %v780_v59 = vsub.f32 %v3445_v18, %v3451_v24  ;;  %v2567_v40 = vld [vmem:[%s3428_s13 + $0x3] ss:$8 sm:$0x7] }
  0xf3   : > { %v790_v60 = vadd.f32 %v787_v26, %v784_v20  ;;  %v791_v61 = vadd.f32 %v788_v32, %v785_v21  ;;  %v792_v62 = vadd.f32 %v789_v33, %v786_v25  ;;  %v829_v2 = vsub.f32 %v816_v41, %v826_v48  ;;  %v2571_v41 = vld [vmem:[%s3436_s14 + $0x48] sm:$0xff]  ;;  %v2572_v47 = vld [vmem:[%s3436_s14 + $0x50] sm:$0xff]  ;;  %v2573_v48 = vld [vmem:[%s3436_s14 + $0x58] sm:$0xff] }
  0xf4   : > { %v830_v3 = vsub.f32 %v817_v46, %v827_v50  ;;  %v840_v4 = vadd.f32 %v837_v51, %v834_v43  ;;  %v861_v8 = vperm.slane %v2558_v45, 2  ;;  %v831_v9 = vadd.f32 %v828_v55, %v778_v31 }
  0xf5   : > { %v841_v10 = vadd.f32 %v838_v52, %v835_v44  ;;  %v842_v11 = vadd.f32 %v839_v53, %v836_v49  ;;  %v865_v12 = vmul.f32 %v2560_v56, %v859_v57  ;;  %v866_v13 = vmul.f32 %v2561_v0, %v860_v58  ;;  %v2574_v49 = vld [vmem:[%s3423_s10 + $0x4] ss:$8 sm:$0x7] }
  0xf6   : > { %v867_v14 = vmul.f32 %v2562_v1, %v861_v8  ;;  %v869_v15 = vperm.slane %v2559_v63, 0  ;;  %v870_v16 = vperm.slane %v2559_v63, 1  ;;  %v871_v18 = vperm.slane %v2559_v63, 2 }
  0xf7   : > { %v884_v19 = vmul.f32 %v2563_v5, %v859_v57  ;;  %v885_v20 = vmul.f32 %v2564_v6, %v860_v58  ;;  %v886_v21 = vmul.f32 %v2565_v7, %v861_v8  ;;  %v909_v28 = vperm.slane %v2566_v17, 0 }
  0xf8   : > { %v875_v22 = vmul.f32 %v2563_v5, %v869_v15  ;;  %v876_v23 = vmul.f32 %v2564_v6, %v870_v16  ;;  %v887_v24 = vmul.f32 %v2560_v56, %v869_v15  ;;  %v888_v25 = vmul.f32 %v2561_v0, %v870_v16  ;;  %v2577_v6 = vld [vmem:[%s3431_s18 + $0x68] sm:$0xff] }
  0xf9   : > { %v877_v26 = vmul.f32 %v2565_v7, %v871_v18  ;;  %v889_v27 = vmul.f32 %v2562_v1, %v871_v18  ;;  %v910_v29 = vperm.slane %v2566_v17, 1  ;;  %v832_v30 = vadd.f32 %v829_v2, %v779_v54  ;;  %v2576_v2 = vld [vmem:[%s3431_s18 + $0x60] sm:$0xff]  ;;  %v2580_v18 = vld [vmem:[%s3436_s14 + $0x68] sm:$0xff] }
  0xfa   : > { %v833_v31 = vadd.f32 %v830_v3, %v780_v59  ;;  %v843_v32 = vadd.f32 %v840_v4, %v790_v60  ;;  %v878_v33 = vsub.f32 %v865_v12, %v875_v22  ;;  %v844_v37 = vadd.f32 %v841_v10, %v791_v61  ;;  %v2575_v12 = vld [vmem:[%s3428_s13 + $0x4] ss:$8 sm:$0x7] }
  0xfb   : > { %v845_v38 = vadd.f32 %v842_v11, %v792_v62  ;;  %v879_v39 = vsub.f32 %v866_v13, %v876_v23  ;;  %v911_v42 = vperm.slane %v2566_v17, 2  ;;  %v880_v43 = vsub.f32 %v867_v14, %v877_v26  ;;  %v2578_v13 = vld [vmem:[%s3431_s18 + $0x70] sm:$0xff]  ;;  %v2579_v17 = vld [vmem:[%s3436_s14 + $0x60] sm:$0xff] }
  0xfc   : > { %v890_v44 = vadd.f32 %v887_v24, %v884_v19  ;;  %v891_v45 = vadd.f32 %v888_v25, %v885_v20  ;;  %v892_v46 = vadd.f32 %v889_v27, %v886_v21  ;;  %v881_v50 = vadd.f32 %v878_v33, %v831_v9  ;;  %v2581_v19 = vld [vmem:[%s3436_s14 + $0x70] sm:$0xff] }
  0xfd   : > { %v915_v51 = vmul.f32 %v2568_v34, %v909_v28  ;;  %v916_v52 = vmul.f32 %v2569_v35, %v910_v29  ;;  %v917_v53 = vmul.f32 %v2570_v36, %v911_v42  ;;  %v919_v54 = vperm.slane %v2567_v40, 0 }
  0xfe   : > { %v920_v55 = vperm.slane %v2567_v40, 1  ;;  %v921_v56 = vperm.slane %v2567_v40, 2  ;;  %v934_v57 = vmul.f32 %v2571_v41, %v909_v28  ;;  %v935_v58 = vmul.f32 %v2572_v47, %v910_v29  ;;  %v2582_v29 = vld [vmem:[%s3423_s10 + $0x5] ss:$8 sm:$0x7] }
  0xff   : > { %v936_v59 = vmul.f32 %v2573_v48, %v911_v42  ;;  %v959_v60 = vperm.slane %v2574_v49, 0  ;;  %v960_v61 = vperm.slane %v2574_v49, 1  ;;  %v925_v62 = vmul.f32 %v2571_v41, %v919_v54 }
 0x100   : > { %v926_v63 = vmul.f32 %v2572_v47, %v920_v55  ;;  %v927_v0 = vmul.f32 %v2573_v48, %v921_v56  ;;  %v937_v1 = vmul.f32 %v2568_v34, %v919_v54  ;;  %v882_v3 = vadd.f32 %v879_v39, %v832_v30  ;;  %v2585_v47 = vld [vmem:[%s3431_s18 + $0x80] sm:$0xff]  ;;  %v2586_v48 = vld [vmem:[%s3431_s18 + $0x88] sm:$0xff] }
 0x101   : > { %v938_v4 = vmul.f32 %v2569_v35, %v920_v55  ;;  %v939_v5 = vmul.f32 %v2570_v36, %v921_v56  ;;  %v961_v7 = vperm.slane %v2574_v49, 2  ;;  %v883_v8 = vadd.f32 %v880_v43, %v833_v31 }
 0x102   : > { %v893_v9 = vadd.f32 %v890_v44, %v843_v32  ;;  %v894_v10 = vadd.f32 %v891_v45, %v844_v37  ;;  %v928_v11 = vsub.f32 %v915_v51, %v925_v62  ;;  %v895_v14 = vadd.f32 %v892_v46, %v845_v38  ;;  %v2584_v46 = vld [vmem:[%s3431_s18 + $0x78] sm:$0xff] }
 0x103   : > { %v929_v15 = vsub.f32 %v916_v52, %v926_v63  ;;  %v930_v16 = vsub.f32 %v917_v53, %v927_v0  ;;  %v965_v20 = vmul.f32 %v2576_v2, %v959_v60  ;;  %v940_v21 = vadd.f32 %v937_v1, %v934_v57  ;;  %v2583_v52 = vld [vmem:[%s3428_s13 + $0x5] ss:$8 sm:$0x7]  ;;  %v2587_v53 = vld [vmem:[%s3436_s14 + $0x78] sm:$0xff] }
 0x104   : > { %v941_v22 = vadd.f32 %v938_v4, %v935_v58  ;;  %v942_v23 = vadd.f32 %v939_v5, %v936_v59  ;;  %v966_v24 = vmul.f32 %v2577_v6, %v960_v61  ;;  %v931_v25 = vadd.f32 %v928_v11, %v881_v50  ;;  %v2588_v59 = vld [vmem:[%s3436_s14 + $0x80] sm:$0xff] }
 0x105   : > { %v967_v26 = vmul.f32 %v2578_v13, %v961_v7  ;;  %v969_v27 = vperm.slane %v2575_v12, 0  ;;  %v970_v28 = vperm.slane %v2575_v12, 1  ;;  %v971_v30 = vperm.slane %v2575_v12, 2 }
 0x106   : > { %v984_v31 = vmul.f32 %v2579_v17, %v959_v60  ;;  %v985_v32 = vmul.f32 %v2580_v18, %v960_v61  ;;  %v986_v33 = vmul.f32 %v2581_v19, %v961_v7  ;;  %v1009_v40 = vperm.slane %v2582_v29, 0  ;;  %v2589_v60 = vld [vmem:[%s3436_s14 + $0x88] sm:$0xff] }
 0x107   : > { %v975_v34 = vmul.f32 %v2579_v17, %v969_v27  ;;  %v976_v35 = vmul.f32 %v2580_v18, %v970_v28  ;;  %v987_v36 = vmul.f32 %v2576_v2, %v969_v27  ;;  %v988_v37 = vmul.f32 %v2577_v6, %v970_v28  ;;  %v2590_v61 = vld [vmem:[%s3423_s10 + $0x6] ss:$8 sm:$0x7]  ;;  %v2593_v18 = vld [vmem:[%s3431_s18 + $0x98] sm:$0xff] }
 0x108   : > { %v977_v38 = vmul.f32 %v2581_v19, %v971_v30  ;;  %v989_v39 = vmul.f32 %v2578_v13, %v971_v30  ;;  %v1010_v41 = vperm.slane %v2582_v29, 1  ;;  %v932_v42 = vadd.f32 %v929_v15, %v882_v3  ;;  %v2596_v30 = vld [vmem:[%s3436_s14 + $0x98] sm:$0xff] }
 0x109   : > { %v933_v43 = vadd.f32 %v930_v16, %v883_v8  ;;  %v943_v44 = vadd.f32 %v940_v21, %v893_v9  ;;  %v978_v45 = vsub.f32 %v965_v20, %v975_v34  ;;  %v944_v49 = vadd.f32 %v941_v22, %v894_v10 }
 0x10a   : > { %v945_v50 = vadd.f32 %v942_v23, %v895_v14  ;;  %v979_v51 = vsub.f32 %v966_v24, %v976_v35  ;;  %v1011_v54 = vperm.slane %v2582_v29, 2  ;;  %v980_v55 = vsub.f32 %v967_v26, %v977_v38  ;;  %v2592_v14 = vld [vmem:[%s3431_s18 + $0x90] sm:$0xff] }
 0x10b   : > { %v990_v56 = vadd.f32 %v987_v36, %v984_v31  ;;  %v991_v57 = vadd.f32 %v988_v37, %v985_v32  ;;  %v992_v58 = vadd.f32 %v989_v39, %v986_v33  ;;  %v981_v62 = vadd.f32 %v978_v45, %v931_v25  ;;  %v2591_v24 = vld [vmem:[%s3428_s13 + $0x6] ss:$8 sm:$0x7] }
 0x10c   : > { %v1015_v63 = vmul.f32 %v2584_v46, %v1009_v40  ;;  %v1016_v0 = vmul.f32 %v2585_v47, %v1010_v41  ;;  %v1017_v1 = vmul.f32 %v2586_v48, %v1011_v54  ;;  %v1019_v2 = vperm.slane %v2583_v52, 0  ;;  %v2594_v25 = vld [vmem:[%s3431_s18 + $0xa0] sm:$0xff]  ;;  %v2595_v29 = vld [vmem:[%s3436_s14 + $0x90] sm:$0xff] }
 0x10d   : > { %v1020_v3 = vperm.slane %v2583_v52, 1  ;;  %v1021_v4 = vperm.slane %v2583_v52, 2  ;;  %v1034_v5 = vmul.f32 %v2587_v53, %v1009_v40  ;;  %v1035_v6 = vmul.f32 %v2588_v59, %v1010_v41  ;;  %v2597_v31 = vld [vmem:[%s3436_s14 + $0xa0] sm:$0xff] }
 0x10e   : > { %v1036_v7 = vmul.f32 %v2589_v60, %v1011_v54  ;;  %v1059_v8 = vperm.slane %v2590_v61, 0  ;;  %v1060_v9 = vperm.slane %v2590_v61, 1  ;;  %v1025_v10 = vmul.f32 %v2587_v53, %v1019_v2  ;;  %v2598_v41 = vld [vmem:[%s3423_s10 + $0x7] ss:$8 sm:$0x7] }
 0x10f   : > { %v1026_v11 = vmul.f32 %v2588_v59, %v1020_v3  ;;  %v1027_v12 = vmul.f32 %v2589_v60, %v1021_v4  ;;  %v1037_v13 = vmul.f32 %v2584_v46, %v1019_v2  ;;  %v982_v15 = vadd.f32 %v979_v51, %v932_v42  ;;  %v2601_v59 = vld [vmem:[%s3431_s18 + $0xb0] sm:$0xff]  ;;  %v2602_v60 = vld [vmem:[%s3431_s18 + $0xb8] sm:$0xff] }
 0x110   : > { %v1038_v16 = vmul.f32 %v2585_v47, %v1020_v3  ;;  %v1039_v17 = vmul.f32 %v2586_v48, %v1021_v4  ;;  %v1061_v19 = vperm.slane %v2590_v61, 2  ;;  %v983_v20 = vadd.f32 %v980_v55, %v933_v43 }
 0x111   : > { %v993_v21 = vadd.f32 %v990_v56, %v943_v44  ;;  %v994_v22 = vadd.f32 %v991_v57, %v944_v49  ;;  %v1028_v23 = vsub.f32 %v1015_v63, %v1025_v10  ;;  %v995_v26 = vadd.f32 %v992_v58, %v945_v50  ;;  %v2600_v58 = vld [vmem:[%s3431_s18 + $0xa8] sm:$0xff] }
 0x112   : > { %v1029_v27 = vsub.f32 %v1016_v0, %v1026_v11  ;;  %v1030_v28 = vsub.f32 %v1017_v1, %v1027_v12  ;;  %v1065_v32 = vmul.f32 %v2592_v14, %v1059_v8  ;;  %v1040_v33 = vadd.f32 %v1037_v13, %v1034_v5  ;;  %v2599_v0 = vld [vmem:[%s3428_s13 + $0x7] ss:$8 sm:$0x7] }
 0x113   : > { %v1041_v34 = vadd.f32 %v1038_v16, %v1035_v6  ;;  %v1042_v35 = vadd.f32 %v1039_v17, %v1036_v7  ;;  %v1066_v36 = vmul.f32 %v2593_v18, %v1060_v9  ;;  %v1031_v37 = vadd.f32 %v1028_v23, %v981_v62  ;;  %v2603_v1 = vld [vmem:[%s3436_s14 + $0xa8] sm:$0xff]  ;;  %v2604_v7 = vld [vmem:[%s3436_s14 + $0xb0] sm:$0xff] }
 0x114   : > { %v1067_v38 = vmul.f32 %v2594_v25, %v1061_v19  ;;  %v1069_v39 = vperm.slane %v2591_v24, 0  ;;  %v1070_v40 = vperm.slane %v2591_v24, 1  ;;  %v1071_v42 = vperm.slane %v2591_v24, 2 }
 0x115   : > { %v1084_v43 = vmul.f32 %v2595_v29, %v1059_v8  ;;  %v1085_v44 = vmul.f32 %v2596_v30, %v1060_v9  ;;  %v1086_v45 = vmul.f32 %v2597_v31, %v1061_v19  ;;  %v1109_v52 = vperm.slane %v2598_v41, 0  ;;  %v2605_v8 = vld [vmem:[%s3436_s14 + $0xb8] sm:$0xff] }
 0x116   : > { %v1075_v46 = vmul.f32 %v2595_v29, %v1069_v39  ;;  %v1076_v47 = vmul.f32 %v2596_v30, %v1070_v40  ;;  %v1087_v48 = vmul.f32 %v2592_v14, %v1069_v39  ;;  %v1088_v49 = vmul.f32 %v2593_v18, %v1070_v40  ;;  %v2606_v9 = vld [vmem:[%s3423_s10 + $0x18] ss:$8 sm:$0x7] }
 0x117   : > { %v1077_v50 = vmul.f32 %v2597_v31, %v1071_v42  ;;  %v1089_v51 = vmul.f32 %v2594_v25, %v1071_v42  ;;  %v1110_v53 = vperm.slane %v2598_v41, 1  ;;  %v1032_v54 = vadd.f32 %v1029_v27, %v982_v15  ;;  %v2609_v30 = vld [vmem:[%s3431_s18 + $0xc8] sm:$0xff] }
 0x118   : > { %v1033_v55 = vadd.f32 %v1030_v28, %v983_v20  ;;  %v1043_v56 = vadd.f32 %v1040_v33, %v993_v21  ;;  %v1078_v57 = vsub.f32 %v1065_v32, %v1075_v46  ;;  %v1044_v61 = vadd.f32 %v1041_v34, %v994_v22  ;;  %v2612_v42 = vld [vmem:[%s3436_s14 + $0xc8] sm:$0xff] }
 0x119   : > { %v1045_v62 = vadd.f32 %v1042_v35, %v995_v26  ;;  %v1079_v63 = vsub.f32 %v1066_v36, %v1076_v47  ;;  %v1111_v2 = vperm.slane %v2598_v41, 2  ;;  %v1080_v3 = vsub.f32 %v1067_v38, %v1077_v50  ;;  %v2608_v26 = vld [vmem:[%s3431_s18 + $0xc0] sm:$0xff] }
 0x11a   : > { %v1090_v4 = vadd.f32 %v1087_v48, %v1084_v43  ;;  %v1091_v5 = vadd.f32 %v1088_v49, %v1085_v44  ;;  %v1092_v6 = vadd.f32 %v1089_v51, %v1086_v45  ;;  %v1081_v10 = vadd.f32 %v1078_v57, %v1031_v37  ;;  %v2607_v36 = vld [vmem:[%s3428_s13 + $0x18] ss:$8 sm:$0x7]  ;;  %v2610_v37 = vld [vmem:[%s3431_s18 + $0xd0] sm:$0xff] }
 0x11b   : > { %v1115_v11 = vmul.f32 %v2600_v58, %v1109_v52  ;;  %v1116_v12 = vmul.f32 %v2601_v59, %v1110_v53  ;;  %v1117_v13 = vmul.f32 %v2602_v60, %v1111_v2  ;;  %v1119_v14 = vperm.slane %v2599_v0, 0  ;;  %v2611_v41 = vld [vmem:[%s3436_s14 + $0xc0] sm:$0xff]  ;;  %v2613_v43 = vld [vmem:[%s3436_s14 + $0xd0] sm:$0xff] }
 0x11c   : > { %v1120_v15 = vperm.slane %v2599_v0, 1  ;;  %v1121_v16 = vperm.slane %v2599_v0, 2  ;;  %v1134_v17 = vmul.f32 %v2603_v1, %v1109_v52  ;;  %v1135_v18 = vmul.f32 %v2604_v7, %v1110_v53  ;;  %v2614_v53 = vld [vmem:[%s3423_s10 + $0x19] ss:$8 sm:$0x7] }
 0x11d   : > { %v1136_v19 = vmul.f32 %v2605_v8, %v1111_v2  ;;  %v1159_v20 = vperm.slane %v2606_v9, 0  ;;  %v1160_v21 = vperm.slane %v2606_v9, 1  ;;  %v1125_v22 = vmul.f32 %v2603_v1, %v1119_v14 }
 0x11e   : > { %v1126_v23 = vmul.f32 %v2604_v7, %v1120_v15  ;;  %v1127_v24 = vmul.f32 %v2605_v8, %v1121_v16  ;;  %v1137_v25 = vmul.f32 %v2600_v58, %v1119_v14  ;;  %v1082_v27 = vadd.f32 %v1079_v63, %v1032_v54  ;;  %v2617_v7 = vld [vmem:[%s3431_s18 + $0xe0] sm:$0xff]  ;;  %v2618_v8 = vld [vmem:[%s3431_s18 + $0xe8] sm:$0xff] }
 0x11f   : > { %v1138_v28 = vmul.f32 %v2601_v59, %v1120_v15  ;;  %v1139_v29 = vmul.f32 %v2602_v60, %v1121_v16  ;;  %v1161_v31 = vperm.slane %v2606_v9, 2  ;;  %v1083_v32 = vadd.f32 %v1080_v3, %v1033_v55 }
 0x120   : > { %v1093_v33 = vadd.f32 %v1090_v4, %v1043_v56  ;;  %v1094_v34 = vadd.f32 %v1091_v5, %v1044_v61  ;;  %v1128_v35 = vsub.f32 %v1115_v11, %v1125_v22  ;;  %v1095_v38 = vadd.f32 %v1092_v6, %v1045_v62  ;;  %v2616_v6 = vld [vmem:[%s3431_s18 + $0xd8] sm:$0xff] }
 0x121   : > { %v1129_v39 = vsub.f32 %v1116_v12, %v1126_v23  ;;  %v1130_v40 = vsub.f32 %v1117_v13, %v1127_v24  ;;  %v1165_v44 = vmul.f32 %v2608_v26, %v1159_v20  ;;  %v1140_v45 = vadd.f32 %v1137_v25, %v1134_v17  ;;  %v2615_v12 = vld [vmem:[%s3428_s13 + $0x19] ss:$8 sm:$0x7] }
 0x122   : > { %v1141_v46 = vadd.f32 %v1138_v28, %v1135_v18  ;;  %v1142_v47 = vadd.f32 %v1139_v29, %v1136_v19  ;;  %v1166_v48 = vmul.f32 %v2609_v30, %v1160_v21  ;;  %v1131_v49 = vadd.f32 %v1128_v35, %v1081_v10  ;;  %v2619_v13 = vld [vmem:[%s3436_s14 + $0xd8] sm:$0xff]  ;;  %v2620_v19 = vld [vmem:[%s3436_s14 + $0xe0] sm:$0xff] }
 0x123   : > { %v1167_v50 = vmul.f32 %v2610_v37, %v1161_v31  ;;  %v1169_v51 = vperm.slane %v2607_v36, 0  ;;  %v1170_v52 = vperm.slane %v2607_v36, 1  ;;  %v1171_v54 = vperm.slane %v2607_v36, 2 }
 0x124   : > { %v1184_v55 = vmul.f32 %v2611_v41, %v1159_v20  ;;  %v1185_v56 = vmul.f32 %v2612_v42, %v1160_v21  ;;  %v1186_v57 = vmul.f32 %v2613_v43, %v1161_v31  ;;  %v1209_v0 = vperm.slane %v2614_v53, 0  ;;  %v2621_v20 = vld [vmem:[%s3436_s14 + $0xe8] sm:$0xff] }
 0x125   : > { %v1175_v58 = vmul.f32 %v2611_v41, %v1169_v51  ;;  %v1176_v59 = vmul.f32 %v2612_v42, %v1170_v52  ;;  %v1187_v60 = vmul.f32 %v2608_v26, %v1169_v51  ;;  %v1188_v61 = vmul.f32 %v2609_v30, %v1170_v52  ;;  %v2622_v21 = vld [vmem:[%s3423_s10 + $0x1a] ss:$8 sm:$0x7] }
 0x126   : > { %v1177_v62 = vmul.f32 %v2613_v43, %v1171_v54  ;;  %v1189_v63 = vmul.f32 %v2610_v37, %v1171_v54  ;;  %v1210_v1 = vperm.slane %v2614_v53, 1  ;;  %v1132_v2 = vadd.f32 %v1129_v39, %v1082_v27  ;;  %v2625_v42 = vld [vmem:[%s3431_s18 + $0xf8] sm:$0xff] }
 0x127   : > { %v1133_v3 = vadd.f32 %v1130_v40, %v1083_v32  ;;  %v1143_v4 = vadd.f32 %v1140_v45, %v1093_v33  ;;  %v1178_v5 = vsub.f32 %v1165_v44, %v1175_v58  ;;  %v1144_v9 = vadd.f32 %v1141_v46, %v1094_v34  ;;  %v2628_v54 = vld [vmem:[%s3436_s14 + $0xf8] sm:$0xff] }
 0x128   : > { %v1145_v10 = vadd.f32 %v1142_v47, %v1095_v38  ;;  %v1179_v11 = vsub.f32 %v1166_v48, %v1176_v59  ;;  %v1211_v14 = vperm.slane %v2614_v53, 2  ;;  %v1180_v15 = vsub.f32 %v1167_v50, %v1177_v62  ;;  %v2624_v38 = vld [vmem:[%s3431_s18 + $0xf0] sm:$0xff]  ;;  %v2623_v48 = vld [vmem:[%s3428_s13 + $0x1a] ss:$8 sm:$0x7] }
 0x129   : > { %v1190_v16 = vadd.f32 %v1187_v60, %v1184_v55  ;;  %v1191_v17 = vadd.f32 %v1188_v61, %v1185_v56  ;;  %v1192_v18 = vadd.f32 %v1189_v63, %v1186_v57  ;;  %v1181_v22 = vadd.f32 %v1178_v5, %v1131_v49  ;;  %v2626_v49 = vld [vmem:[%s3431_s18 + $0x100] sm:$0xff]  ;;  %v2627_v53 = vld [vmem:[%s3436_s14 + $0xf0] sm:$0xff] }
 0x12a   : > { %v1215_v23 = vmul.f32 %v2616_v6, %v1209_v0  ;;  %v1216_v24 = vmul.f32 %v2617_v7, %v1210_v1  ;;  %v1217_v25 = vmul.f32 %v2618_v8, %v1211_v14  ;;  %v1219_v26 = vperm.slane %v2615_v12, 0  ;;  %v2629_v55 = vld [vmem:[%s3436_s14 + $0x100] sm:$0xff] }
 0x12b   : > { %v1220_v27 = vperm.slane %v2615_v12, 1  ;;  %v1221_v28 = vperm.slane %v2615_v12, 2  ;;  %v1234_v29 = vmul.f32 %v2619_v13, %v1209_v0  ;;  %v1235_v30 = vmul.f32 %v2620_v19, %v1210_v1  ;;  %v2630_v1 = vld [vmem:[%s3423_s10 + $0x1b] ss:$8 sm:$0x7] }
 0x12c   : > { %v1236_v31 = vmul.f32 %v2621_v20, %v1211_v14  ;;  %v1259_v32 = vperm.slane %v2622_v21, 0  ;;  %v1260_v33 = vperm.slane %v2622_v21, 1  ;;  %v1225_v34 = vmul.f32 %v2619_v13, %v1219_v26 }
 0x12d   : > { %v1226_v35 = vmul.f32 %v2620_v19, %v1220_v27  ;;  %v1227_v36 = vmul.f32 %v2621_v20, %v1221_v28  ;;  %v1237_v37 = vmul.f32 %v2616_v6, %v1219_v26  ;;  %v1182_v39 = vadd.f32 %v1179_v11, %v1132_v2  ;;  %v2633_v19 = vld [vmem:[%s3431_s18 + $0x110] sm:$0xff]  ;;  %v2634_v20 = vld [vmem:[%s3431_s18 + $0x118] sm:$0xff] }
 0x12e   : > { %v1238_v40 = vmul.f32 %v2617_v7, %v1220_v27  ;;  %v1239_v41 = vmul.f32 %v2618_v8, %v1221_v28  ;;  %v1261_v43 = vperm.slane %v2622_v21, 2  ;;  %v1183_v44 = vadd.f32 %v1180_v15, %v1133_v3 }
 0x12f   : > { %v1193_v45 = vadd.f32 %v1190_v16, %v1143_v4  ;;  %v1194_v46 = vadd.f32 %v1191_v17, %v1144_v9  ;;  %v1228_v47 = vsub.f32 %v1215_v23, %v1225_v34  ;;  %v1195_v50 = vadd.f32 %v1192_v18, %v1145_v10  ;;  %v2632_v18 = vld [vmem:[%s3431_s18 + $0x108] sm:$0xff] }
 0x130   : > { %v1229_v51 = vsub.f32 %v1216_v24, %v1226_v35  ;;  %v1230_v52 = vsub.f32 %v1217_v25, %v1227_v36  ;;  %v1265_v56 = vmul.f32 %v2624_v38, %v1259_v32  ;;  %v1240_v57 = vadd.f32 %v1237_v37, %v1234_v29  ;;  %v2631_v24 = vld [vmem:[%s3428_s13 + $0x1b] ss:$8 sm:$0x7] }
 0x131   : > { %v1241_v58 = vadd.f32 %v1238_v40, %v1235_v30  ;;  %v1242_v59 = vadd.f32 %v1239_v41, %v1236_v31  ;;  %v1266_v60 = vmul.f32 %v2625_v42, %v1260_v33  ;;  %v1231_v61 = vadd.f32 %v1228_v47, %v1181_v22  ;;  %v2635_v25 = vld [vmem:[%s3436_s14 + $0x108] sm:$0xff]  ;;  %v2636_v31 = vld [vmem:[%s3436_s14 + $0x110] sm:$0xff] }
 0x132   : > { %v1267_v62 = vmul.f32 %v2626_v49, %v1261_v43  ;;  %v1269_v63 = vperm.slane %v2623_v48, 0  ;;  %v1270_v0 = vperm.slane %v2623_v48, 1  ;;  %v1271_v2 = vperm.slane %v2623_v48, 2 }
 0x133   : > { %v1284_v3 = vmul.f32 %v2627_v53, %v1259_v32  ;;  %v1285_v4 = vmul.f32 %v2628_v54, %v1260_v33  ;;  %v1286_v5 = vmul.f32 %v2629_v55, %v1261_v43  ;;  %v1309_v12 = vperm.slane %v2630_v1, 0  ;;  %v2637_v32 = vld [vmem:[%s3436_s14 + $0x118] sm:$0xff] }
 0x134   : > { %v1275_v6 = vmul.f32 %v2627_v53, %v1269_v63  ;;  %v1276_v7 = vmul.f32 %v2628_v54, %v1270_v0  ;;  %v1287_v8 = vmul.f32 %v2624_v38, %v1269_v63  ;;  %v1288_v9 = vmul.f32 %v2625_v42, %v1270_v0  ;;  %v2638_v33 = vld [vmem:[%s3423_s10 + $0x1c] ss:$8 sm:$0x7] }
 0x135   : > { %v1277_v10 = vmul.f32 %v2629_v55, %v1271_v2  ;;  %v1289_v11 = vmul.f32 %v2626_v49, %v1271_v2  ;;  %v1310_v13 = vperm.slane %v2630_v1, 1  ;;  %v1232_v14 = vadd.f32 %v1229_v51, %v1182_v39  ;;  %v2641_v54 = vld [vmem:[%s3431_s18 + $0x128] sm:$0xff] }
 0x136   : > { %v1233_v15 = vadd.f32 %v1230_v52, %v1183_v44  ;;  %v1243_v16 = vadd.f32 %v1240_v57, %v1193_v45  ;;  %v1278_v17 = vsub.f32 %v1265_v56, %v1275_v6  ;;  %v1244_v21 = vadd.f32 %v1241_v58, %v1194_v46  ;;  %v2644_v2 = vld [vmem:[%s3436_s14 + $0x128] sm:$0xff] }
 0x137   : > { %v1245_v22 = vadd.f32 %v1242_v59, %v1195_v50  ;;  %v1279_v23 = vsub.f32 %v1266_v60, %v1276_v7  ;;  %v1311_v26 = vperm.slane %v2630_v1, 2  ;;  %v1280_v27 = vsub.f32 %v1267_v62, %v1277_v10  ;;  %v2640_v50 = vld [vmem:[%s3431_s18 + $0x120] sm:$0xff] }
 0x138   : > { %v1290_v28 = vadd.f32 %v1287_v8, %v1284_v3  ;;  %v1291_v29 = vadd.f32 %v1288_v9, %v1285_v4  ;;  %v1292_v30 = vadd.f32 %v1289_v11, %v1286_v5  ;;  %v1281_v34 = vadd.f32 %v1278_v17, %v1231_v61  ;;  %v2639_v60 = vld [vmem:[%s3428_s13 + $0x1c] ss:$8 sm:$0x7]  ;;  %v2642_v61 = vld [vmem:[%s3431_s18 + $0x130] sm:$0xff] }
 0x139   : > { %v1315_v35 = vmul.f32 %v2632_v18, %v1309_v12  ;;  %v1316_v36 = vmul.f32 %v2633_v19, %v1310_v13  ;;  %v1317_v37 = vmul.f32 %v2634_v20, %v1311_v26  ;;  %v1319_v38 = vperm.slane %v2631_v24, 0  ;;  %v2643_v1 = vld [vmem:[%s3436_s14 + $0x120] sm:$0xff]  ;;  %v2645_v3 = vld [vmem:[%s3436_s14 + $0x130] sm:$0xff] }
 0x13a   : > { %v1320_v39 = vperm.slane %v2631_v24, 1  ;;  %v1321_v40 = vperm.slane %v2631_v24, 2  ;;  %v1334_v41 = vmul.f32 %v2635_v25, %v1309_v12  ;;  %v1335_v42 = vmul.f32 %v2636_v31, %v1310_v13  ;;  %v2646_v13 = vld [vmem:[%s3423_s10 + $0x1d] ss:$8 sm:$0x7] }
 0x13b   : > { %v1336_v43 = vmul.f32 %v2637_v32, %v1311_v26  ;;  %v1359_v44 = vperm.slane %v2638_v33, 0  ;;  %v1360_v45 = vperm.slane %v2638_v33, 1  ;;  %v1325_v46 = vmul.f32 %v2635_v25, %v1319_v38 }
 0x13c   : > { %v1326_v47 = vmul.f32 %v2636_v31, %v1320_v39  ;;  %v1327_v48 = vmul.f32 %v2637_v32, %v1321_v40  ;;  %v1337_v49 = vmul.f32 %v2632_v18, %v1319_v38  ;;  %v1282_v51 = vadd.f32 %v1279_v23, %v1232_v14  ;;  %v2649_v31 = vld [vmem:[%s3431_s18 + $0x140] sm:$0xff]  ;;  %v2650_v32 = vld [vmem:[%s3431_s18 + $0x148] sm:$0xff] }
 0x13d   : > { %v1338_v52 = vmul.f32 %v2633_v19, %v1320_v39  ;;  %v1339_v53 = vmul.f32 %v2634_v20, %v1321_v40  ;;  %v1361_v55 = vperm.slane %v2638_v33, 2  ;;  %v1283_v56 = vadd.f32 %v1280_v27, %v1233_v15 }
 0x13e   : > { %v1293_v57 = vadd.f32 %v1290_v28, %v1243_v16  ;;  %v1294_v58 = vadd.f32 %v1291_v29, %v1244_v21  ;;  %v1328_v59 = vsub.f32 %v1315_v35, %v1325_v46  ;;  %v1295_v62 = vadd.f32 %v1292_v30, %v1245_v22  ;;  %v2648_v30 = vld [vmem:[%s3431_s18 + $0x138] sm:$0xff] }
 0x13f   : > { %v1329_v63 = vsub.f32 %v1316_v36, %v1326_v47  ;;  %v1330_v0 = vsub.f32 %v1317_v37, %v1327_v48  ;;  %v1365_v4 = vmul.f32 %v2640_v50, %v1359_v44  ;;  %v1340_v5 = vadd.f32 %v1337_v49, %v1334_v41  ;;  %v2647_v36 = vld [vmem:[%s3428_s13 + $0x1d] ss:$8 sm:$0x7] }
 0x140   : > { %v1341_v6 = vadd.f32 %v1338_v52, %v1335_v42  ;;  %v1342_v7 = vadd.f32 %v1339_v53, %v1336_v43  ;;  %v1366_v8 = vmul.f32 %v2641_v54, %v1360_v45  ;;  %v1331_v9 = vadd.f32 %v1328_v59, %v1281_v34  ;;  %v2651_v37 = vld [vmem:[%s3436_s14 + $0x138] sm:$0xff]  ;;  %v2652_v43 = vld [vmem:[%s3436_s14 + $0x140] sm:$0xff] }
 0x141   : > { %v1367_v10 = vmul.f32 %v2642_v61, %v1361_v55  ;;  %v1369_v11 = vperm.slane %v2639_v60, 0  ;;  %v1370_v12 = vperm.slane %v2639_v60, 1  ;;  %v1371_v14 = vperm.slane %v2639_v60, 2 }
 0x142   : > { %v1384_v15 = vmul.f32 %v2643_v1, %v1359_v44  ;;  %v1385_v16 = vmul.f32 %v2644_v2, %v1360_v45  ;;  %v1386_v17 = vmul.f32 %v2645_v3, %v1361_v55  ;;  %v1409_v24 = vperm.slane %v2646_v13, 0  ;;  %v2653_v44 = vld [vmem:[%s3436_s14 + $0x148] sm:$0xff] }
 0x143   : > { %v1375_v18 = vmul.f32 %v2643_v1, %v1369_v11  ;;  %v1376_v19 = vmul.f32 %v2644_v2, %v1370_v12  ;;  %v1387_v20 = vmul.f32 %v2640_v50, %v1369_v11  ;;  %v1388_v21 = vmul.f32 %v2641_v54, %v1370_v12  ;;  %v2654_v45 = vld [vmem:[%s3423_s10 + $0x1e] ss:$8 sm:$0x7] }
 0x144   : > { %v1377_v22 = vmul.f32 %v2645_v3, %v1371_v14  ;;  %v1389_v23 = vmul.f32 %v2642_v61, %v1371_v14  ;;  %v1410_v25 = vperm.slane %v2646_v13, 1  ;;  %v1332_v26 = vadd.f32 %v1329_v63, %v1282_v51  ;;  %v2657_v2 = vld [vmem:[%s3431_s18 + $0x158] sm:$0xff] }
 0x145   : > { %v1333_v27 = vadd.f32 %v1330_v0, %v1283_v56  ;;  %v1343_v28 = vadd.f32 %v1340_v5, %v1293_v57  ;;  %v1378_v29 = vsub.f32 %v1365_v4, %v1375_v18  ;;  %v1344_v33 = vadd.f32 %v1341_v6, %v1294_v58  ;;  %v2660_v14 = vld [vmem:[%s3436_s14 + $0x158] sm:$0xff] }
 0x146   : > { %v1345_v34 = vadd.f32 %v1342_v7, %v1295_v62  ;;  %v1379_v35 = vsub.f32 %v1366_v8, %v1376_v19  ;;  %v1411_v38 = vperm.slane %v2646_v13, 2  ;;  %v1380_v39 = vsub.f32 %v1367_v10, %v1377_v22  ;;  %v2656_v62 = vld [vmem:[%s3431_s18 + $0x150] sm:$0xff]  ;;  %v2655_v8 = vld [vmem:[%s3428_s13 + $0x1e] ss:$8 sm:$0x7] }
 0x147   : > { %v1390_v40 = vadd.f32 %v1387_v20, %v1384_v15  ;;  %v1391_v41 = vadd.f32 %v1388_v21, %v1385_v16  ;;  %v1392_v42 = vadd.f32 %v1389_v23, %v1386_v17  ;;  %v1381_v46 = vadd.f32 %v1378_v29, %v1331_v9  ;;  %v2658_v9 = vld [vmem:[%s3431_s18 + $0x160] sm:$0xff]  ;;  %v2659_v13 = vld [vmem:[%s3436_s14 + $0x150] sm:$0xff] }
 0x148   : > { %v1415_v47 = vmul.f32 %v2648_v30, %v1409_v24  ;;  %v1416_v48 = vmul.f32 %v2649_v31, %v1410_v25  ;;  %v1417_v49 = vmul.f32 %v2650_v32, %v1411_v38  ;;  %v1419_v50 = vperm.slane %v2647_v36, 0  ;;  %v2661_v15 = vld [vmem:[%s3436_s14 + $0x160] sm:$0xff] }
 0x149   : > { %v1420_v51 = vperm.slane %v2647_v36, 1  ;;  %v1421_v52 = vperm.slane %v2647_v36, 2  ;;  %v1434_v53 = vmul.f32 %v2651_v37, %v1409_v24  ;;  %v1435_v54 = vmul.f32 %v2652_v43, %v1410_v25  ;;  %v2662_v25 = vld [vmem:[%s3423_s10 + $0x1f] ss:$8 sm:$0x7] }
 0x14a   : > { %v1436_v55 = vmul.f32 %v2653_v44, %v1411_v38  ;;  %v1459_v56 = vperm.slane %v2654_v45, 0  ;;  %v1460_v57 = vperm.slane %v2654_v45, 1  ;;  %v1425_v58 = vmul.f32 %v2651_v37, %v1419_v50 }
 0x14b   : > { %v1426_v59 = vmul.f32 %v2652_v43, %v1420_v51  ;;  %v1427_v60 = vmul.f32 %v2653_v44, %v1421_v52  ;;  %v1437_v61 = vmul.f32 %v2648_v30, %v1419_v50  ;;  %v1382_v63 = vadd.f32 %v1379_v35, %v1332_v26  ;;  %v2665_v43 = vld [vmem:[%s3431_s18 + $0x170] sm:$0xff]  ;;  %v2666_v44 = vld [vmem:[%s3431_s18 + $0x178] sm:$0xff] }
 0x14c   : > { %v1438_v0 = vmul.f32 %v2649_v31, %v1420_v51  ;;  %v1439_v1 = vmul.f32 %v2650_v32, %v1421_v52  ;;  %v1461_v3 = vperm.slane %v2654_v45, 2  ;;  %v1383_v4 = vadd.f32 %v1380_v39, %v1333_v27 }
 0x14d   : > { %v1393_v5 = vadd.f32 %v1390_v40, %v1343_v28  ;;  %v1394_v6 = vadd.f32 %v1391_v41, %v1344_v33  ;;  %v1428_v7 = vsub.f32 %v1415_v47, %v1425_v58  ;;  %v1395_v10 = vadd.f32 %v1392_v42, %v1345_v34  ;;  %v2664_v42 = vld [vmem:[%s3431_s18 + $0x168] sm:$0xff] }
 0x14e   : > { %v1429_v11 = vsub.f32 %v1416_v48, %v1426_v59  ;;  %v1430_v12 = vsub.f32 %v1417_v49, %v1427_v60  ;;  %v1465_v16 = vmul.f32 %v2656_v62, %v1459_v56  ;;  %v1440_v17 = vadd.f32 %v1437_v61, %v1434_v53  ;;  %v2663_v48 = vld [vmem:[%s3428_s13 + $0x1f] ss:$8 sm:$0x7] }
 0x14f   : > { %v1441_v18 = vadd.f32 %v1438_v0, %v1435_v54  ;;  %v1442_v19 = vadd.f32 %v1439_v1, %v1436_v55  ;;  %v1466_v20 = vmul.f32 %v2657_v2, %v1460_v57  ;;  %v1431_v21 = vadd.f32 %v1428_v7, %v1381_v46  ;;  %v2667_v49 = vld [vmem:[%s3436_s14 + $0x168] sm:$0xff]  ;;  %v2668_v55 = vld [vmem:[%s3436_s14 + $0x170] sm:$0xff] }
 0x150   : > { %v1467_v22 = vmul.f32 %v2658_v9, %v1461_v3  ;;  %v1469_v23 = vperm.slane %v2655_v8, 0  ;;  %v1470_v24 = vperm.slane %v2655_v8, 1  ;;  %v1471_v26 = vperm.slane %v2655_v8, 2 }
 0x151   : > { %v1484_v27 = vmul.f32 %v2659_v13, %v1459_v56  ;;  %v1485_v28 = vmul.f32 %v2660_v14, %v1460_v57  ;;  %v1486_v29 = vmul.f32 %v2661_v15, %v1461_v3  ;;  %v1509_v36 = vperm.slane %v2662_v25, 0  ;;  %v2669_v56 = vld [vmem:[%s3436_s14 + $0x178] sm:$0xff] }
 0x152   : > { %v1475_v30 = vmul.f32 %v2659_v13, %v1469_v23  ;;  %v1476_v31 = vmul.f32 %v2660_v14, %v1470_v24  ;;  %v1487_v32 = vmul.f32 %v2656_v62, %v1469_v23  ;;  %v1488_v33 = vmul.f32 %v2657_v2, %v1470_v24  ;;  %v2670_v57 = vld [vmem:[%s3423_s10 + $0x30] ss:$8 sm:$0x7]  ;;  %v2673_v14 = vld [vmem:[%s3431_s18 + $0x188] sm:$0xff] }
 0x153   : > { %v1477_v34 = vmul.f32 %v2661_v15, %v1471_v26  ;;  %v1489_v35 = vmul.f32 %v2658_v9, %v1471_v26  ;;  %v1510_v37 = vperm.slane %v2662_v25, 1  ;;  %v1432_v38 = vadd.f32 %v1429_v11, %v1382_v63  ;;  %v2676_v26 = vld [vmem:[%s3436_s14 + $0x188] sm:$0xff] }
 0x154   : > { %v1433_v39 = vadd.f32 %v1430_v12, %v1383_v4  ;;  %v1443_v40 = vadd.f32 %v1440_v17, %v1393_v5  ;;  %v1478_v41 = vsub.f32 %v1465_v16, %v1475_v30  ;;  %v1444_v45 = vadd.f32 %v1441_v18, %v1394_v6 }
 0x155   : > { %v1445_v46 = vadd.f32 %v1442_v19, %v1395_v10  ;;  %v1479_v47 = vsub.f32 %v1466_v20, %v1476_v31  ;;  %v1511_v50 = vperm.slane %v2662_v25, 2  ;;  %v1480_v51 = vsub.f32 %v1467_v22, %v1477_v34  ;;  %v2672_v10 = vld [vmem:[%s3431_s18 + $0x180] sm:$0xff] }
 0x156   : > { %v1490_v52 = vadd.f32 %v1487_v32, %v1484_v27  ;;  %v1491_v53 = vadd.f32 %v1488_v33, %v1485_v28  ;;  %v1492_v54 = vadd.f32 %v1489_v35, %v1486_v29  ;;  %v1481_v58 = vadd.f32 %v1478_v41, %v1431_v21  ;;  %v2671_v20 = vld [vmem:[%s3428_s13 + $0x30] ss:$8 sm:$0x7] }
 0x157   : > { %v1515_v59 = vmul.f32 %v2664_v42, %v1509_v36  ;;  %v1516_v60 = vmul.f32 %v2665_v43, %v1510_v37  ;;  %v1517_v61 = vmul.f32 %v2666_v44, %v1511_v50  ;;  %v1519_v62 = vperm.slane %v2663_v48, 0  ;;  %v2674_v21 = vld [vmem:[%s3431_s18 + $0x190] sm:$0xff]  ;;  %v2675_v25 = vld [vmem:[%s3436_s14 + $0x180] sm:$0xff] }
 0x158   : > { %v1520_v63 = vperm.slane %v2663_v48, 1  ;;  %v1521_v0 = vperm.slane %v2663_v48, 2  ;;  %v1534_v1 = vmul.f32 %v2667_v49, %v1509_v36  ;;  %v1535_v2 = vmul.f32 %v2668_v55, %v1510_v37  ;;  %v2677_v27 = vld [vmem:[%s3436_s14 + $0x190] sm:$0xff] }
 0x159   : > { %v1536_v3 = vmul.f32 %v2669_v56, %v1511_v50  ;;  %v1559_v4 = vperm.slane %v2670_v57, 0  ;;  %v1560_v5 = vperm.slane %v2670_v57, 1  ;;  %v1525_v6 = vmul.f32 %v2667_v49, %v1519_v62  ;;  %v2678_v37 = vld [vmem:[%s3423_s10 + $0x31] ss:$8 sm:$0x7] }
 0x15a   : > { %v1526_v7 = vmul.f32 %v2668_v55, %v1520_v63  ;;  %v1527_v8 = vmul.f32 %v2669_v56, %v1521_v0  ;;  %v1537_v9 = vmul.f32 %v2664_v42, %v1519_v62  ;;  %v1482_v11 = vadd.f32 %v1479_v47, %v1432_v38  ;;  %v2681_v55 = vld [vmem:[%s3431_s18 + $0x1a0] sm:$0xff]  ;;  %v2682_v56 = vld [vmem:[%s3431_s18 + $0x1a8] sm:$0xff] }
 0x15b   : > { %v1538_v12 = vmul.f32 %v2665_v43, %v1520_v63  ;;  %v1539_v13 = vmul.f32 %v2666_v44, %v1521_v0  ;;  %v1561_v15 = vperm.slane %v2670_v57, 2  ;;  %v1483_v16 = vadd.f32 %v1480_v51, %v1433_v39 }
 0x15c   : > { %v1493_v17 = vadd.f32 %v1490_v52, %v1443_v40  ;;  %v1494_v18 = vadd.f32 %v1491_v53, %v1444_v45  ;;  %v1528_v19 = vsub.f32 %v1515_v59, %v1525_v6  ;;  %v1495_v22 = vadd.f32 %v1492_v54, %v1445_v46  ;;  %v2680_v54 = vld [vmem:[%s3431_s18 + $0x198] sm:$0xff] }
 0x15d   : > { %v1529_v23 = vsub.f32 %v1516_v60, %v1526_v7  ;;  %v1530_v24 = vsub.f32 %v1517_v61, %v1527_v8  ;;  %v1565_v28 = vmul.f32 %v2672_v10, %v1559_v4  ;;  %v1540_v29 = vadd.f32 %v1537_v9, %v1534_v1  ;;  %v2679_v60 = vld [vmem:[%s3428_s13 + $0x31] ss:$8 sm:$0x7] }
 0x15e   : > { %v1541_v30 = vadd.f32 %v1538_v12, %v1535_v2  ;;  %v1542_v31 = vadd.f32 %v1539_v13, %v1536_v3  ;;  %v1566_v32 = vmul.f32 %v2673_v14, %v1560_v5  ;;  %v1531_v33 = vadd.f32 %v1528_v19, %v1481_v58  ;;  %v2683_v61 = vld [vmem:[%s3436_s14 + $0x198] sm:$0xff]  ;;  %v2684_v3 = vld [vmem:[%s3436_s14 + $0x1a0] sm:$0xff] }
 0x15f   : > { %v1567_v34 = vmul.f32 %v2674_v21, %v1561_v15  ;;  %v1569_v35 = vperm.slane %v2671_v20, 0  ;;  %v1570_v36 = vperm.slane %v2671_v20, 1  ;;  %v1571_v38 = vperm.slane %v2671_v20, 2 }
 0x160   : > { %v1584_v39 = vmul.f32 %v2675_v25, %v1559_v4  ;;  %v1585_v40 = vmul.f32 %v2676_v26, %v1560_v5  ;;  %v1586_v41 = vmul.f32 %v2677_v27, %v1561_v15  ;;  %v1609_v48 = vperm.slane %v2678_v37, 0  ;;  %v2685_v4 = vld [vmem:[%s3436_s14 + $0x1a8] sm:$0xff]  ;;  %v2686_v5 = vld [vmem:[%s3423_s10 + $0x32] ss:$8 sm:$0x7] }
 0x161   : > { %v1575_v42 = vmul.f32 %v2675_v25, %v1569_v35  ;;  %v1576_v43 = vmul.f32 %v2676_v26, %v1570_v36  ;;  %v1587_v44 = vmul.f32 %v2672_v10, %v1569_v35  ;;  %v1588_v45 = vmul.f32 %v2673_v14, %v1570_v36  ;;  %v2689_v26 = vld [vmem:[%s3431_s18 + $0x1b8] sm:$0xff] }
 0x162   : > { %v1577_v46 = vmul.f32 %v2677_v27, %v1571_v38  ;;  %v1589_v47 = vmul.f32 %v2674_v21, %v1571_v38  ;;  %v1610_v49 = vperm.slane %v2678_v37, 1  ;;  %v1532_v50 = vadd.f32 %v1529_v23, %v1482_v11  ;;  %v2692_v38 = vld [vmem:[%s3436_s14 + $0x1b8] sm:$0xff] }
 0x163   : > { %v1533_v51 = vadd.f32 %v1530_v24, %v1483_v16  ;;  %v1543_v52 = vadd.f32 %v1540_v29, %v1493_v17  ;;  %v1578_v53 = vsub.f32 %v1565_v28, %v1575_v42  ;;  %v1544_v57 = vadd.f32 %v1541_v30, %v1494_v18 }
 0x164   : > { %v1545_v58 = vadd.f32 %v1542_v31, %v1495_v22  ;;  %v1579_v59 = vsub.f32 %v1566_v32, %v1576_v43  ;;  %v1611_v62 = vperm.slane %v2678_v37, 2  ;;  %v1580_v63 = vsub.f32 %v1567_v34, %v1577_v46  ;;  %v2688_v22 = vld [vmem:[%s3431_s18 + $0x1b0] sm:$0xff] }
 0x165   : > { %v1590_v0 = vadd.f32 %v1587_v44, %v1584_v39  ;;  %v1591_v1 = vadd.f32 %v1588_v45, %v1585_v40  ;;  %v1592_v2 = vadd.f32 %v1589_v47, %v1586_v41  ;;  %v1581_v6 = vadd.f32 %v1578_v53, %v1531_v33  ;;  %v2687_v32 = vld [vmem:[%s3428_s13 + $0x32] ss:$8 sm:$0x7] }
 0x166   : > { %v1615_v7 = vmul.f32 %v2680_v54, %v1609_v48  ;;  %v1616_v8 = vmul.f32 %v2681_v55, %v1610_v49  ;;  %v1617_v9 = vmul.f32 %v2682_v56, %v1611_v62  ;;  %v1619_v10 = vperm.slane %v2679_v60, 0  ;;  %v2690_v33 = vld [vmem:[%s3431_s18 + $0x1c0] sm:$0xff]  ;;  %v2691_v37 = vld [vmem:[%s3436_s14 + $0x1b0] sm:$0xff] }
 0x167   : > { %v1620_v11 = vperm.slane %v2679_v60, 1  ;;  %v1621_v12 = vperm.slane %v2679_v60, 2  ;;  %v1634_v13 = vmul.f32 %v2683_v61, %v1609_v48  ;;  %v1635_v14 = vmul.f32 %v2684_v3, %v1610_v49  ;;  %v2693_v39 = vld [vmem:[%s3436_s14 + $0x1c0] sm:$0xff] }
 0x168   : > { %v1636_v15 = vmul.f32 %v2685_v4, %v1611_v62  ;;  %v1659_v16 = vperm.slane %v2686_v5, 0  ;;  %v1660_v17 = vperm.slane %v2686_v5, 1  ;;  %v1625_v18 = vmul.f32 %v2683_v61, %v1619_v10  ;;  %v2694_v49 = vld [vmem:[%s3423_s10 + $0x33] ss:$8 sm:$0x7] }
 0x169   : > { %v1626_v19 = vmul.f32 %v2684_v3, %v1620_v11  ;;  %v1627_v20 = vmul.f32 %v2685_v4, %v1621_v12  ;;  %v1637_v21 = vmul.f32 %v2680_v54, %v1619_v10  ;;  %v1582_v23 = vadd.f32 %v1579_v59, %v1532_v50  ;;  %v2697_v3 = vld [vmem:[%s3431_s18 + $0x1d0] sm:$0xff]  ;;  %v2698_v4 = vld [vmem:[%s3431_s18 + $0x1d8] sm:$0xff] }
 0x16a   : > { %v1638_v24 = vmul.f32 %v2681_v55, %v1620_v11  ;;  %v1639_v25 = vmul.f32 %v2682_v56, %v1621_v12  ;;  %v1661_v27 = vperm.slane %v2686_v5, 2  ;;  %v1583_v28 = vadd.f32 %v1580_v63, %v1533_v51 }
 0x16b   : > { %v1593_v29 = vadd.f32 %v1590_v0, %v1543_v52  ;;  %v1594_v30 = vadd.f32 %v1591_v1, %v1544_v57  ;;  %v1628_v31 = vsub.f32 %v1615_v7, %v1625_v18  ;;  %v1595_v34 = vadd.f32 %v1592_v2, %v1545_v58  ;;  %v2696_v2 = vld [vmem:[%s3431_s18 + $0x1c8] sm:$0xff] }
 0x16c   : > { %v1629_v35 = vsub.f32 %v1616_v8, %v1626_v19  ;;  %v1630_v36 = vsub.f32 %v1617_v9, %v1627_v20  ;;  %v1665_v40 = vmul.f32 %v2688_v22, %v1659_v16  ;;  %v1640_v41 = vadd.f32 %v1637_v21, %v1634_v13  ;;  %v2695_v8 = vld [vmem:[%s3428_s13 + $0x33] ss:$8 sm:$0x7]  ;;  %v2699_v9 = vld [vmem:[%s3436_s14 + $0x1c8] sm:$0xff] }
 0x16d   : > { %v1641_v42 = vadd.f32 %v1638_v24, %v1635_v14  ;;  %v1642_v43 = vadd.f32 %v1639_v25, %v1636_v15  ;;  %v1666_v44 = vmul.f32 %v2689_v26, %v1660_v17  ;;  %v1631_v45 = vadd.f32 %v1628_v31, %v1581_v6  ;;  %v2700_v15 = vld [vmem:[%s3436_s14 + $0x1d0] sm:$0xff] }
 0x16e   : > { %v1667_v46 = vmul.f32 %v2690_v33, %v1661_v27  ;;  %v1669_v47 = vperm.slane %v2687_v32, 0  ;;  %v1670_v48 = vperm.slane %v2687_v32, 1  ;;  %v1671_v50 = vperm.slane %v2687_v32, 2 }
 0x16f   : > { %v1684_v51 = vmul.f32 %v2691_v37, %v1659_v16  ;;  %v1685_v52 = vmul.f32 %v2692_v38, %v1660_v17  ;;  %v1686_v53 = vmul.f32 %v2693_v39, %v1661_v27  ;;  %v1709_v60 = vperm.slane %v2694_v49, 0  ;;  %v2701_v16 = vld [vmem:[%s3436_s14 + $0x1d8] sm:$0xff] }
 0x170   : > { %v1675_v54 = vmul.f32 %v2691_v37, %v1669_v47  ;;  %v1676_v55 = vmul.f32 %v2692_v38, %v1670_v48  ;;  %v1687_v56 = vmul.f32 %v2688_v22, %v1669_v47  ;;  %v1688_v57 = vmul.f32 %v2689_v26, %v1670_v48  ;;  %v2702_v17 = vld [vmem:[%s3423_s10 + $0x34] ss:$8 sm:$0x7]  ;;  %v2705_v38 = vld [vmem:[%s3431_s18 + $0x1e8] sm:$0xff] }
 0x171   : > { %v1677_v58 = vmul.f32 %v2693_v39, %v1671_v50  ;;  %v1689_v59 = vmul.f32 %v2690_v33, %v1671_v50  ;;  %v1710_v61 = vperm.slane %v2694_v49, 1  ;;  %v1632_v62 = vadd.f32 %v1629_v35, %v1582_v23  ;;  %v2708_v50 = vld [vmem:[%s3436_s14 + $0x1e8] sm:$0xff] }
 0x172   : > { %v1633_v63 = vadd.f32 %v1630_v36, %v1583_v28  ;;  %v1643_v0 = vadd.f32 %v1640_v41, %v1593_v29  ;;  %v1678_v1 = vsub.f32 %v1665_v40, %v1675_v54  ;;  %v1644_v5 = vadd.f32 %v1641_v42, %v1594_v30 }
 0x173   : > { %v1645_v6 = vadd.f32 %v1642_v43, %v1595_v34  ;;  %v1679_v7 = vsub.f32 %v1666_v44, %v1676_v55  ;;  %v1711_v10 = vperm.slane %v2694_v49, 2  ;;  %v1680_v11 = vsub.f32 %v1667_v46, %v1677_v58  ;;  %v2704_v34 = vld [vmem:[%s3431_s18 + $0x1e0] sm:$0xff] }
 0x174   : > { %v1690_v12 = vadd.f32 %v1687_v56, %v1684_v51  ;;  %v1691_v13 = vadd.f32 %v1688_v57, %v1685_v52  ;;  %v1692_v14 = vadd.f32 %v1689_v59, %v1686_v53  ;;  %v1681_v18 = vadd.f32 %v1678_v1, %v1631_v45  ;;  %v2703_v44 = vld [vmem:[%s3428_s13 + $0x34] ss:$8 sm:$0x7] }
 0x175   : > { %v1715_v19 = vmul.f32 %v2696_v2, %v1709_v60  ;;  %v1716_v20 = vmul.f32 %v2697_v3, %v1710_v61  ;;  %v1717_v21 = vmul.f32 %v2698_v4, %v1711_v10  ;;  %v1719_v22 = vperm.slane %v2695_v8, 0  ;;  %v2706_v45 = vld [vmem:[%s3431_s18 + $0x1f0] sm:$0xff]  ;;  %v2707_v49 = vld [vmem:[%s3436_s14 + $0x1e0] sm:$0xff] }
 0x176   : > { %v1720_v23 = vperm.slane %v2695_v8, 1  ;;  %v1721_v24 = vperm.slane %v2695_v8, 2  ;;  %v1734_v25 = vmul.f32 %v2699_v9, %v1709_v60  ;;  %v1735_v26 = vmul.f32 %v2700_v15, %v1710_v61  ;;  %v2709_v51 = vld [vmem:[%s3436_s14 + $0x1f0] sm:$0xff] }
 0x177   : > { %v1736_v27 = vmul.f32 %v2701_v16, %v1711_v10  ;;  %v1759_v28 = vperm.slane %v2702_v17, 0  ;;  %v1760_v29 = vperm.slane %v2702_v17, 1  ;;  %v1725_v30 = vmul.f32 %v2699_v9, %v1719_v22  ;;  %v2710_v61 = vld [vmem:[%s3423_s10 + $0x35] ss:$8 sm:$0x7] }
 0x178   : > { %v1726_v31 = vmul.f32 %v2700_v15, %v1720_v23  ;;  %v1727_v32 = vmul.f32 %v2701_v16, %v1721_v24  ;;  %v1737_v33 = vmul.f32 %v2696_v2, %v1719_v22  ;;  %v1682_v35 = vadd.f32 %v1679_v7, %v1632_v62  ;;  %v2713_v15 = vld [vmem:[%s3431_s18 + $0x200] sm:$0xff]  ;;  %v2714_v16 = vld [vmem:[%s3431_s18 + $0x208] sm:$0xff] }
 0x179   : > { %v1738_v36 = vmul.f32 %v2697_v3, %v1720_v23  ;;  %v1739_v37 = vmul.f32 %v2698_v4, %v1721_v24  ;;  %v1761_v39 = vperm.slane %v2702_v17, 2  ;;  %v1683_v40 = vadd.f32 %v1680_v11, %v1633_v63 }
 0x17a   : > { %v1693_v41 = vadd.f32 %v1690_v12, %v1643_v0  ;;  %v1694_v42 = vadd.f32 %v1691_v13, %v1644_v5  ;;  %v1728_v43 = vsub.f32 %v1715_v19, %v1725_v30  ;;  %v1695_v46 = vadd.f32 %v1692_v14, %v1645_v6  ;;  %v2712_v14 = vld [vmem:[%s3431_s18 + $0x1f8] sm:$0xff] }
 0x17b   : > { %v1729_v47 = vsub.f32 %v1716_v20, %v1726_v31  ;;  %v1730_v48 = vsub.f32 %v1717_v21, %v1727_v32  ;;  %v1765_v52 = vmul.f32 %v2704_v34, %v1759_v28  ;;  %v1740_v53 = vadd.f32 %v1737_v33, %v1734_v25  ;;  %v2711_v20 = vld [vmem:[%s3428_s13 + $0x35] ss:$8 sm:$0x7] }
 0x17c   : > { %v1741_v54 = vadd.f32 %v1738_v36, %v1735_v26  ;;  %v1742_v55 = vadd.f32 %v1739_v37, %v1736_v27  ;;  %v1766_v56 = vmul.f32 %v2705_v38, %v1760_v29  ;;  %v1731_v57 = vadd.f32 %v1728_v43, %v1681_v18  ;;  %v2715_v21 = vld [vmem:[%s3436_s14 + $0x1f8] sm:$0xff]  ;;  %v2716_v27 = vld [vmem:[%s3436_s14 + $0x200] sm:$0xff] }
 0x17d   : > { %v1767_v58 = vmul.f32 %v2706_v45, %v1761_v39  ;;  %v1769_v59 = vperm.slane %v2703_v44, 0  ;;  %v1770_v60 = vperm.slane %v2703_v44, 1  ;;  %v1771_v62 = vperm.slane %v2703_v44, 2 }
 0x17e   : > { %v1784_v63 = vmul.f32 %v2707_v49, %v1759_v28  ;;  %v1785_v0 = vmul.f32 %v2708_v50, %v1760_v29  ;;  %v1786_v1 = vmul.f32 %v2709_v51, %v1761_v39  ;;  %v1809_v8 = vperm.slane %v2710_v61, 0  ;;  %v2717_v28 = vld [vmem:[%s3436_s14 + $0x208] sm:$0xff]  ;;  %v2718_v29 = vld [vmem:[%s3423_s10 + $0x36] ss:$8 sm:$0x7] }
 0x17f   : > { %v1775_v2 = vmul.f32 %v2707_v49, %v1769_v59  ;;  %v1776_v3 = vmul.f32 %v2708_v50, %v1770_v60  ;;  %v1787_v4 = vmul.f32 %v2704_v34, %v1769_v59  ;;  %v1788_v5 = vmul.f32 %v2705_v38, %v1770_v60  ;;  %v2721_v50 = vld [vmem:[%s3431_s18 + $0x218] sm:$0xff] }
 0x180   : > { %v1777_v6 = vmul.f32 %v2709_v51, %v1771_v62  ;;  %v1789_v7 = vmul.f32 %v2706_v45, %v1771_v62  ;;  %v1810_v9 = vperm.slane %v2710_v61, 1  ;;  %v1732_v10 = vadd.f32 %v1729_v47, %v1682_v35  ;;  %v2724_v62 = vld [vmem:[%s3436_s14 + $0x218] sm:$0xff] }
 0x181   : > { %v1733_v11 = vadd.f32 %v1730_v48, %v1683_v40  ;;  %v1743_v12 = vadd.f32 %v1740_v53, %v1693_v41  ;;  %v1778_v13 = vsub.f32 %v1765_v52, %v1775_v2  ;;  %v1744_v17 = vadd.f32 %v1741_v54, %v1694_v42 }
 0x182   : > { %v1745_v18 = vadd.f32 %v1742_v55, %v1695_v46  ;;  %v1779_v19 = vsub.f32 %v1766_v56, %v1776_v3  ;;  %v1811_v22 = vperm.slane %v2710_v61, 2  ;;  %v1780_v23 = vsub.f32 %v1767_v58, %v1777_v6  ;;  %v2720_v46 = vld [vmem:[%s3431_s18 + $0x210] sm:$0xff] }
 0x183   : > { %v1790_v24 = vadd.f32 %v1787_v4, %v1784_v63  ;;  %v1791_v25 = vadd.f32 %v1788_v5, %v1785_v0  ;;  %v1792_v26 = vadd.f32 %v1789_v7, %v1786_v1  ;;  %v1781_v30 = vadd.f32 %v1778_v13, %v1731_v57  ;;  %v2719_v56 = vld [vmem:[%s3428_s13 + $0x36] ss:$8 sm:$0x7] }
 0x184   : > { %v1815_v31 = vmul.f32 %v2712_v14, %v1809_v8  ;;  %v1816_v32 = vmul.f32 %v2713_v15, %v1810_v9  ;;  %v1817_v33 = vmul.f32 %v2714_v16, %v1811_v22  ;;  %v1819_v34 = vperm.slane %v2711_v20, 0  ;;  %v2722_v57 = vld [vmem:[%s3431_s18 + $0x220] sm:$0xff]  ;;  %v2723_v61 = vld [vmem:[%s3436_s14 + $0x210] sm:$0xff] }
 0x185   : > { %v1820_v35 = vperm.slane %v2711_v20, 1  ;;  %v1821_v36 = vperm.slane %v2711_v20, 2  ;;  %v1834_v37 = vmul.f32 %v2715_v21, %v1809_v8  ;;  %v1835_v38 = vmul.f32 %v2716_v27, %v1810_v9  ;;  %v2725_v63 = vld [vmem:[%s3436_s14 + $0x220] sm:$0xff] }
 0x186   : > { %v1836_v39 = vmul.f32 %v2717_v28, %v1811_v22  ;;  %v1859_v40 = vperm.slane %v2718_v29, 0  ;;  %v1860_v41 = vperm.slane %v2718_v29, 1  ;;  %v1825_v42 = vmul.f32 %v2715_v21, %v1819_v34  ;;  %v2726_v9 = vld [vmem:[%s3423_s10 + $0x37] ss:$8 sm:$0x7] }
 0x187   : > { %v1826_v43 = vmul.f32 %v2716_v27, %v1820_v35  ;;  %v1827_v44 = vmul.f32 %v2717_v28, %v1821_v36  ;;  %v1837_v45 = vmul.f32 %v2712_v14, %v1819_v34  ;;  %v1782_v47 = vadd.f32 %v1779_v19, %v1732_v10  ;;  %v2729_v27 = vld [vmem:[%s3431_s18 + $0x230] sm:$0xff]  ;;  %v2730_v28 = vld [vmem:[%s3431_s18 + $0x238] sm:$0xff] }
 0x188   : > { %v1838_v48 = vmul.f32 %v2713_v15, %v1820_v35  ;;  %v1839_v49 = vmul.f32 %v2714_v16, %v1821_v36  ;;  %v1861_v51 = vperm.slane %v2718_v29, 2  ;;  %v1783_v52 = vadd.f32 %v1780_v23, %v1733_v11 }
 0x189   : > { %v1793_v53 = vadd.f32 %v1790_v24, %v1743_v12  ;;  %v1794_v54 = vadd.f32 %v1791_v25, %v1744_v17  ;;  %v1828_v55 = vsub.f32 %v1815_v31, %v1825_v42  ;;  %v1795_v58 = vadd.f32 %v1792_v26, %v1745_v18  ;;  %v2728_v26 = vld [vmem:[%s3431_s18 + $0x228] sm:$0xff] }
 0x18a   : > { %v1829_v59 = vsub.f32 %v1816_v32, %v1826_v43  ;;  %v1830_v60 = vsub.f32 %v1817_v33, %v1827_v44  ;;  %v1865_v0 = vmul.f32 %v2720_v46, %v1859_v40  ;;  %v1840_v1 = vadd.f32 %v1837_v45, %v1834_v37  ;;  %v2727_v32 = vld [vmem:[%s3428_s13 + $0x37] ss:$8 sm:$0x7]  ;;  %v2731_v33 = vld [vmem:[%s3436_s14 + $0x228] sm:$0xff] }
 0x18b   : > { %v1841_v2 = vadd.f32 %v1838_v48, %v1835_v38  ;;  %v1842_v3 = vadd.f32 %v1839_v49, %v1836_v39  ;;  %v1866_v4 = vmul.f32 %v2721_v50, %v1860_v41  ;;  %v1831_v5 = vadd.f32 %v1828_v55, %v1781_v30  ;;  %v2732_v39 = vld [vmem:[%s3436_s14 + $0x230] sm:$0xff] }
 0x18c   : > { %v1867_v6 = vmul.f32 %v2722_v57, %v1861_v51  ;;  %v1869_v7 = vperm.slane %v2719_v56, 0  ;;  %v1870_v8 = vperm.slane %v2719_v56, 1  ;;  %v1871_v10 = vperm.slane %v2719_v56, 2 }
 0x18d   : > { %v1884_v11 = vmul.f32 %v2723_v61, %v1859_v40  ;;  %v1885_v12 = vmul.f32 %v2724_v62, %v1860_v41  ;;  %v1886_v13 = vmul.f32 %v2725_v63, %v1861_v51  ;;  %v1909_v20 = vperm.slane %v2726_v9, 0  ;;  %v2733_v40 = vld [vmem:[%s3436_s14 + $0x238] sm:$0xff] }
 0x18e   : > { %v1875_v14 = vmul.f32 %v2723_v61, %v1869_v7  ;;  %v1876_v15 = vmul.f32 %v2724_v62, %v1870_v8  ;;  %v1887_v16 = vmul.f32 %v2720_v46, %v1869_v7  ;;  %v1888_v17 = vmul.f32 %v2721_v50, %v1870_v8  ;;  %v2734_v41 = vld [vmem:[%s3423_s10 + $0x48] ss:$8 sm:$0x7] }
 0x18f   : > { %v1877_v18 = vmul.f32 %v2725_v63, %v1871_v10  ;;  %v1889_v19 = vmul.f32 %v2722_v57, %v1871_v10  ;;  %v1910_v21 = vperm.slane %v2726_v9, 1  ;;  %v1832_v22 = vadd.f32 %v1829_v59, %v1782_v47  ;;  %v2737_v62 = vld [vmem:[%s3431_s18 + $0x248] sm:$0xff] }
 0x190   : > { %v1833_v23 = vadd.f32 %v1830_v60, %v1783_v52  ;;  %v1843_v24 = vadd.f32 %v1840_v1, %v1793_v53  ;;  %v1878_v25 = vsub.f32 %v1865_v0, %v1875_v14  ;;  %v1844_v29 = vadd.f32 %v1841_v2, %v1794_v54  ;;  %v2740_v10 = vld [vmem:[%s3436_s14 + $0x248] sm:$0xff] }
 0x191   : > { %v1845_v30 = vadd.f32 %v1842_v3, %v1795_v58  ;;  %v1879_v31 = vsub.f32 %v1866_v4, %v1876_v15  ;;  %v1911_v34 = vperm.slane %v2726_v9, 2  ;;  %v1880_v35 = vsub.f32 %v1867_v6, %v1877_v18  ;;  %v2736_v58 = vld [vmem:[%s3431_s18 + $0x240] sm:$0xff]  ;;  %v2735_v4 = vld [vmem:[%s3428_s13 + $0x48] ss:$8 sm:$0x7] }
 0x192   : > { %v1890_v36 = vadd.f32 %v1887_v16, %v1884_v11  ;;  %v1891_v37 = vadd.f32 %v1888_v17, %v1885_v12  ;;  %v1892_v38 = vadd.f32 %v1889_v19, %v1886_v13  ;;  %v1881_v42 = vadd.f32 %v1878_v25, %v1831_v5  ;;  %v2738_v5 = vld [vmem:[%s3431_s18 + $0x250] sm:$0xff]  ;;  %v2739_v9 = vld [vmem:[%s3436_s14 + $0x240] sm:$0xff] }
 0x193   : > { %v1915_v43 = vmul.f32 %v2728_v26, %v1909_v20  ;;  %v1916_v44 = vmul.f32 %v2729_v27, %v1910_v21  ;;  %v1917_v45 = vmul.f32 %v2730_v28, %v1911_v34  ;;  %v1919_v46 = vperm.slane %v2727_v32, 0  ;;  %v2741_v11 = vld [vmem:[%s3436_s14 + $0x250] sm:$0xff] }
 0x194   : > { %v1920_v47 = vperm.slane %v2727_v32, 1  ;;  %v1921_v48 = vperm.slane %v2727_v32, 2  ;;  %v1934_v49 = vmul.f32 %v2731_v33, %v1909_v20  ;;  %v1935_v50 = vmul.f32 %v2732_v39, %v1910_v21  ;;  %v2742_v21 = vld [vmem:[%s3423_s10 + $0x49] ss:$8 sm:$0x7] }
 0x195   : > { %v1936_v51 = vmul.f32 %v2733_v40, %v1911_v34  ;;  %v1959_v52 = vperm.slane %v2734_v41, 0  ;;  %v1960_v53 = vperm.slane %v2734_v41, 1  ;;  %v1925_v54 = vmul.f32 %v2731_v33, %v1919_v46 }
 0x196   : > { %v1926_v55 = vmul.f32 %v2732_v39, %v1920_v47  ;;  %v1927_v56 = vmul.f32 %v2733_v40, %v1921_v48  ;;  %v1937_v57 = vmul.f32 %v2728_v26, %v1919_v46  ;;  %v1882_v59 = vadd.f32 %v1879_v31, %v1832_v22  ;;  %v2745_v39 = vld [vmem:[%s3431_s18 + $0x260] sm:$0xff]  ;;  %v2746_v40 = vld [vmem:[%s3431_s18 + $0x268] sm:$0xff] }
 0x197   : > { %v1938_v60 = vmul.f32 %v2729_v27, %v1920_v47  ;;  %v1939_v61 = vmul.f32 %v2730_v28, %v1921_v48  ;;  %v1961_v63 = vperm.slane %v2734_v41, 2  ;;  %v1883_v0 = vadd.f32 %v1880_v35, %v1833_v23 }
 0x198   : > { %v1893_v1 = vadd.f32 %v1890_v36, %v1843_v24  ;;  %v1894_v2 = vadd.f32 %v1891_v37, %v1844_v29  ;;  %v1928_v3 = vsub.f32 %v1915_v43, %v1925_v54  ;;  %v1895_v6 = vadd.f32 %v1892_v38, %v1845_v30  ;;  %v2744_v38 = vld [vmem:[%s3431_s18 + $0x258] sm:$0xff] }
 0x199   : > { %v1929_v7 = vsub.f32 %v1916_v44, %v1926_v55  ;;  %v1930_v8 = vsub.f32 %v1917_v45, %v1927_v56  ;;  %v1965_v12 = vmul.f32 %v2736_v58, %v1959_v52  ;;  %v1940_v13 = vadd.f32 %v1937_v57, %v1934_v49  ;;  %v2743_v44 = vld [vmem:[%s3428_s13 + $0x49] ss:$8 sm:$0x7] }
 0x19a   : > { %v1941_v14 = vadd.f32 %v1938_v60, %v1935_v50  ;;  %v1942_v15 = vadd.f32 %v1939_v61, %v1936_v51  ;;  %v1966_v16 = vmul.f32 %v2737_v62, %v1960_v53  ;;  %v1931_v17 = vadd.f32 %v1928_v3, %v1881_v42  ;;  %v2747_v45 = vld [vmem:[%s3436_s14 + $0x258] sm:$0xff]  ;;  %v2748_v51 = vld [vmem:[%s3436_s14 + $0x260] sm:$0xff] }
 0x19b   : > { %v1967_v18 = vmul.f32 %v2738_v5, %v1961_v63  ;;  %v1969_v19 = vperm.slane %v2735_v4, 0  ;;  %v1970_v20 = vperm.slane %v2735_v4, 1  ;;  %v1971_v22 = vperm.slane %v2735_v4, 2 }
 0x19c   : > { %v1984_v23 = vmul.f32 %v2739_v9, %v1959_v52  ;;  %v1985_v24 = vmul.f32 %v2740_v10, %v1960_v53  ;;  %v1986_v25 = vmul.f32 %v2741_v11, %v1961_v63  ;;  %v2009_v32 = vperm.slane %v2742_v21, 0  ;;  %v2749_v52 = vld [vmem:[%s3436_s14 + $0x268] sm:$0xff] }
 0x19d   : > { %v1975_v26 = vmul.f32 %v2739_v9, %v1969_v19  ;;  %v1976_v27 = vmul.f32 %v2740_v10, %v1970_v20  ;;  %v1987_v28 = vmul.f32 %v2736_v58, %v1969_v19  ;;  %v1988_v29 = vmul.f32 %v2737_v62, %v1970_v20  ;;  %v2750_v53 = vld [vmem:[%s3423_s10 + $0x4a] ss:$8 sm:$0x7] }
 0x19e   : > { %v1977_v30 = vmul.f32 %v2741_v11, %v1971_v22  ;;  %v1989_v31 = vmul.f32 %v2738_v5, %v1971_v22  ;;  %v2010_v33 = vperm.slane %v2742_v21, 1  ;;  %v1932_v34 = vadd.f32 %v1929_v7, %v1882_v59  ;;  %v2753_v10 = vld [vmem:[%s3431_s18 + $0x278] sm:$0xff] }
 0x19f   : > { %v1933_v35 = vadd.f32 %v1930_v8, %v1883_v0  ;;  %v1943_v36 = vadd.f32 %v1940_v13, %v1893_v1  ;;  %v1978_v37 = vsub.f32 %v1965_v12, %v1975_v26  ;;  %v1944_v41 = vadd.f32 %v1941_v14, %v1894_v2  ;;  %v2756_v22 = vld [vmem:[%s3436_s14 + $0x278] sm:$0xff] }
 0x1a0   : > { %v1945_v42 = vadd.f32 %v1942_v15, %v1895_v6  ;;  %v1979_v43 = vsub.f32 %v1966_v16, %v1976_v27  ;;  %v2011_v46 = vperm.slane %v2742_v21, 2  ;;  %v1980_v47 = vsub.f32 %v1967_v18, %v1977_v30  ;;  %v2752_v6 = vld [vmem:[%s3431_s18 + $0x270] sm:$0xff] }
 0x1a1   : > { %v1990_v48 = vadd.f32 %v1987_v28, %v1984_v23  ;;  %v1991_v49 = vadd.f32 %v1988_v29, %v1985_v24  ;;  %v1992_v50 = vadd.f32 %v1989_v31, %v1986_v25  ;;  %v1981_v54 = vadd.f32 %v1978_v37, %v1931_v17  ;;  %v2751_v16 = vld [vmem:[%s3428_s13 + $0x4a] ss:$8 sm:$0x7]  ;;  %v2754_v17 = vld [vmem:[%s3431_s18 + $0x280] sm:$0xff] }
 0x1a2   : > { %v2015_v55 = vmul.f32 %v2744_v38, %v2009_v32  ;;  %v2016_v56 = vmul.f32 %v2745_v39, %v2010_v33  ;;  %v2017_v57 = vmul.f32 %v2746_v40, %v2011_v46  ;;  %v2019_v58 = vperm.slane %v2743_v44, 0  ;;  %v2755_v21 = vld [vmem:[%s3436_s14 + $0x270] sm:$0xff]  ;;  %v2757_v23 = vld [vmem:[%s3436_s14 + $0x280] sm:$0xff] }
 0x1a3   : > { %v2020_v59 = vperm.slane %v2743_v44, 1  ;;  %v2021_v60 = vperm.slane %v2743_v44, 2  ;;  %v2034_v61 = vmul.f32 %v2747_v45, %v2009_v32  ;;  %v2035_v62 = vmul.f32 %v2748_v51, %v2010_v33  ;;  %v2758_v33 = vld [vmem:[%s3423_s10 + $0x4b] ss:$8 sm:$0x7] }
 0x1a4   : > { %v2036_v63 = vmul.f32 %v2749_v52, %v2011_v46  ;;  %v2059_v0 = vperm.slane %v2750_v53, 0  ;;  %v2060_v1 = vperm.slane %v2750_v53, 1  ;;  %v2025_v2 = vmul.f32 %v2747_v45, %v2019_v58 }
 0x1a5   : > { %v2026_v3 = vmul.f32 %v2748_v51, %v2020_v59  ;;  %v2027_v4 = vmul.f32 %v2749_v52, %v2021_v60  ;;  %v2037_v5 = vmul.f32 %v2744_v38, %v2019_v58  ;;  %v1982_v7 = vadd.f32 %v1979_v43, %v1932_v34  ;;  %v2761_v51 = vld [vmem:[%s3431_s18 + $0x290] sm:$0xff]  ;;  %v2762_v52 = vld [vmem:[%s3431_s18 + $0x298] sm:$0xff] }
 0x1a6   : > { %v2038_v8 = vmul.f32 %v2745_v39, %v2020_v59  ;;  %v2039_v9 = vmul.f32 %v2746_v40, %v2021_v60  ;;  %v2061_v11 = vperm.slane %v2750_v53, 2  ;;  %v1983_v12 = vadd.f32 %v1980_v47, %v1933_v35 }
 0x1a7   : > { %v1993_v13 = vadd.f32 %v1990_v48, %v1943_v36  ;;  %v1994_v14 = vadd.f32 %v1991_v49, %v1944_v41  ;;  %v2028_v15 = vsub.f32 %v2015_v55, %v2025_v2  ;;  %v1995_v18 = vadd.f32 %v1992_v50, %v1945_v42  ;;  %v2760_v50 = vld [vmem:[%s3431_s18 + $0x288] sm:$0xff] }
 0x1a8   : > { %v2029_v19 = vsub.f32 %v2016_v56, %v2026_v3  ;;  %v2030_v20 = vsub.f32 %v2017_v57, %v2027_v4  ;;  %v2065_v24 = vmul.f32 %v2752_v6, %v2059_v0  ;;  %v2040_v25 = vadd.f32 %v2037_v5, %v2034_v61  ;;  %v2759_v56 = vld [vmem:[%s3428_s13 + $0x4b] ss:$8 sm:$0x7] }
 0x1a9   : > { %v2041_v26 = vadd.f32 %v2038_v8, %v2035_v62  ;;  %v2042_v27 = vadd.f32 %v2039_v9, %v2036_v63  ;;  %v2066_v28 = vmul.f32 %v2753_v10, %v2060_v1  ;;  %v2031_v29 = vadd.f32 %v2028_v15, %v1981_v54  ;;  %v2763_v57 = vld [vmem:[%s3436_s14 + $0x288] sm:$0xff]  ;;  %v2764_v63 = vld [vmem:[%s3436_s14 + $0x290] sm:$0xff] }
 0x1aa   : > { %v2067_v30 = vmul.f32 %v2754_v17, %v2061_v11  ;;  %v2069_v31 = vperm.slane %v2751_v16, 0  ;;  %v2070_v32 = vperm.slane %v2751_v16, 1  ;;  %v2071_v34 = vperm.slane %v2751_v16, 2 }
 0x1ab   : > { %v2084_v35 = vmul.f32 %v2755_v21, %v2059_v0  ;;  %v2085_v36 = vmul.f32 %v2756_v22, %v2060_v1  ;;  %v2086_v37 = vmul.f32 %v2757_v23, %v2061_v11  ;;  %v2109_v44 = vperm.slane %v2758_v33, 0  ;;  %v2765_v0 = vld [vmem:[%s3436_s14 + $0x298] sm:$0xff] }
 0x1ac   : > { %v2075_v38 = vmul.f32 %v2755_v21, %v2069_v31  ;;  %v2076_v39 = vmul.f32 %v2756_v22, %v2070_v32  ;;  %v2087_v40 = vmul.f32 %v2752_v6, %v2069_v31  ;;  %v2088_v41 = vmul.f32 %v2753_v10, %v2070_v32  ;;  %v2766_v1 = vld [vmem:[%s3423_s10 + $0x4c] ss:$8 sm:$0x7] }
 0x1ad   : > { %v2077_v42 = vmul.f32 %v2757_v23, %v2071_v34  ;;  %v2089_v43 = vmul.f32 %v2754_v17, %v2071_v34  ;;  %v2110_v45 = vperm.slane %v2758_v33, 1  ;;  %v2032_v46 = vadd.f32 %v2029_v19, %v1982_v7  ;;  %v2769_v22 = vld [vmem:[%s3431_s18 + $0x2a8] sm:$0xff] }
 0x1ae   : > { %v2033_v47 = vadd.f32 %v2030_v20, %v1983_v12  ;;  %v2043_v48 = vadd.f32 %v2040_v25, %v1993_v13  ;;  %v2078_v49 = vsub.f32 %v2065_v24, %v2075_v38  ;;  %v2044_v53 = vadd.f32 %v2041_v26, %v1994_v14  ;;  %v2772_v34 = vld [vmem:[%s3436_s14 + $0x2a8] sm:$0xff] }
 0x1af   : > { %v2045_v54 = vadd.f32 %v2042_v27, %v1995_v18  ;;  %v2079_v55 = vsub.f32 %v2066_v28, %v2076_v39  ;;  %v2111_v58 = vperm.slane %v2758_v33, 2  ;;  %v2080_v59 = vsub.f32 %v2067_v30, %v2077_v42  ;;  %v2768_v18 = vld [vmem:[%s3431_s18 + $0x2a0] sm:$0xff]  ;;  %v2767_v28 = vld [vmem:[%s3428_s13 + $0x4c] ss:$8 sm:$0x7] }
 0x1b0   : > { %v2090_v60 = vadd.f32 %v2087_v40, %v2084_v35  ;;  %v2091_v61 = vadd.f32 %v2088_v41, %v2085_v36  ;;  %v2092_v62 = vadd.f32 %v2089_v43, %v2086_v37  ;;  %v2081_v2 = vadd.f32 %v2078_v49, %v2031_v29  ;;  %v2770_v29 = vld [vmem:[%s3431_s18 + $0x2b0] sm:$0xff]  ;;  %v2771_v33 = vld [vmem:[%s3436_s14 + $0x2a0] sm:$0xff] }
 0x1b1   : > { %v2115_v3 = vmul.f32 %v2760_v50, %v2109_v44  ;;  %v2116_v4 = vmul.f32 %v2761_v51, %v2110_v45  ;;  %v2117_v5 = vmul.f32 %v2762_v52, %v2111_v58  ;;  %v2119_v6 = vperm.slane %v2759_v56, 0  ;;  %v2773_v35 = vld [vmem:[%s3436_s14 + $0x2b0] sm:$0xff] }
 0x1b2   : > { %v2120_v7 = vperm.slane %v2759_v56, 1  ;;  %v2121_v8 = vperm.slane %v2759_v56, 2  ;;  %v2134_v9 = vmul.f32 %v2763_v57, %v2109_v44  ;;  %v2135_v10 = vmul.f32 %v2764_v63, %v2110_v45  ;;  %v2774_v45 = vld [vmem:[%s3423_s10 + $0x4d] ss:$8 sm:$0x7] }
 0x1b3   : > { %v2136_v11 = vmul.f32 %v2765_v0, %v2111_v58  ;;  %v2159_v12 = vperm.slane %v2766_v1, 0  ;;  %v2160_v13 = vperm.slane %v2766_v1, 1  ;;  %v2125_v14 = vmul.f32 %v2763_v57, %v2119_v6 }
 0x1b4   : > { %v2126_v15 = vmul.f32 %v2764_v63, %v2120_v7  ;;  %v2127_v16 = vmul.f32 %v2765_v0, %v2121_v8  ;;  %v2137_v17 = vmul.f32 %v2760_v50, %v2119_v6  ;;  %v2082_v19 = vadd.f32 %v2079_v55, %v2032_v46  ;;  %v2777_v63 = vld [vmem:[%s3431_s18 + $0x2c0] sm:$0xff]  ;;  %v2778_v0 = vld [vmem:[%s3431_s18 + $0x2c8] sm:$0xff] }
 0x1b5   : > { %v2138_v20 = vmul.f32 %v2761_v51, %v2120_v7  ;;  %v2139_v21 = vmul.f32 %v2762_v52, %v2121_v8  ;;  %v2161_v23 = vperm.slane %v2766_v1, 2  ;;  %v2083_v24 = vadd.f32 %v2080_v59, %v2033_v47 }
 0x1b6   : > { %v2093_v25 = vadd.f32 %v2090_v60, %v2043_v48  ;;  %v2094_v26 = vadd.f32 %v2091_v61, %v2044_v53  ;;  %v2128_v27 = vsub.f32 %v2115_v3, %v2125_v14  ;;  %v2095_v30 = vadd.f32 %v2092_v62, %v2045_v54  ;;  %v2776_v62 = vld [vmem:[%s3431_s18 + $0x2b8] sm:$0xff] }
 0x1b7   : > { %v2129_v31 = vsub.f32 %v2116_v4, %v2126_v15  ;;  %v2130_v32 = vsub.f32 %v2117_v5, %v2127_v16  ;;  %v2165_v36 = vmul.f32 %v2768_v18, %v2159_v12  ;;  %v2140_v37 = vadd.f32 %v2137_v17, %v2134_v9  ;;  %v2775_v4 = vld [vmem:[%s3428_s13 + $0x4d] ss:$8 sm:$0x7] }
 0x1b8   : > { %v2141_v38 = vadd.f32 %v2138_v20, %v2135_v10  ;;  %v2142_v39 = vadd.f32 %v2139_v21, %v2136_v11  ;;  %v2166_v40 = vmul.f32 %v2769_v22, %v2160_v13  ;;  %v2131_v41 = vadd.f32 %v2128_v27, %v2081_v2  ;;  %v2779_v5 = vld [vmem:[%s3436_s14 + $0x2b8] sm:$0xff]  ;;  %v2780_v11 = vld [vmem:[%s3436_s14 + $0x2c0] sm:$0xff] }
 0x1b9   : > { %v2167_v42 = vmul.f32 %v2770_v29, %v2161_v23  ;;  %v2169_v43 = vperm.slane %v2767_v28, 0  ;;  %v2170_v44 = vperm.slane %v2767_v28, 1  ;;  %v2171_v46 = vperm.slane %v2767_v28, 2 }
 0x1ba   : > { %v2184_v47 = vmul.f32 %v2771_v33, %v2159_v12  ;;  %v2185_v48 = vmul.f32 %v2772_v34, %v2160_v13  ;;  %v2186_v49 = vmul.f32 %v2773_v35, %v2161_v23  ;;  %v2209_v56 = vperm.slane %v2774_v45, 0  ;;  %v2781_v12 = vld [vmem:[%s3436_s14 + $0x2c8] sm:$0xff] }
 0x1bb   : > { %v2175_v50 = vmul.f32 %v2771_v33, %v2169_v43  ;;  %v2176_v51 = vmul.f32 %v2772_v34, %v2170_v44  ;;  %v2187_v52 = vmul.f32 %v2768_v18, %v2169_v43  ;;  %v2188_v53 = vmul.f32 %v2769_v22, %v2170_v44  ;;  %v2782_v13 = vld [vmem:[%s3423_s10 + $0x4e] ss:$8 sm:$0x7] }
 0x1bc   : > { %v2177_v54 = vmul.f32 %v2773_v35, %v2171_v46  ;;  %v2189_v55 = vmul.f32 %v2770_v29, %v2171_v46  ;;  %v2210_v57 = vperm.slane %v2774_v45, 1  ;;  %v2132_v58 = vadd.f32 %v2129_v31, %v2082_v19  ;;  %v2785_v34 = vld [vmem:[%s3431_s18 + $0x2d8] sm:$0xff] }
 0x1bd   : > { %v2133_v59 = vadd.f32 %v2130_v32, %v2083_v24  ;;  %v2143_v60 = vadd.f32 %v2140_v37, %v2093_v25  ;;  %v2178_v61 = vsub.f32 %v2165_v36, %v2175_v50  ;;  %v2144_v1 = vadd.f32 %v2141_v38, %v2094_v26  ;;  %v2788_v46 = vld [vmem:[%s3436_s14 + $0x2d8] sm:$0xff] }
 0x1be   : > { %v2145_v2 = vadd.f32 %v2142_v39, %v2095_v30  ;;  %v2179_v3 = vsub.f32 %v2166_v40, %v2176_v51  ;;  %v2211_v6 = vperm.slane %v2774_v45, 2  ;;  %v2180_v7 = vsub.f32 %v2167_v42, %v2177_v54  ;;  %v2784_v30 = vld [vmem:[%s3431_s18 + $0x2d0] sm:$0xff] }
 0x1bf   : > { %v2190_v8 = vadd.f32 %v2187_v52, %v2184_v47  ;;  %v2191_v9 = vadd.f32 %v2188_v53, %v2185_v48  ;;  %v2192_v10 = vadd.f32 %v2189_v55, %v2186_v49  ;;  %v2181_v14 = vadd.f32 %v2178_v61, %v2131_v41  ;;  %v2783_v40 = vld [vmem:[%s3428_s13 + $0x4e] ss:$8 sm:$0x7]  ;;  %v2786_v41 = vld [vmem:[%s3431_s18 + $0x2e0] sm:$0xff] }
 0x1c0   : > { %v2215_v15 = vmul.f32 %v2776_v62, %v2209_v56  ;;  %v2216_v16 = vmul.f32 %v2777_v63, %v2210_v57  ;;  %v2217_v17 = vmul.f32 %v2778_v0, %v2211_v6  ;;  %v2219_v18 = vperm.slane %v2775_v4, 0  ;;  %v2787_v45 = vld [vmem:[%s3436_s14 + $0x2d0] sm:$0xff]  ;;  %v2789_v47 = vld [vmem:[%s3436_s14 + $0x2e0] sm:$0xff] }
 0x1c1   : > { %v2220_v19 = vperm.slane %v2775_v4, 1  ;;  %v2221_v20 = vperm.slane %v2775_v4, 2  ;;  %v2234_v21 = vmul.f32 %v2779_v5, %v2209_v56  ;;  %v2235_v22 = vmul.f32 %v2780_v11, %v2210_v57  ;;  %v2790_v57 = vld [vmem:[%s3423_s10 + $0x4f] ss:$8 sm:$0x7] }
 0x1c2   : > { %v2236_v23 = vmul.f32 %v2781_v12, %v2211_v6  ;;  %v2259_v24 = vperm.slane %v2782_v13, 0  ;;  %v2260_v25 = vperm.slane %v2782_v13, 1  ;;  %v2225_v26 = vmul.f32 %v2779_v5, %v2219_v18 }
 0x1c3   : > { %v2226_v27 = vmul.f32 %v2780_v11, %v2220_v19  ;;  %v2227_v28 = vmul.f32 %v2781_v12, %v2221_v20  ;;  %v2237_v29 = vmul.f32 %v2776_v62, %v2219_v18  ;;  %v2182_v31 = vadd.f32 %v2179_v3, %v2132_v58  ;;  %v2793_v11 = vld [vmem:[%s3431_s18 + $0x2f0] sm:$0xff]  ;;  %v2794_v12 = vld [vmem:[%s3431_s18 + $0x2f8] sm:$0xff] }
 0x1c4   : > { %v2238_v32 = vmul.f32 %v2777_v63, %v2220_v19  ;;  %v2239_v33 = vmul.f32 %v2778_v0, %v2221_v20  ;;  %v2261_v35 = vperm.slane %v2782_v13, 2  ;;  %v2183_v36 = vadd.f32 %v2180_v7, %v2133_v59 }
 0x1c5   : > { %v2193_v37 = vadd.f32 %v2190_v8, %v2143_v60  ;;  %v2194_v38 = vadd.f32 %v2191_v9, %v2144_v1  ;;  %v2228_v39 = vsub.f32 %v2215_v15, %v2225_v26  ;;  %v2195_v42 = vadd.f32 %v2192_v10, %v2145_v2  ;;  %v2792_v10 = vld [vmem:[%s3431_s18 + $0x2e8] sm:$0xff] }
 0x1c6   : > { %v2229_v43 = vsub.f32 %v2216_v16, %v2226_v27  ;;  %v2230_v44 = vsub.f32 %v2217_v17, %v2227_v28  ;;  %v2265_v48 = vmul.f32 %v2784_v30, %v2259_v24  ;;  %v2240_v49 = vadd.f32 %v2237_v29, %v2234_v21  ;;  %v2791_v16 = vld [vmem:[%s3428_s13 + $0x4f] ss:$8 sm:$0x7] }
 0x1c7   : > { %v2241_v50 = vadd.f32 %v2238_v32, %v2235_v22  ;;  %v2242_v51 = vadd.f32 %v2239_v33, %v2236_v23  ;;  %v2266_v52 = vmul.f32 %v2785_v34, %v2260_v25  ;;  %v2231_v53 = vadd.f32 %v2228_v39, %v2181_v14  ;;  %v2795_v17 = vld [vmem:[%s3436_s14 + $0x2e8] sm:$0xff]  ;;  %v2796_v23 = vld [vmem:[%s3436_s14 + $0x2f0] sm:$0xff] }
 0x1c8   : > { %v2267_v54 = vmul.f32 %v2786_v41, %v2261_v35  ;;  %v2269_v55 = vperm.slane %v2783_v40, 0  ;;  %v2270_v56 = vperm.slane %v2783_v40, 1  ;;  %v2271_v58 = vperm.slane %v2783_v40, 2 }
 0x1c9   : > { %v2284_v59 = vmul.f32 %v2787_v45, %v2259_v24  ;;  %v2285_v60 = vmul.f32 %v2788_v46, %v2260_v25  ;;  %v2286_v61 = vmul.f32 %v2789_v47, %v2261_v35  ;;  %v2309_v4 = vperm.slane %v2790_v57, 0  ;;  %v2797_v24 = vld [vmem:[%s3436_s14 + $0x2f8] sm:$0xff] }
 0x1ca   : > { %v2275_v62 = vmul.f32 %v2787_v45, %v2269_v55  ;;  %v2276_v63 = vmul.f32 %v2788_v46, %v2270_v56  ;;  %v2287_v0 = vmul.f32 %v2784_v30, %v2269_v55  ;;  %v2288_v1 = vmul.f32 %v2785_v34, %v2270_v56 }
 0x1cb   : > { %v2277_v2 = vmul.f32 %v2789_v47, %v2271_v58  ;;  %v2289_v3 = vmul.f32 %v2786_v41, %v2271_v58  ;;  %v2310_v5 = vperm.slane %v2790_v57, 1  ;;  %v2232_v6 = vadd.f32 %v2229_v43, %v2182_v31 }
 0x1cc   : > { %v2233_v7 = vadd.f32 %v2230_v44, %v2183_v36  ;;  %v2243_v8 = vadd.f32 %v2240_v49, %v2193_v37  ;;  %v2278_v9 = vsub.f32 %v2265_v48, %v2275_v62  ;;  %v2244_v13 = vadd.f32 %v2241_v50, %v2194_v38 }
 0x1cd   : > { %v2279_v14 = vsub.f32 %v2266_v52, %v2276_v63  ;;  %v2280_v15 = vsub.f32 %v2267_v54, %v2277_v2  ;;  %v2311_v18 = vperm.slane %v2790_v57, 2  ;;  %v2245_v19 = vadd.f32 %v2242_v51, %v2195_v42 }
 0x1ce   : > { %v2290_v20 = vadd.f32 %v2287_v0, %v2284_v59  ;;  %v2291_v21 = vadd.f32 %v2288_v1, %v2285_v60  ;;  %v2292_v22 = vadd.f32 %v2289_v3, %v2286_v61  ;;  %v2281_v25 = vadd.f32 %v2278_v9, %v2231_v53 }
 0x1cf   : > { %v2315_v26 = vmul.f32 %v2792_v10, %v2309_v4  ;;  %v2316_v27 = vmul.f32 %v2793_v11, %v2310_v5  ;;  %v2317_v28 = vmul.f32 %v2794_v12, %v2311_v18  ;;  %v2319_v29 = vperm.slane %v2791_v16, 0 }
 0x1d0   : > { %v2320_v30 = vperm.slane %v2791_v16, 1  ;;  %v2321_v31 = vperm.slane %v2791_v16, 2  ;;  %v2334_v32 = vmul.f32 %v2795_v17, %v2309_v4  ;;  %v2282_v33 = vadd.f32 %v2279_v14, %v2232_v6 }
 0x1d1   : > { %v2283_v34 = vadd.f32 %v2280_v15, %v2233_v7  ;;  %v2335_v35 = vmul.f32 %v2796_v23, %v2310_v5  ;;  %v2336_v36 = vmul.f32 %v2797_v24, %v2311_v18  ;;  %v2325_v37 = vmul.f32 %v2795_v17, %v2319_v29 }
 0x1d2   : > { %v2326_v38 = vmul.f32 %v2796_v23, %v2320_v30  ;;  %v2327_v39 = vmul.f32 %v2797_v24, %v2321_v31  ;;  %v2337_v40 = vmul.f32 %v2792_v10, %v2319_v29  ;;  %v2293_v41 = vadd.f32 %v2290_v20, %v2243_v8 }
 0x1d3   : > { %v2294_v42 = vadd.f32 %v2291_v21, %v2244_v13  ;;  %v2338_v43 = vmul.f32 %v2793_v11, %v2320_v30  ;;  %v2339_v44 = vmul.f32 %v2794_v12, %v2321_v31  ;;  %v2328_v45 = vsub.f32 %v2315_v26, %v2325_v37 }
 0x1d4   : > { %v2329_v46 = vsub.f32 %v2316_v27, %v2326_v38  ;;  %v2330_v47 = vsub.f32 %v2317_v28, %v2327_v39  ;;  %v2340_v48 = vadd.f32 %v2337_v40, %v2334_v32  ;;  %v2295_v49 = vadd.f32 %v2292_v22, %v2245_v19 }
 0x1d5   : > { %v2341_v50 = vadd.f32 %v2338_v43, %v2335_v35  ;;  %v2342_v51 = vadd.f32 %v2339_v44, %v2336_v36  ;;  %v2331_v52 = vadd.f32 %v2328_v45, %v2281_v25 }
 0x1d6   : > { %v2332_v53 = vadd.f32 %v2329_v46, %v2282_v33  ;;  %v2333_v54 = vadd.f32 %v2330_v47, %v2283_v34  ;;  %v2343_v55 = vadd.f32 %v2340_v48, %v2293_v41 }
 0x1d7   : > { %v2344_v56 = vadd.f32 %v2341_v50, %v2294_v42  ;;  %2346 = vst [vmem:[%s740_s27] sm:$0xff] %v2331_v52  ;;  %v2345_v57 = vadd.f32 %v2342_v51, %v2295_v49 }
 0x1d8   : > { %2347 = vst [vmem:[%s740_s27 + $0x8] sm:$0xff] %v2332_v53 }
 0x1d9   : > { %2348 = vst [vmem:[%s740_s27 + $0x10] sm:$0xff] %v2333_v54 }
 0x1da   : > { %2349 = vst [vmem:[%s749_s7] sm:$0xff] %v2343_v55 }
 0x1db   : > { %2350 = vst [vmem:[%s749_s7 + $0x8] sm:$0xff] %v2344_v56 }
 0x1dc   : > { %2351 = vst [vmem:[%s749_s7 + $0x10] sm:$0xff] %v2345_v57 }
 0x1dd PF: > { %s16_s24 = sadd.s32 1, %s2918_s24   ;;  %s3749_s18 = smov %s2898_s19 }
 0x1de   : > { %p13_p12 = scmp.ge.s32.totalorder %s16_s24, 10   ;;  %s3750_s19 = smov %s3003_s30 }
 0x1df   : > { %s3751_s20 = smov %s2910_s22  ;;  %s3752_s21 = smov %s2914_s23 }
 0x1e0   : > { %s3753_s22 = smov %s3756_s25  ;;  %s3754_s23 = smov %s3760_s26 }
 0x1e1   :  { %15 = sbr.rel (!%p13_p12) target bundleno = 4 (0x4), region = 267 }

// kernel: reverse.8
= control target key start
LH: loop header
LB: loop body
LE: loop exit
PB: predicated region body
PF: predicated region fallthrough
CT: control target
= control target key end

     0   :  { %s1448_s0 = inlined_call_operand.vmem [shape: f32[2,32,32,15], index: 0, kind: input, shape index: {}]   ;;  %s1449_s1 = inlined_call_operand.vmem [shape: f32[2,32,32,15], index: 1, kind: output, shape index: {}]  }
   0x1   :  { %v480_v0 = vld [vmem:[%s1448_s0 + $0x1c0] sm:$0xff]  ;;  %v538_v30 = vld [vmem:[%s1448_s0 + $0x1c8] sm:$0xff]  ;;  %v598_v60 = vld [vmem:[%s1448_s0 + $0x1d0] sm:$0xff] }
   0x2   :  { %v481_v1 = vld [vmem:[%s1448_s0 + $0x3a0] sm:$0xff]  ;;  %4 = vst [vmem:[%s1449_s1] sm:$0xff] %v480_v0  ;;  %v540_v31 = vld [vmem:[%s1448_s0 + $0x3a8] sm:$0xff]  ;;  %v600_v61 = vld [vmem:[%s1448_s0 + $0x3b0] sm:$0xff] }
   0x3   :  { %v483_v2 = vld [vmem:[%s1448_s0 + $0x1a0] sm:$0xff]  ;;  %482 = vst [vmem:[%s1449_s1 + $0x1e0] sm:$0xff] %v481_v1  ;;  %v542_v32 = vld [vmem:[%s1448_s0 + $0x1a8] sm:$0xff]  ;;  %v602_v62 = vld [vmem:[%s1448_s0 + $0x1b0] sm:$0xff] }
   0x4   :  { %v485_v3 = vld [vmem:[%s1448_s0 + $0x380] sm:$0xff]  ;;  %484 = vst [vmem:[%s1449_s1 + $0x20] sm:$0xff] %v483_v2  ;;  %v544_v33 = vld [vmem:[%s1448_s0 + $0x388] sm:$0xff]  ;;  %v604_v63 = vld [vmem:[%s1448_s0 + $0x390] sm:$0xff] }
   0x5   :  { %v487_v4 = vld [vmem:[%s1448_s0 + $0x180] sm:$0xff]  ;;  %486 = vst [vmem:[%s1449_s1 + $0x200] sm:$0xff] %v485_v3  ;;  %v546_v34 = vld [vmem:[%s1448_s0 + $0x188] sm:$0xff]  ;;  %v606_v0 = vld [vmem:[%s1448_s0 + $0x190] sm:$0xff] }
   0x6   :  { %v489_v5 = vld [vmem:[%s1448_s0 + $0x360] sm:$0xff]  ;;  %488 = vst [vmem:[%s1449_s1 + $0x40] sm:$0xff] %v487_v4  ;;  %v548_v35 = vld [vmem:[%s1448_s0 + $0x368] sm:$0xff]  ;;  %v608_v1 = vld [vmem:[%s1448_s0 + $0x370] sm:$0xff] }
   0x7   :  { %v491_v6 = vld [vmem:[%s1448_s0 + $0x160] sm:$0xff]  ;;  %490 = vst [vmem:[%s1449_s1 + $0x220] sm:$0xff] %v489_v5  ;;  %v550_v36 = vld [vmem:[%s1448_s0 + $0x168] sm:$0xff]  ;;  %v610_v2 = vld [vmem:[%s1448_s0 + $0x170] sm:$0xff] }
   0x8   :  { %v493_v7 = vld [vmem:[%s1448_s0 + $0x340] sm:$0xff]  ;;  %492 = vst [vmem:[%s1449_s1 + $0x60] sm:$0xff] %v491_v6  ;;  %v552_v37 = vld [vmem:[%s1448_s0 + $0x348] sm:$0xff]  ;;  %v612_v3 = vld [vmem:[%s1448_s0 + $0x350] sm:$0xff] }
   0x9   :  { %v495_v8 = vld [vmem:[%s1448_s0 + $0x140] sm:$0xff]  ;;  %494 = vst [vmem:[%s1449_s1 + $0x240] sm:$0xff] %v493_v7  ;;  %v554_v38 = vld [vmem:[%s1448_s0 + $0x148] sm:$0xff]  ;;  %v614_v4 = vld [vmem:[%s1448_s0 + $0x150] sm:$0xff] }
   0xa   :  { %v497_v9 = vld [vmem:[%s1448_s0 + $0x320] sm:$0xff]  ;;  %496 = vst [vmem:[%s1449_s1 + $0x80] sm:$0xff] %v495_v8  ;;  %v556_v39 = vld [vmem:[%s1448_s0 + $0x328] sm:$0xff]  ;;  %v616_v5 = vld [vmem:[%s1448_s0 + $0x330] sm:$0xff] }
   0xb   :  { %v499_v10 = vld [vmem:[%s1448_s0 + $0x120] sm:$0xff]  ;;  %498 = vst [vmem:[%s1449_s1 + $0x260] sm:$0xff] %v497_v9  ;;  %v558_v40 = vld [vmem:[%s1448_s0 + $0x128] sm:$0xff]  ;;  %v618_v6 = vld [vmem:[%s1448_s0 + $0x130] sm:$0xff] }
   0xc   :  { %v501_v11 = vld [vmem:[%s1448_s0 + $0x300] sm:$0xff]  ;;  %500 = vst [vmem:[%s1449_s1 + $0xa0] sm:$0xff] %v499_v10  ;;  %v560_v41 = vld [vmem:[%s1448_s0 + $0x308] sm:$0xff]  ;;  %v620_v7 = vld [vmem:[%s1448_s0 + $0x310] sm:$0xff] }
   0xd   :  { %v503_v12 = vld [vmem:[%s1448_s0 + $0x100] sm:$0xff]  ;;  %502 = vst [vmem:[%s1449_s1 + $0x280] sm:$0xff] %v501_v11  ;;  %v562_v42 = vld [vmem:[%s1448_s0 + $0x108] sm:$0xff]  ;;  %v622_v8 = vld [vmem:[%s1448_s0 + $0x110] sm:$0xff] }
   0xe   :  { %v505_v13 = vld [vmem:[%s1448_s0 + $0x2e0] sm:$0xff]  ;;  %504 = vst [vmem:[%s1449_s1 + $0xc0] sm:$0xff] %v503_v12  ;;  %v564_v43 = vld [vmem:[%s1448_s0 + $0x2e8] sm:$0xff]  ;;  %v624_v9 = vld [vmem:[%s1448_s0 + $0x2f0] sm:$0xff] }
   0xf   :  { %v507_v14 = vld [vmem:[%s1448_s0 + $0xe0] sm:$0xff]  ;;  %506 = vst [vmem:[%s1449_s1 + $0x2a0] sm:$0xff] %v505_v13  ;;  %v566_v44 = vld [vmem:[%s1448_s0 + $0xe8] sm:$0xff]  ;;  %v626_v10 = vld [vmem:[%s1448_s0 + $0xf0] sm:$0xff] }
  0x10   :  { %v509_v15 = vld [vmem:[%s1448_s0 + $0x2c0] sm:$0xff]  ;;  %508 = vst [vmem:[%s1449_s1 + $0xe0] sm:$0xff] %v507_v14  ;;  %v568_v45 = vld [vmem:[%s1448_s0 + $0x2c8] sm:$0xff]  ;;  %v628_v11 = vld [vmem:[%s1448_s0 + $0x2d0] sm:$0xff] }
  0x11   :  { %v511_v16 = vld [vmem:[%s1448_s0 + $0xc0] sm:$0xff]  ;;  %510 = vst [vmem:[%s1449_s1 + $0x2c0] sm:$0xff] %v509_v15  ;;  %v570_v46 = vld [vmem:[%s1448_s0 + $0xc8] sm:$0xff]  ;;  %v630_v12 = vld [vmem:[%s1448_s0 + $0xd0] sm:$0xff] }
  0x12   :  { %v513_v17 = vld [vmem:[%s1448_s0 + $0x2a0] sm:$0xff]  ;;  %512 = vst [vmem:[%s1449_s1 + $0x100] sm:$0xff] %v511_v16  ;;  %v572_v47 = vld [vmem:[%s1448_s0 + $0x2a8] sm:$0xff]  ;;  %v632_v13 = vld [vmem:[%s1448_s0 + $0x2b0] sm:$0xff] }
  0x13   :  { %v515_v18 = vld [vmem:[%s1448_s0 + $0xa0] sm:$0xff]  ;;  %514 = vst [vmem:[%s1449_s1 + $0x2e0] sm:$0xff] %v513_v17  ;;  %v574_v48 = vld [vmem:[%s1448_s0 + $0xa8] sm:$0xff]  ;;  %v634_v14 = vld [vmem:[%s1448_s0 + $0xb0] sm:$0xff] }
  0x14   :  { %v517_v19 = vld [vmem:[%s1448_s0 + $0x280] sm:$0xff]  ;;  %516 = vst [vmem:[%s1449_s1 + $0x120] sm:$0xff] %v515_v18  ;;  %v576_v49 = vld [vmem:[%s1448_s0 + $0x288] sm:$0xff]  ;;  %v636_v15 = vld [vmem:[%s1448_s0 + $0x290] sm:$0xff] }
  0x15   :  { %v519_v20 = vld [vmem:[%s1448_s0 + $0x80] sm:$0xff]  ;;  %518 = vst [vmem:[%s1449_s1 + $0x300] sm:$0xff] %v517_v19  ;;  %v578_v50 = vld [vmem:[%s1448_s0 + $0x88] sm:$0xff]  ;;  %v638_v16 = vld [vmem:[%s1448_s0 + $0x90] sm:$0xff] }
  0x16   :  { %v521_v21 = vld [vmem:[%s1448_s0 + $0x260] sm:$0xff]  ;;  %520 = vst [vmem:[%s1449_s1 + $0x140] sm:$0xff] %v519_v20  ;;  %v580_v51 = vld [vmem:[%s1448_s0 + $0x268] sm:$0xff]  ;;  %v640_v17 = vld [vmem:[%s1448_s0 + $0x270] sm:$0xff] }
  0x17   :  { %v523_v22 = vld [vmem:[%s1448_s0 + $0x60] sm:$0xff]  ;;  %522 = vst [vmem:[%s1449_s1 + $0x320] sm:$0xff] %v521_v21  ;;  %v582_v52 = vld [vmem:[%s1448_s0 + $0x68] sm:$0xff]  ;;  %v642_v18 = vld [vmem:[%s1448_s0 + $0x70] sm:$0xff] }
  0x18   :  { %v525_v23 = vld [vmem:[%s1448_s0 + $0x240] sm:$0xff]  ;;  %524 = vst [vmem:[%s1449_s1 + $0x160] sm:$0xff] %v523_v22  ;;  %v584_v53 = vld [vmem:[%s1448_s0 + $0x248] sm:$0xff]  ;;  %v644_v19 = vld [vmem:[%s1448_s0 + $0x250] sm:$0xff] }
  0x19   :  { %v527_v24 = vld [vmem:[%s1448_s0 + $0x40] sm:$0xff]  ;;  %526 = vst [vmem:[%s1449_s1 + $0x340] sm:$0xff] %v525_v23  ;;  %v586_v54 = vld [vmem:[%s1448_s0 + $0x48] sm:$0xff]  ;;  %v646_v20 = vld [vmem:[%s1448_s0 + $0x50] sm:$0xff] }
  0x1a   :  { %v529_v25 = vld [vmem:[%s1448_s0 + $0x220] sm:$0xff]  ;;  %528 = vst [vmem:[%s1449_s1 + $0x180] sm:$0xff] %v527_v24  ;;  %v588_v55 = vld [vmem:[%s1448_s0 + $0x228] sm:$0xff]  ;;  %v648_v21 = vld [vmem:[%s1448_s0 + $0x230] sm:$0xff] }
  0x1b   :  { %v531_v26 = vld [vmem:[%s1448_s0 + $0x20] sm:$0xff]  ;;  %530 = vst [vmem:[%s1449_s1 + $0x360] sm:$0xff] %v529_v25  ;;  %v590_v56 = vld [vmem:[%s1448_s0 + $0x28] sm:$0xff]  ;;  %v650_v22 = vld [vmem:[%s1448_s0 + $0x30] sm:$0xff] }
  0x1c   :  { %v533_v27 = vld [vmem:[%s1448_s0 + $0x200] sm:$0xff]  ;;  %532 = vst [vmem:[%s1449_s1 + $0x1a0] sm:$0xff] %v531_v26  ;;  %v592_v57 = vld [vmem:[%s1448_s0 + $0x208] sm:$0xff]  ;;  %v652_v23 = vld [vmem:[%s1448_s0 + $0x210] sm:$0xff] }
  0x1d   :  { %v113_v28 = vld [vmem:[%s1448_s0] sm:$0xff]  ;;  %534 = vst [vmem:[%s1449_s1 + $0x380] sm:$0xff] %v533_v27  ;;  %v594_v58 = vld [vmem:[%s1448_s0 + $0x8] sm:$0xff]  ;;  %v654_v24 = vld [vmem:[%s1448_s0 + $0x10] sm:$0xff] }
  0x1e   :  { %v536_v29 = vld [vmem:[%s1448_s0 + $0x1e0] sm:$0xff]  ;;  %535 = vst [vmem:[%s1449_s1 + $0x1c0] sm:$0xff] %v113_v28  ;;  %v596_v59 = vld [vmem:[%s1448_s0 + $0x1e8] sm:$0xff]  ;;  %v656_v25 = vld [vmem:[%s1448_s0 + $0x1f0] sm:$0xff] }
  0x1f   :  { %537 = vst [vmem:[%s1449_s1 + $0x3a0] sm:$0xff] %v536_v29  ;;  %v658_v26 = vld [vmem:[%s1448_s0 + $0x1d8] sm:$0xff] }
  0x20   :  { %539 = vst [vmem:[%s1449_s1 + $0x8] sm:$0xff] %v538_v30  ;;  %v660_v27 = vld [vmem:[%s1448_s0 + $0x3b8] sm:$0xff] }
  0x21   :  { %541 = vst [vmem:[%s1449_s1 + $0x1e8] sm:$0xff] %v540_v31  ;;  %v662_v28 = vld [vmem:[%s1448_s0 + $0x1b8] sm:$0xff] }
  0x22   :  { %543 = vst [vmem:[%s1449_s1 + $0x28] sm:$0xff] %v542_v32  ;;  %v664_v29 = vld [vmem:[%s1448_s0 + $0x398] sm:$0xff] }
  0x23   :  { %545 = vst [vmem:[%s1449_s1 + $0x208] sm:$0xff] %v544_v33  ;;  %v666_v30 = vld [vmem:[%s1448_s0 + $0x198] sm:$0xff] }
  0x24   :  { %547 = vst [vmem:[%s1449_s1 + $0x48] sm:$0xff] %v546_v34  ;;  %v668_v31 = vld [vmem:[%s1448_s0 + $0x378] sm:$0xff] }
  0x25   :  { %549 = vst [vmem:[%s1449_s1 + $0x228] sm:$0xff] %v548_v35  ;;  %v670_v32 = vld [vmem:[%s1448_s0 + $0x178] sm:$0xff] }
  0x26   :  { %551 = vst [vmem:[%s1449_s1 + $0x68] sm:$0xff] %v550_v36  ;;  %v672_v33 = vld [vmem:[%s1448_s0 + $0x358] sm:$0xff] }
  0x27   :  { %553 = vst [vmem:[%s1449_s1 + $0x248] sm:$0xff] %v552_v37  ;;  %v674_v34 = vld [vmem:[%s1448_s0 + $0x158] sm:$0xff] }
  0x28   :  { %555 = vst [vmem:[%s1449_s1 + $0x88] sm:$0xff] %v554_v38  ;;  %v676_v35 = vld [vmem:[%s1448_s0 + $0x338] sm:$0xff] }
  0x29   :  { %557 = vst [vmem:[%s1449_s1 + $0x268] sm:$0xff] %v556_v39  ;;  %v678_v36 = vld [vmem:[%s1448_s0 + $0x138] sm:$0xff] }
  0x2a   :  { %559 = vst [vmem:[%s1449_s1 + $0xa8] sm:$0xff] %v558_v40  ;;  %v680_v37 = vld [vmem:[%s1448_s0 + $0x318] sm:$0xff] }
  0x2b   :  { %561 = vst [vmem:[%s1449_s1 + $0x288] sm:$0xff] %v560_v41  ;;  %v682_v38 = vld [vmem:[%s1448_s0 + $0x118] sm:$0xff] }
  0x2c   :  { %563 = vst [vmem:[%s1449_s1 + $0xc8] sm:$0xff] %v562_v42  ;;  %v684_v39 = vld [vmem:[%s1448_s0 + $0x2f8] sm:$0xff] }
  0x2d   :  { %565 = vst [vmem:[%s1449_s1 + $0x2a8] sm:$0xff] %v564_v43  ;;  %v686_v40 = vld [vmem:[%s1448_s0 + $0xf8] sm:$0xff] }
  0x2e   :  { %567 = vst [vmem:[%s1449_s1 + $0xe8] sm:$0xff] %v566_v44  ;;  %v688_v41 = vld [vmem:[%s1448_s0 + $0x2d8] sm:$0xff] }
  0x2f   :  { %569 = vst [vmem:[%s1449_s1 + $0x2c8] sm:$0xff] %v568_v45  ;;  %v690_v42 = vld [vmem:[%s1448_s0 + $0xd8] sm:$0xff] }
  0x30   :  { %571 = vst [vmem:[%s1449_s1 + $0x108] sm:$0xff] %v570_v46  ;;  %v692_v43 = vld [vmem:[%s1448_s0 + $0x2b8] sm:$0xff] }
  0x31   :  { %573 = vst [vmem:[%s1449_s1 + $0x2e8] sm:$0xff] %v572_v47  ;;  %v694_v44 = vld [vmem:[%s1448_s0 + $0xb8] sm:$0xff] }
  0x32   :  { %575 = vst [vmem:[%s1449_s1 + $0x128] sm:$0xff] %v574_v48  ;;  %v696_v45 = vld [vmem:[%s1448_s0 + $0x298] sm:$0xff] }
  0x33   :  { %577 = vst [vmem:[%s1449_s1 + $0x308] sm:$0xff] %v576_v49  ;;  %v698_v46 = vld [vmem:[%s1448_s0 + $0x98] sm:$0xff] }
  0x34   :  { %579 = vst [vmem:[%s1449_s1 + $0x148] sm:$0xff] %v578_v50  ;;  %v700_v47 = vld [vmem:[%s1448_s0 + $0x278] sm:$0xff] }
  0x35   :  { %581 = vst [vmem:[%s1449_s1 + $0x328] sm:$0xff] %v580_v51  ;;  %v702_v48 = vld [vmem:[%s1448_s0 + $0x78] sm:$0xff] }
  0x36   :  { %583 = vst [vmem:[%s1449_s1 + $0x168] sm:$0xff] %v582_v52  ;;  %v704_v49 = vld [vmem:[%s1448_s0 + $0x258] sm:$0xff] }
  0x37   :  { %585 = vst [vmem:[%s1449_s1 + $0x348] sm:$0xff] %v584_v53  ;;  %v706_v50 = vld [vmem:[%s1448_s0 + $0x58] sm:$0xff] }
  0x38   :  { %587 = vst [vmem:[%s1449_s1 + $0x188] sm:$0xff] %v586_v54  ;;  %v708_v51 = vld [vmem:[%s1448_s0 + $0x238] sm:$0xff] }
  0x39   :  { %589 = vst [vmem:[%s1449_s1 + $0x368] sm:$0xff] %v588_v55  ;;  %v710_v52 = vld [vmem:[%s1448_s0 + $0x38] sm:$0xff] }
  0x3a   :  { %591 = vst [vmem:[%s1449_s1 + $0x1a8] sm:$0xff] %v590_v56  ;;  %v712_v53 = vld [vmem:[%s1448_s0 + $0x218] sm:$0xff] }
  0x3b   :  { %593 = vst [vmem:[%s1449_s1 + $0x388] sm:$0xff] %v592_v57  ;;  %v714_v54 = vld [vmem:[%s1448_s0 + $0x18] sm:$0xff] }
  0x3c   :  { %595 = vst [vmem:[%s1449_s1 + $0x1c8] sm:$0xff] %v594_v58  ;;  %v716_v55 = vld [vmem:[%s1448_s0 + $0x1f8] sm:$0xff] }
  0x3d   :  { %597 = vst [vmem:[%s1449_s1 + $0x3a8] sm:$0xff] %v596_v59 }
  0x3e   :  { %599 = vst [vmem:[%s1449_s1 + $0x10] sm:$0xff] %v598_v60 }
  0x3f   :  { %601 = vst [vmem:[%s1449_s1 + $0x1f0] sm:$0xff] %v600_v61 }
  0x40   :  { %603 = vst [vmem:[%s1449_s1 + $0x30] sm:$0xff] %v602_v62 }
  0x41   :  { %605 = vst [vmem:[%s1449_s1 + $0x210] sm:$0xff] %v604_v63 }
  0x42   :  { %607 = vst [vmem:[%s1449_s1 + $0x50] sm:$0xff] %v606_v0 }
  0x43   :  { %609 = vst [vmem:[%s1449_s1 + $0x230] sm:$0xff] %v608_v1 }
  0x44   :  { %611 = vst [vmem:[%s1449_s1 + $0x70] sm:$0xff] %v610_v2 }
  0x45   :  { %613 = vst [vmem:[%s1449_s1 + $0x250] sm:$0xff] %v612_v3 }
  0x46   :  { %615 = vst [vmem:[%s1449_s1 + $0x90] sm:$0xff] %v614_v4 }
  0x47   :  { %617 = vst [vmem:[%s1449_s1 + $0x270] sm:$0xff] %v616_v5 }
  0x48   :  { %619 = vst [vmem:[%s1449_s1 + $0xb0] sm:$0xff] %v618_v6 }
  0x49   :  { %621 = vst [vmem:[%s1449_s1 + $0x290] sm:$0xff] %v620_v7 }
  0x4a   :  { %623 = vst [vmem:[%s1449_s1 + $0xd0] sm:$0xff] %v622_v8 }
  0x4b   :  { %625 = vst [vmem:[%s1449_s1 + $0x2b0] sm:$0xff] %v624_v9 }
  0x4c   :  { %627 = vst [vmem:[%s1449_s1 + $0xf0] sm:$0xff] %v626_v10 }
  0x4d   :  { %629 = vst [vmem:[%s1449_s1 + $0x2d0] sm:$0xff] %v628_v11 }
  0x4e   :  { %631 = vst [vmem:[%s1449_s1 + $0x110] sm:$0xff] %v630_v12 }
  0x4f   :  { %633 = vst [vmem:[%s1449_s1 + $0x2f0] sm:$0xff] %v632_v13 }
  0x50   :  { %635 = vst [vmem:[%s1449_s1 + $0x130] sm:$0xff] %v634_v14 }
  0x51   :  { %637 = vst [vmem:[%s1449_s1 + $0x310] sm:$0xff] %v636_v15 }
  0x52   :  { %639 = vst [vmem:[%s1449_s1 + $0x150] sm:$0xff] %v638_v16 }
  0x53   :  { %641 = vst [vmem:[%s1449_s1 + $0x330] sm:$0xff] %v640_v17 }
  0x54   :  { %643 = vst [vmem:[%s1449_s1 + $0x170] sm:$0xff] %v642_v18 }
  0x55   :  { %645 = vst [vmem:[%s1449_s1 + $0x350] sm:$0xff] %v644_v19 }
  0x56   :  { %647 = vst [vmem:[%s1449_s1 + $0x190] sm:$0xff] %v646_v20 }
  0x57   :  { %649 = vst [vmem:[%s1449_s1 + $0x370] sm:$0xff] %v648_v21 }
  0x58   :  { %651 = vst [vmem:[%s1449_s1 + $0x1b0] sm:$0xff] %v650_v22 }
  0x59   :  { %653 = vst [vmem:[%s1449_s1 + $0x390] sm:$0xff] %v652_v23 }
  0x5a   :  { %655 = vst [vmem:[%s1449_s1 + $0x1d0] sm:$0xff] %v654_v24 }
  0x5b   :  { %657 = vst [vmem:[%s1449_s1 + $0x3b0] sm:$0xff] %v656_v25 }
  0x5c   :  { %659 = vst [vmem:[%s1449_s1 + $0x18] sm:$0xff] %v658_v26 }
  0x5d   :  { %661 = vst [vmem:[%s1449_s1 + $0x1f8] sm:$0xff] %v660_v27 }
  0x5e   :  { %663 = vst [vmem:[%s1449_s1 + $0x38] sm:$0xff] %v662_v28 }
  0x5f   :  { %665 = vst [vmem:[%s1449_s1 + $0x218] sm:$0xff] %v664_v29 }
  0x60   :  { %667 = vst [vmem:[%s1449_s1 + $0x58] sm:$0xff] %v666_v30 }
  0x61   :  { %669 = vst [vmem:[%s1449_s1 + $0x238] sm:$0xff] %v668_v31 }
  0x62   :  { %671 = vst [vmem:[%s1449_s1 + $0x78] sm:$0xff] %v670_v32 }
  0x63   :  { %673 = vst [vmem:[%s1449_s1 + $0x258] sm:$0xff] %v672_v33 }
  0x64   :  { %675 = vst [vmem:[%s1449_s1 + $0x98] sm:$0xff] %v674_v34 }
  0x65   :  { %677 = vst [vmem:[%s1449_s1 + $0x278] sm:$0xff] %v676_v35 }
  0x66   :  { %679 = vst [vmem:[%s1449_s1 + $0xb8] sm:$0xff] %v678_v36 }
  0x67   :  { %681 = vst [vmem:[%s1449_s1 + $0x298] sm:$0xff] %v680_v37 }
  0x68   :  { %683 = vst [vmem:[%s1449_s1 + $0xd8] sm:$0xff] %v682_v38 }
  0x69   :  { %685 = vst [vmem:[%s1449_s1 + $0x2b8] sm:$0xff] %v684_v39 }
  0x6a   :  { %687 = vst [vmem:[%s1449_s1 + $0xf8] sm:$0xff] %v686_v40 }
  0x6b   :  { %689 = vst [vmem:[%s1449_s1 + $0x2d8] sm:$0xff] %v688_v41 }
  0x6c   :  { %691 = vst [vmem:[%s1449_s1 + $0x118] sm:$0xff] %v690_v42 }
  0x6d   :  { %693 = vst [vmem:[%s1449_s1 + $0x2f8] sm:$0xff] %v692_v43 }
  0x6e   :  { %695 = vst [vmem:[%s1449_s1 + $0x138] sm:$0xff] %v694_v44 }
  0x6f   :  { %697 = vst [vmem:[%s1449_s1 + $0x318] sm:$0xff] %v696_v45 }
  0x70   :  { %699 = vst [vmem:[%s1449_s1 + $0x158] sm:$0xff] %v698_v46 }
  0x71   :  { %701 = vst [vmem:[%s1449_s1 + $0x338] sm:$0xff] %v700_v47 }
  0x72   :  { %703 = vst [vmem:[%s1449_s1 + $0x178] sm:$0xff] %v702_v48 }
  0x73   :  { %705 = vst [vmem:[%s1449_s1 + $0x358] sm:$0xff] %v704_v49 }
  0x74   :  { %707 = vst [vmem:[%s1449_s1 + $0x198] sm:$0xff] %v706_v50 }
  0x75   :  { %709 = vst [vmem:[%s1449_s1 + $0x378] sm:$0xff] %v708_v51 }
  0x76   :  { %711 = vst [vmem:[%s1449_s1 + $0x1b8] sm:$0xff] %v710_v52 }
  0x77   :  { %713 = vst [vmem:[%s1449_s1 + $0x398] sm:$0xff] %v712_v53 }
  0x78   :  { %715 = vst [vmem:[%s1449_s1 + $0x1d8] sm:$0xff] %v714_v54 }
  0x79   :  { %717 = vst [vmem:[%s1449_s1 + $0x3b8] sm:$0xff] %v716_v55 }

// kernel: tile.34
= control target key start
LH: loop header
LB: loop body
LE: loop exit
PB: predicated region body
PF: predicated region fallthrough
CT: control target
= control target key end

     0   :  { %s22_s0 = inlined_call_operand.vmem [shape: f32[32], index: 0, kind: input, shape index: {}]   ;;  %s23_s1 = inlined_call_operand.vmem [shape: f32[4,32], index: 1, kind: output, shape index: {}]  }
   0x1   :  { %v4_v0 = vld [vmem:[%s22_s0] ss:$0 sm:$0xff] }
   0x2   :  { %5 = vst [vmem:[%s23_s1] sm:$0xf] %v4_v0 }

// kernel: fno2d_forward.12
= control target key start
LH: loop header
LB: loop body
LE: loop exit
PB: predicated region body
PF: predicated region fallthrough
CT: control target
= control target key end

     0   :  { %s839_s15 = smov 0   ;;  %s1172_s0 = inlined_call_operand.vmem [shape: f32[512,128], index: 0, kind: input, shape index: {}]   ;;  %s1173_s1 = inlined_call_operand.vmem [shape: f32[128,128], index: 1, kind: input, shape index: {}]   ;;  %s1174_s2 = inlined_call_operand.vmem [shape: f32[1,128], index: 2, kind: input, shape index: {}]   ;;  %s1175_s3 = inlined_call_operand.vmem [shape: f32[512,128], index: 3, kind: input, shape index: {}]   ;;  %s1176_s4 = inlined_call_operand.vmem [shape: f32[512,128], index: 4, kind: output, shape index: {}]  }
   0x1 LB: > { %s704_s16 = sadd.s32 4294967295, %s812_s15   ;;  %p708_p0 = scmp.ge.s32.totalorder %s812_s15, 1  ;;  %s812_s15 = sphi %s839_s15, %s14_s15  }
   0x2   : > { %p174_p1 = scmp.lt.s32.totalorder %s812_s15, 9 }
   0x4   : > { %p175_p2 = pnand %p708_p0, %p174_p1 }
   0x5   : > { %s709_s7 = sshll.u32 (!%p175_p2), %s704_s16, 3 }
   0x6   : > { %178 = sbr.rel (%p175_p2) target bundleno = 285 (0x11d), region = 36  ;;  %p206_p3 = scmp.lt.s32.totalorder (!%p175_p2), %s709_s7, 63 }
   0xb   : > { %v246_v0 = vld [vmem:[%s1173_s1 + $0x78] sm:$0xff]  ;;  %v245_v1 = vld [vmem:[%s1173_s1 + $0x70] sm:$0xff]  ;;  %v244_v2 = vld [vmem:[%s1173_s1 + $0x68] sm:$0xff]  ;;  %s1188_s7 = smov (!%p206_p3, %s709_s7), 63 }
   0xc   : > { %251 = vmatpush.msra.mxu0 %v246_v0  ;;  %717 = vmatpush.msra.mxu1 %v246_v0  ;;  %v243_v3 = vld [vmem:[%s1173_s1 + $0x60] sm:$0xff]  ;;  %v242_v4 = vld [vmem:[%s1173_s1 + $0x58] sm:$0xff]  ;;  %v241_v5 = vld [vmem:[%s1173_s1 + $0x50] sm:$0xff]  ;;  %s891_s21 = sshll.u32 %s1188_s7, 3 }
   0xd   : > { %718 = vmatpush.msra.mxu2 %v246_v0  ;;  %719 = vmatpush.msra.mxu3 %v246_v0  ;;  %v240_v6 = vld [vmem:[%s1173_s1 + $0x48] sm:$0xff]  ;;  %v239_v7 = vld [vmem:[%s1173_s1 + $0x40] sm:$0xff]  ;;  %v238_v8 = vld [vmem:[%s1173_s1 + $0x38] sm:$0xff]  ;;  %s209_s26 = scalar_lea.vmem %s1172_s0, %s891_s21  ;;  %s907_s5 = scalar_lea.vmem %s1175_s3, %s891_s21 }
   0xe   : > { %252 = vmatpush.msra.mxu0 %v245_v1  ;;  %720 = vmatpush.msra.mxu1 %v245_v1  ;;  %v237_v9 = vld [vmem:[%s1173_s1 + $0x30] sm:$0xff]  ;;  %v236_v10 = vld [vmem:[%s1173_s1 + $0x28] sm:$0xff]  ;;  %v235_v11 = vld [vmem:[%s1173_s1 + $0x20] sm:$0xff]  ;;  %s1104_s10 = scalar_lea.vmem %s1176_s4, %s891_s21 }
   0xf   : > { %721 = vmatpush.msra.mxu2 %v245_v1  ;;  %722 = vmatpush.msra.mxu3 %v245_v1  ;;  %v234_v12 = vld [vmem:[%s1173_s1 + $0x18] sm:$0xff]  ;;  %v233_v13 = vld [vmem:[%s1173_s1 + $0x10] sm:$0xff]  ;;  %v232_v14 = vld [vmem:[%s1173_s1 + $0x8] sm:$0xff] }
  0x10   : > { %253 = vmatpush.msra.mxu0 %v244_v2  ;;  %723 = vmatpush.msra.mxu1 %v244_v2  ;;  %v231_v15 = vld [vmem:[%s1173_s1] sm:$0xff]  ;;  %v225_v17 = vld [vmem:[%s209_s26 + $0x10] sm:$0xff]  ;;  %v224_v20 = vld [vmem:[%s209_s26 + $0x8] sm:$0xff] }
  0x11   : > { %724 = vmatpush.msra.mxu2 %v244_v2  ;;  %725 = vmatpush.msra.mxu3 %v244_v2  ;;  %v223_v16 = vld [vmem:[%s209_s26] sm:$0xff]  ;;  %v229_v19 = vld [vmem:[%s209_s26 + $0x30] sm:$0xff]  ;;  %v226_v21 = vld [vmem:[%s209_s26 + $0x18] sm:$0xff] }
  0x12   : > { %254 = vmatpush.msra.mxu0 %v243_v3  ;;  %726 = vmatpush.msra.mxu1 %v243_v3  ;;  %v227_v18 = vld [vmem:[%s209_s26 + $0x20] sm:$0xff]  ;;  %v228_v22 = vld [vmem:[%s209_s26 + $0x28] sm:$0xff]  ;;  %v230_v23 = vld [vmem:[%s209_s26 + $0x38] sm:$0xff] }
  0x13   : > { %727 = vmatpush.msra.mxu2 %v243_v3  ;;  %728 = vmatpush.msra.mxu3 %v243_v3  ;;  %v912_v24 = vld [vmem:[%s1174_s2] ss:$0 sm:$0xff]  ;;  %v294_v28 = vld [vmem:[%s907_s5 + $0x10] sm:$0xff] }
  0x14   : > { %255 = vmatpush.msra.mxu0 %v242_v4  ;;  %729 = vmatpush.msra.mxu1 %v242_v4  ;;  %v292_v26 = vld [vmem:[%s907_s5] sm:$0xff]  ;;  %v298_v40 = vld [vmem:[%s907_s5 + $0x30] sm:$0xff] }
  0x15   : > { %730 = vmatpush.msra.mxu2 %v242_v4  ;;  %731 = vmatpush.msra.mxu3 %v242_v4  ;;  %v296_v38 = vld [vmem:[%s907_s5 + $0x20] sm:$0xff] }
  0x16   : > { %256 = vmatpush.msra.mxu0 %v241_v5  ;;  %732 = vmatpush.msra.mxu1 %v241_v5 }
  0x17   : > { %733 = vmatpush.msra.mxu2 %v241_v5  ;;  %734 = vmatpush.msra.mxu3 %v241_v5 }
  0x18   : > { %257 = vmatpush.msra.mxu0 %v240_v6  ;;  %735 = vmatpush.msra.mxu1 %v240_v6 }
  0x19   : > { %736 = vmatpush.msra.mxu2 %v240_v6  ;;  %737 = vmatpush.msra.mxu3 %v240_v6 }
  0x1a   : > { %258 = vmatpush.msra.mxu0 %v239_v7  ;;  %738 = vmatpush.msra.mxu1 %v239_v7 }
  0x1b   : > { %739 = vmatpush.msra.mxu2 %v239_v7  ;;  %740 = vmatpush.msra.mxu3 %v239_v7 }
  0x1c   : > { %259 = vmatpush.msra.mxu0 %v238_v8  ;;  %741 = vmatpush.msra.mxu1 %v238_v8 }
  0x1d   : > { %742 = vmatpush.msra.mxu2 %v238_v8  ;;  %743 = vmatpush.msra.mxu3 %v238_v8 }
  0x1e   : > { %260 = vmatpush.msra.mxu0 %v237_v9  ;;  %744 = vmatpush.msra.mxu1 %v237_v9 }
  0x1f   : > { %745 = vmatpush.msra.mxu2 %v237_v9  ;;  %746 = vmatpush.msra.mxu3 %v237_v9 }
  0x20   : > { %261 = vmatpush.msra.mxu0 %v236_v10  ;;  %747 = vmatpush.msra.mxu1 %v236_v10 }
  0x21   : > { %748 = vmatpush.msra.mxu2 %v236_v10  ;;  %749 = vmatpush.msra.mxu3 %v236_v10 }
  0x22   : > { %262 = vmatpush.msra.mxu0 %v235_v11  ;;  %750 = vmatpush.msra.mxu1 %v235_v11 }
  0x23   : > { %751 = vmatpush.msra.mxu2 %v235_v11  ;;  %752 = vmatpush.msra.mxu3 %v235_v11  ;;  %v293_v11 = vld [vmem:[%s907_s5 + $0x8] sm:$0xff] }
  0x24   : > { %263 = vmatpush.msra.mxu0 %v234_v12  ;;  %753 = vmatpush.msra.mxu1 %v234_v12 }
  0x25   : > { %754 = vmatpush.msra.mxu2 %v234_v12  ;;  %755 = vmatpush.msra.mxu3 %v234_v12 }
  0x26   : > { %264 = vmatpush.msra.mxu0 %v233_v13  ;;  %756 = vmatpush.msra.mxu1 %v233_v13 }
  0x27   : > { %757 = vmatpush.msra.mxu2 %v233_v13  ;;  %758 = vmatpush.msra.mxu3 %v233_v13 }
  0x28   : > { %265 = vmatpush.msra.mxu0 %v232_v14  ;;  %759 = vmatpush.msra.mxu1 %v232_v14 }
  0x29   : > { %760 = vmatpush.msra.mxu2 %v232_v14  ;;  %761 = vmatpush.msra.mxu3 %v232_v14 }
  0x2a   : > { %266 = vmatpush.msra.mxu0 %v231_v15  ;;  %762 = vmatpush.msra.mxu1 %v231_v15 }
  0x2b   : > { %763 = vmatpush.msra.mxu2 %v231_v15  ;;  %764 = vmatpush.msra.mxu3 %v231_v15  ;;  %v295_v15 = vld [vmem:[%s907_s5 + $0x18] sm:$0xff] }
  0x2c   : > { %267 = vmatmul.f32.vlgmr.msra.gmra.mxu0 %v223_v16  ;;  %273 = vmatmul.f32.vlgmr.msra.gmra.mxu1 %v225_v17 }
  0x2d   : > { %279 = vmatmul.f32.vlgmr.msra.gmra.mxu2 %v227_v18  ;;  %285 = vmatmul.f32.vlgmr.msra.gmra.mxu3 %v229_v19 }
  0x34   : > { %270 = vmatmul.f32.gmra.mxu0 %v224_v20  ;;  %276 = vmatmul.f32.gmra.mxu1 %v226_v21 }
  0x35   : > { %282 = vmatmul.f32.gmra.mxu2 %v228_v22  ;;  %288 = vmatmul.f32.gmra.mxu3 %v230_v23 }
  0xa9   : > { %v268_v25 = vpop.f32.mrf.mxu0  ;;  %v274_v27 = vpop.f32.mrf.mxu1 }
  0xaa   : > { %v269_v29 = vadd.f32 %v912_v24, %v268_v25  ;;  %v275_v30 = vadd.f32 %v912_v24, %v274_v27 }
  0xac   : > { %v300_v31 = vadd.f32 %v292_v26, %v269_v29  ;;  %v302_v32 = vadd.f32 %v294_v28, %v275_v30 }
  0xae   : > { %v918_v33 = vmul.f32 0.70710677, %v300_v31  ;;  %v920_v34 = vmul.f32 0.70710677, %v302_v32  ;;  %v941_v56 = vmul.f32 0.5, %v300_v31  ;;  %v944_v61 = vmul.f32 0.5, %v302_v32 }
  0xb0   : > { %v324_v35 = vand.u32 2147483647, %v918_v33  ;;  %v326_v36 = vand.u32 2147483647, %v920_v34  ;;  %v280_v37 = vpop.f32.mrf.mxu2  ;;  %v286_v39 = vpop.f32.mrf.mxu3 }
  0xb1   : > { %v281_v41 = vadd.f32 %v912_v24, %v280_v37  ;;  %v287_v42 = vadd.f32 %v912_v24, %v286_v39  ;;  %v271_v54 = vpop.f32.mrf.mxu0  ;;  %v277_v55 = vpop.f32.mrf.mxu1 }
  0xb2   : > { %v332_v43 = vmul.f32 0.3275911, %v324_v35  ;;  %v540_v44 = vsub.f32 0.0, %v324_v35  ;;  %v334_v45 = vmul.f32 0.3275911, %v326_v36  ;;  %v542_v53 = vsub.f32 0.0, %v326_v36 }
  0xb3   : > { %v928_v46 = vadd.f32 %v296_v38, %v281_v41  ;;  %v930_v47 = vadd.f32 %v298_v40, %v287_v42  ;;  %v272_v1 = vadd.f32 %v912_v24, %v271_v54  ;;  %v278_v2 = vadd.f32 %v912_v24, %v277_v55 }
  0xb4   : > { %v340_v48 = vadd.f32 1.0, %v332_v43  ;;  %v932_v49 = vadd.f32 1.0, %v334_v45  ;;  %v548_v51 = vmul.f32 %v540_v44, %v324_v35  ;;  %v550_v63 = vmul.f32 %v542_v53, %v326_v36 }
  0xb5   : > { %v935_v50 = vmul.f32 0.70710677, %v928_v46  ;;  %v938_v52 = vmul.f32 0.70710677, %v930_v47  ;;  %v965_v21 = vadd.f32 %v293_v11, %v272_v1  ;;  %v967_v26 = vadd.f32 %v295_v15, %v278_v2 }
  0xb6   : > { %774 = vrcp.f32 %v340_v48  ;;  %v357_v57 = vand.u32 2147483647, %v340_v48  ;;  %v359_v59 = vand.u32 2147483648, %v340_v48  ;;  %v556_v60 = vmul.f32 1.442695, %v548_v51 }
  0xb7   : > { %776 = vrcp.f32 %v932_v49  ;;  %v328_v58 = vand.u32 2147483647, %v935_v50  ;;  %v330_v62 = vand.u32 2147483647, %v938_v52  ;;  %vm353_vm0 = vweird.f32 %v340_v48 }
  0xb8   : > { %vm383_vm1 = vweird.f32 %v932_v49  ;;  %v387_v4 = vand.u32 2147483647, %v932_v49  ;;  %vm951_vm2 = vcmp.eq.f32.partialorder %v357_v57, 8.507059e+37  ;;  %v360_v12 = vor.u32 1.1754944e-38, %v359_v59  ;;  %v283_v22 = vpop.f32.mrf.mxu2 }
  0xb9   : > { %v336_v0 = vmul.f32 0.3275911, %v328_v58  ;;  %v338_v5 = vmul.f32 0.3275911, %v330_v62  ;;  %v544_v10 = vsub.f32 0.0, %v328_v58  ;;  %778 = vpow2.f32 %v556_v60 }
  0xba   : > { %v389_v17 = vand.u32 2147483648, %v932_v49  ;;  %v560_v18 = vmul.f32 1.442695, %v550_v63  ;;  %v546_v20 = vsub.f32 0.0, %v330_v62  ;;  %vm969_vm5 = vcmp.eq.f32.partialorder %v387_v4, 8.507059e+37 }
  0xbb   : > { %v955_v9 = vadd.f32 1.0, %v336_v0  ;;  %v959_v14 = vadd.f32 1.0, %v338_v5  ;;  %v552_v25 = vmul.f32 %v544_v10, %v328_v58  ;;  %v975_v32 = vadd.f32 %v912_v24, %v283_v22 }
  0xbc   : > { %v775_v3 = vpop.eup %774  ;;  %v390_v31 = vor.u32 1.1754944e-38, %v389_v17  ;;  %v554_v38 = vmul.f32 %v546_v20, %v330_v62  ;;  %v982_v39 = vmul.f32 0.70710677, %v965_v21  ;;  %v989_v43 = vmul.f32 0.70710677, %v967_v26 }
  0xbd   : > { %v777_v6 = vpop.eup %776  ;;  %v349_v7 = vmul.f32 %v775_v3, %v340_v48  ;;  %780 = vrcp.f32 %v955_v9  ;;  %vm354_vm3 = vweird.f32 %v775_v3  ;;  %v417_v29 = vand.u32 2147483647, %v955_v9 }
  0xbe   : > { %v379_v13 = vmul.f32 %v777_v6, %v932_v49  ;;  %782 = vrcp.f32 %v959_v14  ;;  %vm384_vm4 = vweird.f32 %v777_v6  ;;  %vm355_vm6 = vmor %vm353_vm0, %vm354_vm3  ;;  %v419_v37 = vand.u32 2147483648, %v955_v9 }
  0xbf   : > { %v350_v16 = vsub.f32 1.0, %v349_v7  ;;  %784 = vpow2.f32 %v560_v18  ;;  %v977_v35 = vpop.eup %778  ;;  %vm385_vm7 = vmor %vm383_vm1, %vm384_vm4  ;;  %vm413_vm8 = vweird.f32 %v955_v9  ;;  %v564_v42 = vmul.f32 1.442695, %v552_v25 }
  0xc0   : > { %v380_v19 = vsub.f32 1.0, %v379_v13  ;;  %vm996_vm9 = vcmp.eq.f32.partialorder %v417_v29, 8.507059e+37  ;;  %vm443_vm10 = vweird.f32 %v959_v14  ;;  %v447_v57 = vand.u32 2147483647, %v959_v14 }
  0xc1   : > { %v351_v23 = vmul.f32 %v775_v3, %v350_v16  ;;  %v420_v60 = vor.u32 1.1754944e-38, %v419_v37  ;;  %v325_v62 = vand.u32 2147483647, %v982_v39  ;;  %v449_v2 = vand.u32 2147483648, %v959_v14 }
  0xc2   : > { %v381_v27 = vmul.f32 %v777_v6, %v380_v19  ;;  %786 = vpow2.f32 %v564_v42  ;;  %v568_v17 = vmul.f32 1.442695, %v554_v38  ;;  %vm448_vm15 = vcmp.eq.f32.partialorder %v447_v57, 8.507059e+37 }
  0xc3   : > { %v352_v30 = vadd.f32 %v775_v3, %v351_v23  ;;  %v781_v40 = vpop.eup %780  ;;  %v450_v22 = vor.u32 1.1754944e-38, %v449_v2  ;;  %vm590_vm3 = vcmp.lt.f32.partialorder %v920_v34, 0.0  ;;  %v289_v34 = vpop.f32.mrf.mxu3 }
  0xc4   : > { %v382_v36 = vadd.f32 %v777_v6, %v381_v27  ;;  %v783_v44 = vpop.eup %782  ;;  %v409_v51 = vmul.f32 %v781_v40, %v955_v9  ;;  %vm414_vm11 = vweird.f32 %v781_v40 }
  0xc5   : > { %v356_v41 = vsel %vm355_vm6, %v775_v3, %v352_v30  ;;  %v439_v55 = vmul.f32 %v783_v44, %v959_v14  ;;  %v1010_v63 = vpop.eup %784  ;;  %v1014_v3 = vand.u32 2147483647, %v989_v43  ;;  %vm444_vm12 = vweird.f32 %v783_v44  ;;  %vm415_vm13 = vmor %vm413_vm8, %vm414_vm11  ;;  %v297_v14 = vld [vmem:[%s907_s5 + $0x28] sm:$0xff] }
  0xc6   : > { %v993_v45 = vsel %vm951_vm2, %v360_v12, %v356_v41  ;;  %v386_v48 = vsel %vm385_vm7, %v777_v6, %v382_v36  ;;  %v410_v59 = vsub.f32 1.0, %v409_v51  ;;  %v333_v6 = vmul.f32 0.3275911, %v325_v62  ;;  %vm445_vm14 = vmor %vm443_vm10, %vm444_vm12 }
  0xc7   : > { %v468_v49 = vmul.f32 1.0614054, %v993_v45  ;;  %v1004_v54 = vsel %vm969_vm5, %v390_v31, %v386_v48  ;;  %v440_v1 = vsub.f32 1.0, %v439_v55  ;;  %v335_v10 = vmul.f32 0.3275911, %v1014_v3 }
  0xc8   : > { %v470_v58 = vmul.f32 1.0614054, %v1004_v54  ;;  %v411_v5 = vmul.f32 %v781_v40, %v410_v59  ;;  %v1019_v13 = vadd.f32 1.0, %v333_v6  ;;  %v541_v30 = vsub.f32 0.0, %v325_v62  ;;  %v1041_v38 = vpop.eup %786 }
  0xc9   : > { %v476_v0 = vadd.f32 -1.4531521, %v468_v49  ;;  %v441_v8 = vmul.f32 %v783_v44, %v440_v1  ;;  %v1023_v18 = vadd.f32 1.0, %v335_v10  ;;  %v543_v51 = vsub.f32 0.0, %v1014_v3 }
  0xca   : > { %v478_v4 = vadd.f32 -1.4531521, %v470_v58  ;;  %v412_v12 = vadd.f32 %v781_v40, %v411_v5  ;;  %788 = vrcp.f32 %v1019_v13  ;;  %v372_v37 = vand.u32 2147483647, %v1019_v13 }
  0xcb   : > { %v484_v7 = vmul.f32 %v476_v0, %v993_v45  ;;  %v442_v16 = vadd.f32 %v783_v44, %v441_v8  ;;  %790 = vrcp.f32 %v1023_v18  ;;  %v374_v42 = vand.u32 2147483648, %v1019_v13 }
  0xcc   : > { %v486_v11 = vmul.f32 %v478_v4, %v1004_v54  ;;  %v416_v20 = vsel %vm415_vm13, %v781_v40, %v412_v12  ;;  %792 = vpow2.f32 %v568_v17  ;;  %v1047_v53 = vadd.f32 %v297_v14, %v975_v32 }
  0xcd   : > { %v492_v15 = vadd.f32 1.4214138, %v484_v7  ;;  %v1031_v25 = vsel %vm996_vm9, %v420_v60, %v416_v20  ;;  %v446_v9 = vsel %vm445_vm14, %v783_v44, %v442_v16  ;;  %vm368_vm0 = vweird.f32 %v1019_v13 }
  0xce   : > { %v494_v19 = vadd.f32 1.4214138, %v486_v11  ;;  %v472_v28 = vmul.f32 1.0614054, %v1031_v25  ;;  %v1035_v29 = vsel %vm448_vm15, %v450_v22, %v446_v9  ;;  %v1052_v58 = vmul.f32 %v541_v30, %v325_v62 }
  0xcf   : > { %v500_v23 = vmul.f32 %v492_v15, %v993_v45  ;;  %v474_v36 = vmul.f32 1.0614054, %v1035_v29  ;;  %vm1056_vm1 = vcmp.eq.f32.partialorder %v372_v37, 8.507059e+37  ;;  %v402_v32 = vand.u32 2147483647, %v1023_v18 }
  0xd0   : > { %v502_v27 = vmul.f32 %v494_v19, %v1004_v54  ;;  %v480_v41 = vadd.f32 -1.4531521, %v472_v28  ;;  %v789_v49 = vpop.eup %788  ;;  %vm588_vm2 = vcmp.lt.f32.partialorder %v918_v33, 0.0  ;;  %v375_v5 = vor.u32 1.1754944e-38, %v374_v42 }
  0xd1   : > { %v508_v31 = vadd.f32 -0.28449672, %v500_v23  ;;  %v482_v48 = vadd.f32 -1.4531521, %v474_v36  ;;  %v364_v0 = vmul.f32 %v789_v49, %v1019_v13  ;;  %v404_v6 = vand.u32 2147483648, %v1023_v18  ;;  %v791_v62 = vpop.eup %790 }
  0xd2   : > { %v510_v40 = vadd.f32 -0.28449672, %v502_v27  ;;  %v488_v57 = vmul.f32 %v480_v41, %v1031_v25  ;;  %vm398_vm4 = vweird.f32 %v1023_v18  ;;  %v793_v11 = vpop.eup %792  ;;  %vm369_vm5 = vweird.f32 %v789_v49 }
  0xd3   : > { %v516_v44 = vmul.f32 %v508_v31, %v993_v45  ;;  %v490_v60 = vmul.f32 %v482_v48, %v1035_v29  ;;  %v365_v10 = vsub.f32 1.0, %v364_v0  ;;  %v394_v16 = vmul.f32 %v791_v62, %v1023_v18  ;;  %vm370_vm7 = vmor %vm368_vm0, %vm369_vm5 }
  0xd4   : > { %v518_v55 = vmul.f32 %v510_v40, %v1004_v54  ;;  %v496_v4 = vadd.f32 1.4214138, %v488_v57  ;;  %vm1071_vm6 = vcmp.eq.f32.partialorder %v402_v32, 8.507059e+37  ;;  %v405_v27 = vor.u32 1.1754944e-38, %v404_v6 }
  0xd5   : > { %v524_v59 = vadd.f32 0.2548296, %v516_v44  ;;  %v498_v8 = vadd.f32 1.4214138, %v490_v60  ;;  %v366_v20 = vmul.f32 %v789_v49, %v365_v10  ;;  %v395_v9 = vsub.f32 1.0, %v394_v16 }
  0xd6   : > { %v526_v2 = vadd.f32 0.2548296, %v518_v55  ;;  %v504_v15 = vmul.f32 %v496_v4, %v1031_v25  ;;  %v1077_v14 = vmul.f32 0.70710677, %v1047_v53  ;;  %vm399_vm8 = vweird.f32 %v791_v62 }
  0xd7   : > { %v532_v7 = vmul.f32 %v524_v59, %v993_v45  ;;  %v506_v19 = vmul.f32 %v498_v8, %v1035_v29  ;;  %v367_v30 = vadd.f32 %v789_v49, %v366_v20  ;;  %v396_v36 = vmul.f32 %v791_v62, %v395_v9  ;;  %vm400_vm9 = vmor %vm398_vm4, %vm399_vm8 }
  0xd8   : > { %v534_v12 = vmul.f32 %v526_v2, %v1004_v54  ;;  %v512_v23 = vadd.f32 -0.28449672, %v504_v15  ;;  %v1085_v41 = vand.u32 2147483647, %v1077_v14  ;;  %v290_v15 = vadd.f32 %v912_v24, %v289_v34 }
  0xd9   : > { %v572_v17 = vmul.f32 %v977_v35, %v532_v7  ;;  %v514_v28 = vadd.f32 -0.28449672, %v506_v19  ;;  %v371_v40 = vsel %vm370_vm7, %v789_v49, %v367_v30  ;;  %v397_v55 = vadd.f32 %v791_v62, %v396_v36 }
  0xda   : > { %v574_v22 = vmul.f32 %v1010_v63, %v534_v12  ;;  %v520_v35 = vmul.f32 %v512_v23, %v1031_v25  ;;  %v1089_v48 = vsel %vm1056_vm1, %v375_v5, %v371_v40  ;;  %v337_v49 = vmul.f32 0.3275911, %v1085_v41 }
  0xdb   : > { %v580_v54 = vsub.f32 1.0, %v572_v17  ;;  %v522_v63 = vmul.f32 %v514_v28, %v1035_v29  ;;  %v469_v59 = vmul.f32 1.0614054, %v1089_v48  ;;  %v401_v32 = vsel %vm400_vm9, %v791_v62, %v397_v55  ;;  %v299_v17 = vld [vmem:[%s907_s5 + $0x38] sm:$0xff] }
  0xdc   : > { %v582_v31 = vsub.f32 1.0, %v574_v22  ;;  %v528_v44 = vadd.f32 0.2548296, %v520_v35  ;;  %v1109_v4 = vsel %vm1071_vm6, %v405_v27, %v401_v32  ;;  %v1114_v62 = vadd.f32 1.0, %v337_v49 }
  0xdd   : > { %v596_v37 = vsub.f32 0.0, %v580_v54  ;;  %v530_v57 = vadd.f32 0.2548296, %v522_v63  ;;  %v477_v18 = vadd.f32 -1.4531521, %v469_v59  ;;  %vm592_vm10 = vcmp.lt.f32.partialorder %v935_v50, 0.0 }
  0xde   : > { %v598_v42 = vsub.f32 0.0, %v582_v31  ;;  %v536_v1 = vmul.f32 %v528_v44, %v1031_v25  ;;  %v471_v6 = vmul.f32 1.0614054, %v1109_v4  ;;  %794 = vrcp.f32 %v1114_v62 }
  0xdf   : > { %v604_v13 = vsel %vm588_vm2, %v596_v37, %v580_v54  ;;  %v538_v2 = vmul.f32 %v530_v57, %v1035_v29  ;;  %v485_v29 = vmul.f32 %v477_v18, %v1089_v48  ;;  %v558_v19 = vmul.f32 1.442695, %v1052_v58 }
  0xe0   : > { %v612_v60 = vadd.f32 1.0, %v604_v13  ;;  %v606_v0 = vsel %vm590_vm3, %v598_v42, %v582_v31  ;;  %v576_v25 = vmul.f32 %v1041_v38, %v536_v1  ;;  %v479_v12 = vadd.f32 -1.4531521, %v471_v6 }
  0xe1   : > { %v614_v33 = vadd.f32 1.0, %v606_v0  ;;  %v578_v8 = vmul.f32 %v793_v11, %v538_v2  ;;  %v493_v16 = vadd.f32 1.4214138, %v485_v29  ;;  %v551_v38 = vmul.f32 %v543_v51, %v1014_v3 }
  0xe2   : > { %v620_v5 = vmul.f32 %v612_v60, %v941_v56  ;;  %v584_v10 = vsub.f32 1.0, %v576_v25  ;;  %v487_v20 = vmul.f32 %v479_v12, %v1109_v4  ;;  %v314_v45 = vmul.f32 0.5, %v930_v47 }
  0xe3   : > { %v622_v7 = vmul.f32 %v614_v33, %v944_v61  ;;  %v586_v56 = vsub.f32 1.0, %v578_v8  ;;  %v312_v61 = vmul.f32 0.5, %v928_v46  ;;  %v501_v22 = vmul.f32 %v493_v16, %v1089_v48 }
  0xe4   : > { %628 = vst [vmem:[%s1104_s10] sm:$0xff] %v620_v5  ;;  %v600_v11 = vsub.f32 0.0, %v584_v10  ;;  %vm594_vm11 = vcmp.lt.f32.partialorder %v938_v52, 0.0  ;;  %v495_v9 = vadd.f32 1.4214138, %v487_v20  ;;  %v1133_v3 = vadd.f32 %v299_v17, %v290_v15  ;;  %v795_v54 = vpop.eup %794 }
  0xe5   : > { %630 = vst [vmem:[%s1104_s10 + $0x10] sm:$0xff] %v622_v7  ;;  %v602_v24 = vsub.f32 0.0, %v586_v56  ;;  %v509_v27 = vadd.f32 -0.28449672, %v501_v22  ;;  %v562_v58 = vmul.f32 1.442695, %v551_v38  ;;  %796 = vpow2.f32 %v558_v19 }
  0xe6   : > { %v608_v23 = vsel %vm592_vm10, %v600_v11, %v584_v10  ;;  %v503_v47 = vmul.f32 %v495_v9, %v1109_v4  ;;  %v1137_v50 = vmul.f32 0.70710677, %v1133_v3  ;;  %v424_v31 = vmul.f32 %v795_v54, %v1114_v62 }
  0xe7   : > { %v616_v46 = vadd.f32 1.0, %v608_v23  ;;  %v610_v51 = vsel %vm594_vm11, %v602_v24, %v586_v56  ;;  %v517_v52 = vmul.f32 %v509_v27, %v1089_v48  ;;  %798 = vpow2.f32 %v562_v58 }
  0xe8   : > { %v618_v28 = vadd.f32 1.0, %v610_v51  ;;  %v511_v36 = vadd.f32 -0.28449672, %v503_v47  ;;  %v1142_v37 = vand.u32 2147483647, %v1137_v50  ;;  %v425_v40 = vsub.f32 1.0, %v424_v31 }
  0xe9   : > { %v624_v30 = vmul.f32 %v616_v46, %v312_v61  ;;  %v525_v63 = vadd.f32 0.2548296, %v517_v52  ;;  %v434_v44 = vand.u32 2147483648, %v1114_v62  ;;  %vm429_vm12 = vweird.f32 %v795_v54 }
  0xea   : > { %v626_v35 = vmul.f32 %v618_v28, %v314_v45  ;;  %v519_v42 = vmul.f32 %v511_v36, %v1109_v4  ;;  %v339_v55 = vmul.f32 0.3275911, %v1142_v37  ;;  %v426_v57 = vmul.f32 %v795_v54, %v425_v40 }
  0xeb   : > { %632 = vst [vmem:[%s1104_s10 + $0x20] sm:$0xff] %v624_v30  ;;  %v533_v13 = vmul.f32 %v525_v63, %v1089_v48  ;;  %v432_v59 = vand.u32 2147483647, %v1114_v62  ;;  %v797_v49 = vpop.eup %796  ;;  %vm428_vm13 = vweird.f32 %v1114_v62  ;;  %v435_v2 = vor.u32 1.1754944e-38, %v434_v44 }
  0xec   : > { %634 = vst [vmem:[%s1104_s10 + $0x30] sm:$0xff] %v626_v35  ;;  %v527_v60 = vadd.f32 0.2548296, %v519_v42  ;;  %v347_v0 = vadd.f32 1.0, %v339_v55  ;;  %v427_v32 = vadd.f32 %v795_v54, %v426_v57  ;;  %vm430_vm14 = vmor %vm428_vm13, %vm429_vm12  ;;  %v545_v6 = vsub.f32 0.0, %v1085_v41 }
  0xed   : > { %v573_v1 = vmul.f32 %v797_v49, %v533_v13  ;;  %v799_v18 = vpop.eup %798  ;;  %vm433_vm15 = vcmp.eq.f32.partialorder %v432_v59, 8.507059e+37  ;;  %vm589_vm0 = vcmp.lt.f32.partialorder %v982_v39, 0.0  ;;  %v309_v12 = vmul.f32 0.5, %v965_v21 }
  0xee   : > { %v535_v33 = vmul.f32 %v527_v60, %v1109_v4  ;;  %800 = vrcp.f32 %v347_v0  ;;  %v431_v5 = vsel %vm430_vm14, %v795_v54, %v427_v32  ;;  %v553_v16 = vmul.f32 %v545_v6, %v1085_v41 }
  0xef   : > { %v581_v34 = vsub.f32 1.0, %v573_v1  ;;  %v436_v25 = vsel %vm433_vm15, %v435_v2, %v431_v5  ;;  %vm591_vm1 = vcmp.lt.f32.partialorder %v989_v43, 0.0  ;;  %v311_v39 = vmul.f32 0.5, %v967_v26 }
  0xf0   : > { %v575_v48 = vmul.f32 %v799_v18, %v535_v33  ;;  %v473_v8 = vmul.f32 1.0614054, %v436_v25  ;;  %v566_v24 = vmul.f32 1.442695, %v553_v16  ;;  %v462_v22 = vand.u32 2147483647, %v347_v0 }
  0xf1   : > { %v597_v7 = vsub.f32 0.0, %v581_v34  ;;  %v464_v21 = vand.u32 2147483648, %v347_v0  ;;  %vm458_vm3 = vweird.f32 %v347_v0  ;;  %v547_v54 = vsub.f32 0.0, %v1142_v37 }
  0xf2   : > { %v583_v29 = vsub.f32 1.0, %v575_v48  ;;  %v481_v62 = vadd.f32 -1.4531521, %v473_v8  ;;  %802 = vpow2.f32 %v566_v24  ;;  %vm463_vm5 = vcmp.eq.f32.partialorder %v462_v22, 8.507059e+37 }
  0xf3   : > { %v605_v10 = vsel %vm589_vm0, %v597_v7, %v581_v34  ;;  %v465_v51 = vor.u32 1.1754944e-38, %v464_v21  ;;  %v555_v35 = vmul.f32 %v547_v54, %v1142_v37  ;;  %vm593_vm6 = vcmp.lt.f32.partialorder %v1077_v14, 0.0 }
  0xf4   : > { %v801_v4 = vpop.eup %800  ;;  %v613_v15 = vadd.f32 1.0, %v605_v10  ;;  %v599_v56 = vsub.f32 0.0, %v583_v29  ;;  %v489_v38 = vmul.f32 %v481_v62, %v436_v25  ;;  %v313_v49 = vmul.f32 0.5, %v1047_v53 }
  0xf5   : > { %v454_v17 = vmul.f32 %v801_v4, %v347_v0  ;;  %vm459_vm2 = vweird.f32 %v801_v4  ;;  %v570_v44 = vmul.f32 1.442695, %v555_v35  ;;  %vm595_vm7 = vcmp.lt.f32.partialorder %v1137_v50, 0.0 }
  0xf6   : > { %v621_v61 = vmul.f32 %v613_v15, %v309_v12  ;;  %v607_v11 = vsel %vm591_vm1, %v599_v56, %v583_v29  ;;  %v497_v20 = vadd.f32 1.4214138, %v489_v38  ;;  %vm460_vm4 = vmor %vm458_vm3, %vm459_vm2  ;;  %v315_v14 = vmul.f32 0.5, %v1133_v3 }
  0xf7   : > { %v615_v19 = vadd.f32 1.0, %v607_v11  ;;  %v455_v45 = vsub.f32 1.0, %v454_v17  ;;  %804 = vpow2.f32 %v570_v44 }
  0xf8   : > { %629 = vst [vmem:[%s1104_s10 + $0x8] sm:$0xff] %v621_v61  ;;  %v505_v9 = vmul.f32 %v497_v20, %v436_v25  ;;  %v803_v31 = vpop.eup %802 }
  0xf9   : > { %v623_v23 = vmul.f32 %v615_v19, %v311_v39  ;;  %v456_v46 = vmul.f32 %v801_v4, %v455_v45 }
  0xfa   : > { %v513_v43 = vadd.f32 -0.28449672, %v505_v9 }
  0xfb   : > { %631 = vst [vmem:[%s1104_s10 + $0x18] sm:$0xff] %v623_v23  ;;  %v457_v41 = vadd.f32 %v801_v4, %v456_v46 }
  0xfc   : > { %v521_v27 = vmul.f32 %v513_v43, %v436_v25 }
  0xfd   : > { %v461_v26 = vsel %vm460_vm4, %v801_v4, %v457_v41  ;;  %v805_v33 = vpop.eup %804 }
  0xfe   : > { %v466_v58 = vsel %vm463_vm5, %v465_v51, %v461_v26  ;;  %v529_v28 = vadd.f32 0.2548296, %v521_v27 }
  0xff   : > { %v475_v47 = vmul.f32 1.0614054, %v466_v58 }
 0x100   : > { %v537_v30 = vmul.f32 %v529_v28, %v436_v25 }
 0x101   : > { %v483_v52 = vadd.f32 -1.4531521, %v475_v47 }
 0x102   : > { %v577_v36 = vmul.f32 %v803_v31, %v537_v30 }
 0x103   : > { %v491_v63 = vmul.f32 %v483_v52, %v466_v58 }
 0x104   : > { %v585_v40 = vsub.f32 1.0, %v577_v36 }
 0x105   : > { %v499_v42 = vadd.f32 1.4214138, %v491_v63 }
 0x106   : > { %v601_v55 = vsub.f32 0.0, %v585_v40 }
 0x107   : > { %v507_v13 = vmul.f32 %v499_v42, %v466_v58 }
 0x108   : > { %v609_v57 = vsel %vm593_vm6, %v601_v55, %v585_v40 }
 0x109   : > { %v515_v59 = vadd.f32 -0.28449672, %v507_v13  ;;  %v617_v60 = vadd.f32 1.0, %v609_v57 }
 0x10b   : > { %v523_v0 = vmul.f32 %v515_v59, %v466_v58  ;;  %v625_v1 = vmul.f32 %v617_v60, %v313_v49 }
 0x10d   : > { %v531_v37 = vadd.f32 0.2548296, %v523_v0  ;;  %633 = vst [vmem:[%s1104_s10 + $0x28] sm:$0xff] %v625_v1 }
 0x10f   : > { %v539_v32 = vmul.f32 %v531_v37, %v466_v58 }
 0x111   : > { %v579_v2 = vmul.f32 %v805_v33, %v539_v32 }
 0x113   : > { %v587_v18 = vsub.f32 1.0, %v579_v2 }
 0x115   : > { %v603_v34 = vsub.f32 0.0, %v587_v18 }
 0x117   : > { %v611_v5 = vsel %vm595_vm7, %v603_v34, %v587_v18 }
 0x118   : > { %v619_v48 = vadd.f32 1.0, %v611_v5 }
 0x11a   : > { %v627_v25 = vmul.f32 %v619_v48, %v315_v14 }
 0x11c   : > { %635 = vst [vmem:[%s1104_s10 + $0x38] sm:$0xff] %v627_v25 }
 0x11d PF: > { %s14_s15 = sadd.s32 1, %s812_s15  }
 0x11e   : > { %p11_p4 = scmp.ge.s32.totalorder %s14_s15, 10  }
 0x120   :  { %13 = sbr.rel (!%p11_p4) target bundleno = 1 (0x1), region = 69 }

// kernel: fno2d_forward.18
= control target key start
LH: loop header
LB: loop body
LE: loop exit
PB: predicated region body
PF: predicated region fallthrough
CT: control target
= control target key end

     0   :  { %s487_s15 = smov 0   ;;  %s585_s0 = inlined_call_operand.vmem [shape: f32[512,128], index: 0, kind: input, shape index: {}]   ;;  %s586_s1 = inlined_call_operand.vmem [shape: f32[128,128], index: 1, kind: input, shape index: {}]   ;;  %s587_s2 = inlined_call_operand.vmem [shape: f32[1,128], index: 2, kind: input, shape index: {}]   ;;  %s588_s3 = inlined_call_operand.vmem [shape: f32[512,128], index: 3, kind: input, shape index: {}]   ;;  %s589_s4 = inlined_call_operand.vmem [shape: f32[512,128], index: 4, kind: output, shape index: {}]  }
   0x1 LB: > { %s384_s16 = sadd.s32 4294967295, %s460_s15   ;;  %p388_p0 = scmp.ge.s32.totalorder %s460_s15, 1  ;;  %s460_s15 = sphi %s487_s15, %s14_s15  }
   0x2   : > { %p174_p1 = scmp.lt.s32.totalorder %s460_s15, 9 }
   0x4   : > { %p175_p2 = pnand %p388_p0, %p174_p1 }
   0x5   : > { %s389_s7 = sshll.u32 (!%p175_p2), %s384_s16, 3 }
   0x6   : > { %178 = sbr.rel (%p175_p2) target bundleno = 189 (0xbd), region = 36  ;;  %p206_p3 = scmp.lt.s32.totalorder (!%p175_p2), %s389_s7, 63 }
   0xb   : > { %v246_v0 = vld [vmem:[%s586_s1 + $0x78] sm:$0xff]  ;;  %v245_v1 = vld [vmem:[%s586_s1 + $0x70] sm:$0xff]  ;;  %v244_v2 = vld [vmem:[%s586_s1 + $0x68] sm:$0xff]  ;;  %s591_s7 = smov (!%p206_p3, %s389_s7), 63 }
   0xc   : > { %398 = vmatpush.msra.mxu2 %v246_v0  ;;  %399 = vmatpush.msra.mxu3 %v246_v0  ;;  %v243_v3 = vld [vmem:[%s586_s1 + $0x60] sm:$0xff]  ;;  %v242_v4 = vld [vmem:[%s586_s1 + $0x58] sm:$0xff]  ;;  %v241_v5 = vld [vmem:[%s586_s1 + $0x50] sm:$0xff]  ;;  %s536_s19 = sshll.u32 %s591_s7, 3 }
   0xd   : > { %251 = vmatpush.msra.mxu0 %v246_v0  ;;  %397 = vmatpush.msra.mxu1 %v246_v0  ;;  %v240_v6 = vld [vmem:[%s586_s1 + $0x48] sm:$0xff]  ;;  %v239_v7 = vld [vmem:[%s586_s1 + $0x40] sm:$0xff]  ;;  %v238_v8 = vld [vmem:[%s586_s1 + $0x38] sm:$0xff]  ;;  %s209_s26 = scalar_lea.vmem %s585_s0, %s536_s19  ;;  %s555_s5 = scalar_lea.vmem %s588_s3, %s536_s19 }
   0xe   : > { %401 = vmatpush.msra.mxu2 %v245_v1  ;;  %402 = vmatpush.msra.mxu3 %v245_v1  ;;  %v237_v9 = vld [vmem:[%s586_s1 + $0x30] sm:$0xff]  ;;  %v236_v10 = vld [vmem:[%s586_s1 + $0x28] sm:$0xff]  ;;  %v235_v11 = vld [vmem:[%s586_s1 + $0x20] sm:$0xff]  ;;  %s566_s10 = scalar_lea.vmem %s589_s4, %s536_s19 }
   0xf   : > { %252 = vmatpush.msra.mxu0 %v245_v1  ;;  %400 = vmatpush.msra.mxu1 %v245_v1  ;;  %v234_v12 = vld [vmem:[%s586_s1 + $0x18] sm:$0xff]  ;;  %v233_v13 = vld [vmem:[%s586_s1 + $0x10] sm:$0xff]  ;;  %v232_v14 = vld [vmem:[%s586_s1 + $0x8] sm:$0xff] }
  0x10   : > { %404 = vmatpush.msra.mxu2 %v244_v2  ;;  %405 = vmatpush.msra.mxu3 %v244_v2  ;;  %v231_v15 = vld [vmem:[%s586_s1] sm:$0xff]  ;;  %v229_v17 = vld [vmem:[%s209_s26 + $0x30] sm:$0xff]  ;;  %v228_v20 = vld [vmem:[%s209_s26 + $0x28] sm:$0xff] }
  0x11   : > { %253 = vmatpush.msra.mxu0 %v244_v2  ;;  %403 = vmatpush.msra.mxu1 %v244_v2  ;;  %v227_v16 = vld [vmem:[%s209_s26 + $0x20] sm:$0xff]  ;;  %v225_v19 = vld [vmem:[%s209_s26 + $0x10] sm:$0xff]  ;;  %v230_v21 = vld [vmem:[%s209_s26 + $0x38] sm:$0xff] }
  0x12   : > { %407 = vmatpush.msra.mxu2 %v243_v3  ;;  %408 = vmatpush.msra.mxu3 %v243_v3  ;;  %v223_v18 = vld [vmem:[%s209_s26] sm:$0xff]  ;;  %v224_v22 = vld [vmem:[%s209_s26 + $0x8] sm:$0xff]  ;;  %v226_v23 = vld [vmem:[%s209_s26 + $0x18] sm:$0xff] }
  0x13   : > { %254 = vmatpush.msra.mxu0 %v243_v3  ;;  %406 = vmatpush.msra.mxu1 %v243_v3  ;;  %v453_v24 = vld [vmem:[%s587_s2] ss:$0 sm:$0xff]  ;;  %v294_v28 = vld [vmem:[%s555_s5 + $0x10] sm:$0xff]  ;;  %v293_v42 = vld [vmem:[%s555_s5 + $0x8] sm:$0xff] }
  0x14   : > { %410 = vmatpush.msra.mxu2 %v242_v4  ;;  %411 = vmatpush.msra.mxu3 %v242_v4  ;;  %v292_v26 = vld [vmem:[%s555_s5] sm:$0xff]  ;;  %v298_v36 = vld [vmem:[%s555_s5 + $0x30] sm:$0xff]  ;;  %v295_v44 = vld [vmem:[%s555_s5 + $0x18] sm:$0xff] }
  0x15   : > { %255 = vmatpush.msra.mxu0 %v242_v4  ;;  %409 = vmatpush.msra.mxu1 %v242_v4  ;;  %v296_v34 = vld [vmem:[%s555_s5 + $0x20] sm:$0xff]  ;;  %v297_v50 = vld [vmem:[%s555_s5 + $0x28] sm:$0xff]  ;;  %v299_v52 = vld [vmem:[%s555_s5 + $0x38] sm:$0xff] }
  0x16   : > { %413 = vmatpush.msra.mxu2 %v241_v5  ;;  %414 = vmatpush.msra.mxu3 %v241_v5 }
  0x17   : > { %256 = vmatpush.msra.mxu0 %v241_v5  ;;  %412 = vmatpush.msra.mxu1 %v241_v5 }
  0x18   : > { %416 = vmatpush.msra.mxu2 %v240_v6  ;;  %417 = vmatpush.msra.mxu3 %v240_v6 }
  0x19   : > { %257 = vmatpush.msra.mxu0 %v240_v6  ;;  %415 = vmatpush.msra.mxu1 %v240_v6 }
  0x1a   : > { %419 = vmatpush.msra.mxu2 %v239_v7  ;;  %420 = vmatpush.msra.mxu3 %v239_v7 }
  0x1b   : > { %258 = vmatpush.msra.mxu0 %v239_v7  ;;  %418 = vmatpush.msra.mxu1 %v239_v7 }
  0x1c   : > { %422 = vmatpush.msra.mxu2 %v238_v8  ;;  %423 = vmatpush.msra.mxu3 %v238_v8 }
  0x1d   : > { %259 = vmatpush.msra.mxu0 %v238_v8  ;;  %421 = vmatpush.msra.mxu1 %v238_v8 }
  0x1e   : > { %425 = vmatpush.msra.mxu2 %v237_v9  ;;  %426 = vmatpush.msra.mxu3 %v237_v9 }
  0x1f   : > { %260 = vmatpush.msra.mxu0 %v237_v9  ;;  %424 = vmatpush.msra.mxu1 %v237_v9 }
  0x20   : > { %428 = vmatpush.msra.mxu2 %v236_v10  ;;  %429 = vmatpush.msra.mxu3 %v236_v10 }
  0x21   : > { %261 = vmatpush.msra.mxu0 %v236_v10  ;;  %427 = vmatpush.msra.mxu1 %v236_v10 }
  0x22   : > { %431 = vmatpush.msra.mxu2 %v235_v11  ;;  %432 = vmatpush.msra.mxu3 %v235_v11 }
  0x23   : > { %262 = vmatpush.msra.mxu0 %v235_v11  ;;  %430 = vmatpush.msra.mxu1 %v235_v11 }
  0x24   : > { %434 = vmatpush.msra.mxu2 %v234_v12  ;;  %435 = vmatpush.msra.mxu3 %v234_v12 }
  0x25   : > { %263 = vmatpush.msra.mxu0 %v234_v12  ;;  %433 = vmatpush.msra.mxu1 %v234_v12 }
  0x26   : > { %437 = vmatpush.msra.mxu2 %v233_v13  ;;  %438 = vmatpush.msra.mxu3 %v233_v13 }
  0x27   : > { %264 = vmatpush.msra.mxu0 %v233_v13  ;;  %436 = vmatpush.msra.mxu1 %v233_v13 }
  0x28   : > { %440 = vmatpush.msra.mxu2 %v232_v14  ;;  %441 = vmatpush.msra.mxu3 %v232_v14 }
  0x29   : > { %265 = vmatpush.msra.mxu0 %v232_v14  ;;  %439 = vmatpush.msra.mxu1 %v232_v14 }
  0x2a   : > { %443 = vmatpush.msra.mxu2 %v231_v15  ;;  %444 = vmatpush.msra.mxu3 %v231_v15 }
  0x2b   : > { %279 = vmatmul.f32.vlgmr.msra.gmra.mxu2 %v227_v16  ;;  %285 = vmatmul.f32.vlgmr.msra.gmra.mxu3 %v229_v17 }
  0x2c   : > { %266 = vmatpush.msra.mxu0 %v231_v15  ;;  %442 = vmatpush.msra.mxu1 %v231_v15 }
  0x2d   : > { %267 = vmatmul.f32.vlgmr.msra.gmra.mxu0 %v223_v18  ;;  %273 = vmatmul.f32.vlgmr.msra.gmra.mxu1 %v225_v19 }
  0x33   : > { %282 = vmatmul.f32.gmra.mxu2 %v228_v20  ;;  %288 = vmatmul.f32.gmra.mxu3 %v230_v21 }
  0x35   : > { %270 = vmatmul.f32.gmra.mxu0 %v224_v22  ;;  %276 = vmatmul.f32.gmra.mxu1 %v226_v23 }
  0xaa   : > { %v268_v25 = vpop.f32.mrf.mxu0  ;;  %v274_v27 = vpop.f32.mrf.mxu1 }
  0xab   : > { %v269_v29 = vadd.f32 %v453_v24, %v268_v25  ;;  %v275_v30 = vadd.f32 %v453_v24, %v274_v27 }
  0xad   : > { %v300_v31 = vadd.f32 %v292_v26, %v269_v29  ;;  %v302_v32 = vadd.f32 %v294_v28, %v275_v30 }
  0xae   : > { %v280_v33 = vpop.f32.mrf.mxu2  ;;  %v286_v35 = vpop.f32.mrf.mxu3 }
  0xaf   : > { %308 = vst [vmem:[%s566_s10] sm:$0xff] %v300_v31  ;;  %v281_v37 = vadd.f32 %v453_v24, %v280_v33  ;;  %v287_v38 = vadd.f32 %v453_v24, %v286_v35 }
  0xb0   : > { %310 = vst [vmem:[%s566_s10 + $0x10] sm:$0xff] %v302_v32 }
  0xb1   : > { %v304_v39 = vadd.f32 %v296_v34, %v281_v37  ;;  %v306_v40 = vadd.f32 %v298_v36, %v287_v38 }
  0xb2   : > { %v271_v41 = vpop.f32.mrf.mxu0  ;;  %v277_v43 = vpop.f32.mrf.mxu1 }
  0xb3   : > { %312 = vst [vmem:[%s566_s10 + $0x20] sm:$0xff] %v304_v39  ;;  %v272_v45 = vadd.f32 %v453_v24, %v271_v41  ;;  %v278_v46 = vadd.f32 %v453_v24, %v277_v43 }
  0xb4   : > { %314 = vst [vmem:[%s566_s10 + $0x30] sm:$0xff] %v306_v40 }
  0xb5   : > { %v301_v47 = vadd.f32 %v293_v42, %v272_v45  ;;  %v303_v48 = vadd.f32 %v295_v44, %v278_v46 }
  0xb6   : > { %v283_v49 = vpop.f32.mrf.mxu2  ;;  %v289_v51 = vpop.f32.mrf.mxu3 }
  0xb7   : > { %309 = vst [vmem:[%s566_s10 + $0x8] sm:$0xff] %v301_v47  ;;  %v284_v53 = vadd.f32 %v453_v24, %v283_v49  ;;  %v290_v54 = vadd.f32 %v453_v24, %v289_v51 }
  0xb8   : > { %311 = vst [vmem:[%s566_s10 + $0x18] sm:$0xff] %v303_v48 }
  0xb9   : > { %v305_v55 = vadd.f32 %v297_v50, %v284_v53  ;;  %v307_v56 = vadd.f32 %v299_v52, %v290_v54 }
  0xbb   : > { %313 = vst [vmem:[%s566_s10 + $0x28] sm:$0xff] %v305_v55 }
  0xbc   : > { %315 = vst [vmem:[%s566_s10 + $0x38] sm:$0xff] %v307_v56 }
  0xbd PF: > { %s14_s15 = sadd.s32 1, %s460_s15  }
  0xbe   : > { %p11_p4 = scmp.ge.s32.totalorder %s14_s15, 10  }
  0xc0   :  { %13 = sbr.rel (!%p11_p4) target bundleno = 1 (0x1), region = 69 }

// kernel: tile.50
= control target key start
LH: loop header
LB: loop body
LE: loop exit
PB: predicated region body
PF: predicated region fallthrough
CT: control target
= control target key end

     0   :  { %s22_s0 = inlined_call_operand.vmem [shape: f32[64], index: 0, kind: input, shape index: {}]   ;;  %s23_s1 = inlined_call_operand.vmem [shape: f32[8,64], index: 1, kind: output, shape index: {}]  }
   0x1   :  { %v4_v0 = vld [vmem:[%s22_s0] ss:$0 sm:$0xff] }
   0x2   :  { %5 = vst [vmem:[%s23_s1] sm:$0xff] %v4_v0 }

// kernel: tile.51
= control target key start
LH: loop header
LB: loop body
LE: loop exit
PB: predicated region body
PF: predicated region fallthrough
CT: control target
= control target key end

     0   :  { %vm3_vm0 = vcmask 523264   ;;  %s40_s8 = smov 64   ;;  %vm9_vm1 = vcmask 1048064   ;;  %s69_s0 = inlined_call_operand.vmem [shape: f32[8,64], index: 0, kind: input, shape index: {}]   ;;  %s70_s1 = inlined_call_operand.vmem [shape: f32[1,512], index: 1, kind: output, shape index: {}]  }
   0x1   :  { %v35_v0 = vld [vmem:[%s69_s0 + $0x1] ss:$2 sm:$0xf]   ;;  %v2_v1 = vld [vmem:[%s69_s0] ss:$2 sm:$0xf]  }
   0x2   :  { %7 = vrot.lane.b32.xlu0 %v35_v0, %s40_s8  ;;  %4 = vst.msk [vmem:[#allocation0] ss:$8 sm:$0xf] %vm3_vm0, %v2_v1  }
  0x74   :  { %v8_v2 = vpop.permute.xlu0 %7  }
  0x75   :  { %10 = vst.msk [vmem:[#allocation0] ss:$8 sm:$0xf] %vm9_vm1, %v8_v2  }
  0x7c   :  { %v13_v3 = vld [vmem:[#allocation0] sm:$0x1]  ;;  %v18_v4 = vld [vmem:[#allocation0 + $0x8] sm:$0x1]  ;;  %v24_v5 = vld [vmem:[#allocation0 + $0x10] sm:$0x1] }
  0x7d   :  { %16 = vst [vmem:[%s70_s1] sm:$0x1] %v13_v3  ;;  %v30_v6 = vld [vmem:[#allocation0 + $0x18] sm:$0x1] }
  0x7e   :  { %36 = vst [vmem:[%s70_s1 + $0x1] sm:$0x1] %v18_v4 }
  0x7f   :  { %37 = vst [vmem:[%s70_s1 + $0x2] sm:$0x1] %v24_v5 }
  0x80   :  { %38 = vst [vmem:[%s70_s1 + $0x3] sm:$0x1] %v30_v6 }

// kernel: tile.54
= control target key start
LH: loop header
LB: loop body
LE: loop exit
PB: predicated region body
PF: predicated region fallthrough
CT: control target
= control target key end

     0   :  { %s22_s0 = inlined_call_operand.vmem [shape: f32[4], index: 0, kind: input, shape index: {}]   ;;  %s23_s1 = inlined_call_operand.vmem [shape: f32[8,4], index: 1, kind: output, shape index: {}]  }
   0x1   :  { %v4_v0 = vld [vmem:[%s22_s0] ss:$0 sm:$0xff] }
   0x2   :  { %5 = vst [vmem:[%s23_s1] sm:$0xff] %v4_v0 }

// kernel: tile.55
= control target key start
LH: loop header
LB: loop body
LE: loop exit
PB: predicated region body
PF: predicated region fallthrough
CT: control target
= control target key end

     0   :  { %s67_s10 = smov 28   ;;  %s68_s11 = smov 20   ;;  %vm3_vm0 = vcmask 31744   ;;  %vm9_vm1 = vcmask 261344   ;;  %vm15_vm2 = vcmask 228544   ;;  %vm21_vm3 = vcmask 195744   ;;  %s111_s0 = inlined_call_operand.vmem [shape: f32[8,4], index: 0, kind: input, shape index: {}]   ;;  %s112_s1 = inlined_call_operand.vmem [shape: f32[1,32], index: 1, kind: output, shape index: {}]  }
   0x1   :  { %v53_v0 = vld [vmem:[%s111_s0 + $0x7] sm:$0x1]   ;;  %v55_v1 = vld [vmem:[%s111_s0 + $0x5] sm:$0x1]   ;;  %v57_v2 = vld [vmem:[%s111_s0 + $0x3] sm:$0x1]  }
   0x2   :  { %7 = vrot.lane.b32.xlu0 %v53_v0, %s67_s10  ;;  %19 = vrot.lane.b32.xlu1 %v55_v1, %s68_s11  ;;  %s69_s14 = smov 12   ;;  %v54_v3 = vld [vmem:[%s111_s0 + $0x6] sm:$0x1]   ;;  %v56_v4 = vld [vmem:[%s111_s0 + $0x4] sm:$0x1]   ;;  %s70_s21 = smov 24  }
   0x3   :  { %31 = vrot.lane.b32.xlu2 %v57_v2, %s69_s14  ;;  %v58_v5 = vld [vmem:[%s111_s0 + $0x2] sm:$0x1]   ;;  %s71_s22 = smov 16   ;;  %s72_s23 = smov 8   ;;  %v59_v6 = vld [vmem:[%s111_s0 + $0x1] sm:$0x1]  }
   0x4   :  { %s73_s26 = smov 4   ;;  %v2_v7 = vld [vmem:[%s111_s0] sm:$0x1]   ;;  %vm27_vm4 = vcmask 162944   ;;  %vm33_vm5 = vcmask 130144   ;;  %vm39_vm6 = vcmask 97344  }
   0x5   :  { %4 = vst.msk [vmem:[#allocation0] sm:$0x1] %vm3_vm0, %v2_v7   ;;  %vm45_vm7 = vcmask 64544  }
   0xa   :  { %13 = vrot.lane.b32.xlu0 %v54_v3, %s70_s21  ;;  %25 = vrot.lane.b32.xlu1 %v56_v4, %s71_s22 }
   0xb   :  { %37 = vrot.lane.b32.xlu2 %v58_v5, %s72_s23 }
  0x12   :  { %43 = vrot.lane.b32.xlu0 %v59_v6, %s73_s26 }
  0x5d   :  { %v32_v8 = vpop.permute.xlu2 %31  }
  0x65   :  { %v38_v9 = vpop.permute.xlu2 %37  }
  0x74   :  { %v8_v10 = vpop.permute.xlu0 %7   ;;  %v20_v11 = vpop.permute.xlu1 %19  }
  0x75   :  { %10 = vst.msk [vmem:[#allocation0] sm:$0x1] %vm9_vm1, %v8_v10  }
  0x7c   :  { %v14_v12 = vpop.permute.xlu0 %13   ;;  %v26_v13 = vpop.permute.xlu1 %25  }
  0x7d   :  { %16 = vst.msk [vmem:[#allocation0] sm:$0x1] %vm15_vm2, %v14_v12  }
  0x7e   :  { %22 = vst.msk [vmem:[#allocation0] sm:$0x1] %vm21_vm3, %v20_v11  }
  0x7f   :  { %28 = vst.msk [vmem:[#allocation0] sm:$0x1] %vm27_vm4, %v26_v13  }
  0x80   :  { %34 = vst.msk [vmem:[#allocation0] sm:$0x1] %vm33_vm5, %v32_v8  }
  0x81   :  { %40 = vst.msk [vmem:[#allocation0] sm:$0x1] %vm39_vm6, %v38_v9  }
  0x84   :  { %v44_v14 = vpop.permute.xlu0 %43  }
  0x85   :  { %46 = vst.msk [vmem:[#allocation0] sm:$0x1] %vm45_vm7, %v44_v14  }
  0x8c   :  { %v49_v15 = vld [vmem:[#allocation0] sm:$0x1] }
  0x8d   :  { %52 = vst [vmem:[%s112_s1] sm:$0x1] %v49_v15 }

// kernel: fno2d_forward.19
= control target key start
LH: loop header
LB: loop body
LE: loop exit
PB: predicated region body
PF: predicated region fallthrough
CT: control target
= control target key end

     0   :  { %s2452_s18 = smov 0   ;;  %s5478_s0 = inlined_call_operand.vmem [shape: f32[64,1024], index: 0, kind: input, shape index: {}]   ;;  %s5479_s1 = inlined_call_operand.vmem [shape: f32[256,512], index: 1, kind: input, shape index: {}]   ;;  %s5480_s2 = inlined_call_operand.vmem [shape: f32[1,512], index: 2, kind: input, shape index: {}]   ;;  %s5481_s3 = inlined_call_operand.vmem [shape: f32[512,32], index: 3, kind: input, shape index: {}]   ;;  %s5482_s4 = inlined_call_operand.vmem [shape: f32[1,32], index: 4, kind: input, shape index: {}]   ;;  %s5483_s5 = inlined_call_operand.vmem [shape: f32[64,128], index: 5, kind: output, shape index: {}]  }
   0x1 LB: > { %s2109_s19 = sadd.s32 4294967295, %s2417_s18   ;;  %p2113_p0 = scmp.ge.s32.totalorder %s2417_s18, 1  ;;  %s2417_s18 = sphi %s2452_s18, %s15_s18  }
   0x2   : > { %p187_p1 = scmp.lt.s32.totalorder %s2417_s18, 9 }
   0x4   : > { %p188_p2 = pnand %p2113_p0, %p187_p1 }
   0x6   : > { %191 = sbr.rel (%p188_p2) target bundleno = 1181 (0x49d), region = 40 }
   0xb   : > { %v2463_v0 = vld [vmem:[%s5479_s1 + $0x1e0] sm:$0xff]  ;;  %v2468_v1 = vld [vmem:[%s5479_s1 + $0x1e8] sm:$0xff]  ;;  %p2672_p3 = scmp.lt.s32.totalorder %s2109_s19, 7  ;;  %v2854_v63 = vld [vmem:[%s5479_s1 + $0x1f0] sm:$0xff]  ;;  %s2419_s21 = smov 32  }
   0xc   : > { %v2473_v2 = vld [vmem:[%s5479_s1 + $0x1c0] sm:$0xff]  ;;  %363 = vmatpush.msra.mxu0 %v2463_v0  ;;  %403 = vmatpush.msra.mxu2 %v2468_v1  ;;  %v2485_v4 = vld [vmem:[%s5479_s1 + $0x1c8] sm:$0xff]  ;;  %5727 = vst [vmem:[#allocation12_spill] sm:$0xff] %v2854_v63  ;;  %s2420_s22 = smov 64   ;;  %s2421_s23 = smov 96  }
   0xd   : > { %v2480_v3 = vld [vmem:[%s5479_s1 + $0x3e0] sm:$0xff]  ;;  %v2490_v5 = vld [vmem:[%s5479_s1 + $0x3e8] sm:$0xff]  ;;  %s6192_s19 = smov (!%p2672_p3, %s2109_s19), 7 }
   0xe   : > { %383 = vmatpush.msra.mxu1 %v2480_v3  ;;  %423 = vmatpush.msra.mxu3 %v2490_v5  ;;  %v2497_v6 = vld [vmem:[%s5479_s1 + $0x1a0] sm:$0xff]  ;;  %v2507_v8 = vld [vmem:[%s5479_s1 + $0x1a8] sm:$0xff]  ;;  %s2119_s8 = sshll.u32 %s6192_s19, 6  ;;  %s2116_s24 = sshll.u32 %s6192_s19, 3 }
   0xf   : > { %v2502_v7 = vld [vmem:[%s5479_s1 + $0x3c0] sm:$0xff]  ;;  %364 = vmatpush.msra.mxu0 %v2473_v2  ;;  %404 = vmatpush.msra.mxu2 %v2485_v4  ;;  %v2514_v9 = vld [vmem:[%s5479_s1 + $0x3c8] sm:$0xff]  ;;  %s2818_s25 = scalar_lea.vmem %s5478_s0, %s2119_s8  ;;  %s222_s28 = scalar_lea.vmem %s5483_s5, %s2116_s24 }
  0x10   : > { %v2519_v10 = vld [vmem:[%s5479_s1 + $0x3a0] sm:$0xff]  ;;  %384 = vmatpush.msra.mxu1 %v2502_v7  ;;  %424 = vmatpush.msra.mxu3 %v2514_v9  ;;  %v2531_v12 = vld [vmem:[%s5479_s1 + $0x188] sm:$0xff] }
  0x11   : > { %v2526_v11 = vld [vmem:[%s5479_s1 + $0x180] sm:$0xff]  ;;  %v2536_v13 = vld [vmem:[%s5479_s1 + $0x3a8] sm:$0xff]  ;;  %365 = vmatpush.msra.mxu0 %v2497_v6  ;;  %405 = vmatpush.msra.mxu2 %v2507_v8 }
  0x12   : > { %v2543_v14 = vld [vmem:[%s5479_s1 + $0x380] sm:$0xff]  ;;  %v2548_v15 = vld [vmem:[%s5479_s1 + $0x388] sm:$0xff]  ;;  %385 = vmatpush.msra.mxu1 %v2519_v10  ;;  %425 = vmatpush.msra.mxu3 %v2536_v13 }
  0x13   : > { %v2555_v16 = vld [vmem:[%s5479_s1 + $0x160] sm:$0xff]  ;;  %v2560_v17 = vld [vmem:[%s5479_s1 + $0x168] sm:$0xff]  ;;  %366 = vmatpush.msra.mxu0 %v2526_v11  ;;  %406 = vmatpush.msra.mxu2 %v2531_v12 }
  0x14   : > { %v2567_v18 = vld [vmem:[%s5479_s1 + $0x360] sm:$0xff]  ;;  %v2572_v19 = vld [vmem:[%s5479_s1 + $0x368] sm:$0xff]  ;;  %386 = vmatpush.msra.mxu1 %v2543_v14  ;;  %426 = vmatpush.msra.mxu3 %v2548_v15 }
  0x15   : > { %v2579_v20 = vld [vmem:[%s5479_s1 + $0x140] sm:$0xff]  ;;  %v2584_v21 = vld [vmem:[%s5479_s1 + $0x148] sm:$0xff]  ;;  %367 = vmatpush.msra.mxu0 %v2555_v16  ;;  %407 = vmatpush.msra.mxu2 %v2560_v17 }
  0x16   : > { %v2591_v22 = vld [vmem:[%s5479_s1 + $0x340] sm:$0xff]  ;;  %v2596_v23 = vld [vmem:[%s5479_s1 + $0x348] sm:$0xff]  ;;  %387 = vmatpush.msra.mxu1 %v2567_v18  ;;  %427 = vmatpush.msra.mxu3 %v2572_v19 }
  0x17   : > { %v2603_v24 = vld [vmem:[%s5479_s1 + $0x120] sm:$0xff]  ;;  %v2608_v25 = vld [vmem:[%s5479_s1 + $0x128] sm:$0xff]  ;;  %368 = vmatpush.msra.mxu0 %v2579_v20  ;;  %408 = vmatpush.msra.mxu2 %v2584_v21 }
  0x18   : > { %v2615_v26 = vld [vmem:[%s5479_s1 + $0x320] sm:$0xff]  ;;  %v2620_v27 = vld [vmem:[%s5479_s1 + $0x328] sm:$0xff]  ;;  %388 = vmatpush.msra.mxu1 %v2591_v22  ;;  %428 = vmatpush.msra.mxu3 %v2596_v23 }
  0x19   : > { %v2627_v28 = vld [vmem:[%s5479_s1 + $0x100] sm:$0xff]  ;;  %v2632_v29 = vld [vmem:[%s5479_s1 + $0x108] sm:$0xff]  ;;  %369 = vmatpush.msra.mxu0 %v2603_v24  ;;  %409 = vmatpush.msra.mxu2 %v2608_v25 }
  0x1a   : > { %v2639_v30 = vld [vmem:[%s5479_s1 + $0x300] sm:$0xff]  ;;  %v2644_v31 = vld [vmem:[%s5479_s1 + $0x308] sm:$0xff]  ;;  %389 = vmatpush.msra.mxu1 %v2615_v26  ;;  %429 = vmatpush.msra.mxu3 %v2620_v27 }
  0x1b   : > { %v2651_v32 = vld [vmem:[%s5479_s1 + $0xe0] sm:$0xff]  ;;  %v2656_v33 = vld [vmem:[%s5479_s1 + $0xe8] sm:$0xff]  ;;  %370 = vmatpush.msra.mxu0 %v2627_v28  ;;  %410 = vmatpush.msra.mxu2 %v2632_v29 }
  0x1c   : > { %v2663_v34 = vld [vmem:[%s5479_s1 + $0x2e0] sm:$0xff]  ;;  %v2668_v35 = vld [vmem:[%s5479_s1 + $0x2e8] sm:$0xff]  ;;  %390 = vmatpush.msra.mxu1 %v2639_v30  ;;  %430 = vmatpush.msra.mxu3 %v2644_v31 }
  0x1d   : > { %v2681_v36 = vld [vmem:[%s5479_s1 + $0xc0] sm:$0xff]  ;;  %v2686_v37 = vld [vmem:[%s5479_s1 + $0xc8] sm:$0xff]  ;;  %371 = vmatpush.msra.mxu0 %v2651_v32  ;;  %411 = vmatpush.msra.mxu2 %v2656_v33 }
  0x1e   : > { %v2693_v38 = vld [vmem:[%s5479_s1 + $0x2c0] sm:$0xff]  ;;  %v2698_v39 = vld [vmem:[%s5479_s1 + $0x2c8] sm:$0xff]  ;;  %391 = vmatpush.msra.mxu1 %v2663_v34  ;;  %431 = vmatpush.msra.mxu3 %v2668_v35 }
  0x1f   : > { %v2705_v40 = vld [vmem:[%s5479_s1 + $0xa0] sm:$0xff]  ;;  %v2710_v41 = vld [vmem:[%s5479_s1 + $0xa8] sm:$0xff]  ;;  %372 = vmatpush.msra.mxu0 %v2681_v36  ;;  %412 = vmatpush.msra.mxu2 %v2686_v37 }
  0x20   : > { %v2717_v42 = vld [vmem:[%s5479_s1 + $0x2a0] sm:$0xff]  ;;  %v2722_v43 = vld [vmem:[%s5479_s1 + $0x2a8] sm:$0xff]  ;;  %392 = vmatpush.msra.mxu1 %v2693_v38  ;;  %432 = vmatpush.msra.mxu3 %v2698_v39 }
  0x21   : > { %5717 = vst [vmem:[#allocation2_spill] sm:$0xff] %v2722_v43  ;;  %v2735_v44 = vld [vmem:[%s5479_s1 + $0x80] sm:$0xff]  ;;  %v2740_v45 = vld [vmem:[%s5479_s1 + $0x88] sm:$0xff]  ;;  %373 = vmatpush.msra.mxu0 %v2705_v40  ;;  %413 = vmatpush.msra.mxu2 %v2710_v41 }
  0x22   : > { %5718 = vst [vmem:[#allocation3_spill] sm:$0xff] %v2740_v45  ;;  %v2747_v46 = vld [vmem:[%s5479_s1 + $0x280] sm:$0xff]  ;;  %v2752_v47 = vld [vmem:[%s5479_s1 + $0x288] sm:$0xff]  ;;  %393 = vmatpush.msra.mxu1 %v2717_v42  ;;  %433 = vmatpush.msra.mxu3 %v2722_v43  ;;  %v280_v43 = vld [vmem:[%s5479_s1 + $0x1b8] sm:$0xff] }
  0x23   : > { %5719 = vst [vmem:[#allocation4_spill] sm:$0xff] %v2752_v47  ;;  %v2759_v48 = vld [vmem:[%s5479_s1 + $0x60] sm:$0xff]  ;;  %v2764_v49 = vld [vmem:[%s5479_s1 + $0x68] sm:$0xff]  ;;  %374 = vmatpush.msra.mxu0 %v2735_v44  ;;  %414 = vmatpush.msra.mxu2 %v2740_v45  ;;  %v2918_v45 = vld [vmem:[%s5479_s1 + $0x190] sm:$0xff] }
  0x24   : > { %5720 = vst [vmem:[#allocation5_spill] sm:$0xff] %v2764_v49  ;;  %v2771_v50 = vld [vmem:[%s5479_s1 + $0x260] sm:$0xff]  ;;  %v2776_v51 = vld [vmem:[%s5479_s1 + $0x268] sm:$0xff]  ;;  %394 = vmatpush.msra.mxu1 %v2747_v46  ;;  %434 = vmatpush.msra.mxu3 %v2752_v47  ;;  %v284_v47 = vld [vmem:[%s5479_s1 + $0x1d8] sm:$0xff] }
  0x25   : > { %5721 = vst [vmem:[#allocation6_spill] sm:$0xff] %v2776_v51  ;;  %v2784_v52 = vld [vmem:[%s5479_s1 + $0x40] sm:$0xff]  ;;  %v2789_v53 = vld [vmem:[%s5479_s1 + $0x48] sm:$0xff]  ;;  %375 = vmatpush.msra.mxu0 %v2759_v48  ;;  %415 = vmatpush.msra.mxu2 %v2764_v49  ;;  %v2900_v49 = vld [vmem:[%s5479_s1 + $0x1b0] sm:$0xff] }
  0x26   : > { %5722 = vst [vmem:[#allocation7_spill] sm:$0xff] %v2789_v53  ;;  %v2796_v54 = vld [vmem:[%s5479_s1 + $0x240] sm:$0xff]  ;;  %v2801_v55 = vld [vmem:[%s5479_s1 + $0x248] sm:$0xff]  ;;  %395 = vmatpush.msra.mxu1 %v2771_v50  ;;  %435 = vmatpush.msra.mxu3 %v2776_v51 }
  0x27   : > { %5723 = vst [vmem:[#allocation8_spill] sm:$0xff] %v2801_v55  ;;  %v2808_v56 = vld [vmem:[%s5479_s1 + $0x20] sm:$0xff]  ;;  %v2813_v57 = vld [vmem:[%s5479_s1 + $0x28] sm:$0xff]  ;;  %376 = vmatpush.msra.mxu0 %v2784_v52  ;;  %416 = vmatpush.msra.mxu2 %v2789_v53  ;;  %v2885_v53 = vld [vmem:[%s5479_s1 + $0x3f0] sm:$0xff] }
  0x28   : > { %5724 = vst [vmem:[#allocation9_spill] sm:$0xff] %v2813_v57  ;;  %v2825_v58 = vld [vmem:[%s5479_s1 + $0x220] sm:$0xff]  ;;  %v2830_v59 = vld [vmem:[%s5479_s1 + $0x228] sm:$0xff]  ;;  %396 = vmatpush.msra.mxu1 %v2796_v54  ;;  %436 = vmatpush.msra.mxu3 %v2801_v55  ;;  %v288_v55 = vld [vmem:[%s5479_s1 + $0x1f8] sm:$0xff] }
  0x29   : > { %5725 = vst [vmem:[#allocation10_spill] sm:$0xff] %v2830_v59  ;;  %v2837_v60 = vld [vmem:[%s5479_s1] sm:$0xff]  ;;  %v2842_v61 = vld [vmem:[%s5479_s1 + $0x8] sm:$0xff]  ;;  %377 = vmatpush.msra.mxu0 %v2808_v56  ;;  %417 = vmatpush.msra.mxu2 %v2813_v57 }
  0x2a   : > { %5726 = vst [vmem:[#allocation11_spill] sm:$0xff] %v2842_v61  ;;  %v2847_v62 = vld [vmem:[%s2818_s25] sm:$0xff]  ;;  %397 = vmatpush.msra.mxu1 %v2825_v58  ;;  %437 = vmatpush.msra.mxu3 %v2830_v59  ;;  %v2869_v59 = vld [vmem:[%s5479_s1 + $0x208] sm:$0xff] }
  0x2b   : > { %378 = vmatpush.msra.mxu0 %v2837_v60  ;;  %418 = vmatpush.msra.mxu2 %v2842_v61  ;;  %v2864_v57 = vld [vmem:[%s5479_s1 + $0x200] sm:$0xff]  ;;  %5728 = vst [vmem:[#allocation13_spill] sm:$0xff] %v2869_v59  ;;  %v2874_v51 = vld [vmem:[%s2818_s25 + $0x8] sm:$0xff]  ;;  %v2880_v61 = vld [vmem:[%s5479_s1 + $0x1d0] sm:$0xff] }
  0x2c   : > { %379 = vmatmul.f32.vlgmr.msra.gmra.mxu0 %v2847_v62  ;;  %419 = vmatmul.f32.vlgmr.msra.gmra.mxu2 %v2847_v62  ;;  %5729 = vst [vmem:[#allocation14_spill] sm:$0xff] %v2880_v61 }
  0x2d   : > { %443 = vmatpush.msrb.mxu0 %v2854_v63  ;;  %483 = vmatpush.msrb.mxu2 %v288_v55  ;;  %5730 = vst [vmem:[#allocation15_spill] sm:$0xff] %v2885_v53  ;;  %v352_v55 = vld [vmem:[%s5479_s1 + $0x3f8] sm:$0xff] }
  0x2e   : > { %398 = vmatpush.msra.mxu1 %v2864_v57  ;;  %438 = vmatpush.msra.mxu3 %v2869_v59  ;;  %5731 = vst [vmem:[#allocation16_spill] sm:$0xff] %v2900_v49  ;;  %v2905_v59 = vld [vmem:[%s5479_s1 + $0x3d0] sm:$0xff]  ;;  %v348_v63 = vld [vmem:[%s5479_s1 + $0x3d8] sm:$0xff] }
  0x2f   : > { %399 = vmatmul.f32.vlgmr.msra.gmra.mxu1 %v2874_v51  ;;  %439 = vmatmul.f32.vlgmr.msra.gmra.mxu3 %v2874_v51  ;;  %5732 = vst [vmem:[#allocation17_spill] sm:$0xff] %v2905_v59 }
  0x30   : > { %444 = vmatpush.msrb.mxu0 %v2880_v61  ;;  %463 = vmatpush.msrb.mxu1 %v2885_v53  ;;  %5733 = vst [vmem:[#allocation18_spill] sm:$0xff] %v2918_v45  ;;  %v2923_v61 = vld [vmem:[%s5479_s1 + $0x3b0] sm:$0xff]  ;;  %v276_v53 = vld [vmem:[%s5479_s1 + $0x198] sm:$0xff] }
  0x31   : > { %484 = vmatpush.msrb.mxu2 %v284_v47  ;;  %503 = vmatpush.msrb.mxu3 %v352_v55  ;;  %5734 = vst [vmem:[#allocation19_spill] sm:$0xff] %v2923_v61  ;;  %v344_v47 = vld [vmem:[%s5479_s1 + $0x3b8] sm:$0xff]  ;;  %v2936_v55 = vld [vmem:[%s5479_s1 + $0x170] sm:$0xff] }
  0x32   : > { %445 = vmatpush.msrb.mxu0 %v2900_v49  ;;  %464 = vmatpush.msrb.mxu1 %v2905_v59  ;;  %5735 = vst [vmem:[#allocation20_spill] sm:$0xff] %v2936_v55  ;;  %v2941_v49 = vld [vmem:[%s5479_s1 + $0x390] sm:$0xff]  ;;  %v272_v59 = vld [vmem:[%s5479_s1 + $0x178] sm:$0xff] }
  0x33   : > { %485 = vmatpush.msrb.mxu2 %v280_v43  ;;  %504 = vmatpush.msrb.mxu3 %v348_v63  ;;  %5736 = vst [vmem:[#allocation21_spill] sm:$0xff] %v2941_v49  ;;  %v340_v43 = vld [vmem:[%s5479_s1 + $0x398] sm:$0xff]  ;;  %v2954_v63 = vld [vmem:[%s5479_s1 + $0x150] sm:$0xff] }
  0x34   : > { %446 = vmatpush.msrb.mxu0 %v2918_v45  ;;  %465 = vmatpush.msrb.mxu1 %v2923_v61  ;;  %5737 = vst [vmem:[#allocation22_spill] sm:$0xff] %v2954_v63  ;;  %v2959_v45 = vld [vmem:[%s5479_s1 + $0x370] sm:$0xff]  ;;  %v268_v61 = vld [vmem:[%s5479_s1 + $0x158] sm:$0xff] }
  0x35   : > { %486 = vmatpush.msrb.mxu2 %v276_v53  ;;  %505 = vmatpush.msrb.mxu3 %v344_v47  ;;  %5738 = vst [vmem:[#allocation23_spill] sm:$0xff] %v2959_v45  ;;  %v336_v53 = vld [vmem:[%s5479_s1 + $0x378] sm:$0xff]  ;;  %v2972_v47 = vld [vmem:[%s5479_s1 + $0x130] sm:$0xff] }
  0x36   : > { %447 = vmatpush.msrb.mxu0 %v2936_v55  ;;  %466 = vmatpush.msrb.mxu1 %v2941_v49  ;;  %5739 = vst [vmem:[#allocation24_spill] sm:$0xff] %v2972_v47  ;;  %v2977_v55 = vld [vmem:[%s5479_s1 + $0x350] sm:$0xff]  ;;  %v264_v49 = vld [vmem:[%s5479_s1 + $0x138] sm:$0xff] }
  0x37   : > { %487 = vmatpush.msrb.mxu2 %v272_v59  ;;  %506 = vmatpush.msrb.mxu3 %v340_v43  ;;  %5740 = vst [vmem:[#allocation25_spill] sm:$0xff] %v2977_v55  ;;  %v332_v59 = vld [vmem:[%s5479_s1 + $0x358] sm:$0xff]  ;;  %v2990_v43 = vld [vmem:[%s5479_s1 + $0x110] sm:$0xff] }
  0x38   : > { %448 = vmatpush.msrb.mxu0 %v2954_v63  ;;  %467 = vmatpush.msrb.mxu1 %v2959_v45  ;;  %5741 = vst [vmem:[#allocation26_spill] sm:$0xff] %v2990_v43  ;;  %v2995_v63 = vld [vmem:[%s5479_s1 + $0x330] sm:$0xff]  ;;  %v260_v45 = vld [vmem:[%s5479_s1 + $0x118] sm:$0xff] }
  0x39   : > { %488 = vmatpush.msrb.mxu2 %v268_v61  ;;  %507 = vmatpush.msrb.mxu3 %v336_v53  ;;  %5742 = vst [vmem:[#allocation27_spill] sm:$0xff] %v2995_v63  ;;  %v328_v61 = vld [vmem:[%s5479_s1 + $0x338] sm:$0xff]  ;;  %v3008_v53 = vld [vmem:[%s5479_s1 + $0xf0] sm:$0xff] }
  0x3a   : > { %449 = vmatpush.msrb.mxu0 %v2972_v47  ;;  %468 = vmatpush.msrb.mxu1 %v2977_v55  ;;  %5743 = vst [vmem:[#allocation28_spill] sm:$0xff] %v3008_v53  ;;  %v3013_v47 = vld [vmem:[%s5479_s1 + $0x310] sm:$0xff]  ;;  %v256_v55 = vld [vmem:[%s5479_s1 + $0xf8] sm:$0xff] }
  0x3b   : > { %489 = vmatpush.msrb.mxu2 %v264_v49  ;;  %508 = vmatpush.msrb.mxu3 %v332_v59  ;;  %5744 = vst [vmem:[#allocation29_spill] sm:$0xff] %v3013_v47  ;;  %v324_v49 = vld [vmem:[%s5479_s1 + $0x318] sm:$0xff]  ;;  %v3026_v59 = vld [vmem:[%s5479_s1 + $0xd0] sm:$0xff] }
  0x3c   : > { %450 = vmatpush.msrb.mxu0 %v2990_v43  ;;  %469 = vmatpush.msrb.mxu1 %v2995_v63  ;;  %5745 = vst [vmem:[#allocation30_spill] sm:$0xff] %v3026_v59  ;;  %v3031_v43 = vld [vmem:[%s5479_s1 + $0x2f0] sm:$0xff]  ;;  %v252_v63 = vld [vmem:[%s5479_s1 + $0xd8] sm:$0xff] }
  0x3d   : > { %490 = vmatpush.msrb.mxu2 %v260_v45  ;;  %509 = vmatpush.msrb.mxu3 %v328_v61  ;;  %5746 = vst [vmem:[#allocation31_spill] sm:$0xff] %v3031_v43  ;;  %v320_v45 = vld [vmem:[%s5479_s1 + $0x2f8] sm:$0xff]  ;;  %v3044_v61 = vld [vmem:[%s5479_s1 + $0xb0] sm:$0xff] }
  0x3e   : > { %451 = vmatpush.msrb.mxu0 %v3008_v53  ;;  %470 = vmatpush.msrb.mxu1 %v3013_v47  ;;  %5747 = vst [vmem:[#allocation32_spill] sm:$0xff] %v3044_v61  ;;  %v3049_v53 = vld [vmem:[%s5479_s1 + $0x2d0] sm:$0xff]  ;;  %v3056_v47 = vld [vmem:[%s5479_s1 + $0xb8] sm:$0xff] }
  0x3f   : > { %491 = vmatpush.msrb.mxu2 %v256_v55  ;;  %510 = vmatpush.msrb.mxu3 %v324_v49  ;;  %5748 = vst [vmem:[#allocation33_spill] sm:$0xff] %v3049_v53  ;;  %v316_v55 = vld [vmem:[%s5479_s1 + $0x2d8] sm:$0xff]  ;;  %v3064_v49 = vld [vmem:[%s5479_s1 + $0x90] sm:$0xff] }
  0x40   : > { %452 = vmatpush.msrb.mxu0 %v3026_v59  ;;  %471 = vmatpush.msrb.mxu1 %v3031_v43  ;;  %5749 = vst [vmem:[#allocation34_spill] sm:$0xff] %v3056_v47  ;;  %v3069_v43 = vld [vmem:[%s5479_s1 + $0x2b0] sm:$0xff]  ;;  %v3076_v59 = vld [vmem:[%s5479_s1 + $0x98] sm:$0xff] }
  0x41   : > { %492 = vmatpush.msrb.mxu2 %v252_v63  ;;  %511 = vmatpush.msrb.mxu3 %v320_v45  ;;  %5750 = vst [vmem:[#allocation35_spill] sm:$0xff] %v3064_v49  ;;  %v312_v63 = vld [vmem:[%s5479_s1 + $0x2b8] sm:$0xff]  ;;  %v3085_v45 = vld [vmem:[%s5479_s1 + $0x70] sm:$0xff] }
  0x42   : > { %5751 = vst [vmem:[#allocation36_spill] sm:$0xff] %v3069_v43  ;;  %453 = vmatpush.msrb.mxu0 %v3044_v61  ;;  %472 = vmatpush.msrb.mxu1 %v3049_v53  ;;  %v3090_v53 = vld [vmem:[%s5479_s1 + $0x290] sm:$0xff]  ;;  %v3097_v61 = vld [vmem:[%s5479_s1 + $0x78] sm:$0xff] }
  0x43   : > { %5752 = vst [vmem:[#allocation37_spill] sm:$0xff] %v3076_v59  ;;  %493 = vmatpush.msrb.mxu2 %v3056_v47  ;;  %512 = vmatpush.msrb.mxu3 %v316_v55  ;;  %v308_v55 = vld [vmem:[%s5479_s1 + $0x298] sm:$0xff]  ;;  %v3106_v47 = vld [vmem:[%s5479_s1 + $0x50] sm:$0xff] }
  0x44   : > { %5753 = vst [vmem:[#allocation38_spill] sm:$0xff] %v3085_v45  ;;  %454 = vmatpush.msrb.mxu0 %v3064_v49  ;;  %473 = vmatpush.msrb.mxu1 %v3069_v43  ;;  %v3111_v43 = vld [vmem:[%s5479_s1 + $0x270] sm:$0xff]  ;;  %v3118_v49 = vld [vmem:[%s5479_s1 + $0x58] sm:$0xff] }
  0x45   : > { %5754 = vst [vmem:[#allocation39_spill] sm:$0xff] %v3090_v53  ;;  %494 = vmatpush.msrb.mxu2 %v3076_v59  ;;  %513 = vmatpush.msrb.mxu3 %v312_v63  ;;  %v3123_v63 = vld [vmem:[%s5479_s1 + $0x278] sm:$0xff]  ;;  %v3129_v59 = vld [vmem:[%s5479_s1 + $0x30] sm:$0xff] }
  0x46   : > { %5755 = vst [vmem:[#allocation40_spill] sm:$0xff] %v3097_v61  ;;  %455 = vmatpush.msrb.mxu0 %v3085_v45  ;;  %474 = vmatpush.msrb.mxu1 %v3090_v53  ;;  %v3134_v53 = vld [vmem:[%s5479_s1 + $0x250] sm:$0xff]  ;;  %v3141_v45 = vld [vmem:[%s5479_s1 + $0x38] sm:$0xff] }
  0x47   : > { %5756 = vst [vmem:[#allocation41_spill] sm:$0xff] %v3111_v43  ;;  %495 = vmatpush.msrb.mxu2 %v3097_v61  ;;  %514 = vmatpush.msrb.mxu3 %v308_v55  ;;  %v3146_v55 = vld [vmem:[%s5479_s1 + $0x258] sm:$0xff]  ;;  %v3153_v61 = vld [vmem:[%s5479_s1 + $0x10] sm:$0xff] }
  0x48   : > { %5757 = vst [vmem:[#allocation42_spill] sm:$0xff] %v3118_v49  ;;  %456 = vmatpush.msrb.mxu0 %v3106_v47  ;;  %475 = vmatpush.msrb.mxu1 %v3111_v43  ;;  %v3158_v43 = vld [vmem:[%s5479_s1 + $0x230] sm:$0xff] }
  0x49   : > { %5758 = vst [vmem:[#allocation43_spill] sm:$0xff] %v3123_v63  ;;  %496 = vmatpush.msrb.mxu2 %v3118_v49  ;;  %515 = vmatpush.msrb.mxu3 %v3123_v63  ;;  %v3165_v49 = vld [vmem:[%s5479_s1 + $0x18] sm:$0xff] }
  0x4a   : > { %5759 = vst [vmem:[#allocation44_spill] sm:$0xff] %v3129_v59  ;;  %457 = vmatpush.msrb.mxu0 %v3129_v59  ;;  %476 = vmatpush.msrb.mxu1 %v3134_v53  ;;  %v3170_v63 = vld [vmem:[%s5479_s1 + $0x238] sm:$0xff] }
  0x4b   : > { %5760 = vst [vmem:[#allocation45_spill] sm:$0xff] %v3134_v53  ;;  %497 = vmatpush.msrb.mxu2 %v3141_v45  ;;  %516 = vmatpush.msrb.mxu3 %v3146_v55  ;;  %v3179_v53 = vld [vmem:[%s5479_s1 + $0x210] sm:$0xff]  ;;  %v3184_v59 = vld [vmem:[%s5479_s1 + $0x218] sm:$0xff] }
  0x4c   : > { %5761 = vst [vmem:[#allocation46_spill] sm:$0xff] %v3141_v45  ;;  %458 = vmatpush.msrb.mxu0 %v3153_v61  ;;  %477 = vmatpush.msrb.mxu1 %v3158_v43  ;;  %v3232_v45 = vld [vmem:[%s5481_s3 + $0xe8] sm:$0xff] }
  0x4d   : > { %5762 = vst [vmem:[#allocation47_spill] sm:$0xff] %v3146_v55  ;;  %498 = vmatpush.msrb.mxu2 %v3165_v49  ;;  %517 = vmatpush.msrb.mxu3 %v3170_v63  ;;  %v3197_v55 = vld [vmem:[%s5481_s3 + $0x78] sm:$0xff] }
  0x4e   : > { %5763 = vst [vmem:[#allocation48_spill] sm:$0xff] %v3158_v43  ;;  %459 = vmatmul.f32.vlgmr.msrb.gmra.mxu0 %v2847_v62  ;;  %499 = vmatmul.f32.vlgmr.msrb.gmra.mxu2 %v2847_v62  ;;  %v3208_v62 = vld [vmem:[%s5481_s3 + $0xf8] sm:$0xff] }
  0x4f   : > { %5764 = vst [vmem:[#allocation49_spill] sm:$0xff] %v3165_v49  ;;  %478 = vmatpush.msrb.mxu1 %v3179_v53  ;;  %518 = vmatpush.msrb.mxu3 %v3184_v59  ;;  %v3227_v49 = vld [vmem:[%s5481_s3 + $0x60] sm:$0xff] }
  0x50   : > { %5765 = vst [vmem:[#allocation50_spill] sm:$0xff] %v3170_v63  ;;  %479 = vmatmul.f32.vlgmr.msrb.gmra.mxu1 %v2874_v51  ;;  %519 = vmatmul.f32.vlgmr.msrb.gmra.mxu3 %v2874_v51  ;;  %v3203_v63 = vld [vmem:[%s5481_s3 + $0x70] sm:$0xff]  ;;  %v3215_v51 = vld [vmem:[%s5481_s3 + $0x68] sm:$0xff] }
  0x51   : > { %5766 = vst [vmem:[#allocation51_spill] sm:$0xff] %v3179_v53  ;;  %751 = vmatpush.msra.mxu0 %v3197_v55  ;;  %771 = vmatpush.msra.mxu1 %v3208_v62  ;;  %v3333_v53 = vld [vmem:[%s5480_s2] sm:$0xf] }
  0x52   : > { %5767 = vst [vmem:[#allocation52_spill] sm:$0xff] %v3184_v59  ;;  %v3220_v59 = vld [vmem:[%s5481_s3 + $0xf0] sm:$0xff] }
  0x53   : > { %5768 = vst [vmem:[#allocation53_spill] sm:$0xff] %v3203_v63  ;;  %752 = vmatpush.msra.mxu0 %v3203_v63  ;;  %772 = vmatpush.msra.mxu1 %v3220_v59 }
  0x54   : > { %5769 = vst [vmem:[#allocation54_spill] sm:$0xff] %v3208_v62  ;;  %v3239_v62 = vld [vmem:[%s5481_s3 + $0x58] sm:$0xff] }
  0x55   : > { %5770 = vst [vmem:[#allocation55_spill] sm:$0xff] %v3215_v51  ;;  %753 = vmatpush.msra.mxu0 %v3215_v51  ;;  %773 = vmatpush.msra.mxu1 %v3232_v45  ;;  %v3350_v51 = vperm.slane %v3333_v53, 0 }
  0x56   : > { %5771 = vst [vmem:[#allocation56_spill] sm:$0xff] %v3220_v59  ;;  %v3244_v59 = vld [vmem:[%s5481_s3 + $0xe0] sm:$0xff] }
  0x57   : > { %5772 = vst [vmem:[#allocation57_spill] sm:$0xff] %v3227_v49  ;;  %754 = vmatpush.msra.mxu0 %v3227_v49  ;;  %774 = vmatpush.msra.mxu1 %v3244_v59  ;;  %v3251_v49 = vld [vmem:[%s5481_s3 + $0x50] sm:$0xff] }
  0x58   : > { %5773 = vst [vmem:[#allocation58_spill] sm:$0xff] %v3232_v45  ;;  %v3256_v45 = vld [vmem:[%s5481_s3 + $0xd8] sm:$0xff] }
  0x59   : > { %5774 = vst [vmem:[#allocation59_spill] sm:$0xff] %v3239_v62  ;;  %755 = vmatpush.msra.mxu0 %v3239_v62  ;;  %775 = vmatpush.msra.mxu1 %v3256_v45  ;;  %v3263_v62 = vld [vmem:[%s5481_s3 + $0x48] sm:$0xff] }
  0x5a   : > { %5775 = vst [vmem:[#allocation60_spill] sm:$0xff] %v3244_v59  ;;  %v3268_v59 = vld [vmem:[%s5481_s3 + $0xd0] sm:$0xff] }
  0x5b   : > { %5776 = vst [vmem:[#allocation61_spill] sm:$0xff] %v3251_v49  ;;  %756 = vmatpush.msra.mxu0 %v3251_v49  ;;  %776 = vmatpush.msra.mxu1 %v3268_v59  ;;  %v3275_v49 = vld [vmem:[%s5481_s3 + $0x40] sm:$0xff] }
  0x5c   : > { %5777 = vst [vmem:[#allocation62_spill] sm:$0xff] %v3256_v45  ;;  %v3280_v45 = vld [vmem:[%s5481_s3 + $0xc8] sm:$0xff] }
  0x5d   : > { %5778 = vst [vmem:[#allocation63_spill] sm:$0xff] %v3263_v62  ;;  %757 = vmatpush.msra.mxu0 %v3263_v62  ;;  %777 = vmatpush.msra.mxu1 %v3280_v45  ;;  %v3287_v62 = vld [vmem:[%s5481_s3 + $0x38] sm:$0xff] }
  0x5e   : > { %5779 = vst [vmem:[#allocation64_spill] sm:$0xff] %v3268_v59  ;;  %v3292_v59 = vld [vmem:[%s5481_s3 + $0xc0] sm:$0xff] }
  0x5f   : > { %5780 = vst [vmem:[#allocation65_spill] sm:$0xff] %v3275_v49  ;;  %758 = vmatpush.msra.mxu0 %v3275_v49  ;;  %778 = vmatpush.msra.mxu1 %v3292_v59  ;;  %v3299_v49 = vld [vmem:[%s5481_s3 + $0x30] sm:$0xff] }
  0x60   : > { %5781 = vst [vmem:[#allocation66_spill] sm:$0xff] %v3280_v45  ;;  %v3304_v45 = vld [vmem:[%s5481_s3 + $0xb8] sm:$0xff] }
  0x61   : > { %5782 = vst [vmem:[#allocation67_spill] sm:$0xff] %v3287_v62  ;;  %759 = vmatpush.msra.mxu0 %v3287_v62  ;;  %779 = vmatpush.msra.mxu1 %v3304_v45  ;;  %v3311_v62 = vld [vmem:[%s5481_s3 + $0x28] sm:$0xff] }
  0x62   : > { %5783 = vst [vmem:[#allocation68_spill] sm:$0xff] %v3292_v59  ;;  %v3316_v59 = vld [vmem:[%s5481_s3 + $0xb0] sm:$0xff] }
  0x63   : > { %5784 = vst [vmem:[#allocation69_spill] sm:$0xff] %v3299_v49  ;;  %760 = vmatpush.msra.mxu0 %v3299_v49  ;;  %780 = vmatpush.msra.mxu1 %v3316_v59  ;;  %v3323_v49 = vld [vmem:[%s5481_s3 + $0x20] sm:$0xff] }
  0x64   : > { %5785 = vst [vmem:[#allocation70_spill] sm:$0xff] %v3304_v45  ;;  %v3328_v45 = vld [vmem:[%s5481_s3 + $0xa8] sm:$0xff] }
  0x65   : > { %5786 = vst [vmem:[#allocation71_spill] sm:$0xff] %v3311_v62  ;;  %761 = vmatpush.msra.mxu0 %v3311_v62  ;;  %781 = vmatpush.msra.mxu1 %v3328_v45  ;;  %v3345_v62 = vld [vmem:[%s5481_s3 + $0xa0] sm:$0xff] }
  0x66   : > { %5787 = vst [vmem:[#allocation72_spill] sm:$0xff] %v3316_v59  ;;  %v3340_v59 = vld [vmem:[%s5481_s3 + $0x18] sm:$0xff] }
  0x67   : > { %5788 = vst [vmem:[#allocation73_spill] sm:$0xff] %v3323_v49  ;;  %762 = vmatpush.msra.mxu0 %v3323_v49  ;;  %782 = vmatpush.msra.mxu1 %v3345_v62  ;;  %v3360_v49 = vld [vmem:[%s5481_s3 + $0x98] sm:$0xff] }
  0x68   : > { %5789 = vst [vmem:[#allocation74_spill] sm:$0xff] %v3328_v45  ;;  %v3355_v45 = vld [vmem:[%s5481_s3 + $0x10] sm:$0xff] }
  0x69   : > { %5790 = vst [vmem:[#allocation75_spill] sm:$0xff] %v3340_v59  ;;  %763 = vmatpush.msra.mxu0 %v3340_v59  ;;  %783 = vmatpush.msra.mxu1 %v3360_v49  ;;  %v3372_v59 = vld [vmem:[%s5481_s3 + $0x90] sm:$0xff] }
  0x6a   : > { %5791 = vst [vmem:[#allocation76_spill] sm:$0xff] %v3345_v62  ;;  %v3367_v62 = vld [vmem:[%s5481_s3 + $0x8] sm:$0xff] }
  0x6b   : > { %5792 = vst [vmem:[#allocation77_spill] sm:$0xff] %v3350_v51  ;;  %764 = vmatpush.msra.mxu0 %v3355_v45  ;;  %784 = vmatpush.msra.mxu1 %v3372_v59 }
  0x6c   : > { %5793 = vst [vmem:[#allocation78_spill] sm:$0xff] %v3355_v45  ;;  %v3385_v45 = vld [vmem:[%s5481_s3 + $0x88] sm:$0xff] }
  0x6d   : > { %5794 = vst [vmem:[#allocation79_spill] sm:$0xff] %v3360_v49  ;;  %765 = vmatpush.msra.mxu0 %v3367_v62  ;;  %v3380_v49 = vld [vmem:[%s5481_s3] sm:$0xff]  ;;  %785 = vmatpush.msra.mxu1 %v3385_v45 }
  0x6e   : > { %5795 = vst [vmem:[#allocation80_spill] sm:$0xff] %v3367_v62  ;;  %v3402_v62 = vld [vmem:[%s5481_s3 + $0x80] sm:$0xff] }
  0x6f   : > { %5796 = vst [vmem:[#allocation81_spill] sm:$0xff] %v3372_v59  ;;  %766 = vmatpush.msra.mxu0 %v3380_v49  ;;  %v3392_v59 = vld [vmem:[%s5481_s3 + $0x178] sm:$0xff]  ;;  %786 = vmatpush.msra.mxu1 %v3402_v62 }
  0x70   : > { %5797 = vst [vmem:[#allocation82_spill] sm:$0xff] %v3380_v49  ;;  %791 = vmatpush.msra.mxu2 %v3392_v59 }
  0x71   : > { %5798 = vst [vmem:[#allocation83_spill] sm:$0xff] %v3385_v45  ;;  %833 = vmatpush.msrb.mxu0 %v2463_v0  ;;  %v3410_v45 = vld [vmem:[%s5481_s3 + $0x170] sm:$0xff]  ;;  %853 = vmatpush.msrb.mxu1 %v2480_v3  ;;  %v3445_v3 = vld [vmem:[%s5481_s3 + $0x160] sm:$0xff] }
  0x72   : > { %5799 = vst [vmem:[#allocation84_spill] sm:$0xff] %v3392_v59  ;;  %v3415_v59 = vld [vmem:[%s5481_s3 + $0x1f8] sm:$0xff]  ;;  %792 = vmatpush.msra.mxu2 %v3410_v45 }
  0x73   : > { %5801 = vst [vmem:[#allocation86_spill] sm:$0xff] %v3402_v62  ;;  %811 = vmatpush.msra.mxu3 %v3415_v59  ;;  %834 = vmatpush.msrb.mxu0 %v2473_v2  ;;  %v3432_v62 = vld [vmem:[%s5481_s3 + $0x1f0] sm:$0xff] }
  0x74   : > { %5802 = vst [vmem:[#allocation87_spill] sm:$0xff] %v3415_v59  ;;  %854 = vmatpush.msrb.mxu1 %v2502_v7 }
  0x75   : > { %5804 = vst [vmem:[#allocation89_spill] sm:$0xff] %v3432_v62  ;;  %812 = vmatpush.msra.mxu3 %v3432_v62  ;;  %835 = vmatpush.msrb.mxu0 %v2497_v6 }
  0x76   : > { %855 = vmatpush.msrb.mxu1 %v2519_v10 }
  0x77   : > { %836 = vmatpush.msrb.mxu0 %v2526_v11  ;;  %v3472_v11 = vld [vmem:[%s5481_s3 + $0x1e0] sm:$0xff] }
  0x78   : > { %856 = vmatpush.msrb.mxu1 %v2543_v14  ;;  %v3484_v14 = vld [vmem:[%s5481_s3 + $0x150] sm:$0xff] }
  0x79   : > { %837 = vmatpush.msrb.mxu0 %v2555_v16  ;;  %v3489_v16 = vld [vmem:[%s5481_s3 + $0x1d8] sm:$0xff] }
  0x7a   : > { %857 = vmatpush.msrb.mxu1 %v2567_v18 }
  0x7b   : > { %838 = vmatpush.msrb.mxu0 %v2579_v20  ;;  %v3499_v20 = vld [vmem:[%s5481_s3 + $0x148] sm:$0xff] }
  0x7c   : > { %858 = vmatpush.msrb.mxu1 %v2591_v22 }
  0x7d   : > { %839 = vmatpush.msrb.mxu0 %v2603_v24 }
  0x7e   : > { %859 = vmatpush.msrb.mxu1 %v2615_v26 }
  0x7f   : > { %840 = vmatpush.msrb.mxu0 %v2627_v28 }
  0x80   : > { %860 = vmatpush.msrb.mxu1 %v2639_v30 }
  0x81   : > { %841 = vmatpush.msrb.mxu0 %v2651_v32 }
  0x82   : > { %861 = vmatpush.msrb.mxu1 %v2663_v34  ;;  %v3549_v34 = vld [vmem:[%s5481_s3 + $0x1b8] sm:$0xff] }
  0x83   : > { %842 = vmatpush.msrb.mxu0 %v2681_v36  ;;  %5810 = vst [vmem:[#allocation95_spill] sm:$0xff] %v3549_v34 }
  0x84   : > { %862 = vmatpush.msrb.mxu1 %v2693_v38 }
  0x85   : > { %843 = vmatpush.msrb.mxu0 %v2705_v40  ;;  %v3567_v40 = vld [vmem:[%s5481_s3 + $0x1b0] sm:$0xff] }
  0x86   : > { %5814 = vst [vmem:[#allocation97_spill] sm:$0xff] %v3567_v40  ;;  %863 = vmatpush.msrb.mxu1 %v2717_v42 }
  0x87   : > { %844 = vmatpush.msrb.mxu0 %v2735_v44  ;;  %v3583_v44 = vld [vmem:[%s5481_s3 + $0x1a8] sm:$0xff] }
  0x88   : > { %864 = vmatpush.msrb.mxu1 %v2747_v46 }
  0x89   : > { %845 = vmatpush.msrb.mxu0 %v2759_v48  ;;  %v3599_v48 = vld [vmem:[%s5481_s3 + $0x118] sm:$0xff] }
  0x8a   : > { %865 = vmatpush.msrb.mxu1 %v2771_v50  ;;  %v3683_v50 = vld [vmem:[%s5481_s3 + $0x180] sm:$0xff] }
  0x8b   : > { %846 = vmatpush.msrb.mxu0 %v2784_v52  ;;  %v3623_v52 = vld [vmem:[%s5481_s3 + $0x198] sm:$0xff] }
  0x8c   : > { %5817 = vst [vmem:[#allocation100_spill] sm:$0xff] %v3623_v52  ;;  %866 = vmatpush.msrb.mxu1 %v2796_v54 }
  0x8d   : > { %847 = vmatpush.msrb.mxu0 %v2808_v56  ;;  %v3643_v56 = vld [vmem:[%s5481_s3 + $0x108] sm:$0xff] }
  0x8e   : > { %867 = vmatpush.msrb.mxu1 %v2825_v58 }
  0x8f   : > { %848 = vmatpush.msrb.mxu0 %v2837_v60  ;;  %v3664_v60 = vld [vmem:[%s5481_s3 + $0x100] sm:$0xff] }
  0x90   : > { %868 = vmatpush.msrb.mxu1 %v2864_v57 }
  0xa9   : > { %v380_v43 = vpop.f32.mrf.mxu0 }
  0xaa   : > { %v381_v63 = vadd.f32 %v380_v43, %v3350_v51  ;;  %v3395_v51 = vperm.slane %v3333_v53, 1 }
  0xac   : > { %v400_v43 = vpop.f32.mrf.mxu1  ;;  %5800 = vst [vmem:[#allocation85_spill] sm:$0xff] %v3395_v51 }
  0xad   : > { %v3404_v49 = vadd.f32 %v400_v43, %v381_v63  ;;  %v3427_v43 = vld [vmem:[%s5481_s3 + $0x168] sm:$0xff] }
  0xae   : > { %5803 = vst [vmem:[#allocation88_spill] sm:$0xff] %v3427_v43  ;;  %793 = vmatpush.msra.mxu2 %v3427_v43 }
  0xaf   : > { %v3420_v0 = vmul.f32 0.70710677, %v3404_v49  ;;  %v420_v63 = vpop.f32.mrf.mxu2 }
  0xb0   : > { %v421_v59 = vadd.f32 %v420_v63, %v3395_v51  ;;  %v3450_v63 = vld [vmem:[%s5481_s3 + $0x1e8] sm:$0xff]  ;;  %794 = vmatpush.msra.mxu2 %v3445_v3 }
  0xb1   : > { %v3438_v2 = vand.u32 2147483647, %v3420_v0  ;;  %5805 = vst [vmem:[#allocation90_spill] sm:$0xff] %v3450_v63  ;;  %813 = vmatpush.msra.mxu3 %v3450_v63  ;;  %v3467_v63 = vld [vmem:[%s5481_s3 + $0x158] sm:$0xff]  ;;  %vm663_vm8 = vcmp.lt.f32.partialorder %v3420_v0, 0.0 }
  0xb2   : > { %v440_v51 = vpop.f32.mrf.mxu3  ;;  %795 = vmatpush.msra.mxu2 %v3467_v63 }
  0xb3   : > { %v535_v62 = vmul.f32 0.3275911, %v3438_v2  ;;  %v3455_v6 = vadd.f32 %v440_v51, %v421_v59  ;;  %814 = vmatpush.msra.mxu3 %v3472_v11  ;;  %v3504_v59 = vld [vmem:[%s5481_s3 + $0x1d0] sm:$0xff]  ;;  %v3520_v51 = vld [vmem:[%s5481_s3 + $0x1c8] sm:$0xff] }
  0xb4   : > { %796 = vmatpush.msra.mxu2 %v3484_v14  ;;  %5806 = vst [vmem:[#allocation91_spill] sm:$0xff] %v3504_v59 }
  0xb5   : > { %v539_v7 = vadd.f32 1.0, %v535_v62  ;;  %v3460_v43 = vmul.f32 0.70710677, %v3455_v6  ;;  %815 = vmatpush.msra.mxu3 %v3489_v16  ;;  %v3515_v62 = vld [vmem:[%s5481_s3 + $0x140] sm:$0xff]  ;;  %5807 = vst [vmem:[#allocation92_spill] sm:$0xff] %v3520_v51 }
  0xb6   : > { %797 = vmatpush.msra.mxu2 %v3499_v20 }
  0xb7   : > { %2132 = vrcp.f32 %v539_v7  ;;  %v3477_v10 = vand.u32 2147483647, %v3460_v43  ;;  %816 = vmatpush.msra.mxu3 %v3504_v59  ;;  %v554_v28 = vand.u32 2147483648, %v539_v7  ;;  %vm548_vm0 = vweird.f32 %v539_v7  ;;  %v3544_v59 = vld [vmem:[%s5481_s3 + $0x130] sm:$0xff] }
  0xb8   : > { %798 = vmatpush.msra.mxu2 %v3515_v62  ;;  %v552_v30 = vand.u32 2147483647, %v539_v7  ;;  %5809 = vst [vmem:[#allocation94_spill] sm:$0xff] %v3544_v59  ;;  %vm664_vm11 = vcmp.lt.f32.partialorder %v3460_v43, 0.0 }
  0xb9   : > { %v536_v18 = vmul.f32 0.3275911, %v3477_v10  ;;  %817 = vmatpush.msra.mxu3 %v3520_v51  ;;  %v3538_v51 = vld [vmem:[%s5481_s3 + $0x1c0] sm:$0xff] }
  0xba   : > { %5808 = vst [vmem:[#allocation93_spill] sm:$0xff] %v3538_v51  ;;  %vm553_vm3 = vcmp.eq.f32.partialorder %v552_v30, 8.507059e+37 }
  0xbb   : > { %v3508_v22 = vadd.f32 1.0, %v536_v18  ;;  %v3530_v18 = vld [vmem:[%s5481_s3 + $0x138] sm:$0xff]  ;;  %818 = vmatpush.msra.mxu3 %v3538_v51  ;;  %v3562_v51 = vld [vmem:[%s5481_s3 + $0x128] sm:$0xff] }
  0xbc   : > { %799 = vmatpush.msra.mxu2 %v3530_v18  ;;  %5813 = vst [vmem:[#allocation96_spill] sm:$0xff] %v3562_v51 }
  0xbd   : > { %v2133_v24 = vpop.eup %2132  ;;  %2134 = vrcp.f32 %v3508_v22  ;;  %819 = vmatpush.msra.mxu3 %v3549_v34  ;;  %vm563_vm4 = vweird.f32 %v3508_v22  ;;  %v569_v30 = vand.u32 2147483648, %v3508_v22 }
  0xbe   : > { %v544_v26 = vmul.f32 %v2133_v24, %v539_v7  ;;  %vm549_vm1 = vweird.f32 %v2133_v24  ;;  %800 = vmatpush.msra.mxu2 %v3544_v59  ;;  %v3578_v59 = vld [vmem:[%s5481_s3 + $0x120] sm:$0xff] }
  0xbf   : > { %vm3554_vm2 = vmor %vm548_vm0, %vm549_vm1  ;;  %820 = vmatpush.msra.mxu3 %v3567_v40 }
  0xc0   : > { %v545_v32 = vsub.f32 1.0, %v544_v26  ;;  %v555_v26 = vor.u32 1.1754944e-38, %v554_v28  ;;  %801 = vmatpush.msra.mxu2 %v3562_v51  ;;  %v639_v28 = vsub.f32 0.0, %v3438_v2  ;;  %v567_v51 = vand.u32 2147483647, %v3508_v22 }
  0xc1   : > { %821 = vmatpush.msra.mxu3 %v3583_v44 }
  0xc2   : > { %v546_v36 = vmul.f32 %v2133_v24, %v545_v32  ;;  %802 = vmatpush.msra.mxu2 %v3578_v59  ;;  %v643_v7 = vmul.f32 %v639_v28, %v3438_v2  ;;  %v570_v2 = vor.u32 1.1754944e-38, %v569_v30  ;;  %vm3635_vm7 = vcmp.eq.f32.partialorder %v567_v51, 8.507059e+37 }
  0xc3   : > { %v2135_v38 = vpop.eup %2134 }
  0xc4   : > { %v547_v32 = vadd.f32 %v2133_v24, %v546_v36  ;;  %v559_v34 = vmul.f32 %v2135_v38, %v3508_v22  ;;  %vm564_vm5 = vweird.f32 %v2135_v38  ;;  %803 = vmatpush.msra.mxu2 %v3599_v48  ;;  %v3648_v22 = vld [vmem:[%s5481_s3 + $0x190] sm:$0xff]  ;;  %v647_v30 = vmul.f32 1.442695, %v643_v7 }
  0xc5   : > { %vm3629_vm6 = vmor %vm563_vm4, %vm564_vm5  ;;  %v640_v7 = vsub.f32 0.0, %v3477_v10 }
  0xc6   : > { %v551_v42 = vsel %vm3554_vm2, %v2133_v24, %v547_v32  ;;  %v560_v40 = vsub.f32 1.0, %v559_v34  ;;  %v3604_v24 = vld [vmem:[%s5481_s3 + $0x1a0] sm:$0xff]  ;;  %v3609_v34 = vperm.slane %v3333_v53, 2  ;;  %v3618_v32 = vld [vmem:[%s5481_s3 + $0x110] sm:$0xff]  ;;  %2136 = vpow2.f32 %v647_v30 }
  0xc7   : > { %v3592_v36 = vsel %vm553_vm3, %v555_v26, %v551_v42  ;;  %5815 = vst [vmem:[#allocation98_spill] sm:$0xff] %v3604_v24  ;;  %822 = vmatpush.msra.mxu3 %v3604_v24  ;;  %804 = vmatpush.msra.mxu2 %v3618_v32 }
  0xc8   : > { %v603_v46 = vmul.f32 1.0614054, %v3592_v36  ;;  %5816 = vst [vmem:[#allocation99_spill] sm:$0xff] %v3609_v34  ;;  %v561_v26 = vmul.f32 %v2135_v38, %v560_v40 }
  0xc9   : > { %823 = vmatpush.msra.mxu3 %v3623_v52  ;;  %805 = vmatpush.msra.mxu2 %v3643_v56  ;;  %v3658_v52 = vperm.slane %v3333_v53, 3 }
  0xca   : > { %v607_v42 = vadd.f32 -1.4531521, %v603_v46  ;;  %v562_v40 = vadd.f32 %v2135_v38, %v561_v26 }
  0xcb   : > { %v460_v24 = vpop.f32.mrf.mxu0  ;;  %5822 = vst [vmem:[#allocation101_spill] sm:$0xff] %v3658_v52  ;;  %824 = vmatpush.msra.mxu3 %v3648_v22  ;;  %806 = vmatpush.msra.mxu2 %v3664_v60 }
  0xcc   : > { %v611_v54 = vmul.f32 %v607_v42, %v3592_v36  ;;  %v461_v51 = vadd.f32 %v460_v24, %v3609_v34  ;;  %v566_v46 = vsel %vm3629_vm6, %v2135_v38, %v562_v40  ;;  %v3669_v24 = vld [vmem:[%s5481_s3 + $0x188] sm:$0xff] }
  0xcd   : > { %v480_v26 = vpop.f32.mrf.mxu1  ;;  %v571_v38 = vsel %vm3635_vm7, %v570_v2, %v566_v46  ;;  %825 = vmatpush.msra.mxu3 %v3669_v24  ;;  %873 = vmatpush.msrb.mxu2 %v2468_v1  ;;  %v644_v1 = vmul.f32 %v640_v7, %v3477_v10 }
  0xce   : > { %v615_v58 = vadd.f32 1.4214138, %v611_v54  ;;  %v3674_v53 = vadd.f32 %v480_v26, %v461_v51  ;;  %v604_v42 = vmul.f32 1.0614054, %v571_v38 }
  0xcf   : > { %826 = vmatpush.msra.mxu3 %v3683_v50  ;;  %874 = vmatpush.msrb.mxu2 %v2485_v4  ;;  %v649_v7 = vmul.f32 1.442695, %v644_v1 }
  0xd0   : > { %v619_v2 = vmul.f32 %v615_v58, %v3592_v36  ;;  %v3687_v40 = vmul.f32 0.70710677, %v3674_v53  ;;  %v608_v28 = vadd.f32 -1.4531521, %v604_v42 }
  0xd1   : > { %v500_v54 = vpop.f32.mrf.mxu2  ;;  %893 = vmatpush.msrb.mxu3 %v2490_v5  ;;  %875 = vmatpush.msrb.mxu2 %v2507_v8  ;;  %v2137_v5 = vpop.eup %2136 }
  0xd2   : > { %v623_v57 = vadd.f32 -0.28449672, %v619_v2  ;;  %v3693_v51 = vand.u32 2147483647, %v3687_v40  ;;  %v501_v46 = vadd.f32 %v500_v54, %v3658_v52  ;;  %v612_v26 = vmul.f32 %v608_v28, %v571_v38 }
  0xd3   : > { %v520_v58 = vpop.f32.mrf.mxu3  ;;  %894 = vmatpush.msrb.mxu3 %v2514_v9  ;;  %876 = vmatpush.msrb.mxu2 %v2531_v12  ;;  %vm665_vm2 = vcmp.lt.f32.partialorder %v3687_v40, 0.0  ;;  %v5860_v40 = vld [vmem:[#allocation41_spill] sm:$0xff] }
  0xd4   : > { %v627_v30 = vmul.f32 %v623_v57, %v3592_v36  ;;  %v537_v42 = vmul.f32 0.3275911, %v3693_v51  ;;  %v3700_v34 = vadd.f32 %v520_v58, %v501_v46  ;;  %v616_v4 = vadd.f32 1.4214138, %v612_v26 }
  0xd5   : > { %895 = vmatpush.msrb.mxu3 %v2536_v13  ;;  %877 = vmatpush.msrb.mxu2 %v2560_v17  ;;  %v641_v43 = vsub.f32 0.0, %v3693_v51 }
  0xd6   : > { %v631_v10 = vadd.f32 0.2548296, %v627_v30  ;;  %v541_v2 = vadd.f32 1.0, %v537_v42  ;;  %v620_v28 = vmul.f32 %v616_v4, %v571_v38  ;;  %v3706_v8 = vmul.f32 0.70710677, %v3700_v34 }
  0xd7   : > { %896 = vmatpush.msrb.mxu3 %v2548_v15  ;;  %878 = vmatpush.msrb.mxu2 %v2584_v21 }
  0xd8   : > { %v635_v54 = vmul.f32 %v631_v10, %v3592_v36  ;;  %2138 = vrcp.f32 %v541_v2  ;;  %v624_v9 = vadd.f32 -0.28449672, %v620_v28  ;;  %v3713_v57 = vand.u32 2147483647, %v3706_v8 }
  0xd9   : > { %2140 = vpow2.f32 %v649_v7  ;;  %897 = vmatpush.msrb.mxu3 %v2572_v19  ;;  %879 = vmatpush.msrb.mxu2 %v2608_v25  ;;  %v584_v4 = vand.u32 2147483648, %v541_v2  ;;  %vm578_vm10 = vweird.f32 %v541_v2  ;;  %vm666_vm3 = vcmp.lt.f32.partialorder %v3706_v8, 0.0  ;;  %v3816_v8 = vld [vmem:[%s5479_s1 + $0x1b8] sm:$0xff] }
  0xda   : > { %v655_v12 = vmul.f32 %v2137_v5, %v635_v54  ;;  %v628_v13 = vmul.f32 %v624_v9, %v571_v38  ;;  %v538_v17 = vmul.f32 0.3275911, %v3713_v57  ;;  %v5825_v5 = vld [vmem:[#allocation2_spill] sm:$0xff] }
  0xdb   : > { %898 = vmatpush.msrb.mxu3 %v2596_v23  ;;  %880 = vmatpush.msrb.mxu2 %v2632_v29  ;;  %v523_v23 = vmul.f32 0.5, %v3404_v49  ;;  %v5823_v49 = vld [vmem:[#allocation3_spill] sm:$0xff] }
  0xdc   : > { %v659_v1 = vsub.f32 1.0, %v655_v12  ;;  %v632_v36 = vadd.f32 0.2548296, %v628_v13  ;;  %v3720_v46 = vadd.f32 1.0, %v538_v17  ;;  %v5827_v13 = vld [vmem:[#allocation14_spill] sm:$0xff] }
  0xdd   : > { %899 = vmatpush.msrb.mxu3 %v2620_v27  ;;  %881 = vmatpush.msrb.mxu2 %v2656_v33  ;;  %v582_v27 = vand.u32 2147483647, %v541_v2 }
  0xde   : > { %v2139_v15 = vpop.eup %2138  ;;  %v667_v21 = vsub.f32 0.0, %v659_v1  ;;  %v636_v19 = vmul.f32 %v632_v36, %v571_v38  ;;  %2142 = vrcp.f32 %v3720_v46  ;;  %vm593_vm15 = vweird.f32 %v3720_v46 }
  0xdf   : > { %v574_v26 = vmul.f32 %v2139_v15, %v541_v2  ;;  %v2141_v25 = vpop.eup %2140  ;;  %900 = vmatpush.msrb.mxu3 %v2644_v31  ;;  %882 = vmatpush.msrb.mxu2 %v2686_v37  ;;  %vm579_vm9 = vweird.f32 %v2139_v15  ;;  %v585_v37 = vor.u32 1.1754944e-38, %v584_v4  ;;  %vm583_vm13 = vcmp.eq.f32.partialorder %v582_v27, 8.507059e+37  ;;  %v5833_v27 = vld [vmem:[#allocation18_spill] sm:$0xff] }
  0xe0   : > { %v671_v58 = vsel %vm663_vm8, %v667_v21, %v659_v1  ;;  %v656_v30 = vmul.f32 %v2141_v25, %v636_v19  ;;  %vm580_vm12 = vmor %vm578_vm10, %vm579_vm9  ;;  %v524_v2 = vmul.f32 0.5, %v3455_v6  ;;  %v5828_v1 = vld [vmem:[#allocation4_spill] sm:$0xff]  ;;  %v5829_v21 = vld [vmem:[#allocation7_spill] sm:$0xff]  ;;  %v599_v19 = vand.u32 2147483648, %v3720_v46 }
  0xe1   : > { %v675_v29 = vadd.f32 1.0, %v671_v58  ;;  %v575_v42 = vsub.f32 1.0, %v574_v26  ;;  %901 = vmatpush.msrb.mxu3 %v2668_v35  ;;  %883 = vmatpush.msrb.mxu2 %v2710_v41  ;;  %v5824_v35 = vld [vmem:[#allocation12_spill] sm:$0xff]  ;;  %v5826_v41 = vld [vmem:[#allocation5_spill] sm:$0xff]  ;;  %v5831_v6 = vld [vmem:[#allocation6_spill] sm:$0xff] }
  0xe2   : > { %v660_v38 = vsub.f32 1.0, %v656_v30  ;;  %v5830_v26 = vld [vmem:[#allocation16_spill] sm:$0xff]  ;;  %v5832_v30 = vld [vmem:[#allocation9_spill] sm:$0xff] }
  0xe3   : > { %v679_v0 = vmul.f32 %v675_v29, %v523_v23  ;;  %v576_v33 = vmul.f32 %v2139_v15, %v575_v42  ;;  %902 = vmatpush.msrb.mxu3 %v2698_v39  ;;  %884 = vmatpush.msrb.mxu2 %v5823_v49  ;;  %v3746_v25 = vld [vmem:[%s2818_s25 + $0x10] sm:$0xff]  ;;  %v597_v29 = vand.u32 2147483647, %v3720_v46  ;;  %v645_v42 = vmul.f32 %v641_v43, %v3693_v51  ;;  %v3765_v43 = vld [vmem:[%s2818_s25 + $0x18] sm:$0xff] }
  0xe4   : > { %v668_v31 = vsub.f32 0.0, %v660_v38  ;;  %v2143_v7 = vpop.eup %2142 }
  0xe5   : > { %v577_v10 = vadd.f32 %v2139_v15, %v576_v33  ;;  %767 = vmatmul.f32.vlgmr.msra.gmra.mxu0 %v679_v0  ;;  %903 = vmatpush.msrb.mxu3 %v5825_v5  ;;  %v589_v39 = vmul.f32 %v2143_v7, %v3720_v46  ;;  %vm594_vm14 = vweird.f32 %v2143_v7  ;;  %v600_v33 = vor.u32 1.1754944e-38, %v599_v19 }
  0xe6   : > { %913 = vmatpush.msra.mxu0 %v5824_v35  ;;  %v672_v28 = vsel %vm664_vm11, %v668_v31, %v660_v38  ;;  %885 = vmatpush.msrb.mxu2 %v5826_v41  ;;  %v5834_v38 = vld [vmem:[#allocation15_spill] sm:$0xff]  ;;  %vm595_vm0 = vmor %vm593_vm15, %vm594_vm14  ;;  %v5835_v31 = vld [vmem:[#allocation20_spill] sm:$0xff]  ;;  %vm598_vm1 = vcmp.eq.f32.partialorder %v597_v29, 8.507059e+37  ;;  %v651_v5 = vmul.f32 1.442695, %v645_v42 }
  0xe7   : > { %v581_v54 = vsel %vm580_vm12, %v2139_v15, %v577_v10  ;;  %v676_v9 = vadd.f32 1.0, %v672_v28  ;;  %904 = vmatpush.msrb.mxu3 %v5828_v1  ;;  %v590_v36 = vsub.f32 1.0, %v589_v39  ;;  %v5836_v10 = vld [vmem:[#allocation8_spill] sm:$0xff]  ;;  %v5838_v35 = vld [vmem:[#allocation11_spill] sm:$0xff]  ;;  %v642_v28 = vsub.f32 0.0, %v3713_v57  ;;  %v5840_v39 = vld [vmem:[#allocation10_spill] sm:$0xff] }
  0xe8   : > { %v586_v12 = vsel %vm583_vm13, %v585_v37, %v581_v54  ;;  %914 = vmatpush.msra.mxu0 %v5827_v13  ;;  %886 = vmatpush.msrb.mxu2 %v5829_v21  ;;  %v5837_v37 = vld [vmem:[#allocation17_spill] sm:$0xff]  ;;  %v5839_v54 = vld [vmem:[#allocation22_spill] sm:$0xff]  ;;  %2144 = vpow2.f32 %v651_v5  ;;  %v5854_v5 = vld [vmem:[#allocation31_spill] sm:$0xff] }
  0xe9   : > { %v605_v17 = vmul.f32 1.0614054, %v586_v12  ;;  %v680_v15 = vmul.f32 %v676_v9, %v524_v2  ;;  %905 = vmatpush.msrb.mxu3 %v5831_v6  ;;  %v591_v23 = vmul.f32 %v2143_v7, %v590_v36  ;;  %v5841_v9 = vld [vmem:[#allocation19_spill] sm:$0xff]  ;;  %v5843_v13 = vld [vmem:[#allocation13_spill] sm:$0xff]  ;;  %v646_v21 = vmul.f32 %v642_v28, %v3713_v57  ;;  %v5855_v28 = vld [vmem:[#allocation38_spill] sm:$0xff] }
  0xea   : > { %915 = vmatpush.msra.mxu0 %v5830_v26  ;;  %887 = vmatpush.msrb.mxu2 %v5832_v30  ;;  %v5844_v36 = vld [vmem:[#allocation21_spill] sm:$0xff]  ;;  %v5846_v6 = vld [vmem:[#allocation23_spill] sm:$0xff] }
  0xeb   : > { %v609_v58 = vadd.f32 -1.4531521, %v605_v17  ;;  %787 = vmatmul.f32.vlgmr.msra.gmra.mxu1 %v680_v15  ;;  %v592_v0 = vadd.f32 %v2143_v7, %v591_v23  ;;  %906 = vmatpush.msrb.mxu3 %v5836_v10  ;;  %v5845_v15 = vld [vmem:[#allocation26_spill] sm:$0xff]  ;;  %v5848_v30 = vld [vmem:[#allocation25_spill] sm:$0xff]  ;;  %v653_v42 = vmul.f32 1.442695, %v646_v21 }
  0xec   : > { %916 = vmatpush.msra.mxu0 %v5833_v27  ;;  %933 = vmatpush.msra.mxu1 %v5834_v38  ;;  %v5849_v27 = vld [vmem:[#allocation30_spill] sm:$0xff]  ;;  %v5850_v57 = vld [vmem:[#allocation27_spill] sm:$0xff] }
  0xed   : > { %v613_v4 = vmul.f32 %v609_v58, %v586_v12  ;;  %849 = vmatmul.f32.vlgmr.msrb.gmra.mxu0 %v3746_v25  ;;  %v596_v51 = vsel %vm595_vm0, %v2143_v7, %v592_v0  ;;  %888 = vmatpush.msrb.mxu2 %v5838_v35  ;;  %v5842_v7 = vld [vmem:[#allocation24_spill] sm:$0xff]  ;;  %2146 = vpow2.f32 %v653_v42  ;;  %v5859_v21 = vld [vmem:[#allocation39_spill] sm:$0xff] }
  0xee   : > { %917 = vmatpush.msra.mxu0 %v5835_v31  ;;  %934 = vmatpush.msra.mxu1 %v5837_v37  ;;  %v601_v46 = vsel %vm598_vm1, %v600_v33, %v596_v51  ;;  %v5847_v58 = vld [vmem:[#allocation28_spill] sm:$0xff]  ;;  %v2145_v38 = vpop.eup %2144  ;;  %v5853_v51 = vld [vmem:[#allocation35_spill] sm:$0xff] }
  0xef   : > { %v617_v49 = vadd.f32 1.4214138, %v613_v4  ;;  %907 = vmatpush.msrb.mxu3 %v5840_v39  ;;  %v606_v2 = vmul.f32 1.0614054, %v601_v46  ;;  %v5851_v33 = vld [vmem:[#allocation32_spill] sm:$0xff]  ;;  %v5856_v39 = vld [vmem:[#allocation33_spill] sm:$0xff] }
  0xf0   : > { %918 = vmatpush.msra.mxu0 %v5839_v54  ;;  %935 = vmatpush.msra.mxu1 %v5841_v9  ;;  %v5857_v9 = vld [vmem:[#allocation36_spill] sm:$0xff] }
  0xf1   : > { %v621_v41 = vmul.f32 %v617_v49, %v586_v12  ;;  %908 = vmatpush.msrb.mxu3 %v5843_v13  ;;  %v610_v17 = vadd.f32 -1.4531521, %v606_v2  ;;  %v5852_v49 = vld [vmem:[#allocation29_spill] sm:$0xff]  ;;  %v525_v13 = vmul.f32 0.5, %v3674_v53 }
  0xf2   : > { %919 = vmatpush.msra.mxu0 %v5842_v7  ;;  %936 = vmatpush.msra.mxu1 %v5844_v36  ;;  %v3798_v53 = vld [vmem:[%s5479_s1 + $0x1f8] sm:$0xff] }
  0xf3   : > { %v625_v1 = vadd.f32 -0.28449672, %v621_v41  ;;  %869 = vmatmul.f32.vlgmr.msrb.gmra.mxu1 %v3765_v43  ;;  %v614_v26 = vmul.f32 %v610_v17, %v601_v46  ;;  %v2147_v7 = vpop.eup %2146  ;;  %v5858_v17 = vld [vmem:[#allocation44_spill] sm:$0xff] }
  0xf4   : > { %920 = vmatpush.msra.mxu0 %v5845_v15  ;;  %937 = vmatpush.msra.mxu1 %v5846_v6  ;;  %v5863_v6 = vld [vmem:[#allocation48_spill] sm:$0xff] }
  0xf5   : > { %v629_v19 = vmul.f32 %v625_v1, %v586_v12  ;;  %v618_v29 = vadd.f32 1.4214138, %v614_v26 }
  0xf6   : > { %921 = vmatpush.msra.mxu0 %v5847_v58  ;;  %938 = vmatpush.msra.mxu1 %v5848_v30  ;;  %v526_v58 = vmul.f32 0.5, %v3700_v34  ;;  %v5865_v30 = vld [vmem:[#allocation51_spill] sm:$0xff]  ;;  %v3824_v34 = vld [vmem:[%s5479_s1 + $0x198] sm:$0xff] }
  0xf7   : > { %v633_v23 = vadd.f32 0.2548296, %v629_v19  ;;  %v622_v0 = vmul.f32 %v618_v29, %v601_v46  ;;  %v5864_v29 = vld [vmem:[#allocation55_spill] sm:$0xff] }
  0xf8   : > { %922 = vmatpush.msra.mxu0 %v5849_v27  ;;  %939 = vmatpush.msra.mxu1 %v5850_v57  ;;  %v5866_v27 = vld [vmem:[#allocation57_spill] sm:$0xff] }
  0xf9   : > { %v637_v4 = vmul.f32 %v633_v23, %v586_v12  ;;  %v626_v10 = vadd.f32 -0.28449672, %v622_v0  ;;  %v3832_v0 = vld [vmem:[%s5479_s1 + $0x3f8] sm:$0xff] }
  0xfa   : > { %923 = vmatpush.msra.mxu0 %v5851_v33  ;;  %940 = vmatpush.msra.mxu1 %v5852_v49  ;;  %v3838_v57 = vld [vmem:[%s5479_s1 + $0x178] sm:$0xff]  ;;  %v5869_v33 = vld [vmem:[#allocation56_spill] sm:$0xff] }
  0xfb   : > { %v657_v31 = vmul.f32 %v2145_v38, %v637_v4  ;;  %v630_v35 = vmul.f32 %v626_v10, %v601_v46  ;;  %v5867_v4 = vld [vmem:[#allocation54_spill] sm:$0xff]  ;;  %v5868_v38 = vld [vmem:[#allocation59_spill] sm:$0xff]  ;;  %v3852_v10 = vld [vmem:[%s5479_s1 + $0x158] sm:$0xff] }
  0xfc   : > { %924 = vmatpush.msra.mxu0 %v5853_v51  ;;  %941 = vmatpush.msra.mxu1 %v5854_v5  ;;  %v5870_v49 = vld [vmem:[#allocation61_spill] sm:$0xff]  ;;  %v5871_v51 = vld [vmem:[#allocation58_spill] sm:$0xff]  ;;  %v5872_v5 = vld [vmem:[#allocation63_spill] sm:$0xff] }
  0xfd   : > { %v661_v37 = vsub.f32 1.0, %v657_v31  ;;  %v634_v54 = vadd.f32 0.2548296, %v630_v35  ;;  %v3846_v31 = vld [vmem:[%s5479_s1 + $0x3d8] sm:$0xff] }
  0xfe   : > { %925 = vmatpush.msra.mxu0 %v5855_v28  ;;  %942 = vmatpush.msra.mxu1 %v5856_v39  ;;  %v3866_v35 = vld [vmem:[%s5479_s1 + $0x138] sm:$0xff]  ;;  %v5873_v28 = vld [vmem:[#allocation60_spill] sm:$0xff] }
  0xff   : > { %v669_v12 = vsub.f32 0.0, %v661_v37  ;;  %v638_v2 = vmul.f32 %v634_v54, %v601_v46  ;;  %v5861_v46 = vld [vmem:[#allocation45_spill] sm:$0xff] }
 0x100   : > { %926 = vmatpush.msra.mxu0 %v3106_v47  ;;  %943 = vmatpush.msra.mxu1 %v5857_v9  ;;  %v3880_v54 = vld [vmem:[%s5479_s1 + $0x118] sm:$0xff]  ;;  %v5875_v9 = vld [vmem:[#allocation62_spill] sm:$0xff] }
 0x101   : > { %v673_v41 = vsel %vm665_vm2, %v669_v12, %v661_v37  ;;  %v658_v36 = vmul.f32 %v2147_v7, %v638_v2  ;;  %v3860_v37 = vld [vmem:[%s5479_s1 + $0x3b8] sm:$0xff]  ;;  %v5876_v7 = vld [vmem:[#allocation67_spill] sm:$0xff] }
 0x102   : > { %v677_v1 = vadd.f32 1.0, %v673_v41  ;;  %927 = vmatpush.msra.mxu0 %v5858_v17  ;;  %944 = vmatpush.msra.mxu1 %v5859_v21  ;;  %v3874_v12 = vld [vmem:[%s5479_s1 + $0x398] sm:$0xff]  ;;  %v5877_v17 = vld [vmem:[#allocation64_spill] sm:$0xff] }
 0x103   : > { %v662_v19 = vsub.f32 1.0, %v658_v36  ;;  %v5874_v39 = vld [vmem:[#allocation65_spill] sm:$0xff] }
 0x104   : > { %v681_v15 = vmul.f32 %v677_v1, %v525_v13  ;;  %928 = vmatpush.msra.mxu0 %v3153_v61  ;;  %945 = vmatpush.msra.mxu1 %v5860_v40  ;;  %v5862_v61 = vld [vmem:[#allocation53_spill] sm:$0xff]  ;;  %v5881_v40 = vld [vmem:[#allocation71_spill] sm:$0xff] }
 0x105   : > { %929 = vmatmul.f32.vlgmr.msra.gmra.mxu0 %v3746_v25  ;;  %v670_v47 = vsub.f32 0.0, %v662_v19  ;;  %v3888_v41 = vld [vmem:[%s5479_s1 + $0x378] sm:$0xff] }
 0x106   : > { %807 = vmatmul.f32.vlgmr.msra.gmra.mxu2 %v681_v15  ;;  %1153 = vmatpush.msrb.mxu0 %v3197_v55  ;;  %v3807_v55 = vld [vmem:[%s5479_s1 + $0x1d8] sm:$0xff]  ;;  %v5879_v15 = vld [vmem:[#allocation34_spill] sm:$0xff] }
 0x107   : > { %946 = vmatpush.msra.mxu1 %v5861_v46  ;;  %953 = vmatpush.msra.mxu2 %v3798_v53  ;;  %v674_v26 = vsel %vm666_vm3, %v670_v47, %v662_v19  ;;  %v3894_v2 = vld [vmem:[%s5479_s1 + $0xf8] sm:$0xff]  ;;  %v5880_v19 = vld [vmem:[#allocation66_spill] sm:$0xff] }
 0x108   : > { %1154 = vmatpush.msrb.mxu0 %v5862_v61  ;;  %v678_v23 = vadd.f32 1.0, %v674_v26  ;;  %v3902_v13 = vld [vmem:[%s5479_s1 + $0x358] sm:$0xff]  ;;  %v5883_v61 = vld [vmem:[#allocation68_spill] sm:$0xff] }
 0x109   : > { %947 = vmatpush.msra.mxu1 %v5863_v6  ;;  %954 = vmatpush.msra.mxu2 %v3807_v55  ;;  %v3908_v1 = vld [vmem:[%s5479_s1 + $0xd8] sm:$0xff] }
 0x10a   : > { %1155 = vmatpush.msrb.mxu0 %v5864_v29  ;;  %v682_v42 = vmul.f32 %v678_v23, %v526_v58  ;;  %v5878_v36 = vld [vmem:[#allocation69_spill] sm:$0xff]  ;;  %v5885_v58 = vld [vmem:[#allocation40_spill] sm:$0xff]  ;;  %v5886_v23 = vld [vmem:[#allocation70_spill] sm:$0xff] }
 0x10b   : > { %948 = vmatpush.msra.mxu1 %v5865_v30  ;;  %955 = vmatpush.msra.mxu2 %v3816_v8  ;;  %v3916_v21 = vld [vmem:[%s5479_s1 + $0x338] sm:$0xff]  ;;  %v5887_v29 = vld [vmem:[#allocation75_spill] sm:$0xff] }
 0x10c   : > { %949 = vmatmul.f32.vlgmr.msra.gmra.mxu1 %v3765_v43  ;;  %1156 = vmatpush.msrb.mxu0 %v5866_v27  ;;  %v3925_v47 = vld [vmem:[%s5479_s1 + $0x318] sm:$0xff]  ;;  %v5889_v27 = vld [vmem:[#allocation72_spill] sm:$0xff] }
 0x10d   : > { %956 = vmatpush.msra.mxu2 %v3824_v34  ;;  %1173 = vmatpush.msrb.mxu1 %v5867_v4  ;;  %v5882_v46 = vld [vmem:[#allocation37_spill] sm:$0xff]  ;;  %v5890_v4 = vld [vmem:[#allocation78_spill] sm:$0xff] }
 0x10e   : > { %827 = vmatmul.f32.vlgmr.msra.gmra.mxu3 %v682_v42  ;;  %889 = vmatmul.f32.vlgmr.msrb.gmra.mxu2 %v3746_v25  ;;  %v5884_v26 = vld [vmem:[#allocation73_spill] sm:$0xff]  ;;  %v5888_v42 = vld [vmem:[#allocation42_spill] sm:$0xff] }
 0x10f   : > { %973 = vmatpush.msra.mxu3 %v3832_v0  ;;  %957 = vmatpush.msra.mxu2 %v3838_v57  ;;  %v3934_v6 = vld [vmem:[%s5479_s1 + $0x2f8] sm:$0xff] }
 0x110   : > { %1157 = vmatpush.msrb.mxu0 %v5868_v38  ;;  %1174 = vmatpush.msrb.mxu1 %v5869_v33  ;;  %v3943_v30 = vld [vmem:[%s5479_s1 + $0x2d8] sm:$0xff]  ;;  %v5891_v33 = vld [vmem:[#allocation46_spill] sm:$0xff] }
 0x111   : > { %974 = vmatpush.msra.mxu3 %v3846_v31  ;;  %958 = vmatpush.msra.mxu2 %v3852_v10  ;;  %v3952_v38 = vld [vmem:[%s5479_s1 + $0x2b8] sm:$0xff] }
 0x112   : > { %1158 = vmatpush.msrb.mxu0 %v5870_v49  ;;  %1175 = vmatpush.msrb.mxu1 %v5871_v51  ;;  %v5892_v49 = vld [vmem:[#allocation74_spill] sm:$0xff]  ;;  %v5893_v51 = vld [vmem:[#allocation80_spill] sm:$0xff] }
 0x113   : > { %975 = vmatpush.msra.mxu3 %v3860_v37  ;;  %959 = vmatpush.msra.mxu2 %v3866_v35 }
 0x114   : > { %1159 = vmatpush.msrb.mxu0 %v5872_v5  ;;  %1176 = vmatpush.msrb.mxu1 %v5873_v28  ;;  %v3961_v5 = vld [vmem:[%s5479_s1 + $0x298] sm:$0xff] }
 0x115   : > { %976 = vmatpush.msra.mxu3 %v3874_v12  ;;  %960 = vmatpush.msra.mxu2 %v3880_v54  ;;  %v5894_v28 = vld [vmem:[#allocation49_spill] sm:$0xff] }
 0x116   : > { %909 = vmatmul.f32.vlgmr.msrb.gmra.mxu3 %v3765_v43  ;;  %1160 = vmatpush.msrb.mxu0 %v5874_v39  ;;  %v5895_v39 = vld [vmem:[#allocation76_spill] sm:$0xff] }
 0x117   : > { %977 = vmatpush.msra.mxu3 %v3888_v41  ;;  %961 = vmatpush.msra.mxu2 %v3894_v2 }
 0x118   : > { %1177 = vmatpush.msrb.mxu1 %v5875_v9  ;;  %1161 = vmatpush.msrb.mxu0 %v5876_v7  ;;  %v5896_v9 = vld [vmem:[#allocation43_spill] sm:$0xff]  ;;  %v5897_v7 = vld [vmem:[#allocation84_spill] sm:$0xff] }
 0x119   : > { %978 = vmatpush.msra.mxu3 %v3902_v13  ;;  %962 = vmatpush.msra.mxu2 %v3908_v1 }
 0x11a   : > { %1178 = vmatpush.msrb.mxu1 %v5877_v17  ;;  %1162 = vmatpush.msrb.mxu0 %v5878_v36  ;;  %v5898_v17 = vld [vmem:[#allocation82_spill] sm:$0xff]  ;;  %v5899_v36 = vld [vmem:[#allocation79_spill] sm:$0xff] }
 0x11b   : > { %979 = vmatpush.msra.mxu3 %v3916_v21  ;;  %963 = vmatpush.msra.mxu2 %v5879_v15  ;;  %v5900_v15 = vld [vmem:[#allocation47_spill] sm:$0xff] }
 0x11c   : > { %1179 = vmatpush.msrb.mxu1 %v5880_v19  ;;  %1163 = vmatpush.msrb.mxu0 %v5881_v40  ;;  %v5901_v19 = vld [vmem:[#allocation81_spill] sm:$0xff]  ;;  %v5902_v40 = vld [vmem:[#allocation50_spill] sm:$0xff] }
 0x11d   : > { %980 = vmatpush.msra.mxu3 %v3925_v47  ;;  %964 = vmatpush.msra.mxu2 %v5882_v46  ;;  %v5903_v46 = vld [vmem:[#allocation88_spill] sm:$0xff] }
 0x11e   : > { %1180 = vmatpush.msrb.mxu1 %v5883_v61  ;;  %1164 = vmatpush.msrb.mxu0 %v5884_v26  ;;  %v5904_v61 = vld [vmem:[#allocation83_spill] sm:$0xff]  ;;  %v3986_v26 = vld [vmem:[%s5479_s1 + $0x1c0] sm:$0xff] }
 0x11f   : > { %981 = vmatpush.msra.mxu3 %v3934_v6  ;;  %965 = vmatpush.msra.mxu2 %v5885_v58  ;;  %v5906_v58 = vld [vmem:[#allocation86_spill] sm:$0xff] }
 0x120   : > { %1181 = vmatpush.msrb.mxu1 %v5886_v23  ;;  %1165 = vmatpush.msrb.mxu0 %v5887_v29  ;;  %v5907_v23 = vld [vmem:[#allocation87_spill] sm:$0xff]  ;;  %v3998_v29 = vld [vmem:[%s5479_s1 + $0x3e0] sm:$0xff] }
 0x121   : > { %982 = vmatpush.msra.mxu3 %v3943_v30  ;;  %966 = vmatpush.msra.mxu2 %v5888_v42  ;;  %5908 = vst [vmem:[#allocation3_spill] sm:$0xff] %v3998_v29  ;;  %v4004_v42 = vld [vmem:[%s5479_s1 + $0x1a0] sm:$0xff] }
 0x122   : > { %1182 = vmatpush.msrb.mxu1 %v5889_v27  ;;  %1166 = vmatpush.msrb.mxu0 %v5890_v4  ;;  %v5911_v27 = vld [vmem:[#allocation90_spill] sm:$0xff] }
 0x123   : > { %983 = vmatpush.msra.mxu3 %v3952_v38  ;;  %967 = vmatpush.msra.mxu2 %v5891_v33  ;;  %v4032_v4 = vld [vmem:[%s5479_s1 + $0x160] sm:$0xff] }
 0x124   : > { %1183 = vmatpush.msrb.mxu1 %v5892_v49  ;;  %1167 = vmatpush.msrb.mxu0 %v5893_v51  ;;  %v4046_v33 = vld [vmem:[%s5479_s1 + $0x140] sm:$0xff]  ;;  %v5915_v49 = vld [vmem:[#allocation91_spill] sm:$0xff] }
 0x125   : > { %984 = vmatpush.msra.mxu3 %v3961_v5  ;;  %968 = vmatpush.msra.mxu2 %v5894_v28  ;;  %v5916_v51 = vld [vmem:[#allocation94_spill] sm:$0xff]  ;;  %v5918_v28 = vld [vmem:[#allocation92_spill] sm:$0xff] }
 0x126   : > { %969 = vmatmul.f32.vlgmr.msra.gmra.mxu2 %v3746_v25  ;;  %1184 = vmatpush.msrb.mxu1 %v5895_v39  ;;  %v3977_v25 = vld [vmem:[%s5479_s1 + $0x1e0] sm:$0xff]  ;;  %v5919_v39 = vld [vmem:[#allocation96_spill] sm:$0xff] }
 0x127   : > { %985 = vmatpush.msra.mxu3 %v5896_v9  ;;  %1193 = vmatpush.msrb.mxu2 %v5897_v7  ;;  %v4082_v9 = vld [vmem:[%s5479_s1 + $0x320] sm:$0xff] }
 0x128   : > { %1168 = vmatpush.msrb.mxu0 %v5898_v17  ;;  %1185 = vmatpush.msrb.mxu1 %v5899_v36  ;;  %5920 = vst [vmem:[#allocation7_spill] sm:$0xff] %v4082_v9  ;;  %v4088_v7 = vld [vmem:[%s5479_s1 + $0xe0] sm:$0xff]  ;;  %v5921_v17 = vld [vmem:[#allocation93_spill] sm:$0xff] }
 0x129   : > { %986 = vmatpush.msra.mxu3 %v5900_v15  ;;  %1194 = vmatpush.msrb.mxu2 %v3410_v45  ;;  %v5905_v45 = vld [vmem:[#allocation52_spill] sm:$0xff]  ;;  %v4096_v36 = vld [vmem:[%s5479_s1 + $0x300] sm:$0xff] }
 0x12a   : > { %1186 = vmatpush.msrb.mxu1 %v5901_v19  ;;  %1235 = vmatpush.msra.mxu0 %v3977_v25  ;;  %5922 = vst [vmem:[#allocation16_spill] sm:$0xff] %v4096_v36  ;;  %v4102_v15 = vld [vmem:[%s5479_s1 + $0xc0] sm:$0xff]  ;;  %v5923_v19 = vld [vmem:[#allocation95_spill] sm:$0xff] }
 0x12b   : > { %987 = vmatpush.msra.mxu3 %v5902_v40  ;;  %1195 = vmatpush.msrb.mxu2 %v5903_v46  ;;  %v4116_v40 = vld [vmem:[%s5479_s1 + $0xa0] sm:$0xff]  ;;  %v5925_v46 = vld [vmem:[#allocation97_spill] sm:$0xff] }
 0x12c   : > { %1187 = vmatpush.msrb.mxu1 %v5904_v61  ;;  %1236 = vmatpush.msra.mxu0 %v3986_v26  ;;  %v4130_v61 = vld [vmem:[%s5479_s1 + $0x80] sm:$0xff] }
 0x12d   : > { %988 = vmatpush.msra.mxu3 %v5905_v45  ;;  %1196 = vmatpush.msrb.mxu2 %v3445_v3  ;;  %v5909_v3 = vld [vmem:[#allocation89_spill] sm:$0xff]  ;;  %5927 = vst [vmem:[#allocation18_spill] sm:$0xff] %v4130_v61  ;;  %v4144_v45 = vld [vmem:[%s5479_s1 + $0x60] sm:$0xff] }
 0x12e   : > { %989 = vmatmul.f32.vlgmr.msra.gmra.mxu3 %v3765_v43  ;;  %1188 = vmatpush.msrb.mxu1 %v5906_v58  ;;  %v4018_v43 = vld [vmem:[%s5479_s1 + $0x180] sm:$0xff]  ;;  %5929 = vst [vmem:[#allocation20_spill] sm:$0xff] %v4144_v45 }
 0x12f   : > { %1213 = vmatpush.msrb.mxu3 %v5907_v23  ;;  %1197 = vmatpush.msrb.mxu2 %v3467_v63  ;;  %v4012_v63 = vld [vmem:[%s5479_s1 + $0x3c0] sm:$0xff]  ;;  %v5933_v23 = vld [vmem:[#allocation100_spill] sm:$0xff] }
 0x130   : > { %1255 = vmatpush.msra.mxu1 %v3998_v29  ;;  %1237 = vmatpush.msra.mxu0 %v4004_v42  ;;  %5910 = vst [vmem:[#allocation12_spill] sm:$0xff] %v4012_v63  ;;  %v5930_v58 = vld [vmem:[#allocation98_spill] sm:$0xff] }
 0x131   : > { %1214 = vmatpush.msrb.mxu3 %v5909_v3  ;;  %1198 = vmatpush.msrb.mxu2 %v3484_v14  ;;  %v4026_v14 = vld [vmem:[%s5479_s1 + $0x3a0] sm:$0xff]  ;;  %v4171_v3 = vld [vmem:[%s5479_s1 + $0x1c8] sm:$0xff] }
 0x132   : > { %1256 = vmatpush.msra.mxu1 %v4012_v63  ;;  %1238 = vmatpush.msra.mxu0 %v4018_v43  ;;  %5912 = vst [vmem:[#allocation2_spill] sm:$0xff] %v4026_v14 }
 0x133   : > { %1215 = vmatpush.msrb.mxu3 %v5911_v27  ;;  %1199 = vmatpush.msrb.mxu2 %v3499_v20  ;;  %v4040_v20 = vld [vmem:[%s5479_s1 + $0x380] sm:$0xff]  ;;  %5935 = vst [vmem:[#allocation22_spill] sm:$0xff] %v4171_v3 }
 0x134   : > { %1257 = vmatpush.msra.mxu1 %v4026_v14  ;;  %1239 = vmatpush.msra.mxu0 %v4032_v4  ;;  %5913 = vst [vmem:[#allocation5_spill] sm:$0xff] %v4040_v20  ;;  %v4177_v27 = vld [vmem:[%s5479_s1 + $0x260] sm:$0xff] }
 0x135   : > { %1216 = vmatpush.msrb.mxu3 %v3472_v11  ;;  %1200 = vmatpush.msrb.mxu2 %v3515_v62  ;;  %v4054_v11 = vld [vmem:[%s5479_s1 + $0x360] sm:$0xff]  ;;  %5936 = vst [vmem:[#allocation10_spill] sm:$0xff] %v4177_v27 }
 0x136   : > { %1258 = vmatpush.msra.mxu1 %v4040_v20  ;;  %1240 = vmatpush.msra.mxu0 %v4046_v33  ;;  %5914 = vst [vmem:[#allocation14_spill] sm:$0xff] %v4054_v11  ;;  %v4060_v62 = vld [vmem:[%s5479_s1 + $0x120] sm:$0xff] }
 0x137   : > { %1217 = vmatpush.msrb.mxu3 %v3489_v16  ;;  %1201 = vmatpush.msrb.mxu2 %v3530_v18  ;;  %v4068_v16 = vld [vmem:[%s5479_s1 + $0x340] sm:$0xff] }
 0x138   : > { %1259 = vmatpush.msra.mxu1 %v4054_v11  ;;  %1241 = vmatpush.msra.mxu0 %v4060_v62  ;;  %5917 = vst [vmem:[#allocation4_spill] sm:$0xff] %v4068_v16  ;;  %v4074_v18 = vld [vmem:[%s5479_s1 + $0x100] sm:$0xff] }
 0x139   : > { %1218 = vmatpush.msrb.mxu3 %v5915_v49  ;;  %1202 = vmatpush.msrb.mxu2 %v5916_v51  ;;  %v4184_v49 = vld [vmem:[%s5479_s1 + $0x20] sm:$0xff]  ;;  %v4190_v51 = vld [vmem:[%s5479_s1 + $0x1a8] sm:$0xff] }
 0x13a   : > { %1260 = vmatpush.msra.mxu1 %v4068_v16  ;;  %1242 = vmatpush.msra.mxu0 %v4074_v18  ;;  %5937 = vst [vmem:[#allocation19_spill] sm:$0xff] %v4184_v49 }
 0x13b   : > { %1219 = vmatpush.msrb.mxu3 %v5918_v28  ;;  %1203 = vmatpush.msrb.mxu2 %v5919_v39  ;;  %5938 = vst [vmem:[#allocation24_spill] sm:$0xff] %v4190_v51  ;;  %v4196_v28 = vld [vmem:[%s5479_s1 + $0x240] sm:$0xff]  ;;  %v4209_v39 = vld [vmem:[%s5479_s1 + $0x188] sm:$0xff] }
 0x13c   : > { %1261 = vmatpush.msra.mxu1 %v4082_v9  ;;  %1243 = vmatpush.msra.mxu0 %v4088_v7  ;;  %5939 = vst [vmem:[#allocation13_spill] sm:$0xff] %v4196_v28 }
 0x13d   : > { %1220 = vmatpush.msrb.mxu3 %v5921_v17  ;;  %1204 = vmatpush.msrb.mxu2 %v3578_v59  ;;  %v4110_v59 = vld [vmem:[%s5479_s1 + $0x2e0] sm:$0xff]  ;;  %5941 = vst [vmem:[#allocation26_spill] sm:$0xff] %v4209_v39 }
 0x13e   : > { %1262 = vmatpush.msra.mxu1 %v4096_v36  ;;  %1244 = vmatpush.msra.mxu0 %v4102_v15  ;;  %5924 = vst [vmem:[#allocation6_spill] sm:$0xff] %v4110_v59  ;;  %v4215_v17 = vld [vmem:[%s5479_s1 + $0x220] sm:$0xff] }
 0x13f   : > { %1221 = vmatpush.msrb.mxu3 %v5923_v19  ;;  %1205 = vmatpush.msrb.mxu2 %v3599_v48  ;;  %v4124_v48 = vld [vmem:[%s5479_s1 + $0x2c0] sm:$0xff]  ;;  %5942 = vst [vmem:[#allocation23_spill] sm:$0xff] %v4215_v17  ;;  %v4228_v19 = vld [vmem:[%s5479_s1 + $0x168] sm:$0xff] }
 0x140   : > { %1263 = vmatpush.msra.mxu1 %v4110_v59  ;;  %1245 = vmatpush.msra.mxu0 %v4116_v40  ;;  %5926 = vst [vmem:[#allocation9_spill] sm:$0xff] %v4124_v48  ;;  %v4354_v59 = vld [vmem:[%s5479_s1 + $0x28] sm:$0xff]  ;;  %v4360_v36 = vld [vmem:[%s5482_s4] ss:$0 sm:$0xff] }
 0x141   : > { %1222 = vmatpush.msrb.mxu3 %v5925_v46  ;;  %1206 = vmatpush.msrb.mxu2 %v3618_v32  ;;  %v4138_v32 = vld [vmem:[%s5479_s1 + $0x2a0] sm:$0xff]  ;;  %5944 = vst [vmem:[#allocation25_spill] sm:$0xff] %v4228_v19 }
 0x142   : > { %1264 = vmatpush.msra.mxu1 %v4124_v48  ;;  %1246 = vmatpush.msra.mxu0 %v4130_v61  ;;  %5928 = vst [vmem:[#allocation15_spill] sm:$0xff] %v4138_v32  ;;  %v4234_v46 = vld [vmem:[%s5479_s1 + $0x200] sm:$0xff]  ;;  %v4342_v48 = vld [vmem:[%s5479_s1 + $0x48] sm:$0xff] }
 0x143   : > { %1223 = vmatpush.msrb.mxu3 %v3583_v44  ;;  %1207 = vmatpush.msrb.mxu2 %v3643_v56  ;;  %v4152_v44 = vld [vmem:[%s5479_s1 + $0x1e8] sm:$0xff]  ;;  %v4158_v56 = vld [vmem:[%s5479_s1 + $0x280] sm:$0xff]  ;;  %5945 = vst [vmem:[#allocation30_spill] sm:$0xff] %v4234_v46 }
 0x144   : > { %1265 = vmatpush.msra.mxu1 %v4138_v32  ;;  %1247 = vmatpush.msra.mxu0 %v4144_v45  ;;  %5931 = vst [vmem:[#allocation8_spill] sm:$0xff] %v4152_v44  ;;  %v4330_v32 = vld [vmem:[%s5479_s1 + $0x68] sm:$0xff] }
 0x145   : > { %1224 = vmatpush.msrb.mxu3 %v5930_v58  ;;  %1208 = vmatpush.msrb.mxu2 %v3664_v60  ;;  %5932 = vst [vmem:[#allocation17_spill] sm:$0xff] %v4158_v56  ;;  %v4165_v60 = vld [vmem:[%s5479_s1 + $0x40] sm:$0xff]  ;;  %v4246_v58 = vld [vmem:[%s5479_s1 + $0x148] sm:$0xff] }
 0x146   : > { %1266 = vmatpush.msra.mxu1 %v4158_v56  ;;  %5934 = vst [vmem:[#allocation11_spill] sm:$0xff] %v4165_v60  ;;  %1248 = vmatpush.msra.mxu0 %v4165_v60  ;;  %v4318_v56 = vld [vmem:[%s5479_s1 + $0x88] sm:$0xff] }
 0x147   : > { %1275 = vmatpush.msra.mxu2 %v4152_v44  ;;  %1225 = vmatpush.msrb.mxu3 %v5933_v23  ;;  %5947 = vst [vmem:[#allocation32_spill] sm:$0xff] %v4246_v58  ;;  %v4252_v23 = vld [vmem:[%s5479_s1 + $0x3a8] sm:$0xff] }
 0x148   : > { %1267 = vmatpush.msra.mxu1 %v4177_v27  ;;  %1249 = vmatpush.msra.mxu0 %v4184_v49  ;;  %5948 = vst [vmem:[#allocation29_spill] sm:$0xff] %v4252_v23  ;;  %v4294_v27 = vld [vmem:[%s5479_s1 + $0xc8] sm:$0xff] }
 0x149   : > { %1276 = vmatpush.msra.mxu2 %v4171_v3  ;;  %1226 = vmatpush.msrb.mxu3 %v3648_v22  ;;  %v4203_v22 = vld [vmem:[%s5479_s1] sm:$0xff]  ;;  %5955 = vst [vmem:[#allocation39_spill] sm:$0xff] %v4294_v27 }
 0x14a   : > { %1268 = vmatpush.msra.mxu1 %v4196_v28  ;;  %5940 = vst [vmem:[#allocation21_spill] sm:$0xff] %v4203_v22  ;;  %1250 = vmatpush.msra.mxu0 %v4203_v22  ;;  %v4270_v28 = vld [vmem:[%s5479_s1 + $0x108] sm:$0xff] }
 0x14b   : > { %1277 = vmatpush.msra.mxu2 %v4190_v51  ;;  %1227 = vmatpush.msrb.mxu3 %v3669_v24  ;;  %v4222_v24 = vld [vmem:[%s5479_s1 + $0x3e8] sm:$0xff]  ;;  %5951 = vst [vmem:[#allocation38_spill] sm:$0xff] %v4270_v28 }
 0x14c   : > { %1269 = vmatpush.msra.mxu1 %v4215_v17  ;;  %5943 = vst [vmem:[#allocation28_spill] sm:$0xff] %v4222_v24  ;;  %v4264_v17 = vld [vmem:[%s5479_s1 + $0x388] sm:$0xff] }
 0x14d   : > { %1278 = vmatpush.msra.mxu2 %v4209_v39  ;;  %1228 = vmatpush.msrb.mxu3 %v3683_v50  ;;  %v4240_v50 = vld [vmem:[%s5479_s1 + $0x3c8] sm:$0xff]  ;;  %5950 = vst [vmem:[#allocation31_spill] sm:$0xff] %v4264_v17 }
 0x14e   : > { %1270 = vmatpush.msra.mxu1 %v4234_v46  ;;  %5946 = vst [vmem:[#allocation27_spill] sm:$0xff] %v4240_v50  ;;  %v4258_v46 = vld [vmem:[%s5479_s1 + $0x128] sm:$0xff] }
 0x14f   : > { %1295 = vmatpush.msra.mxu3 %v4222_v24  ;;  %1279 = vmatpush.msra.mxu2 %v4228_v19  ;;  %5949 = vst [vmem:[#allocation35_spill] sm:$0xff] %v4258_v46  ;;  %v4306_v24 = vld [vmem:[%s5479_s1 + $0xa8] sm:$0xff] }
 0x150   : > { %5957 = vst [vmem:[#allocation45_spill] sm:$0xff] %v4306_v24 }
 0x151   : > { %1296 = vmatpush.msra.mxu3 %v4240_v50  ;;  %1280 = vmatpush.msra.mxu2 %v4246_v58  ;;  %v4282_v50 = vld [vmem:[%s5479_s1 + $0xe8] sm:$0xff]  ;;  %5959 = vst [vmem:[#allocation48_spill] sm:$0xff] %v4318_v56 }
 0x152   : > { %5953 = vst [vmem:[#allocation36_spill] sm:$0xff] %v4282_v50 }
 0x153   : > { %1297 = vmatpush.msra.mxu3 %v4252_v23  ;;  %1281 = vmatpush.msra.mxu2 %v4258_v46  ;;  %v4276_v23 = vld [vmem:[%s5479_s1 + $0x368] sm:$0xff]  ;;  %5961 = vst [vmem:[#allocation51_spill] sm:$0xff] %v4330_v32 }
 0x154   : > { %5952 = vst [vmem:[#allocation33_spill] sm:$0xff] %v4276_v23 }
 0x155   : > { %1298 = vmatpush.msra.mxu3 %v4264_v17  ;;  %1282 = vmatpush.msra.mxu2 %v4270_v28  ;;  %v4288_v17 = vld [vmem:[%s5479_s1 + $0x348] sm:$0xff]  ;;  %5963 = vst [vmem:[#allocation54_spill] sm:$0xff] %v4342_v48 }
 0x156   : > { %5954 = vst [vmem:[#allocation44_spill] sm:$0xff] %v4288_v17 }
 0x157   : > { %1299 = vmatpush.msra.mxu3 %v4276_v23  ;;  %1283 = vmatpush.msra.mxu2 %v4282_v50  ;;  %v4300_v23 = vld [vmem:[%s5479_s1 + $0x328] sm:$0xff]  ;;  %5965 = vst [vmem:[#allocation56_spill] sm:$0xff] %v4354_v59 }
 0x158   : > { %5956 = vst [vmem:[#allocation41_spill] sm:$0xff] %v4300_v23 }
 0x159   : > { %1300 = vmatpush.msra.mxu3 %v4288_v17  ;;  %1284 = vmatpush.msra.mxu2 %v4294_v27  ;;  %v4312_v17 = vld [vmem:[%s5479_s1 + $0x308] sm:$0xff]  ;;  %5966 = vst [vmem:[#allocation61_spill] sm:$0xff] %v4360_v36 }
 0x15a   : > { %5958 = vst [vmem:[#allocation53_spill] sm:$0xff] %v4312_v17 }
 0x15b   : > { %1301 = vmatpush.msra.mxu3 %v4300_v23  ;;  %1285 = vmatpush.msra.mxu2 %v4306_v24  ;;  %v4324_v23 = vld [vmem:[%s5479_s1 + $0x2e8] sm:$0xff] }
 0x15c   : > { %5960 = vst [vmem:[#allocation55_spill] sm:$0xff] %v4324_v23 }
 0x15d   : > { %1302 = vmatpush.msra.mxu3 %v4312_v17  ;;  %1286 = vmatpush.msra.mxu2 %v4318_v56  ;;  %v4336_v17 = vld [vmem:[%s5479_s1 + $0x2c8] sm:$0xff] }
 0x15e   : > { %5962 = vst [vmem:[#allocation57_spill] sm:$0xff] %v4336_v17 }
 0x15f   : > { %1303 = vmatpush.msra.mxu3 %v4324_v23  ;;  %1287 = vmatpush.msra.mxu2 %v4330_v32  ;;  %v4348_v23 = vld [vmem:[%s5479_s1 + $0x2a8] sm:$0xff] }
 0x160   : > { %5964 = vst [vmem:[#allocation59_spill] sm:$0xff] %v4348_v23 }
 0x161   : > { %1304 = vmatpush.msra.mxu3 %v4336_v17  ;;  %1288 = vmatpush.msra.mxu2 %v4342_v48  ;;  %v4365_v48 = vld [vmem:[%s5479_s1 + $0x288] sm:$0xff] }
 0x162   : > { %v768_v17 = vpop.f32.mrf.mxu0  ;;  %5967 = vst [vmem:[#allocation58_spill] sm:$0xff] %v4365_v48 }
 0x163   : > { %1305 = vmatpush.msra.mxu3 %v4348_v23  ;;  %1289 = vmatpush.msra.mxu2 %v4354_v59  ;;  %v4371_v23 = vld [vmem:[%s5479_s1 + $0x8] sm:$0xff]  ;;  %v769_v32 = vadd.f32 %v4360_v36, %v768_v17  ;;  %v5973_v36 = vld [vmem:[#allocation77_spill] sm:$0xff] }
 0x164   : > { %5968 = vst [vmem:[#allocation63_spill] sm:$0xff] %v4371_v23  ;;  %v4377_v59 = vld [vmem:[%s5479_s1 + $0x268] sm:$0xff] }
 0x165   : > { %1306 = vmatpush.msra.mxu3 %v4365_v48  ;;  %1290 = vmatpush.msra.mxu2 %v4371_v23  ;;  %5969 = vst [vmem:[#allocation60_spill] sm:$0xff] %v4377_v59  ;;  %v4384_v48 = vld [vmem:[%s5479_s1 + $0x248] sm:$0xff] }
 0x166   : > { %5970 = vst [vmem:[#allocation65_spill] sm:$0xff] %v4384_v48  ;;  %v4390_v23 = vld [vmem:[%s5479_s1 + $0x228] sm:$0xff] }
 0x167   : > { %1307 = vmatpush.msra.mxu3 %v4377_v59  ;;  %5971 = vst [vmem:[#allocation62_spill] sm:$0xff] %v4390_v23  ;;  %v4396_v17 = vld [vmem:[%s5479_s1 + $0x208] sm:$0xff] }
 0x168   : > { %v788_v9 = vpop.f32.mrf.mxu1  ;;  %5972 = vst [vmem:[#allocation67_spill] sm:$0xff] %v4396_v17 }
 0x169   : > { %1308 = vmatpush.msra.mxu3 %v4384_v48  ;;  %v789_v56 = vadd.f32 %v788_v9, %v769_v32 }
 0x16a   : > { %v850_v16 = vpop.f32.mrf.mxu0 }
 0x16b   : > { %1309 = vmatpush.msra.mxu3 %v4390_v23  ;;  %v851_v59 = vadd.f32 %v850_v16, %v5973_v36  ;;  %v5974_v16 = vld [vmem:[#allocation99_spill] sm:$0xff] }
 0x16d   : > { %1310 = vmatpush.msra.mxu3 %v4396_v17 }
 0x170   : > { %v870_v48 = vpop.f32.mrf.mxu1 }
 0x171   : > { %v4400_v24 = vadd.f32 %v870_v48, %v851_v59 }
 0x173   : > { %v4403_v9 = vmul.f32 0.70710677, %v4400_v24 }
 0x175   : > { %v1001_v32 = vand.u32 2147483647, %v4403_v9  ;;  %vm1133_vm12 = vcmp.lt.f32.partialorder %v4403_v9, 0.0 }
 0x177   : > { %v1005_v11 = vmul.f32 0.3275911, %v1001_v32  ;;  %v1109_v58 = vsub.f32 0.0, %v1001_v32 }
 0x179   : > { %v1009_v23 = vadd.f32 1.0, %v1005_v11 }
 0x17b   : > { %2148 = vrcp.f32 %v1009_v23  ;;  %v1024_v14 = vand.u32 2147483648, %v1009_v23  ;;  %vm1018_vm4 = vweird.f32 %v1009_v23  ;;  %v1022_v17 = vand.u32 2147483647, %v1009_v23 }
 0x17d   : > { %v1025_v48 = vor.u32 1.1754944e-38, %v1024_v14  ;;  %vm1023_vm7 = vcmp.eq.f32.partialorder %v1022_v17, 8.507059e+37 }
 0x181   : > { %v2149_v27 = vpop.eup %2148 }
 0x182   : > { %v1014_v20 = vmul.f32 %v2149_v27, %v1009_v23  ;;  %v930_v50 = vpop.f32.mrf.mxu0  ;;  %vm1019_vm5 = vweird.f32 %v2149_v27  ;;  %v1113_v23 = vmul.f32 %v1109_v58, %v1001_v32 }
 0x183   : > { %v931_v36 = vadd.f32 %v930_v50, %v5974_v16  ;;  %vm1020_vm6 = vmor %vm1018_vm4, %vm1019_vm5 }
 0x184   : > { %v1015_v28 = vsub.f32 1.0, %v1014_v20  ;;  %v1117_v17 = vmul.f32 1.442695, %v1113_v23 }
 0x186   : > { %v1016_v59 = vmul.f32 %v2149_v27, %v1015_v28 }
 0x188   : > { %v1017_v63 = vadd.f32 %v2149_v27, %v1016_v59 }
 0x189   : > { %v808_v46 = vpop.f32.mrf.mxu2  ;;  %v950_v29 = vpop.f32.mrf.mxu1 }
 0x18a   : > { %v809_v11 = vadd.f32 %v808_v46, %v789_v56  ;;  %v4407_v19 = vadd.f32 %v950_v29, %v931_v36  ;;  %v1021_v22 = vsel %vm1020_vm6, %v2149_v27, %v1017_v63  ;;  %v5976_v36 = vld [vmem:[#allocation85_spill] sm:$0xff] }
 0x18b   : > { %v1026_v39 = vsel %vm1023_vm7, %v1025_v48, %v1021_v22 }
 0x18c   : > { %v4410_v20 = vmul.f32 0.70710677, %v4407_v19  ;;  %v1073_v49 = vmul.f32 1.0614054, %v1026_v39 }
 0x18e   : > { %v1003_v50 = vand.u32 2147483647, %v4410_v20  ;;  %v1077_v28 = vadd.f32 -1.4531521, %v1073_v49  ;;  %vm1135_vm1 = vcmp.lt.f32.partialorder %v4410_v20, 0.0 }
 0x190   : > { %v1007_v16 = vmul.f32 0.3275911, %v1003_v50  ;;  %v1081_v14 = vmul.f32 %v1077_v28, %v1026_v39 }
 0x191   : > { %v828_v59 = vpop.f32.mrf.mxu3  ;;  %v890_v29 = vpop.f32.mrf.mxu2 }
 0x192   : > { %v1011_v51 = vadd.f32 1.0, %v1007_v16  ;;  %v4413_v60 = vadd.f32 %v828_v59, %v809_v11  ;;  %v1085_v56 = vadd.f32 1.4214138, %v1081_v14  ;;  %v891_v27 = vadd.f32 %v890_v29, %v5976_v36 }
 0x194   : > { %5975 = vst [vmem:[#allocation64_spill] sm:$0xff] %v4413_v60  ;;  %2150 = vrcp.f32 %v1011_v51  ;;  %v1089_v63 = vmul.f32 %v1085_v56, %v1026_v39  ;;  %vm1048_vm8 = vweird.f32 %v1011_v51  ;;  %v1054_v16 = vand.u32 2147483648, %v1011_v51 }
 0x195   : > { %2152 = vpow2.f32 %v1117_v17  ;;  %v1052_v59 = vand.u32 2147483647, %v1011_v51 }
 0x196   : > { %v1093_v22 = vadd.f32 -0.28449672, %v1089_v63  ;;  %v1055_v63 = vor.u32 1.1754944e-38, %v1054_v16 }
 0x197   : > { %vm1053_vm11 = vcmp.eq.f32.partialorder %v1052_v59, 8.507059e+37 }
 0x198   : > { %v1097_v46 = vmul.f32 %v1093_v22, %v1026_v39 }
 0x199   : > { %v910_v58 = vpop.f32.mrf.mxu3 }
 0x19a   : > { %v2151_v32 = vpop.eup %2150  ;;  %v4416_v48 = vadd.f32 %v910_v58, %v891_v27  ;;  %v1101_v49 = vadd.f32 0.2548296, %v1097_v46  ;;  %v1111_v58 = vsub.f32 0.0, %v1003_v50 }
 0x19b   : > { %v1044_v28 = vmul.f32 %v2151_v32, %v1011_v51  ;;  %v2153_v3 = vpop.eup %2152  ;;  %vm1049_vm9 = vweird.f32 %v2151_v32  ;;  %v993_v51 = vmul.f32 0.5, %v4400_v24 }
 0x19c   : > { %v4419_v11 = vmul.f32 0.70710677, %v4416_v48  ;;  %v1105_v23 = vmul.f32 %v1101_v49, %v1026_v39  ;;  %vm1050_vm10 = vmor %vm1048_vm8, %vm1049_vm9 }
 0x19d   : > { %v1045_v14 = vsub.f32 1.0, %v1044_v28 }
 0x19e   : > { %v4422_v17 = vand.u32 2147483647, %v4419_v11  ;;  %v1125_v56 = vmul.f32 %v2153_v3, %v1105_v23  ;;  %vm1134_vm6 = vcmp.lt.f32.partialorder %v4419_v11, 0.0  ;;  %v4568_v11 = vld [vmem:[%s5481_s3 + $0x68] sm:$0xff] }
 0x19f   : > { %v1046_v29 = vmul.f32 %v2151_v32, %v1045_v14  ;;  %v1115_v14 = vmul.f32 %v1111_v58, %v1003_v50 }
 0x1a0   : > { %v1006_v27 = vmul.f32 0.3275911, %v4422_v17  ;;  %v1129_v22 = vsub.f32 1.0, %v1125_v56 }
 0x1a1   : > { %v1047_v46 = vadd.f32 %v2151_v32, %v1046_v29  ;;  %v1121_v29 = vmul.f32 1.442695, %v1115_v14  ;;  %v4457_v14 = vld [vmem:[%s5479_s1 + $0x170] sm:$0xff] }
 0x1a2   : > { %v1010_v60 = vadd.f32 1.0, %v1006_v27  ;;  %v1137_v39 = vsub.f32 0.0, %v1129_v22 }
 0x1a3   : > { %v1051_v49 = vsel %vm1050_vm10, %v2151_v32, %v1047_v46  ;;  %v4430_v32 = vld [vmem:[%s5479_s1 + $0x1f0] sm:$0xff] }
 0x1a4   : > { %v1056_v28 = vsel %vm1053_vm11, %v1055_v63, %v1051_v49  ;;  %2154 = vrcp.f32 %v1010_v60  ;;  %v1141_v36 = vsel %vm1133_vm12, %v1137_v39, %v1129_v22  ;;  %vm1033_vm13 = vweird.f32 %v1010_v60  ;;  %v4443_v46 = vld [vmem:[%s5479_s1 + $0x1b0] sm:$0xff] }
 0x1a5   : > { %v1075_v3 = vmul.f32 1.0614054, %v1056_v28  ;;  %v1145_v23 = vadd.f32 1.0, %v1141_v36  ;;  %v1039_v24 = vand.u32 2147483648, %v1010_v60  ;;  %v1037_v63 = vand.u32 2147483647, %v1010_v60 }
 0x1a6   : > { %2156 = vpow2.f32 %v1121_v29 }
 0x1a7   : > { %v1079_v16 = vadd.f32 -1.4531521, %v1075_v3  ;;  %v1149_v45 = vmul.f32 %v1145_v23, %v993_v51  ;;  %vm1038_vm0 = vcmp.eq.f32.partialorder %v1037_v63, 8.507059e+37  ;;  %v4449_v51 = vld [vmem:[%s5479_s1 + $0x190] sm:$0xff] }
 0x1a9   : > { %v1083_v44 = vmul.f32 %v1079_v16, %v1056_v28  ;;  %1169 = vmatmul.f32.vlgmr.msrb.gmra.mxu0 %v1149_v45  ;;  %v970_v61 = vpop.f32.mrf.mxu2  ;;  %v4436_v45 = vld [vmem:[%s5479_s1 + $0x1d0] sm:$0xff] }
 0x1aa   : > { %v2155_v56 = vpop.eup %2154  ;;  %1315 = vmatpush.msrb.mxu0 %v4430_v32 }
 0x1ab   : > { %v1087_v59 = vadd.f32 1.4214138, %v1083_v44  ;;  %v1029_v9 = vmul.f32 %v2155_v56, %v1010_v60  ;;  %vm1034_vm14 = vweird.f32 %v2155_v56  ;;  %v971_v44 = vadd.f32 %v970_v61, %v3658_v52 }
 0x1ac   : > { %1316 = vmatpush.msrb.mxu0 %v4436_v45  ;;  %vm1035_vm15 = vmor %vm1033_vm13, %vm1034_vm14  ;;  %v1040_v60 = vor.u32 1.1754944e-38, %v1039_v24  ;;  %v2157_v16 = vpop.eup %2156 }
 0x1ad   : > { %v1091_v36 = vmul.f32 %v1087_v59, %v1056_v28  ;;  %v1030_v50 = vsub.f32 1.0, %v1029_v9  ;;  %v1110_v59 = vsub.f32 0.0, %v4422_v17 }
 0x1ae   : > { %1317 = vmatpush.msrb.mxu0 %v4443_v46 }
 0x1af   : > { %v1095_v27 = vadd.f32 -0.28449672, %v1091_v36  ;;  %v1031_v22 = vmul.f32 %v2155_v56, %v1030_v50 }
 0x1b0   : > { %1318 = vmatpush.msrb.mxu0 %v4449_v51 }
 0x1b1   : > { %v1099_v58 = vmul.f32 %v1095_v27, %v1056_v28  ;;  %v1032_v39 = vadd.f32 %v2155_v56, %v1031_v22  ;;  %v990_v49 = vpop.f32.mrf.mxu3  ;;  %v4476_v27 = vld [vmem:[%s5479_s1 + $0x130] sm:$0xff] }
 0x1b2   : > { %v4452_v61 = vadd.f32 %v990_v49, %v971_v44  ;;  %1319 = vmatpush.msrb.mxu0 %v4457_v14  ;;  %v4487_v49 = vld [vmem:[%s5479_s1 + $0x110] sm:$0xff] }
 0x1b3   : > { %v1103_v3 = vadd.f32 0.2548296, %v1099_v58  ;;  %v1036_v23 = vsel %vm1035_vm15, %v2155_v56, %v1032_v39  ;;  %v4467_v56 = vld [vmem:[%s5479_s1 + $0x150] sm:$0xff]  ;;  %v4482_v39 = vld [vmem:[%s2818_s25 + $0x20] sm:$0xff] }
 0x1b4   : > { %v1041_v29 = vsel %vm1038_vm0, %v1040_v60, %v1036_v23  ;;  %v4462_v9 = vmul.f32 0.70710677, %v4452_v61  ;;  %1320 = vmatpush.msrb.mxu0 %v4467_v56 }
 0x1b5   : > { %v1107_v24 = vmul.f32 %v1103_v3, %v1056_v28  ;;  %v1074_v36 = vmul.f32 1.0614054, %v1041_v29  ;;  %v1114_v28 = vmul.f32 %v1110_v59, %v4422_v17  ;;  %1251 = vmatmul.f32.vlgmr.msra.gmra.mxu0 %v4482_v39  ;;  %v4494_v17 = vld [vmem:[%s5479_s1 + $0xf0] sm:$0xff] }
 0x1b6   : > { %v4471_v50 = vand.u32 2147483647, %v4462_v9  ;;  %1321 = vmatpush.msrb.mxu0 %v4476_v27  ;;  %5977 = vst [vmem:[#allocation69_spill] sm:$0xff] %v4494_v17  ;;  %vm1136_vm7 = vcmp.lt.f32.partialorder %v4462_v9, 0.0  ;;  %v996_v9 = vmul.f32 0.5, %v4452_v61 }
 0x1b7   : > { %v1127_v63 = vmul.f32 %v2157_v16, %v1107_v24  ;;  %v1078_v44 = vadd.f32 -1.4531521, %v1074_v36  ;;  %v1119_v59 = vmul.f32 1.442695, %v1114_v28 }
 0x1b8   : > { %v1008_v22 = vmul.f32 0.3275911, %v4471_v50  ;;  %1322 = vmatpush.msrb.mxu0 %v4487_v49 }
 0x1b9   : > { %v1131_v60 = vsub.f32 1.0, %v1127_v63  ;;  %v1082_v58 = vmul.f32 %v1078_v44, %v1041_v29  ;;  %v4501_v63 = vld [vmem:[%s5479_s1 + $0xd0] sm:$0xff]  ;;  %v995_v44 = vmul.f32 0.5, %v4407_v19 }
 0x1ba   : > { %v1012_v3 = vadd.f32 1.0, %v1008_v22  ;;  %1323 = vmatpush.msrb.mxu0 %v4494_v17  ;;  %v4508_v17 = vld [vmem:[%s5479_s1 + $0xb0] sm:$0xff] }
 0x1bb   : > { %v1139_v23 = vsub.f32 0.0, %v1131_v60  ;;  %v1086_v16 = vadd.f32 1.4214138, %v1082_v58 }
 0x1bc   : > { %2158 = vrcp.f32 %v1012_v3  ;;  %1324 = vmatpush.msrb.mxu0 %v4501_v63  ;;  %vm1063_vm3 = vweird.f32 %v1012_v3 }
 0x1bd   : > { %v1143_v24 = vsel %vm1135_vm1, %v1139_v23, %v1131_v60  ;;  %v1090_v36 = vmul.f32 %v1086_v16, %v1041_v29  ;;  %2160 = vpow2.f32 %v1119_v59  ;;  %v4514_v60 = vld [vmem:[%s5479_s1 + $0x90] sm:$0xff] }
 0x1be   : > { %v1147_v22 = vadd.f32 1.0, %v1143_v24  ;;  %1325 = vmatpush.msrb.mxu0 %v4508_v17  ;;  %v4521_v24 = vld [vmem:[%s5479_s1 + $0x70] sm:$0xff] }
 0x1bf   : > { %v1094_v58 = vadd.f32 -0.28449672, %v1090_v36 }
 0x1c0   : > { %v1151_v20 = vmul.f32 %v1147_v22, %v995_v44  ;;  %1326 = vmatpush.msrb.mxu0 %v4514_v60  ;;  %v4528_v44 = vld [vmem:[%s5479_s1 + $0x50] sm:$0xff] }
 0x1c1   : > { %v1098_v28 = vmul.f32 %v1094_v58, %v1041_v29 }
 0x1c2   : > { %v2159_v19 = vpop.eup %2158  ;;  %1209 = vmatmul.f32.vlgmr.msrb.gmra.mxu2 %v1151_v20  ;;  %1327 = vmatpush.msrb.mxu0 %v4521_v24 }
 0x1c3   : > { %v1102_v23 = vadd.f32 0.2548296, %v1098_v28  ;;  %v1059_v16 = vmul.f32 %v2159_v19, %v1012_v3  ;;  %1355 = vmatpush.msrb.mxu2 %v3798_v53  ;;  %v2161_v22 = vpop.eup %2160  ;;  %v1069_v53 = vand.u32 2147483648, %v1012_v3  ;;  %vm1064_vm2 = vweird.f32 %v2159_v19 }
 0x1c4   : > { %1328 = vmatpush.msrb.mxu0 %v4528_v44  ;;  %v1067_v28 = vand.u32 2147483647, %v1012_v3  ;;  %vm1065_vm4 = vmor %vm1063_vm3, %vm1064_vm2 }
 0x1c5   : > { %v1106_v59 = vmul.f32 %v1102_v23, %v1041_v29  ;;  %v1060_v36 = vsub.f32 1.0, %v1059_v16  ;;  %1356 = vmatpush.msrb.mxu2 %v3807_v55  ;;  %v4535_v29 = vld [vmem:[%s5479_s1 + $0x30] sm:$0xff] }
 0x1c6   : > { %1329 = vmatpush.msrb.mxu0 %v4535_v29  ;;  %v4542_v16 = vld [vmem:[%s5479_s1 + $0x10] sm:$0xff]  ;;  %vm1068_vm5 = vcmp.eq.f32.partialorder %v1067_v28, 8.507059e+37 }
 0x1c7   : > { %v1126_v58 = vmul.f32 %v2161_v22, %v1106_v59  ;;  %v1061_v20 = vmul.f32 %v2159_v19, %v1060_v36  ;;  %1357 = vmatpush.msrb.mxu2 %v3816_v8  ;;  %v1070_v8 = vor.u32 1.1754944e-38, %v1069_v53  ;;  %v1112_v22 = vsub.f32 0.0, %v4471_v50 }
 0x1c8   : > { %1330 = vmatpush.msrb.mxu0 %v4542_v16 }
 0x1c9   : > { %v1130_v55 = vsub.f32 1.0, %v1126_v58  ;;  %v1062_v23 = vadd.f32 %v2159_v19, %v1061_v20  ;;  %1358 = vmatpush.msrb.mxu2 %v3824_v34  ;;  %1331 = vmatmul.f32.vlgmr.msrb.gmra.mxu0 %v4482_v39  ;;  %v4551_v34 = vld [vmem:[%s5481_s3 + $0x78] sm:$0xff] }
 0x1ca   : > { %1291 = vmatmul.f32.vlgmr.msra.gmra.mxu2 %v4482_v39  ;;  %1555 = vmatpush.msra.mxu0 %v4551_v34 }
 0x1cb   : > { %v1138_v59 = vsub.f32 0.0, %v1130_v55  ;;  %v1066_v36 = vsel %vm1065_vm4, %v2159_v19, %v1062_v23  ;;  %1359 = vmatpush.msrb.mxu2 %v3838_v57  ;;  %v4560_v57 = vld [vmem:[%s5481_s3 + $0x70] sm:$0xff]  ;;  %v994_v19 = vmul.f32 0.5, %v4416_v48  ;;  %v4576_v48 = vld [vmem:[%s5481_s3 + $0x60] sm:$0xff] }
 0x1cc   : > { %v1071_v3 = vsel %vm1068_vm5, %v1070_v8, %v1066_v36  ;;  %1556 = vmatpush.msra.mxu0 %v4560_v57  ;;  %v4582_v8 = vld [vmem:[%s5479_s1 + $0x3f0] sm:$0xff] }
 0x1cd   : > { %v1142_v53 = vsel %vm1134_vm6, %v1138_v59, %v1130_v55  ;;  %v1076_v58 = vmul.f32 1.0614054, %v1071_v3  ;;  %1360 = vmatpush.msrb.mxu2 %v3852_v10  ;;  %v1116_v55 = vmul.f32 %v1112_v22, %v4471_v50  ;;  %v4589_v50 = vld [vmem:[%s5481_s3 + $0x58] sm:$0xff]  ;;  %v4595_v36 = vld [vmem:[%s5479_s1 + $0x3d0] sm:$0xff] }
 0x1ce   : > { %v1146_v20 = vadd.f32 1.0, %v1142_v53  ;;  %1557 = vmatpush.msra.mxu0 %v4568_v11  ;;  %v4608_v53 = vld [vmem:[%s5479_s1 + $0x3b0] sm:$0xff] }
 0x1cf   : > { %v1080_v28 = vadd.f32 -1.4531521, %v1076_v58  ;;  %1361 = vmatpush.msrb.mxu2 %v3866_v35  ;;  %v4612_v58 = vld [vmem:[%s2818_s25 + $0x28] sm:$0xff] }
 0x1d0   : > { %v1150_v10 = vmul.f32 %v1146_v20, %v994_v19  ;;  %1558 = vmatpush.msra.mxu0 %v4576_v48  ;;  %v4623_v19 = vld [vmem:[%s5481_s3 + $0x48] sm:$0xff] }
 0x1d1   : > { %v1084_v23 = vmul.f32 %v1080_v28, %v1071_v3  ;;  %1362 = vmatpush.msrb.mxu2 %v3880_v54  ;;  %v1123_v54 = vmul.f32 1.442695, %v1116_v55  ;;  %5978 = vst [vmem:[#allocation34_spill] sm:$0xff] %v4623_v19  ;;  %v4629_v28 = vld [vmem:[%s5479_s1 + $0x390] sm:$0xff]  ;;  %v4642_v55 = vld [vmem:[%s5481_s3 + $0x40] sm:$0xff] }
 0x1d2   : > { %1189 = vmatmul.f32.vlgmr.msrb.gmra.mxu1 %v1150_v10  ;;  %1559 = vmatpush.msra.mxu0 %v4589_v50  ;;  %v4635_v10 = vld [vmem:[%s5479_s1 + $0x98] sm:$0xff]  ;;  %5980 = vst [vmem:[#allocation71_spill] sm:$0xff] %v4642_v55 }
 0x1d3   : > { %v1088_v35 = vadd.f32 1.4214138, %v1084_v23  ;;  %1335 = vmatpush.msrb.mxu1 %v4582_v8  ;;  %1363 = vmatpush.msrb.mxu2 %v3894_v2  ;;  %v4602_v2 = vld [vmem:[%s5481_s3 + $0x50] sm:$0xff]  ;;  %2162 = vpow2.f32 %v1123_v54  ;;  %5979 = vst [vmem:[#allocation66_spill] sm:$0xff] %v4635_v10  ;;  %v4654_v54 = vld [vmem:[%s5479_s1 + $0x78] sm:$0xff] }
 0x1d4   : > { %1560 = vmatpush.msra.mxu0 %v4602_v2  ;;  %5981 = vst [vmem:[#allocation37_spill] sm:$0xff] %v4654_v54 }
 0x1d5   : > { %v1092_v59 = vmul.f32 %v1088_v35, %v1071_v3  ;;  %1336 = vmatpush.msrb.mxu1 %v4595_v36  ;;  %1364 = vmatpush.msrb.mxu2 %v3908_v1  ;;  %v4617_v1 = vld [vmem:[%s5479_s1 + $0xb8] sm:$0xff]  ;;  %v4648_v35 = vld [vmem:[%s5479_s1 + $0x370] sm:$0xff] }
 0x1d6   : > { %1561 = vmatpush.msra.mxu0 %v4623_v19 }
 0x1d7   : > { %v1096_v22 = vadd.f32 -0.28449672, %v1092_v59  ;;  %1337 = vmatpush.msrb.mxu1 %v4608_v53  ;;  %1365 = vmatpush.msrb.mxu2 %v4617_v1  ;;  %v4660_v59 = vld [vmem:[%s5481_s3 + $0x38] sm:$0xff] }
 0x1d8   : > { %1562 = vmatpush.msra.mxu0 %v4642_v55  ;;  %5982 = vst [vmem:[#allocation68_spill] sm:$0xff] %v4660_v59  ;;  %v4672_v55 = vld [vmem:[%s5479_s1 + $0x58] sm:$0xff] }
 0x1d9   : > { %v1100_v20 = vmul.f32 %v1096_v22, %v1071_v3  ;;  %1338 = vmatpush.msrb.mxu1 %v4629_v28  ;;  %1366 = vmatpush.msrb.mxu2 %v4635_v10  ;;  %5983 = vst [vmem:[#allocation73_spill] sm:$0xff] %v4672_v55  ;;  %v4696_v10 = vld [vmem:[%s5481_s3 + $0x28] sm:$0xff] }
 0x1da   : > { %1271 = vmatmul.f32.vlgmr.msra.gmra.mxu1 %v4612_v58  ;;  %1563 = vmatpush.msra.mxu0 %v4660_v59  ;;  %v4678_v59 = vld [vmem:[%s5481_s3 + $0x30] sm:$0xff]  ;;  %5986 = vst [vmem:[#allocation75_spill] sm:$0xff] %v4696_v10 }
 0x1db   : > { %v1104_v23 = vadd.f32 0.2548296, %v1100_v20  ;;  %1339 = vmatpush.msrb.mxu1 %v4648_v35  ;;  %1367 = vmatpush.msrb.mxu2 %v4654_v54  ;;  %v4666_v20 = vld [vmem:[%s5479_s1 + $0x350] sm:$0xff]  ;;  %v2163_v54 = vpop.eup %2162  ;;  %5984 = vst [vmem:[#allocation40_spill] sm:$0xff] %v4678_v59 }
 0x1dc   : > { %1564 = vmatpush.msra.mxu0 %v4678_v59  ;;  %v4708_v59 = vld [vmem:[%s5479_s1 + $0x18] sm:$0xff] }
 0x1dd   : > { %v1108_v22 = vmul.f32 %v1104_v23, %v1071_v3  ;;  %1340 = vmatpush.msrb.mxu1 %v4666_v20  ;;  %1368 = vmatpush.msrb.mxu2 %v4672_v55  ;;  %v4684_v23 = vld [vmem:[%s5479_s1 + $0x330] sm:$0xff]  ;;  %v4690_v55 = vld [vmem:[%s5479_s1 + $0x38] sm:$0xff]  ;;  %5987 = vst [vmem:[#allocation42_spill] sm:$0xff] %v4708_v59 }
 0x1de   : > { %5985 = vst [vmem:[#allocation70_spill] sm:$0xff] %v4690_v55  ;;  %1565 = vmatpush.msra.mxu0 %v4696_v10 }
 0x1df   : > { %v1128_v3 = vmul.f32 %v2163_v54, %v1108_v22  ;;  %1341 = vmatpush.msrb.mxu1 %v4684_v23  ;;  %1369 = vmatpush.msrb.mxu2 %v4690_v55  ;;  %v4702_v22 = vld [vmem:[%s5479_s1 + $0x310] sm:$0xff] }
 0x1e0   : > { %v4721_v55 = vld [vmem:[%s5479_s1 + $0x2f0] sm:$0xff] }
 0x1e1   : > { %v1132_v54 = vsub.f32 1.0, %v1128_v3  ;;  %1342 = vmatpush.msrb.mxu1 %v4702_v22  ;;  %1370 = vmatpush.msrb.mxu2 %v4708_v59  ;;  %v4715_v3 = vld [vmem:[%s5481_s3 + $0x20] sm:$0xff]  ;;  %5989 = vst [vmem:[#allocation78_spill] sm:$0xff] %v4721_v55  ;;  %v4727_v59 = vld [vmem:[%s5481_s3 + $0x178] sm:$0xff] }
 0x1e2   : > { %1371 = vmatmul.f32.vlgmr.msrb.gmra.mxu2 %v4482_v39  ;;  %5988 = vst [vmem:[#allocation72_spill] sm:$0xff] %v4715_v3  ;;  %1566 = vmatpush.msra.mxu0 %v4715_v3  ;;  %v4734_v39 = vld [vmem:[%s5481_s3 + $0x18] sm:$0xff] }
 0x1e3   : > { %v1140_v10 = vsub.f32 0.0, %v1132_v54  ;;  %1343 = vmatpush.msrb.mxu1 %v4721_v55  ;;  %5990 = vst [vmem:[#allocation46_spill] sm:$0xff] %v4727_v59  ;;  %1595 = vmatpush.msra.mxu2 %v4727_v59  ;;  %v4740_v55 = vld [vmem:[%s5479_s1 + $0x2d0] sm:$0xff] }
 0x1e4   : > { %5991 = vst [vmem:[#allocation74_spill] sm:$0xff] %v4734_v39  ;;  %1567 = vmatpush.msra.mxu0 %v4734_v39  ;;  %v4746_v59 = vld [vmem:[%s5481_s3 + $0x170] sm:$0xff]  ;;  %v4783_v39 = vld [vmem:[%s5481_s3 + $0x160] sm:$0xff] }
 0x1e5   : > { %v1144_v3 = vsel %vm1136_vm7, %v1140_v10, %v1132_v54  ;;  %1344 = vmatpush.msrb.mxu1 %v4740_v55  ;;  %5992 = vst [vmem:[#allocation80_spill] sm:$0xff] %v4746_v59  ;;  %1596 = vmatpush.msra.mxu2 %v4746_v59  ;;  %v4753_v10 = vld [vmem:[%s5481_s3 + $0x10] sm:$0xff]  ;;  %v4765_v59 = vld [vmem:[%s5481_s3 + $0x168] sm:$0xff] }
 0x1e6   : > { %v1148_v19 = vadd.f32 1.0, %v1144_v3  ;;  %5993 = vst [vmem:[#allocation49_spill] sm:$0xff] %v4753_v10  ;;  %1568 = vmatpush.msra.mxu0 %v4753_v10  ;;  %v4759_v54 = vld [vmem:[%s5479_s1 + $0x2b0] sm:$0xff]  ;;  %v4771_v3 = vld [vmem:[%s5481_s3 + $0x8] sm:$0xff] }
 0x1e7   : > { %5994 = vst [vmem:[#allocation76_spill] sm:$0xff] %v4759_v54  ;;  %1345 = vmatpush.msrb.mxu1 %v4759_v54  ;;  %1597 = vmatpush.msra.mxu2 %v4765_v59  ;;  %v4777_v10 = vld [vmem:[%s5479_s1 + $0x290] sm:$0xff] }
 0x1e8   : > { %5995 = vst [vmem:[#allocation43_spill] sm:$0xff] %v4765_v59  ;;  %v1152_v61 = vmul.f32 %v1148_v19, %v996_v9  ;;  %1569 = vmatpush.msra.mxu0 %v4771_v3  ;;  %v4789_v19 = vld [vmem:[%s5481_s3] sm:$0xff]  ;;  %v4796_v9 = vld [vmem:[%s5479_s1 + $0x270] sm:$0xff] }
 0x1e9   : > { %5996 = vst [vmem:[#allocation84_spill] sm:$0xff] %v4771_v3  ;;  %1346 = vmatpush.msrb.mxu1 %v4777_v10  ;;  %1598 = vmatpush.msra.mxu2 %v4783_v39 }
 0x1ea   : > { %5997 = vst [vmem:[#allocation82_spill] sm:$0xff] %v4777_v10  ;;  %1229 = vmatmul.f32.vlgmr.msrb.gmra.mxu3 %v1152_v61  ;;  %1570 = vmatpush.msra.mxu0 %v4789_v19  ;;  %v4802_v61 = vld [vmem:[%s5481_s3 + $0x158] sm:$0xff] }
 0x1eb   : > { %5998 = vst [vmem:[#allocation79_spill] sm:$0xff] %v4783_v39  ;;  %1375 = vmatpush.msrb.mxu3 %v3832_v0  ;;  %1347 = vmatpush.msrb.mxu1 %v4796_v9  ;;  %v4810_v0 = vld [vmem:[%s5479_s1 + $0x250] sm:$0xff] }
 0x1ec   : > { %5999 = vst [vmem:[#allocation47_spill] sm:$0xff] %v4789_v19  ;;  %1599 = vmatpush.msra.mxu2 %v4802_v61  ;;  %1637 = vmatpush.msrb.mxu0 %v3977_v25  ;;  %v4816_v19 = vld [vmem:[%s5481_s3 + $0x150] sm:$0xff]  ;;  %v4830_v25 = vld [vmem:[%s5481_s3 + $0x148] sm:$0xff] }
 0x1ed   : > { %6000 = vst [vmem:[#allocation81_spill] sm:$0xff] %v4796_v9  ;;  %1376 = vmatpush.msrb.mxu3 %v3846_v31  ;;  %1348 = vmatpush.msrb.mxu1 %v4810_v0  ;;  %v4824_v31 = vld [vmem:[%s5479_s1 + $0x230] sm:$0xff] }
 0x1ee   : > { %6001 = vst [vmem:[#allocation50_spill] sm:$0xff] %v4802_v61  ;;  %1600 = vmatpush.msra.mxu2 %v4816_v19  ;;  %1638 = vmatpush.msrb.mxu0 %v3986_v26  ;;  %v4847_v26 = vld [vmem:[%s5481_s3 + $0xf8] sm:$0xff] }
 0x1ef   : > { %6002 = vst [vmem:[#allocation88_spill] sm:$0xff] %v4810_v0  ;;  %1377 = vmatpush.msrb.mxu3 %v3860_v37  ;;  %1349 = vmatpush.msrb.mxu1 %v4824_v31  ;;  %v4838_v37 = vld [vmem:[%s5479_s1 + $0x210] sm:$0xff] }
 0x1f0   : > { %6003 = vst [vmem:[#allocation83_spill] sm:$0xff] %v4816_v19  ;;  %1601 = vmatpush.msra.mxu2 %v4830_v25  ;;  %1639 = vmatpush.msrb.mxu0 %v4004_v42  ;;  %v4867_v42 = vld [vmem:[%s5481_s3 + $0x138] sm:$0xff] }
 0x1f1   : > { %6004 = vst [vmem:[#allocation52_spill] sm:$0xff] %v4824_v31  ;;  %1378 = vmatpush.msrb.mxu3 %v3874_v12  ;;  %1350 = vmatpush.msrb.mxu1 %v4838_v37  ;;  %v4853_v12 = vld [vmem:[%s5481_s3 + $0x140] sm:$0xff] }
 0x1f2   : > { %6005 = vst [vmem:[#allocation86_spill] sm:$0xff] %v4830_v25  ;;  %1311 = vmatmul.f32.vlgmr.msra.gmra.mxu3 %v4612_v58  ;;  %1351 = vmatmul.f32.vlgmr.msrb.gmra.mxu1 %v4612_v58 }
 0x1f3   : > { %6006 = vst [vmem:[#allocation87_spill] sm:$0xff] %v4838_v37  ;;  %1379 = vmatpush.msrb.mxu3 %v3888_v41  ;;  %1575 = vmatpush.msra.mxu1 %v4847_v26  ;;  %v4861_v41 = vld [vmem:[%s5481_s3 + $0xf0] sm:$0xff] }
 0x1f4   : > { %6007 = vst [vmem:[#allocation89_spill] sm:$0xff] %v4847_v26  ;;  %1602 = vmatpush.msra.mxu2 %v4853_v12  ;;  %1640 = vmatpush.msrb.mxu0 %v4018_v43  ;;  %v4881_v43 = vld [vmem:[%s5481_s3 + $0x130] sm:$0xff] }
 0x1f5   : > { %6008 = vst [vmem:[#allocation90_spill] sm:$0xff] %v4853_v12  ;;  %1380 = vmatpush.msrb.mxu3 %v3902_v13  ;;  %1576 = vmatpush.msra.mxu1 %v4861_v41  ;;  %v4875_v13 = vld [vmem:[%s5481_s3 + $0xe8] sm:$0xff] }
 0x1f6   : > { %6009 = vst [vmem:[#allocation91_spill] sm:$0xff] %v4861_v41  ;;  %1603 = vmatpush.msra.mxu2 %v4867_v42  ;;  %1641 = vmatpush.msrb.mxu0 %v4032_v4  ;;  %v4895_v4 = vld [vmem:[%s5481_s3 + $0x128] sm:$0xff] }
 0x1f7   : > { %6010 = vst [vmem:[#allocation94_spill] sm:$0xff] %v4867_v42  ;;  %1381 = vmatpush.msrb.mxu3 %v3916_v21  ;;  %1577 = vmatpush.msra.mxu1 %v4875_v13  ;;  %v4889_v21 = vld [vmem:[%s5481_s3 + $0xe0] sm:$0xff] }
 0x1f8   : > { %6011 = vst [vmem:[#allocation92_spill] sm:$0xff] %v4875_v13  ;;  %1604 = vmatpush.msra.mxu2 %v4881_v43  ;;  %1642 = vmatpush.msrb.mxu0 %v4046_v33  ;;  %v4909_v33 = vld [vmem:[%s5481_s3 + $0x120] sm:$0xff] }
 0x1f9   : > { %6012 = vst [vmem:[#allocation96_spill] sm:$0xff] %v4881_v43  ;;  %1382 = vmatpush.msrb.mxu3 %v3925_v47  ;;  %1578 = vmatpush.msra.mxu1 %v4889_v21  ;;  %v4903_v47 = vld [vmem:[%s5481_s3 + $0xd8] sm:$0xff]  ;;  %v6092_v43 = vld [vmem:[#allocation30_spill] sm:$0xff] }
 0x1fa   : > { %6013 = vst [vmem:[#allocation93_spill] sm:$0xff] %v4889_v21  ;;  %1605 = vmatpush.msra.mxu2 %v4895_v4  ;;  %1643 = vmatpush.msrb.mxu0 %v4060_v62  ;;  %v4923_v62 = vld [vmem:[%s5481_s3 + $0x118] sm:$0xff] }
 0x1fb   : > { %6014 = vst [vmem:[#allocation95_spill] sm:$0xff] %v4895_v4  ;;  %1383 = vmatpush.msrb.mxu3 %v3934_v6  ;;  %1579 = vmatpush.msra.mxu1 %v4903_v47  ;;  %v4917_v6 = vld [vmem:[%s5481_s3 + $0xd0] sm:$0xff] }
 0x1fc   : > { %6015 = vst [vmem:[#allocation97_spill] sm:$0xff] %v4903_v47  ;;  %1606 = vmatpush.msra.mxu2 %v4909_v33  ;;  %1644 = vmatpush.msrb.mxu0 %v4074_v18  ;;  %v4937_v18 = vld [vmem:[%s5481_s3 + $0x110] sm:$0xff] }
 0x1fd   : > { %6016 = vst [vmem:[#allocation98_spill] sm:$0xff] %v4909_v33  ;;  %1384 = vmatpush.msrb.mxu3 %v3943_v30  ;;  %1580 = vmatpush.msra.mxu1 %v4917_v6  ;;  %v4931_v30 = vld [vmem:[%s5481_s3 + $0xc8] sm:$0xff]  ;;  %v6029_v33 = vld [vmem:[#allocation8_spill] sm:$0xff] }
 0x1fe   : > { %6017 = vst [vmem:[#allocation100_spill] sm:$0xff] %v4917_v6  ;;  %1607 = vmatpush.msra.mxu2 %v4923_v62  ;;  %1645 = vmatpush.msrb.mxu0 %v4088_v7  ;;  %v4951_v7 = vld [vmem:[%s5481_s3 + $0x108] sm:$0xff]  ;;  %v6030_v4 = vld [vmem:[#allocation20_spill] sm:$0xff] }
 0x1ff   : > { %6018 = vst [vmem:[#allocation102_spill] sm:$0xff] %v4923_v62  ;;  %1385 = vmatpush.msrb.mxu3 %v3952_v38  ;;  %1581 = vmatpush.msra.mxu1 %v4931_v30  ;;  %v4945_v38 = vld [vmem:[%s5481_s3 + $0xc0] sm:$0xff]  ;;  %v4983_v62 = vld [vmem:[%s5481_s3 + $0xb0] sm:$0xff] }
 0x200   : > { %6019 = vst [vmem:[#allocation103_spill] sm:$0xff] %v4931_v30  ;;  %1608 = vmatpush.msra.mxu2 %v4937_v18  ;;  %1646 = vmatpush.msrb.mxu0 %v4102_v15  ;;  %v4964_v15 = vld [vmem:[%s5481_s3 + $0xb8] sm:$0xff] }
 0x201   : > { %6020 = vst [vmem:[#allocation104_spill] sm:$0xff] %v4937_v18  ;;  %1386 = vmatpush.msrb.mxu3 %v3961_v5  ;;  %1582 = vmatpush.msra.mxu1 %v4945_v38  ;;  %v4958_v5 = vld [vmem:[%s5479_s1 + $0x278] sm:$0xff] }
 0x202   : > { %6021 = vst [vmem:[#allocation105_spill] sm:$0xff] %v4945_v38  ;;  %1609 = vmatpush.msra.mxu2 %v4951_v7  ;;  %1647 = vmatpush.msrb.mxu0 %v4116_v40  ;;  %v6026_v40 = vld [vmem:[#allocation18_spill] sm:$0xff]  ;;  %v4977_v18 = vld [vmem:[%s5479_s1 + $0x258] sm:$0xff] }
 0x203   : > { %6022 = vst [vmem:[#allocation106_spill] sm:$0xff] %v4951_v7  ;;  %1387 = vmatpush.msrb.mxu3 %v4958_v5  ;;  %1583 = vmatpush.msra.mxu1 %v4964_v15  ;;  %v4970_v7 = vld [vmem:[%s5481_s3 + $0x100] sm:$0xff]  ;;  %v6093_v38 = vld [vmem:[#allocation33_spill] sm:$0xff] }
 0x204   : > { %6023 = vst [vmem:[#allocation107_spill] sm:$0xff] %v4958_v5  ;;  %1610 = vmatpush.msra.mxu2 %v4970_v7  ;;  %1648 = vmatpush.msrb.mxu0 %v6026_v40  ;;  %v4991_v40 = vld [vmem:[%s5479_s1 + $0x238] sm:$0xff]  ;;  %v6094_v5 = vld [vmem:[#allocation44_spill] sm:$0xff] }
 0x205   : > { %6024 = vst [vmem:[#allocation108_spill] sm:$0xff] %v4964_v15  ;;  %1388 = vmatpush.msrb.mxu3 %v4977_v18  ;;  %1584 = vmatpush.msra.mxu1 %v4983_v62  ;;  %v6033_v15 = vld [vmem:[#allocation22_spill] sm:$0xff] }
 0x206   : > { %6025 = vst [vmem:[#allocation109_spill] sm:$0xff] %v4970_v7  ;;  %1677 = vmatpush.msrb.mxu2 %v6029_v33  ;;  %1649 = vmatpush.msrb.mxu0 %v6030_v4  ;;  %v4997_v7 = vld [vmem:[%s5481_s3 + $0xa8] sm:$0xff]  ;;  %v5005_v4 = vld [vmem:[%s5479_s1 + $0x218] sm:$0xff]  ;;  %v5011_v33 = vld [vmem:[%s5481_s3 + $0xa0] sm:$0xff] }
 0x207   : > { %6027 = vst [vmem:[#allocation18_spill] sm:$0xff] %v4977_v18  ;;  %1389 = vmatpush.msrb.mxu3 %v4991_v40  ;;  %1585 = vmatpush.msra.mxu1 %v4997_v7  ;;  %v6089_v18 = vld [vmem:[#allocation29_spill] sm:$0xff] }
 0x208   : > { %6028 = vst [vmem:[#allocation110_spill] sm:$0xff] %v4983_v62  ;;  %1678 = vmatpush.msrb.mxu2 %v6033_v15  ;;  %v6034_v62 = vld [vmem:[#allocation11_spill] sm:$0xff]  ;;  %v5025_v15 = vld [vmem:[%s5481_s3 + $0x98] sm:$0xff] }
 0x209   : > { %6031 = vst [vmem:[#allocation8_spill] sm:$0xff] %v4991_v40  ;;  %1650 = vmatpush.msrb.mxu0 %v6034_v62  ;;  %1390 = vmatpush.msrb.mxu3 %v5005_v4  ;;  %v5019_v62 = vld [vmem:[%s5481_s3 + $0x1f8] sm:$0xff]  ;;  %v5082_v40 = vld [vmem:[%s5481_s3 + $0x1d0] sm:$0xff] }
 0x20a   : > { %6032 = vst [vmem:[#allocation20_spill] sm:$0xff] %v4997_v7  ;;  %1586 = vmatpush.msra.mxu1 %v5011_v33  ;;  %1391 = vmatmul.f32.vlgmr.msrb.gmra.mxu3 %v4612_v58  ;;  %v6037_v7 = vld [vmem:[#allocation24_spill] sm:$0xff] }
 0x20b   : > { %6035 = vst [vmem:[#allocation22_spill] sm:$0xff] %v5005_v4  ;;  %1679 = vmatpush.msrb.mxu2 %v6037_v7  ;;  %1615 = vmatpush.msra.mxu3 %v5019_v62  ;;  %v6040_v4 = vld [vmem:[#allocation19_spill] sm:$0xff]  ;;  %v5033_v58 = vld [vmem:[%s5481_s3 + $0x1f0] sm:$0xff] }
 0x20c   : > { %6036 = vst [vmem:[#allocation11_spill] sm:$0xff] %v5011_v33  ;;  %1587 = vmatpush.msra.mxu1 %v5025_v15  ;;  %1651 = vmatpush.msrb.mxu0 %v6040_v4  ;;  %v6041_v33 = vld [vmem:[#allocation26_spill] sm:$0xff]  ;;  %v5039_v7 = vld [vmem:[%s5481_s3 + $0x90] sm:$0xff]  ;;  %v5047_v4 = vld [vmem:[%s5481_s3 + $0x1e8] sm:$0xff] }
 0x20d   : > { %6038 = vst [vmem:[#allocation24_spill] sm:$0xff] %v5019_v62  ;;  %1680 = vmatpush.msrb.mxu2 %v6041_v33  ;;  %1616 = vmatpush.msra.mxu3 %v5033_v58  ;;  %v6044_v62 = vld [vmem:[#allocation21_spill] sm:$0xff]  ;;  %v5053_v33 = vld [vmem:[%s5481_s3 + $0x88] sm:$0xff] }
 0x20e   : > { %6039 = vst [vmem:[#allocation111_spill] sm:$0xff] %v5025_v15  ;;  %1588 = vmatpush.msra.mxu1 %v5039_v7  ;;  %1652 = vmatpush.msrb.mxu0 %v6044_v62  ;;  %v6045_v15 = vld [vmem:[#allocation25_spill] sm:$0xff]  ;;  %v5060_v62 = vld [vmem:[%s5481_s3 + $0x1e0] sm:$0xff] }
 0x20f   : > { %6042 = vst [vmem:[#allocation19_spill] sm:$0xff] %v5033_v58  ;;  %1681 = vmatpush.msrb.mxu2 %v6045_v15  ;;  %1617 = vmatpush.msra.mxu3 %v5047_v4  ;;  %v6048_v58 = vld [vmem:[#allocation32_spill] sm:$0xff]  ;;  %v5066_v15 = vld [vmem:[%s5481_s3 + $0x80] sm:$0xff] }
 0x210   : > { %6043 = vst [vmem:[#allocation26_spill] sm:$0xff] %v5039_v7  ;;  %1589 = vmatpush.msra.mxu1 %v5053_v33  ;;  %v6052_v7 = vld [vmem:[#allocation35_spill] sm:$0xff] }
 0x211   : > { %6046 = vst [vmem:[#allocation21_spill] sm:$0xff] %v5047_v4  ;;  %1682 = vmatpush.msrb.mxu2 %v6048_v58  ;;  %1618 = vmatpush.msra.mxu3 %v5060_v62  ;;  %v6051_v4 = vld [vmem:[#allocation3_spill] sm:$0xff]  ;;  %v5074_v58 = vld [vmem:[%s5481_s3 + $0x1d8] sm:$0xff] }
 0x212   : > { %6047 = vst [vmem:[#allocation25_spill] sm:$0xff] %v5053_v33  ;;  %1590 = vmatpush.msra.mxu1 %v5066_v15  ;;  %v6054_v33 = vld [vmem:[#allocation12_spill] sm:$0xff] }
 0x213   : > { %6049 = vst [vmem:[#allocation32_spill] sm:$0xff] %v5060_v62  ;;  %1683 = vmatpush.msrb.mxu2 %v6052_v7  ;;  %1619 = vmatpush.msra.mxu3 %v5074_v58  ;;  %v6055_v62 = vld [vmem:[#allocation38_spill] sm:$0xff]  ;;  %v6058_v7 = vld [vmem:[#allocation36_spill] sm:$0xff] }
 0x214   : > { %6050 = vst [vmem:[#allocation112_spill] sm:$0xff] %v5066_v15  ;;  %1657 = vmatpush.msrb.mxu1 %v6051_v4  ;;  %v6057_v4 = vld [vmem:[#allocation2_spill] sm:$0xff]  ;;  %v5090_v15 = vld [vmem:[%s5481_s3 + $0x1c8] sm:$0xff] }
 0x215   : > { %6053 = vst [vmem:[#allocation3_spill] sm:$0xff] %v5074_v58  ;;  %1684 = vmatpush.msrb.mxu2 %v6055_v62  ;;  %1620 = vmatpush.msra.mxu3 %v5082_v40  ;;  %v6061_v62 = vld [vmem:[#allocation39_spill] sm:$0xff]  ;;  %v5098_v58 = vld [vmem:[%s5481_s3 + $0x1c0] sm:$0xff] }
 0x216   : > { %1658 = vmatpush.msrb.mxu1 %v6054_v33  ;;  %6056 = vst [vmem:[#allocation35_spill] sm:$0xff] %v5082_v40  ;;  %v6060_v33 = vld [vmem:[#allocation5_spill] sm:$0xff] }
 0x217   : > { %1685 = vmatpush.msrb.mxu2 %v6058_v7  ;;  %6059 = vst [vmem:[#allocation12_spill] sm:$0xff] %v5090_v15  ;;  %1621 = vmatpush.msra.mxu3 %v5090_v15  ;;  %v6064_v7 = vld [vmem:[#allocation45_spill] sm:$0xff]  ;;  %v5114_v15 = vld [vmem:[%s5481_s3 + $0x1b0] sm:$0xff] }
 0x218   : > { %1659 = vmatpush.msrb.mxu1 %v6057_v4  ;;  %6062 = vst [vmem:[#allocation38_spill] sm:$0xff] %v5098_v58  ;;  %v6063_v4 = vld [vmem:[#allocation14_spill] sm:$0xff]  ;;  %v5106_v40 = vld [vmem:[%s5481_s3 + $0x1b8] sm:$0xff] }
 0x219   : > { %1686 = vmatpush.msrb.mxu2 %v6061_v62  ;;  %1622 = vmatpush.msra.mxu3 %v5098_v58  ;;  %6065 = vst [vmem:[#allocation2_spill] sm:$0xff] %v5106_v40  ;;  %v6067_v62 = vld [vmem:[#allocation48_spill] sm:$0xff]  ;;  %v5122_v58 = vld [vmem:[%s5481_s3 + $0x1a8] sm:$0xff] }
 0x21a   : > { %1660 = vmatpush.msrb.mxu1 %v6060_v33  ;;  %v6066_v33 = vld [vmem:[#allocation4_spill] sm:$0xff]  ;;  %6068 = vst [vmem:[#allocation36_spill] sm:$0xff] %v5114_v15 }
 0x21b   : > { %1687 = vmatpush.msrb.mxu2 %v6064_v7  ;;  %1623 = vmatpush.msra.mxu3 %v5106_v40  ;;  %v6070_v7 = vld [vmem:[#allocation51_spill] sm:$0xff]  ;;  %6071 = vst [vmem:[#allocation5_spill] sm:$0xff] %v5122_v58  ;;  %v5130_v40 = vld [vmem:[%s5481_s3 + $0x1a0] sm:$0xff] }
 0x21c   : > { %1661 = vmatpush.msrb.mxu1 %v6063_v4  ;;  %v6069_v4 = vld [vmem:[#allocation7_spill] sm:$0xff]  ;;  %6074 = vst [vmem:[#allocation39_spill] sm:$0xff] %v5130_v40 }
 0x21d   : > { %1688 = vmatpush.msrb.mxu2 %v6067_v62  ;;  %1624 = vmatpush.msra.mxu3 %v5114_v15  ;;  %v6073_v62 = vld [vmem:[#allocation54_spill] sm:$0xff]  ;;  %v5138_v15 = vld [vmem:[%s5481_s3 + $0x198] sm:$0xff] }
 0x21e   : > { %1662 = vmatpush.msrb.mxu1 %v6066_v33  ;;  %v6072_v33 = vld [vmem:[#allocation16_spill] sm:$0xff]  ;;  %6077 = vst [vmem:[#allocation14_spill] sm:$0xff] %v5138_v15 }
 0x21f   : > { %1689 = vmatpush.msrb.mxu2 %v6070_v7  ;;  %1625 = vmatpush.msra.mxu3 %v5122_v58  ;;  %v6076_v7 = vld [vmem:[#allocation56_spill] sm:$0xff] }
 0x220   : > { %1663 = vmatpush.msrb.mxu1 %v6069_v4  ;;  %v6075_v4 = vld [vmem:[#allocation6_spill] sm:$0xff]  ;;  %v5146_v58 = vld [vmem:[%s5481_s3 + $0x190] sm:$0xff] }
 0x221   : > { %1690 = vmatpush.msrb.mxu2 %v6073_v62  ;;  %1626 = vmatpush.msra.mxu3 %v5130_v40  ;;  %v6079_v62 = vld [vmem:[#allocation63_spill] sm:$0xff]  ;;  %6080 = vst [vmem:[#allocation45_spill] sm:$0xff] %v5146_v58  ;;  %v6088_v40 = vld [vmem:[#allocation13_spill] sm:$0xff] }
 0x222   : > { %1664 = vmatpush.msrb.mxu1 %v6072_v33  ;;  %v6078_v33 = vld [vmem:[#allocation9_spill] sm:$0xff] }
 0x223   : > { %1691 = vmatpush.msrb.mxu2 %v6076_v7  ;;  %1627 = vmatpush.msra.mxu3 %v5138_v15  ;;  %v5153_v7 = vld [vmem:[%s5481_s3 + $0x188] sm:$0xff]  ;;  %v6083_v15 = vld [vmem:[#allocation17_spill] sm:$0xff] }
 0x224   : > { %1665 = vmatpush.msrb.mxu1 %v6075_v4  ;;  %v6081_v4 = vld [vmem:[#allocation15_spill] sm:$0xff]  ;;  %6082 = vst [vmem:[#allocation4_spill] sm:$0xff] %v5153_v7 }
 0x225   : > { %1692 = vmatpush.msrb.mxu2 %v6079_v62  ;;  %1628 = vmatpush.msra.mxu3 %v5146_v58  ;;  %v6085_v62 = vld [vmem:[#allocation28_spill] sm:$0xff]  ;;  %v6086_v58 = vld [vmem:[#allocation10_spill] sm:$0xff] }
 0x226   : > { %1666 = vmatpush.msrb.mxu1 %v6078_v33  ;;  %v5160_v33 = vld [vmem:[%s5481_s3 + $0x180] sm:$0xff] }
 0x227   : > { %1629 = vmatpush.msra.mxu3 %v5153_v7  ;;  %6084 = vst [vmem:[#allocation48_spill] sm:$0xff] %v5160_v33  ;;  %v6090_v7 = vld [vmem:[#allocation23_spill] sm:$0xff] }
 0x228   : > { %1667 = vmatpush.msrb.mxu1 %v6081_v4  ;;  %v6087_v4 = vld [vmem:[#allocation27_spill] sm:$0xff] }
 0x229   : > { %1630 = vmatpush.msra.mxu3 %v5160_v33  ;;  %v6095_v33 = vld [vmem:[#allocation41_spill] sm:$0xff] }
 0x22a   : > { %1668 = vmatpush.msrb.mxu1 %v6083_v15  ;;  %v6091_v15 = vld [vmem:[#allocation31_spill] sm:$0xff] }
 0x22b   : > { %1697 = vmatpush.msrb.mxu3 %v6085_v62  ;;  %v6096_v62 = vld [vmem:[#allocation53_spill] sm:$0xff] }
 0x22c   : > { %1669 = vmatpush.msrb.mxu1 %v6086_v58  ;;  %v6097_v58 = vld [vmem:[#allocation55_spill] sm:$0xff] }
 0x22d   : > { %1698 = vmatpush.msrb.mxu3 %v6087_v4  ;;  %v6098_v4 = vld [vmem:[#allocation57_spill] sm:$0xff] }
 0x22e   : > { %1670 = vmatpush.msrb.mxu1 %v6088_v40  ;;  %v6099_v40 = vld [vmem:[#allocation59_spill] sm:$0xff] }
 0x22f   : > { %1699 = vmatpush.msrb.mxu3 %v6089_v18  ;;  %v6100_v18 = vld [vmem:[#allocation58_spill] sm:$0xff] }
 0x230   : > { %1671 = vmatpush.msrb.mxu1 %v6090_v7  ;;  %v6101_v7 = vld [vmem:[#allocation60_spill] sm:$0xff] }
 0x231   : > { %1700 = vmatpush.msrb.mxu3 %v6091_v15  ;;  %v6102_v15 = vld [vmem:[#allocation65_spill] sm:$0xff] }
 0x232   : > { %1672 = vmatpush.msrb.mxu1 %v6092_v43  ;;  %v6103_v43 = vld [vmem:[#allocation62_spill] sm:$0xff] }
 0x233   : > { %1701 = vmatpush.msrb.mxu3 %v6093_v38  ;;  %v6104_v38 = vld [vmem:[#allocation67_spill] sm:$0xff] }
 0x235   : > { %1702 = vmatpush.msrb.mxu3 %v6094_v5  ;;  %v1170_v5 = vpop.f32.mrf.mxu0 }
 0x237   : > { %1703 = vmatpush.msrb.mxu3 %v6095_v33 }
 0x239   : > { %1704 = vmatpush.msrb.mxu3 %v6096_v62  ;;  %v6105_v62 = vld [vmem:[#allocation77_spill] sm:$0xff] }
 0x23b   : > { %1705 = vmatpush.msrb.mxu3 %v6097_v58 }
 0x23d   : > { %1706 = vmatpush.msrb.mxu3 %v6098_v4  ;;  %v1252_v42 = vpop.f32.mrf.mxu0 }
 0x23e   : > { %v1253_v30 = vadd.f32 %v1252_v42, %v6105_v62  ;;  %v6107_v62 = vld [vmem:[#allocation99_spill] sm:$0xff] }
 0x23f   : > { %1707 = vmatpush.msrb.mxu3 %v6099_v40 }
 0x241   : > { %1708 = vmatpush.msrb.mxu3 %v6100_v18 }
 0x243   : > { %1709 = vmatpush.msrb.mxu3 %v6101_v7 }
 0x245   : > { %1710 = vmatpush.msrb.mxu3 %v6102_v15  ;;  %v6106_v15 = vld [vmem:[#allocation61_spill] sm:$0xff]  ;;  %v1210_v6 = vpop.f32.mrf.mxu2 }
 0x246   : > { %v1332_v19 = vpop.f32.mrf.mxu0 }
 0x247   : > { %1711 = vmatpush.msrb.mxu3 %v6103_v43  ;;  %v1171_v43 = vadd.f32 %v6106_v15, %v1170_v5  ;;  %v1333_v61 = vadd.f32 %v1332_v19, %v6107_v62  ;;  %v6108_v19 = vld [vmem:[#allocation85_spill] sm:$0xff] }
 0x249   : > { %1712 = vmatpush.msrb.mxu3 %v6104_v38 }
 0x24d   : > { %v1292_v15 = vpop.f32.mrf.mxu2 }
 0x24f   : > { %v1190_v33 = vpop.f32.mrf.mxu1 }
 0x250   : > { %v1191_v25 = vadd.f32 %v1190_v33, %v1171_v43 }
 0x257   : > { %v1272_v58 = vpop.f32.mrf.mxu1 }
 0x258   : > { %v5184_v12 = vadd.f32 %v1272_v58, %v1253_v30  ;;  %v1211_v58 = vadd.f32 %v1210_v6, %v1191_v25  ;;  %v1293_v6 = vadd.f32 %v1292_v15, %v6108_v19 }
 0x25a   : > { %v5187_v4 = vmul.f32 0.70710677, %v5184_v12 }
 0x25c   : > { %v1403_v40 = vand.u32 2147483647, %v5187_v4  ;;  %vm1535_vm0 = vcmp.lt.f32.partialorder %v5187_v4, 0.0 }
 0x25e   : > { %v1407_v18 = vmul.f32 0.3275911, %v1403_v40  ;;  %v1511_v33 = vsub.f32 0.0, %v1403_v40 }
 0x260   : > { %v1411_v7 = vadd.f32 1.0, %v1407_v18 }
 0x262   : > { %2164 = vrcp.f32 %v1411_v7  ;;  %v1426_v21 = vand.u32 2147483648, %v1411_v7  ;;  %vm1420_vm8 = vweird.f32 %v1411_v7  ;;  %v1424_v30 = vand.u32 2147483647, %v1411_v7 }
 0x264   : > { %v1427_v18 = vor.u32 1.1754944e-38, %v1426_v21  ;;  %vm1425_vm11 = vcmp.eq.f32.partialorder %v1424_v30, 8.507059e+37 }
 0x265   : > { %v1372_v37 = vpop.f32.mrf.mxu2 }
 0x266   : > { %v1373_v0 = vadd.f32 %v1372_v37, %v3658_v52 }
 0x268   : > { %v2165_v38 = vpop.eup %2164 }
 0x269   : > { %v1416_v47 = vmul.f32 %v2165_v38, %v1411_v7  ;;  %vm1421_vm9 = vweird.f32 %v2165_v38 }
 0x26a   : > { %vm1422_vm10 = vmor %vm1420_vm8, %vm1421_vm9 }
 0x26b   : > { %v1417_v42 = vsub.f32 1.0, %v1416_v47 }
 0x26d   : > { %v1418_v13 = vmul.f32 %v2165_v38, %v1417_v42  ;;  %v1230_v39 = vpop.f32.mrf.mxu3  ;;  %v1515_v42 = vmul.f32 %v1511_v33, %v1403_v40 }
 0x26e   : > { %v1231_v41 = vadd.f32 %v1230_v39, %v1211_v58 }
 0x26f   : > { %v1419_v3 = vadd.f32 %v2165_v38, %v1418_v13  ;;  %v1352_v5 = vpop.f32.mrf.mxu1 }
 0x270   : > { %v5192_v43 = vadd.f32 %v1352_v5, %v1333_v61  ;;  %2038 = vrot.lane.b32.xlu0 %v1231_v41, %s2419_s21  ;;  %v1519_v5 = vmul.f32 1.442695, %v1515_v42 }
 0x271   : > { %v1423_v47 = vsel %vm1422_vm10, %v2165_v38, %v1419_v3 }
 0x272   : > { %v1428_v59 = vsel %vm1425_vm11, %v1427_v18, %v1423_v47  ;;  %v5195_v25 = vmul.f32 0.70710677, %v5192_v43 }
 0x273   : > { %v1475_v7 = vmul.f32 1.0614054, %v1428_v59 }
 0x274   : > { %v1405_v39 = vand.u32 2147483647, %v5195_v25  ;;  %vm1537_vm5 = vcmp.lt.f32.partialorder %v5195_v25, 0.0 }
 0x275   : > { %v1479_v13 = vadd.f32 -1.4531521, %v1475_v7  ;;  %v1312_v21 = vpop.f32.mrf.mxu3 }
 0x276   : > { %v1409_v30 = vmul.f32 0.3275911, %v1405_v39  ;;  %v5199_v58 = vadd.f32 %v1312_v21, %v1293_v6 }
 0x277   : > { %v1483_v61 = vmul.f32 %v1479_v13, %v1428_v59 }
 0x278   : > { %v1413_v62 = vadd.f32 1.0, %v1409_v30  ;;  %v5202_v3 = vmul.f32 0.70710677, %v5199_v58 }
 0x279   : > { %v1487_v41 = vadd.f32 1.4214138, %v1483_v61 }
 0x27a   : > { %2166 = vrcp.f32 %v1413_v62  ;;  %v5205_v18 = vand.u32 2147483647, %v5202_v3  ;;  %vm1450_vm12 = vweird.f32 %v1413_v62  ;;  %v1456_v21 = vand.u32 2147483648, %v1413_v62 }
 0x27b   : > { %v1491_v38 = vmul.f32 %v1487_v41, %v1428_v59  ;;  %2168 = vpow2.f32 %v1519_v5  ;;  %v1454_v41 = vand.u32 2147483647, %v1413_v62  ;;  %vm1536_vm10 = vcmp.lt.f32.partialorder %v5202_v3, 0.0 }
 0x27c   : > { %v1408_v15 = vmul.f32 0.3275911, %v5205_v18  ;;  %v1457_v5 = vor.u32 1.1754944e-38, %v1456_v21 }
 0x27d   : > { %v1495_v40 = vadd.f32 -0.28449672, %v1491_v38  ;;  %vm1455_vm15 = vcmp.eq.f32.partialorder %v1454_v41, 8.507059e+37 }
 0x27e   : > { %v1412_v47 = vadd.f32 1.0, %v1408_v15  ;;  %v1513_v15 = vsub.f32 0.0, %v1405_v39 }
 0x27f   : > { %v1499_v33 = vmul.f32 %v1495_v40, %v1428_v59 }
 0x280   : > { %v2167_v6 = vpop.eup %2166  ;;  %2170 = vrcp.f32 %v1412_v47  ;;  %vm1435_vm1 = vweird.f32 %v1412_v47 }
 0x281   : > { %v1503_v7 = vadd.f32 0.2548296, %v1499_v33  ;;  %v1446_v13 = vmul.f32 %v2167_v6, %v1413_v62  ;;  %v2169_v42 = vpop.eup %2168  ;;  %vm1451_vm13 = vweird.f32 %v2167_v6 }
 0x282   : > { %vm1452_vm14 = vmor %vm1450_vm12, %vm1451_vm13 }
 0x283   : > { %v1507_v30 = vmul.f32 %v1503_v7, %v1428_v59  ;;  %v1447_v61 = vsub.f32 1.0, %v1446_v13  ;;  %v1441_v7 = vand.u32 2147483648, %v1412_v47 }
 0x285   : > { %v1527_v19 = vmul.f32 %v2169_v42, %v1507_v30  ;;  %v1448_v26 = vmul.f32 %v2167_v6, %v1447_v61  ;;  %v1439_v42 = vand.u32 2147483647, %v1412_v47  ;;  %v1517_v61 = vmul.f32 %v1513_v15, %v1405_v39 }
 0x286   : > { %v2171_v38 = vpop.eup %2170  ;;  %v1442_v10 = vor.u32 1.1754944e-38, %v1441_v7  ;;  %v1512_v39 = vsub.f32 0.0, %v5205_v18 }
 0x287   : > { %v1531_v31 = vsub.f32 1.0, %v1527_v19  ;;  %v1449_v40 = vadd.f32 %v2167_v6, %v1448_v26  ;;  %v1431_v33 = vmul.f32 %v2171_v38, %v1412_v47  ;;  %vm1436_vm2 = vweird.f32 %v2171_v38 }
 0x288   : > { %v1395_v19 = vmul.f32 0.5, %v5184_v12  ;;  %vm1437_vm3 = vmor %vm1435_vm1, %vm1436_vm2  ;;  %vm1440_vm4 = vcmp.eq.f32.partialorder %v1439_v42, 8.507059e+37 }
 0x289   : > { %v1539_v9 = vsub.f32 0.0, %v1531_v31  ;;  %v1453_v59 = vsel %vm1452_vm14, %v2167_v6, %v1449_v40  ;;  %v1432_v13 = vsub.f32 1.0, %v1431_v33  ;;  %v1523_v40 = vmul.f32 1.442695, %v1517_v61 }
 0x28a   : > { %v1458_v62 = vsel %vm1455_vm15, %v1457_v5, %v1453_v59  ;;  %v1516_v59 = vmul.f32 %v1512_v39, %v5205_v18 }
 0x28b   : > { %v1543_v30 = vsel %vm1535_vm0, %v1539_v9, %v1531_v31  ;;  %v1477_v21 = vmul.f32 1.0614054, %v1458_v62  ;;  %v1433_v41 = vmul.f32 %v2171_v38, %v1432_v13  ;;  %2172 = vpow2.f32 %v1523_v40 }
 0x28c   : > { %v1547_v26 = vadd.f32 1.0, %v1543_v30  ;;  %v1521_v30 = vmul.f32 1.442695, %v1516_v59 }
 0x28d   : > { %v1481_v4 = vadd.f32 -1.4531521, %v1477_v21  ;;  %v1392_v54 = vpop.f32.mrf.mxu3  ;;  %v1434_v52 = vadd.f32 %v2171_v38, %v1433_v41 }
 0x28e   : > { %v1551_v37 = vmul.f32 %v1547_v26, %v1395_v19  ;;  %v5211_v6 = vadd.f32 %v1392_v54, %v1373_v0 }
 0x28f   : > { %v1485_v5 = vmul.f32 %v1481_v4, %v1458_v62  ;;  %v1438_v33 = vsel %vm1437_vm3, %v2171_v38, %v1434_v52 }
 0x290   : > { %v5214_v9 = vmul.f32 0.70710677, %v5211_v6  ;;  %1571 = vmatmul.f32.vlgmr.msra.gmra.mxu0 %v1551_v37  ;;  %v1443_v12 = vsel %vm1440_vm4, %v1442_v10, %v1438_v33  ;;  %v5226_v10 = vld [vmem:[%s2818_s25 + $0x30] sm:$0xff] }
 0x291   : > { %v1489_v31 = vadd.f32 1.4214138, %v1485_v5  ;;  %1717 = vmatpush.msra.mxu0 %v4430_v32  ;;  %v1476_v47 = vmul.f32 1.0614054, %v1443_v12  ;;  %v2173_v21 = vpop.eup %2172 }
 0x292   : > { %v5219_v15 = vand.u32 2147483647, %v5214_v9  ;;  %vm1538_vm11 = vcmp.lt.f32.partialorder %v5214_v9, 0.0  ;;  %v6117_v9 = vld [vmem:[#allocation73_spill] sm:$0xff] }
 0x293   : > { %v1493_v54 = vmul.f32 %v1489_v31, %v1458_v62  ;;  %1718 = vmatpush.msra.mxu0 %v4436_v45  ;;  %v1480_v52 = vadd.f32 -1.4531521, %v1476_v47  ;;  %v1397_v47 = vmul.f32 0.5, %v5192_v43 }
 0x294   : > { %v1410_v0 = vmul.f32 0.3275911, %v5219_v15 }
 0x295   : > { %v1497_v38 = vadd.f32 -0.28449672, %v1493_v54  ;;  %1719 = vmatpush.msra.mxu0 %v4443_v46  ;;  %v1484_v7 = vmul.f32 %v1480_v52, %v1443_v12 }
 0x296   : > { %v1414_v32 = vadd.f32 1.0, %v1410_v0 }
 0x297   : > { %v1501_v13 = vmul.f32 %v1497_v38, %v1458_v62  ;;  %1720 = vmatpush.msra.mxu0 %v4449_v51  ;;  %v1488_v42 = vadd.f32 1.4214138, %v1484_v7 }
 0x298   : > { %2174 = vrcp.f32 %v1414_v32  ;;  %1653 = vmatmul.f32.vlgmr.msrb.gmra.mxu0 %v5226_v10  ;;  %vm1465_vm7 = vweird.f32 %v1414_v32 }
 0x299   : > { %v1505_v45 = vadd.f32 0.2548296, %v1501_v13  ;;  %1721 = vmatpush.msra.mxu0 %v4457_v14  ;;  %v1492_v19 = vmul.f32 %v1488_v42, %v1443_v12  ;;  %2176 = vpow2.f32 %v1521_v30  ;;  %v6109_v14 = vld [vmem:[#allocation69_spill] sm:$0xff]  ;;  %v1396_v13 = vmul.f32 0.5, %v5199_v58 }
 0x29b   : > { %v1509_v18 = vmul.f32 %v1505_v45, %v1458_v62  ;;  %1722 = vmatpush.msra.mxu0 %v4467_v56  ;;  %v1496_v46 = vadd.f32 -0.28449672, %v1492_v19  ;;  %v1471_v56 = vand.u32 2147483648, %v1414_v32  ;;  %v2389_v45 = vld [vmem:[%s5479_s1 + $0x1d8] sm:$0xff] }
 0x29c   : > { %v2391_v19 = vld [vmem:[%s5479_s1 + $0x198] sm:$0xff] }
 0x29d   : > { %v1529_v26 = vmul.f32 %v2173_v21, %v1509_v18  ;;  %1723 = vmatpush.msra.mxu0 %v4476_v27  ;;  %v1500_v51 = vmul.f32 %v1496_v46, %v1443_v12  ;;  %v1469_v27 = vand.u32 2147483647, %v1414_v32  ;;  %v1472_v25 = vor.u32 1.1754944e-38, %v1471_v56  ;;  %v6122_v56 = vld [vmem:[#allocation75_spill] sm:$0xff] }
 0x29e   : > { %v2175_v61 = vpop.eup %2174 }
 0x29f   : > { %v1533_v41 = vsub.f32 1.0, %v1529_v26  ;;  %v1461_v4 = vmul.f32 %v2175_v61, %v1414_v32  ;;  %1724 = vmatpush.msra.mxu0 %v4487_v49  ;;  %v1504_v37 = vadd.f32 0.2548296, %v1500_v51  ;;  %v2177_v33 = vpop.eup %2176  ;;  %vm1466_vm6 = vweird.f32 %v2175_v61  ;;  %v2396_v26 = vld [vmem:[%s5479_s1 + $0xf8] sm:$0xff] }
 0x2a0   : > { %vm1467_vm8 = vmor %vm1465_vm7, %vm1466_vm6  ;;  %vm1470_vm9 = vcmp.eq.f32.partialorder %v1469_v27, 8.507059e+37  ;;  %v2400_v27 = vld [vmem:[%s5479_s1 + $0x3b8] sm:$0xff] }
 0x2a1   : > { %v1541_v5 = vsub.f32 0.0, %v1533_v41  ;;  %v1462_v40 = vsub.f32 1.0, %v1461_v4  ;;  %1725 = vmatpush.msra.mxu0 %v6109_v14  ;;  %v1508_v62 = vmul.f32 %v1504_v37, %v1443_v12  ;;  %v1398_v4 = vmul.f32 0.5, %v5211_v6  ;;  %v6119_v14 = vld [vmem:[#allocation82_spill] sm:$0xff]  ;;  %v2398_v6 = vld [vmem:[%s5479_s1 + $0x3f8] sm:$0xff] }
 0x2a3   : > { %v1545_v31 = vsel %vm1537_vm5, %v1541_v5, %v1533_v41  ;;  %v1463_v39 = vmul.f32 %v2175_v61, %v1462_v40  ;;  %1726 = vmatpush.msra.mxu0 %v4501_v63  ;;  %v1528_v49 = vmul.f32 %v2177_v33, %v1508_v62  ;;  %v1514_v63 = vsub.f32 0.0, %v5219_v15  ;;  %v6113_v41 = vld [vmem:[#allocation71_spill] sm:$0xff]  ;;  %v6116_v5 = vld [vmem:[#allocation76_spill] sm:$0xff]  ;;  %v6121_v62 = vld [vmem:[#allocation81_spill] sm:$0xff] }
 0x2a4   : > { %v1549_v54 = vadd.f32 1.0, %v1545_v31  ;;  %v6118_v40 = vld [vmem:[#allocation40_spill] sm:$0xff]  ;;  %v2399_v33 = vld [vmem:[%s5479_s1 + $0x3d8] sm:$0xff]  ;;  %v6123_v31 = vld [vmem:[#allocation42_spill] sm:$0xff] }
 0x2a5   : > { %v1464_v52 = vadd.f32 %v2175_v61, %v1463_v39  ;;  %1727 = vmatpush.msra.mxu0 %v4508_v17  ;;  %v1532_v38 = vsub.f32 1.0, %v1528_v49  ;;  %v2388_v17 = vld [vmem:[%s5479_s1 + $0x1f8] sm:$0xff]  ;;  %v1518_v3 = vmul.f32 %v1514_v63, %v5219_v15  ;;  %v6124_v39 = vld [vmem:[#allocation88_spill] sm:$0xff]  ;;  %v6127_v49 = vld [vmem:[#allocation46_spill] sm:$0xff] }
 0x2a6   : > { %v1553_v0 = vmul.f32 %v1549_v54, %v1397_v47  ;;  %v6125_v47 = vld [vmem:[#allocation72_spill] sm:$0xff]  ;;  %v6133_v63 = vld [vmem:[#allocation43_spill] sm:$0xff] }
 0x2a7   : > { %v1468_v12 = vsel %vm1467_vm8, %v2175_v61, %v1464_v52  ;;  %1728 = vmatpush.msra.mxu0 %v4514_v60  ;;  %v1540_v59 = vsub.f32 0.0, %v1532_v38  ;;  %v6126_v54 = vld [vmem:[#allocation52_spill] sm:$0xff]  ;;  %v2401_v52 = vld [vmem:[%s5479_s1 + $0x398] sm:$0xff] }
 0x2a8   : > { %v1473_v7 = vsel %vm1470_vm9, %v1472_v25, %v1468_v12  ;;  %1611 = vmatmul.f32.vlgmr.msra.gmra.mxu2 %v1553_v0  ;;  %v6128_v0 = vld [vmem:[#allocation74_spill] sm:$0xff]  ;;  %v6130_v25 = vld [vmem:[#allocation80_spill] sm:$0xff]  ;;  %v6131_v12 = vld [vmem:[#allocation49_spill] sm:$0xff] }
 0x2a9   : > { %v1478_v43 = vmul.f32 1.0614054, %v1473_v7  ;;  %1757 = vmatpush.msra.mxu2 %v2388_v17  ;;  %1729 = vmatpush.msra.mxu0 %v4521_v24  ;;  %v1544_v32 = vsel %vm1536_vm10, %v1540_v59, %v1532_v38  ;;  %v2390_v24 = vld [vmem:[%s5479_s1 + $0x1b8] sm:$0xff]  ;;  %v6129_v38 = vld [vmem:[#allocation87_spill] sm:$0xff] }
 0x2aa   : > { %v1548_v42 = vadd.f32 1.0, %v1544_v32  ;;  %v2403_v59 = vld [vmem:[%s5479_s1 + $0x358] sm:$0xff]  ;;  %v6135_v32 = vld [vmem:[#allocation91_spill] sm:$0xff] }
 0x2ab   : > { %v1482_v60 = vadd.f32 -1.4531521, %v1478_v43  ;;  %1758 = vmatpush.msra.mxu2 %v2389_v45  ;;  %1730 = vmatpush.msra.mxu0 %v4528_v44  ;;  %v1525_v44 = vmul.f32 1.442695, %v1518_v3  ;;  %v6134_v43 = vld [vmem:[#allocation84_spill] sm:$0xff]  ;;  %v2404_v17 = vld [vmem:[%s5479_s1 + $0x338] sm:$0xff] }
 0x2ac   : > { %v1552_v30 = vmul.f32 %v1548_v42, %v1396_v13  ;;  %v6136_v13 = vld [vmem:[#allocation79_spill] sm:$0xff]  ;;  %v6138_v45 = vld [vmem:[#allocation92_spill] sm:$0xff]  ;;  %v6139_v3 = vld [vmem:[#allocation50_spill] sm:$0xff] }
 0x2ad   : > { %v1486_v21 = vmul.f32 %v1482_v60, %v1473_v7  ;;  %1759 = vmatpush.msra.mxu2 %v2390_v24  ;;  %1731 = vmatpush.msra.mxu0 %v4535_v29  ;;  %v2392_v29 = vld [vmem:[%s5479_s1 + $0x178] sm:$0xff]  ;;  %2178 = vpow2.f32 %v1525_v44  ;;  %v6137_v42 = vld [vmem:[#allocation47_spill] sm:$0xff]  ;;  %v6143_v44 = vld [vmem:[#allocation86_spill] sm:$0xff] }
 0x2ae   : > { %1591 = vmatmul.f32.vlgmr.msra.gmra.mxu1 %v1552_v30  ;;  %v2405_v60 = vld [vmem:[%s5479_s1 + $0x318] sm:$0xff]  ;;  %v6141_v24 = vld [vmem:[#allocation83_spill] sm:$0xff] }
 0x2af   : > { %v1490_v58 = vadd.f32 1.4214138, %v1486_v21  ;;  %1760 = vmatpush.msra.mxu2 %v2391_v19  ;;  %1737 = vmatpush.msra.mxu1 %v4582_v8  ;;  %v5270_v8 = vld [vmem:[%s2818_s25 + $0x38] sm:$0xff] }
 0x2b0   : > { %1732 = vmatpush.msra.mxu0 %v4542_v16  ;;  %1693 = vmatmul.f32.vlgmr.msrb.gmra.mxu2 %v5226_v10  ;;  %v2393_v16 = vld [vmem:[%s5479_s1 + $0x158] sm:$0xff] }
 0x2b1   : > { %v1494_v15 = vmul.f32 %v1490_v58, %v1473_v7  ;;  %1733 = vmatmul.f32.vlgmr.msra.gmra.mxu0 %v5226_v10  ;;  %1738 = vmatpush.msra.mxu1 %v4595_v36  ;;  %v2394_v36 = vld [vmem:[%s5479_s1 + $0x138] sm:$0xff] }
 0x2b2   : > { %1761 = vmatpush.msra.mxu2 %v2392_v29  ;;  %1957 = vmatpush.msrb.mxu0 %v4551_v34  ;;  %v2406_v30 = vld [vmem:[%s5479_s1 + $0x2f8] sm:$0xff]  ;;  %v6144_v29 = vld [vmem:[#allocation100_spill] sm:$0xff] }
 0x2b3   : > { %v1498_v18 = vadd.f32 -0.28449672, %v1494_v15  ;;  %1739 = vmatpush.msra.mxu1 %v4608_v53  ;;  %v2395_v53 = vld [vmem:[%s5479_s1 + $0x118] sm:$0xff] }
 0x2b4   : > { %1762 = vmatpush.msra.mxu2 %v2393_v16  ;;  %1958 = vmatpush.msrb.mxu0 %v4560_v57  ;;  %v6140_v21 = vld [vmem:[#allocation93_spill] sm:$0xff] }
 0x2b5   : > { %v1502_v46 = vmul.f32 %v1498_v18, %v1473_v7  ;;  %1740 = vmatpush.msra.mxu1 %v4629_v28  ;;  %v2179_v28 = vpop.eup %2178  ;;  %v2407_v58 = vld [vmem:[%s5479_s1 + $0x2d8] sm:$0xff]  ;;  %v6145_v18 = vld [vmem:[#allocation90_spill] sm:$0xff] }
 0x2b6   : > { %1763 = vmatpush.msra.mxu2 %v2394_v36  ;;  %1673 = vmatmul.f32.vlgmr.msrb.gmra.mxu1 %v5270_v8  ;;  %v6142_v19 = vld [vmem:[#allocation97_spill] sm:$0xff]  ;;  %v6147_v36 = vld [vmem:[#allocation94_spill] sm:$0xff] }
 0x2b7   : > { %v1506_v34 = vadd.f32 0.2548296, %v1502_v46  ;;  %1959 = vmatpush.msrb.mxu0 %v4568_v11  ;;  %1741 = vmatpush.msra.mxu1 %v4648_v35  ;;  %v2397_v11 = vld [vmem:[%s5479_s1 + $0xd8] sm:$0xff]  ;;  %v6146_v46 = vld [vmem:[#allocation103_spill] sm:$0xff] }
 0x2b8   : > { %1764 = vmatpush.msra.mxu2 %v2395_v53  ;;  %v2408_v15 = vld [vmem:[%s5479_s1 + $0x2b8] sm:$0xff] }
 0x2b9   : > { %v1510_v57 = vmul.f32 %v1506_v34, %v1473_v7  ;;  %1960 = vmatpush.msrb.mxu0 %v4576_v48  ;;  %1742 = vmatpush.msra.mxu1 %v4666_v20  ;;  %v6110_v20 = vld [vmem:[#allocation34_spill] sm:$0xff]  ;;  %v6132_v7 = vld [vmem:[#allocation89_spill] sm:$0xff]  ;;  %v6148_v34 = vld [vmem:[#allocation107_spill] sm:$0xff] }
 0x2ba   : > { %1765 = vmatpush.msra.mxu2 %v2396_v26  ;;  %v2409_v16 = vld [vmem:[%s5479_s1 + $0x298] sm:$0xff]  ;;  %v6152_v26 = vld [vmem:[#allocation108_spill] sm:$0xff] }
 0x2bb   : > { %v1530_v61 = vmul.f32 %v2179_v28, %v1510_v57  ;;  %1961 = vmatpush.msrb.mxu0 %v4589_v50  ;;  %1743 = vmatpush.msra.mxu1 %v4684_v23  ;;  %v6111_v50 = vld [vmem:[#allocation78_spill] sm:$0xff]  ;;  %v6149_v53 = vld [vmem:[#allocation105_spill] sm:$0xff]  ;;  %v6150_v57 = vld [vmem:[#allocation96_spill] sm:$0xff] }
 0x2bc   : > { %1766 = vmatpush.msra.mxu2 %v2397_v11  ;;  %v6112_v23 = vld [vmem:[#allocation66_spill] sm:$0xff]  ;;  %v6154_v11 = vld [vmem:[#allocation8_spill] sm:$0xff] }
 0x2bd   : > { %v1534_v35 = vsub.f32 1.0, %v1530_v61  ;;  %1962 = vmatpush.msrb.mxu0 %v4602_v2  ;;  %1744 = vmatpush.msra.mxu1 %v4702_v22  ;;  %v6114_v2 = vld [vmem:[#allocation37_spill] sm:$0xff]  ;;  %v6151_v28 = vld [vmem:[#allocation18_spill] sm:$0xff]  ;;  %v6153_v61 = vld [vmem:[#allocation95_spill] sm:$0xff] }
 0x2be   : > { %1767 = vmatpush.msra.mxu2 %v4617_v1  ;;  %v6115_v1 = vld [vmem:[#allocation68_spill] sm:$0xff] }
 0x2bf   : > { %v1542_v48 = vsub.f32 0.0, %v1534_v35  ;;  %1963 = vmatpush.msrb.mxu0 %v6110_v20  ;;  %1745 = vmatpush.msra.mxu1 %v6111_v50  ;;  %v6157_v20 = vld [vmem:[#allocation22_spill] sm:$0xff]  ;;  %v6158_v50 = vld [vmem:[#allocation20_spill] sm:$0xff] }
 0x2c0   : > { %1768 = vmatpush.msra.mxu2 %v6112_v23  ;;  %v6159_v23 = vld [vmem:[#allocation102_spill] sm:$0xff] }
 0x2c1   : > { %v1546_v51 = vsel %vm1538_vm11, %v1542_v48, %v1534_v35  ;;  %1964 = vmatpush.msrb.mxu0 %v6113_v41  ;;  %1746 = vmatpush.msra.mxu1 %v4740_v55  ;;  %v6120_v55 = vld [vmem:[#allocation70_spill] sm:$0xff]  ;;  %v6161_v41 = vld [vmem:[#allocation24_spill] sm:$0xff] }
 0x2c2   : > { %v1550_v37 = vadd.f32 1.0, %v1546_v51  ;;  %1769 = vmatpush.msra.mxu2 %v6114_v2  ;;  %v6155_v35 = vld [vmem:[#allocation110_spill] sm:$0xff]  ;;  %v6160_v51 = vld [vmem:[#allocation11_spill] sm:$0xff] }
 0x2c3   : > { %1965 = vmatpush.msrb.mxu0 %v6115_v1  ;;  %1747 = vmatpush.msra.mxu1 %v6116_v5  ;;  %v6156_v48 = vld [vmem:[#allocation98_spill] sm:$0xff]  ;;  %v6164_v2 = vld [vmem:[#allocation19_spill] sm:$0xff]  ;;  %v6167_v5 = vld [vmem:[#allocation21_spill] sm:$0xff] }
 0x2c4   : > { %v1554_v22 = vmul.f32 %v1550_v37, %v1398_v4  ;;  %1770 = vmatpush.msra.mxu2 %v6117_v9  ;;  %v6162_v4 = vld [vmem:[#allocation104_spill] sm:$0xff]  ;;  %v6163_v37 = vld [vmem:[#allocation111_spill] sm:$0xff]  ;;  %v6165_v1 = vld [vmem:[#allocation106_spill] sm:$0xff] }
 0x2c5   : > { %1966 = vmatpush.msrb.mxu0 %v6118_v40  ;;  %1748 = vmatpush.msra.mxu1 %v6119_v14  ;;  %v6168_v9 = vld [vmem:[#allocation109_spill] sm:$0xff]  ;;  %v6170_v40 = vld [vmem:[#allocation32_spill] sm:$0xff] }
 0x2c6   : > { %1631 = vmatmul.f32.vlgmr.msra.gmra.mxu3 %v1554_v22  ;;  %1771 = vmatpush.msra.mxu2 %v6120_v55  ;;  %v6166_v22 = vld [vmem:[#allocation26_spill] sm:$0xff]  ;;  %v6171_v14 = vld [vmem:[#allocation112_spill] sm:$0xff]  ;;  %v6173_v55 = vld [vmem:[#allocation35_spill] sm:$0xff] }
 0x2c7   : > { %1777 = vmatpush.msra.mxu3 %v2398_v6  ;;  %1749 = vmatpush.msra.mxu1 %v6121_v62  ;;  %v6172_v6 = vld [vmem:[#allocation3_spill] sm:$0xff]  ;;  %v6174_v62 = vld [vmem:[#allocation12_spill] sm:$0xff] }
 0x2c8   : > { %1967 = vmatpush.msrb.mxu0 %v6122_v56  ;;  %1772 = vmatpush.msra.mxu2 %v6123_v31  ;;  %v6175_v56 = vld [vmem:[#allocation38_spill] sm:$0xff]  ;;  %v6177_v31 = vld [vmem:[#allocation36_spill] sm:$0xff] }
 0x2c9   : > { %1778 = vmatpush.msra.mxu3 %v2399_v33  ;;  %1750 = vmatpush.msra.mxu1 %v6124_v39  ;;  %v6176_v33 = vld [vmem:[#allocation2_spill] sm:$0xff]  ;;  %v6178_v39 = vld [vmem:[#allocation5_spill] sm:$0xff] }
 0x2ca   : > { %1773 = vmatmul.f32.vlgmr.msra.gmra.mxu2 %v5226_v10  ;;  %1968 = vmatpush.msrb.mxu0 %v6125_v47  ;;  %v2402_v10 = vld [vmem:[%s5479_s1 + $0x378] sm:$0xff]  ;;  %v6180_v47 = vld [vmem:[#allocation14_spill] sm:$0xff] }
 0x2cb   : > { %1779 = vmatpush.msra.mxu3 %v2400_v27  ;;  %1751 = vmatpush.msra.mxu1 %v6126_v54  ;;  %v6179_v27 = vld [vmem:[#allocation39_spill] sm:$0xff]  ;;  %v6181_v54 = vld [vmem:[#allocation45_spill] sm:$0xff] }
 0x2cc   : > { %1997 = vmatpush.msrb.mxu2 %v6127_v49  ;;  %1969 = vmatpush.msrb.mxu0 %v6128_v0  ;;  %v6182_v49 = vld [vmem:[#allocation4_spill] sm:$0xff] }
 0x2cd   : > { %1780 = vmatpush.msra.mxu3 %v2401_v52  ;;  %1752 = vmatpush.msra.mxu1 %v6129_v38  ;;  %v6183_v52 = vld [vmem:[#allocation48_spill] sm:$0xff] }
 0x2ce   : > { %1713 = vmatmul.f32.vlgmr.msrb.gmra.mxu3 %v5270_v8  ;;  %1753 = vmatmul.f32.vlgmr.msra.gmra.mxu1 %v5270_v8 }
 0x2cf   : > { %1781 = vmatpush.msra.mxu3 %v2402_v10  ;;  %1998 = vmatpush.msrb.mxu2 %v6130_v25  ;;  %v6184_v25 = vld [vmem:[#allocation77_spill] sm:$0xff] }
 0x2d0   : > { %1970 = vmatpush.msrb.mxu0 %v6131_v12  ;;  %1977 = vmatpush.msrb.mxu1 %v6132_v7 }
 0x2d1   : > { %1782 = vmatpush.msra.mxu3 %v2403_v59  ;;  %1999 = vmatpush.msrb.mxu2 %v6133_v63 }
 0x2d2   : > { %1971 = vmatpush.msrb.mxu0 %v6134_v43  ;;  %1978 = vmatpush.msrb.mxu1 %v6135_v32 }
 0x2d3   : > { %1783 = vmatpush.msra.mxu3 %v2404_v17  ;;  %2000 = vmatpush.msrb.mxu2 %v6136_v13  ;;  %v5426_v13 = vld [vmem:[%s5482_s4] ss:$0 sm:$0xff] }
 0x2d4   : > { %1972 = vmatpush.msrb.mxu0 %v6137_v42  ;;  %1979 = vmatpush.msrb.mxu1 %v6138_v45 }
 0x2d5   : > { %1784 = vmatpush.msra.mxu3 %v2405_v60  ;;  %2001 = vmatpush.msrb.mxu2 %v6139_v3 }
 0x2d6   : > { %1980 = vmatpush.msrb.mxu1 %v6140_v21 }
 0x2d7   : > { %1785 = vmatpush.msra.mxu3 %v2406_v30  ;;  %2002 = vmatpush.msrb.mxu2 %v6141_v24 }
 0x2d8   : > { %1981 = vmatpush.msrb.mxu1 %v6142_v19 }
 0x2d9   : > { %1786 = vmatpush.msra.mxu3 %v2407_v58  ;;  %2003 = vmatpush.msrb.mxu2 %v6143_v44 }
 0x2da   : > { %1982 = vmatpush.msrb.mxu1 %v6144_v29  ;;  %v6185_v29 = vld [vmem:[#allocation99_spill] sm:$0xff] }
 0x2db   : > { %1787 = vmatpush.msra.mxu3 %v2408_v15  ;;  %2004 = vmatpush.msrb.mxu2 %v6145_v18 }
 0x2dc   : > { %1983 = vmatpush.msrb.mxu1 %v6146_v46 }
 0x2dd   : > { %1788 = vmatpush.msra.mxu3 %v2409_v16  ;;  %2005 = vmatpush.msrb.mxu2 %v6147_v36 }
 0x2de   : > { %1984 = vmatpush.msrb.mxu1 %v6149_v53 }
 0x2df   : > { %1789 = vmatpush.msra.mxu3 %v6148_v34  ;;  %2006 = vmatpush.msrb.mxu2 %v6150_v57 }
 0x2e0   : > { %1985 = vmatpush.msrb.mxu1 %v6152_v26 }
 0x2e1   : > { %1790 = vmatpush.msra.mxu3 %v6151_v28  ;;  %2007 = vmatpush.msrb.mxu2 %v6153_v61 }
 0x2e2   : > { %1986 = vmatpush.msrb.mxu1 %v6155_v35 }
 0x2e3   : > { %1791 = vmatpush.msra.mxu3 %v6154_v11  ;;  %2008 = vmatpush.msrb.mxu2 %v6156_v48  ;;  %v6186_v11 = vld [vmem:[#allocation85_spill] sm:$0xff] }
 0x2e4   : > { %1987 = vmatpush.msrb.mxu1 %v6158_v50 }
 0x2e5   : > { %1792 = vmatpush.msra.mxu3 %v6157_v20  ;;  %2009 = vmatpush.msrb.mxu2 %v6159_v23 }
 0x2e6   : > { %1793 = vmatmul.f32.vlgmr.msra.gmra.mxu3 %v5270_v8  ;;  %1988 = vmatpush.msrb.mxu1 %v6160_v51  ;;  %v6169_v8 = vld [vmem:[#allocation25_spill] sm:$0xff] }
 0x2e7   : > { %2017 = vmatpush.msrb.mxu3 %v6161_v41  ;;  %2010 = vmatpush.msrb.mxu2 %v6162_v4 }
 0x2e8   : > { %1989 = vmatpush.msrb.mxu1 %v6163_v37 }
 0x2e9   : > { %2018 = vmatpush.msrb.mxu3 %v6164_v2  ;;  %2011 = vmatpush.msrb.mxu2 %v6165_v1 }
 0x2ea   : > { %1990 = vmatpush.msrb.mxu1 %v6166_v22 }
 0x2eb   : > { %2019 = vmatpush.msrb.mxu3 %v6167_v5  ;;  %2012 = vmatpush.msrb.mxu2 %v6168_v9 }
 0x2ec   : > { %1991 = vmatpush.msrb.mxu1 %v6169_v8 }
 0x2ed   : > { %2020 = vmatpush.msrb.mxu3 %v6170_v40 }
 0x2ee   : > { %1992 = vmatpush.msrb.mxu1 %v6171_v14 }
 0x2ef   : > { %2021 = vmatpush.msrb.mxu3 %v6172_v6 }
 0x2f1   : > { %2022 = vmatpush.msrb.mxu3 %v6173_v55 }
 0x2f3   : > { %2023 = vmatpush.msrb.mxu3 %v6174_v62 }
 0x2f5   : > { %2024 = vmatpush.msrb.mxu3 %v6175_v56 }
 0x2f7   : > { %2025 = vmatpush.msrb.mxu3 %v6176_v33 }
 0x2f9   : > { %2026 = vmatpush.msrb.mxu3 %v6177_v31 }
 0x2fb   : > { %2027 = vmatpush.msrb.mxu3 %v6178_v39 }
 0x2fd   : > { %2028 = vmatpush.msrb.mxu3 %v6179_v27 }
 0x2ff   : > { %2029 = vmatpush.msrb.mxu3 %v6180_v47 }
 0x301   : > { %2030 = vmatpush.msrb.mxu3 %v6181_v54 }
 0x303   : > { %2031 = vmatpush.msrb.mxu3 %v6182_v49 }
 0x305   : > { %2032 = vmatpush.msrb.mxu3 %v6183_v52 }
 0x30d   : > { %v1572_v0 = vpop.f32.mrf.mxu0 }
 0x30e   : > { %v1573_v42 = vadd.f32 %v5426_v13, %v1572_v0 }
 0x315   : > { %v1654_v10 = vpop.f32.mrf.mxu0 }
 0x316   : > { %v1655_v12 = vadd.f32 %v1654_v10, %v6184_v25 }
 0x32b   : > { %v1592_v38 = vpop.f32.mrf.mxu1  ;;  %v1612_v45 = vpop.f32.mrf.mxu2 }
 0x32c   : > { %v1593_v60 = vadd.f32 %v1592_v38, %v1573_v42 }
 0x32e   : > { %v1734_v21 = vpop.f32.mrf.mxu0  ;;  %v1613_v24 = vadd.f32 %v1612_v45, %v1593_v60 }
 0x32f   : > { %v1735_v18 = vadd.f32 %v1734_v21, %v6185_v29 }
 0x333   : > { %v1674_v59 = vpop.f32.mrf.mxu1  ;;  %v1694_v34 = vpop.f32.mrf.mxu2 }
 0x334   : > { %v5417_v7 = vadd.f32 %v1674_v59, %v1655_v12  ;;  %v1695_v35 = vadd.f32 %v1694_v34, %v6186_v11 }
 0x336   : > { %v5420_v63 = vmul.f32 0.70710677, %v5417_v7 }
 0x338   : > { %v1805_v43 = vand.u32 2147483647, %v5420_v63  ;;  %vm1937_vm6 = vcmp.lt.f32.partialorder %v5420_v63, 0.0 }
 0x33a   : > { %v1809_v17 = vmul.f32 0.3275911, %v1805_v43  ;;  %v1913_v28 = vsub.f32 0.0, %v1805_v43 }
 0x33c   : > { %v1813_v32 = vadd.f32 1.0, %v1809_v17  ;;  %v1917_v23 = vmul.f32 %v1913_v28, %v1805_v43 }
 0x33e   : > { %2180 = vrcp.f32 %v1813_v32  ;;  %v1828_v58 = vand.u32 2147483648, %v1813_v32  ;;  %vm1822_vm12 = vweird.f32 %v1813_v32  ;;  %v1826_v44 = vand.u32 2147483647, %v1813_v32 }
 0x33f   : > { %v1921_v5 = vmul.f32 1.442695, %v1917_v23 }
 0x340   : > { %v1829_v36 = vor.u32 1.1754944e-38, %v1828_v58  ;;  %vm1827_vm15 = vcmp.eq.f32.partialorder %v1826_v44, 8.507059e+37 }
 0x344   : > { %v2181_v3 = vpop.eup %2180 }
 0x345   : > { %v1818_v30 = vmul.f32 %v2181_v3, %v1813_v32  ;;  %vm1823_vm13 = vweird.f32 %v2181_v3 }
 0x346   : > { %vm1824_vm14 = vmor %vm1822_vm12, %vm1823_vm13 }
 0x347   : > { %v1819_v19 = vsub.f32 1.0, %v1818_v30 }
 0x349   : > { %v1632_v15 = vpop.f32.mrf.mxu3  ;;  %v1820_v16 = vmul.f32 %v2181_v3, %v1819_v19 }
 0x34a   : > { %v1633_v46 = vadd.f32 %v1632_v15, %v1613_v24  ;;  %v6189_v24 = vld [vmem:[#allocation101_spill] sm:$0xff]  ;;  %v1797_v15 = vmul.f32 0.5, %v5417_v7 }
 0x34b   : > { %v1821_v53 = vadd.f32 %v2181_v3, %v1820_v16  ;;  %v1754_v57 = vpop.f32.mrf.mxu1 }
 0x34c   : > { %2042 = vrot.lane.b32.xlu0 %v1633_v46, %s2420_s22  ;;  %v5430_v26 = vadd.f32 %v1754_v57, %v1735_v18 }
 0x34d   : > { %v1825_v61 = vsel %vm1824_vm14, %v2181_v3, %v1821_v53  ;;  %v1774_v17 = vpop.f32.mrf.mxu2 }
 0x34e   : > { %v1830_v48 = vsel %vm1827_vm15, %v1829_v36, %v1825_v61  ;;  %v5434_v20 = vmul.f32 0.70710677, %v5430_v26  ;;  %v1775_v58 = vadd.f32 %v1774_v17, %v6189_v24 }
 0x34f   : > { %v1877_v50 = vmul.f32 1.0614054, %v1830_v48 }
 0x350   : > { %v1807_v51 = vand.u32 2147483647, %v5434_v20  ;;  %vm1939_vm9 = vcmp.lt.f32.partialorder %v5434_v20, 0.0 }
 0x351   : > { %v1714_v41 = vpop.f32.mrf.mxu3  ;;  %v1881_v4 = vadd.f32 -1.4531521, %v1877_v50 }
 0x352   : > { %v5437_v37 = vadd.f32 %v1714_v41, %v1695_v35  ;;  %v1811_v2 = vmul.f32 0.3275911, %v1807_v51  ;;  %v1915_v59 = vsub.f32 0.0, %v1807_v51 }
 0x353   : > { %v1885_v1 = vmul.f32 %v1881_v4, %v1830_v48 }
 0x354   : > { %v5440_v22 = vmul.f32 0.70710677, %v5437_v37  ;;  %v1815_v9 = vadd.f32 1.0, %v1811_v2  ;;  %v1919_v36 = vmul.f32 %v1915_v59, %v1807_v51 }
 0x355   : > { %v1889_v8 = vadd.f32 1.4214138, %v1885_v1 }
 0x356   : > { %v5443_v40 = vand.u32 2147483647, %v5440_v22  ;;  %2182 = vrcp.f32 %v1815_v9  ;;  %vm1852_vm0 = vweird.f32 %v1815_v9  ;;  %v1858_v47 = vand.u32 2147483648, %v1815_v9 }
 0x357   : > { %v1893_v14 = vmul.f32 %v1889_v8, %v1830_v48  ;;  %2184 = vpow2.f32 %v1921_v5  ;;  %v1856_v52 = vand.u32 2147483647, %v1815_v9  ;;  %v1925_v50 = vmul.f32 1.442695, %v1919_v36 }
 0x358   : > { %v1810_v6 = vmul.f32 0.3275911, %v5443_v40  ;;  %v1859_v12 = vor.u32 1.1754944e-38, %v1858_v47  ;;  %vm1938_vm14 = vcmp.lt.f32.partialorder %v5440_v22, 0.0 }
 0x359   : > { %v1897_v55 = vadd.f32 -0.28449672, %v1893_v14  ;;  %vm1857_vm3 = vcmp.eq.f32.partialorder %v1856_v52, 8.507059e+37 }
 0x35a   : > { %v1814_v62 = vadd.f32 1.0, %v1810_v6 }
 0x35b   : > { %v1901_v56 = vmul.f32 %v1897_v55, %v1830_v48 }
 0x35c   : > { %2186 = vrcp.f32 %v1814_v62  ;;  %v2183_v33 = vpop.eup %2182  ;;  %v1843_v60 = vand.u32 2147483648, %v1814_v62  ;;  %vm1837_vm4 = vweird.f32 %v1814_v62  ;;  %v1841_v3 = vand.u32 2147483647, %v1814_v62 }
 0x35d   : > { %v1905_v31 = vadd.f32 0.2548296, %v1901_v56  ;;  %v1848_v39 = vmul.f32 %v2183_v33, %v1815_v9  ;;  %v2185_v27 = vpop.eup %2184  ;;  %vm1853_vm1 = vweird.f32 %v2183_v33  ;;  %2188 = vpow2.f32 %v1925_v50 }
 0x35e   : > { %vm5446_vm2 = vmor %vm1852_vm0, %vm1853_vm1  ;;  %v1844_v16 = vor.u32 1.1754944e-38, %v1843_v60  ;;  %vm1842_vm8 = vcmp.eq.f32.partialorder %v1841_v3, 8.507059e+37  ;;  %vm2049_vm0 = vcmask 261120   ;;  %vm2051_vm1 = vcmask 523264  }
 0x35f   : > { %v1909_v54 = vmul.f32 %v1905_v31, %v1830_v48  ;;  %v1849_v49 = vsub.f32 1.0, %v1848_v39  ;;  %v1914_v48 = vsub.f32 0.0, %v5443_v40 }
 0x361   : > { %v1929_v38 = vmul.f32 %v2185_v27, %v1909_v54  ;;  %v1850_v10 = vmul.f32 %v2183_v33, %v1849_v49  ;;  %v1918_v1 = vmul.f32 %v1914_v48, %v5443_v40 }
 0x362   : > { %v2187_v0 = vpop.eup %2186 }
 0x363   : > { %v1833_v43 = vmul.f32 %v2187_v0, %v1814_v62  ;;  %v1933_v32 = vsub.f32 1.0, %v1929_v38  ;;  %v1851_v42 = vadd.f32 %v2183_v33, %v1850_v10  ;;  %vm1838_vm5 = vweird.f32 %v2187_v0  ;;  %v2189_v31 = vpop.eup %2188 }
 0x364   : > { %vm1839_vm7 = vmor %vm1837_vm4, %vm1838_vm5  ;;  %v1923_v62 = vmul.f32 1.442695, %v1918_v1 }
 0x365   : > { %v1834_v45 = vsub.f32 1.0, %v1833_v43  ;;  %v1941_v30 = vsub.f32 0.0, %v1933_v32  ;;  %v1855_v21 = vsel %vm5446_vm2, %v2183_v33, %v1851_v42  ;;  %v1799_v42 = vmul.f32 0.5, %v5430_v26 }
 0x366   : > { %v1860_v19 = vsel %vm1857_vm3, %v1859_v12, %v1855_v21  ;;  %v1798_v26 = vmul.f32 0.5, %v5437_v37  ;;  %vm2053_vm2 = vcmask 785408  }
 0x367   : > { %v1835_v44 = vmul.f32 %v2187_v0, %v1834_v45  ;;  %v1945_v29 = vsel %vm1937_vm6, %v1941_v30, %v1933_v32  ;;  %v1879_v18 = vmul.f32 1.0614054, %v1860_v19 }
 0x368   : > { %v1949_v46 = vadd.f32 1.0, %v1945_v29 }
 0x369   : > { %v1836_v34 = vadd.f32 %v2187_v0, %v1835_v44  ;;  %v1794_v53 = vpop.f32.mrf.mxu3  ;;  %v1883_v57 = vadd.f32 -1.4531521, %v1879_v18 }
 0x36a   : > { %v5455_v28 = vadd.f32 %v1794_v53, %v1775_v58  ;;  %v1953_v61 = vmul.f32 %v1949_v46, %v1797_v15 }
 0x36b   : > { %v1840_v11 = vsel %vm1839_vm7, %v2187_v0, %v1836_v34  ;;  %v1887_v35 = vmul.f32 %v1883_v57, %v1860_v19 }
 0x36c   : > { %v1845_v63 = vsel %vm1842_vm8, %v1844_v16, %v1840_v11  ;;  %v5459_v7 = vmul.f32 0.70710677, %v5455_v28  ;;  %1973 = vmatmul.f32.vlgmr.msrb.gmra.mxu0 %v1953_v61 }
 0x36d   : > { %v1878_v23 = vmul.f32 1.0614054, %v1845_v63  ;;  %v1891_v41 = vadd.f32 1.4214138, %v1887_v35 }
 0x36e   : > { %v1808_v51 = vand.u32 2147483647, %v5459_v7  ;;  %vm1940_vm15 = vcmp.lt.f32.partialorder %v5459_v7, 0.0  ;;  %v6190_v7 = vld [vmem:[#allocation64_spill] sm:$0xff] }
 0x36f   : > { %v1882_v4 = vadd.f32 -1.4531521, %v1878_v23  ;;  %v1895_v2 = vmul.f32 %v1891_v41, %v1860_v19 }
 0x370   : > { %v1812_v5 = vmul.f32 0.3275911, %v1808_v51  ;;  %v1916_v44 = vsub.f32 0.0, %v1808_v51 }
 0x371   : > { %v1886_v9 = vmul.f32 %v1882_v4, %v1845_v63  ;;  %v1899_v8 = vadd.f32 -0.28449672, %v1895_v2  ;;  %v1800_v4 = vmul.f32 0.5, %v5455_v28 }
 0x372   : > { %v1816_v14 = vadd.f32 1.0, %v1812_v5  ;;  %v1920_v36 = vmul.f32 %v1916_v44, %v1808_v51 }
 0x373   : > { %v1890_v6 = vadd.f32 1.4214138, %v1886_v9  ;;  %v1903_v55 = vmul.f32 %v1899_v8, %v1860_v19 }
 0x374   : > { %2190 = vrcp.f32 %v1816_v14  ;;  %v1873_v59 = vand.u32 2147483648, %v1816_v14  ;;  %v1871_v32 = vand.u32 2147483647, %v1816_v14  ;;  %vm1867_vm11 = vweird.f32 %v1816_v14 }
 0x375   : > { %v1894_v56 = vmul.f32 %v1890_v6, %v1845_v63  ;;  %v1907_v33 = vadd.f32 0.2548296, %v1903_v55  ;;  %2192 = vpow2.f32 %v1923_v62  ;;  %v1927_v57 = vmul.f32 1.442695, %v1920_v36 }
 0x376   : > { %v1874_v21 = vor.u32 1.1754944e-38, %v1873_v59  ;;  %vm1872_vm13 = vcmp.eq.f32.partialorder %v1871_v32, 8.507059e+37 }
 0x377   : > { %v1898_v39 = vadd.f32 -0.28449672, %v1894_v56  ;;  %v1911_v27 = vmul.f32 %v1907_v33, %v1860_v19  ;;  %2194 = vpow2.f32 %v1927_v57  ;;  %v2039_v56 = vpop.permute.xlu0 %2038 }
 0x378   : > { %v2050_v33 = vsel %vm2049_vm0, %v6190_v7, %v2039_v56 }
 0x379   : > { %v1902_v47 = vmul.f32 %v1898_v39, %v1845_v63  ;;  %v1931_v49 = vmul.f32 %v2189_v31, %v1911_v27 }
 0x37a   : > { %v2191_v54 = vpop.eup %2190 }
 0x37b   : > { %v1906_v52 = vadd.f32 0.2548296, %v1902_v47  ;;  %v1863_v40 = vmul.f32 %v2191_v54, %v1816_v14  ;;  %v1935_v0 = vsub.f32 1.0, %v1931_v49  ;;  %v2193_v25 = vpop.eup %2192  ;;  %vm1868_vm10 = vweird.f32 %v2191_v54 }
 0x37c   : > { %vm1869_vm12 = vmor %vm1867_vm11, %vm1868_vm10 }
 0x37d   : > { %v1910_v38 = vmul.f32 %v1906_v52, %v1845_v63  ;;  %v1864_v10 = vsub.f32 1.0, %v1863_v40  ;;  %v1943_v12 = vsub.f32 0.0, %v1935_v0  ;;  %v2195_v48 = vpop.eup %2194 }
 0x37f   : > { %v1930_v43 = vmul.f32 %v2193_v25, %v1910_v38  ;;  %v1865_v17 = vmul.f32 %v2191_v54, %v1864_v10  ;;  %v1947_v60 = vsel %vm1939_vm9, %v1943_v12, %v1935_v0 }
 0x380   : > { %v1951_v45 = vadd.f32 1.0, %v1947_v60 }
 0x381   : > { %v1934_v3 = vsub.f32 1.0, %v1930_v43  ;;  %v1866_v30 = vadd.f32 %v2191_v54, %v1865_v17 }
 0x382   : > { %v1955_v24 = vmul.f32 %v1951_v45, %v1799_v42 }
 0x383   : > { %v1942_v58 = vsub.f32 0.0, %v1934_v3  ;;  %v1870_v19 = vsel %vm1869_vm12, %v2191_v54, %v1866_v30 }
 0x384   : > { %v1875_v20 = vsel %vm1872_vm13, %v1874_v21, %v1870_v19  ;;  %2013 = vmatmul.f32.vlgmr.msrb.gmra.mxu2 %v1955_v24 }
 0x385   : > { %v1946_v15 = vsel %vm1938_vm14, %v1942_v58, %v1934_v3  ;;  %v1880_v29 = vmul.f32 1.0614054, %v1875_v20 }
 0x386   : > { %v1950_v18 = vadd.f32 1.0, %v1946_v15 }
 0x387   : > { %v1884_v16 = vadd.f32 -1.4531521, %v1880_v29 }
 0x388   : > { %v1954_v46 = vmul.f32 %v1950_v18, %v1798_v26 }
 0x389   : > { %v1888_v34 = vmul.f32 %v1884_v16, %v1875_v20 }
 0x38a   : > { %1993 = vmatmul.f32.vlgmr.msrb.gmra.mxu1 %v1954_v46 }
 0x38b   : > { %v1892_v53 = vadd.f32 1.4214138, %v1888_v34 }
 0x38d   : > { %v1896_v61 = vmul.f32 %v1892_v53, %v1875_v20 }
 0x38f   : > { %v1900_v11 = vadd.f32 -0.28449672, %v1896_v61 }
 0x391   : > { %v1904_v35 = vmul.f32 %v1900_v11, %v1875_v20 }
 0x393   : > { %v1908_v22 = vadd.f32 0.2548296, %v1904_v35 }
 0x395   : > { %v1912_v63 = vmul.f32 %v1908_v22, %v1875_v20 }
 0x397   : > { %v1932_v50 = vmul.f32 %v2195_v48, %v1912_v63 }
 0x399   : > { %v1936_v23 = vsub.f32 1.0, %v1932_v50 }
 0x39b   : > { %v1944_v41 = vsub.f32 0.0, %v1936_v23 }
 0x39d   : > { %v1948_v37 = vsel %vm1940_vm15, %v1944_v41, %v1936_v23 }
 0x39e   : > { %v1952_v51 = vadd.f32 1.0, %v1948_v37 }
 0x3a0   : > { %v1956_v2 = vmul.f32 %v1952_v51, %v1800_v4 }
 0x3a2   : > { %2033 = vmatmul.f32.vlgmr.msrb.gmra.mxu3 %v1956_v2 }
 0x3be   : > { %v2043_v28 = vpop.permute.xlu0 %2042 }
 0x3e9   : > { %v1974_v1 = vpop.f32.mrf.mxu0 }
 0x3ea   : > { %v1975_v9 = vadd.f32 %v5426_v13, %v1974_v1  ;;  %v2052_v13 = vsel %vm2051_vm1, %v2050_v33, %v2043_v28 }
 0x407   : > { %v1994_v5 = vpop.f32.mrf.mxu1  ;;  %v2014_v14 = vpop.f32.mrf.mxu2 }
 0x408   : > { %v1995_v8 = vadd.f32 %v1994_v5, %v1975_v9 }
 0x40a   : > { %v2015_v6 = vadd.f32 %v2014_v14, %v1995_v8 }
 0x425   : > { %v2034_v55 = vpop.f32.mrf.mxu3 }
 0x426   : > { %v2035_v62 = vadd.f32 %v2034_v55, %v2015_v6 }
 0x428   : > { %2046 = vrot.lane.b32.xlu1 %v2035_v62, %s2421_s23 }
 0x49a   : > { %v2047_v31 = vpop.permute.xlu1 %2046 }
 0x49b   : > { %v2054_v39 = vsel %vm2053_vm2, %v2052_v13, %v2047_v31 }
 0x49c   : > { %2055 = vst [vmem:[%s222_s28] sm:$0xff] %v2054_v39 }
 0x49d PF: > { %s15_s18 = sadd.s32 1, %s2417_s18  }
 0x49e   : > { %p12_p4 = scmp.ge.s32.totalorder %s15_s18, 10  }
 0x4a0   :  { %14 = sbr.rel (!%p12_p4) target bundleno = 1 (0x1), region = 70 }

</bundles_post_ra>
